<compile_context>
chip_gen: v5e
topology: v5e:2x2
jax: 0.10.0
libtpu: 0.0.40
codegen_flags: <defaults>
</compile_context>

<pallas_src>
import functools

import jax
import jax.numpy as jnp
from jax.experimental import pallas as pl
from jax.experimental.pallas import tpu as pltpu


# ----------------------------------------------------------------------------
# Weight preprocessing (wrapper-side, one-time).
# ----------------------------------------------------------------------------
def _expand_conv1_freq(w1):
    # w1:(3,3,1,C1) -> (3,9,7*C1);  out[kh,u,v*C1+c] = w1[kh,u-v,0,c] for 0<=u-v<=2
    C1 = w1.shape[-1]
    W = jnp.zeros((3, 9, 7 * C1), w1.dtype)
    for kh in range(3):
        for v in range(7):
            for kw in range(3):
                W = W.at[kh, v + kw, v * C1:(v + 1) * C1].set(w1[kh, kw, 0])
    return W


def _expand_conv2_freq(w2):
    # w2:(3,3,C1,C2) -> (3,7*C1,3*C2); out[kh,v*C1+c1,w*C2+c2]=w2[kh,v-2w,c1,c2]
    C1, C2 = w2.shape[2], w2.shape[3]
    W = jnp.zeros((3, 7 * C1, 3 * C2), w2.dtype)
    for kh in range(3):
        for wq in range(3):
            for kw in range(3):
                v = 2 * wq + kw
                W = W.at[kh, v * C1:(v + 1) * C1, wq * C2:(wq + 1) * C2].set(w2[kh, kw])
    return W


def _pick_cone_block(F3, max_jb=4):
    # Jb cones per grid step; minimize grid steps, then padding waste.
    best = None
    for jb in range(1, max_jb + 1):
        gj = -(-F3 // jb)
        key = (gj, gj * jb - F3)
        if best is None or key < best[0]:
            best = (key, jb)
    return best[1]


# ----------------------------------------------------------------------------
# The fused kernel: one (batch element, block of Jb output-frequency cones)
# per grid step.  The cone axis is an in-VMEM reduction for the fused
# ScaledLinear; BasicNorm is applied on the last cone block.
# ----------------------------------------------------------------------------
def _make_kernel(T3, Jb):
    Tb, Tb1 = T3 + 1, T3 + 2   # conv2-row / conv1-row counts kept in scratch

    def kernel(xw_ref, w1f_ref, b1_ref, w2f_ref, b2_ref, w3f_ref, b3_ref,
               wo_ref, bo_ref, out_ref, h1_scr, h2_scr):
        jb = pl.program_id(1)
        j0 = jb * Jb
        cd = h1_scr.dtype
        prec = jax.lax.Precision.HIGHEST if cd == jnp.float32 else None

        def dot32(a, b):
            return jnp.dot(a, b, preferred_element_type=jnp.float32, precision=prec)

        def dswish(y):            # DoubleSwish: x * sigmoid(x - 1)
            return y * jax.nn.sigmoid(y - 1.0)

        # Hoist the small resident weights/biases out of the cone loop.
        w1f = w1f_ref[...]        # (27, 7*C1)
        b1 = b1_ref[...]          # (1, 7*C1)
        w2f = w2f_ref[...]        # (168, 3*C2)
        b2 = b2_ref[...]          # (1, 3*C2)
        w3f = w3f_ref[...]        # (288, C3)
        b3 = b3_ref[...]          # (1, C3)

        C1_7 = w1f.shape[1]       # 7*C1  (h1 lane width per residue class)
        C2_3 = w2f.shape[1]       # 3*C2  (h2 lane width per parity class)

        total = None
        for jj in range(Jb):      # static unroll over the cones of this block
            xw = xw_ref[0, jj]                     # (Tb1+1, 36); lane = s*9 + u

            # --- conv1 (1->C1, k3, s1, p1) + DoubleSwish, fused taps (K=27) ---
            a_lo = xw[0:Tb1, :]
            a_hi = xw[1:1 + Tb1, :]
            a_rc = [
                a_lo[:, 0:27],                                     # residue 0
                a_lo[:, 9:36],                                     # residue 1
                jnp.concatenate([a_lo[:, 18:36], a_hi[:, 0:9]], axis=-1),   # r2
                jnp.concatenate([a_lo[:, 27:36], a_hi[:, 0:18]], axis=-1),  # r3
            ]
            # h1_scr[b, rc*7*C1 + v*C1 + c] = conv1 @ (time 4b+rc, freq 4j+v, ch c)
            h1 = jnp.concatenate([dswish(dot32(a, w1f) + b1) for a in a_rc],
                                 axis=-1)
            h1_scr[...] = h1.astype(cd)            # single lane-dense store (224)

            # --- conv2 (C1->C2, k3, s2) + DoubleSwish, fused taps (K=168) -----
            b_p0 = h1_scr[0:Tb, 0:3 * C1_7]                         # contiguous
            b_p1 = jnp.concatenate(
                [h1_scr[0:Tb, 2 * C1_7:4 * C1_7], h1_scr[1:1 + Tb, 0:C1_7]],
                axis=-1)
            # h2_scr[a, p*3*C2 + w*C2 + c2] = conv2 @ (time 2a+p, freq 2j+w, ch c2)
            h2 = jnp.concatenate(
                [dswish(dot32(b_p0, w2f) + b2), dswish(dot32(b_p1, w2f) + b2)],
                axis=-1)
            h2_scr[...] = h2.astype(cd)            # single lane-dense store (192)

            # --- conv3 (C2->C3, k3, s2) + DoubleSwish, fused taps (K=288) -----
            c_in = jnp.concatenate(
                [h2_scr[0:T3, :], h2_scr[1:1 + T3, 0:C2_3]], axis=-1)
            h3 = dswish(dot32(c_in, w3f) + b3).astype(cd)           # (T3, C3)

            # --- ScaledLinear: this cone's contribution (resident wo) ---------
            contrib = dot32(h3, wo_ref[j0 + jj])                    # (T3, odim)
            total = contrib if total is None else total + contrib

        @pl.when(jb == 0)
        def _init():
            out_ref[...] = jnp.zeros_like(out_ref)

        out_ref[...] += total[None]

        # --- bias + BasicNorm (eps=0.25) on the last cone block ---------------
        @pl.when(jb == pl.num_programs(1) - 1)
        def _finalize():
            y = out_ref[...] + bo_ref[...]
            out_ref[...] = y * jax.lax.rsqrt(
                jnp.mean(y * y, axis=-1, keepdims=True) + 0.25)

    return kernel


# ----------------------------------------------------------------------------
# Forward pass
# ----------------------------------------------------------------------------
@functools.partial(jax.jit, static_argnames=("compute_dtype",))
def conv2d_subsampling_forward(x, params, *, compute_dtype=jnp.bfloat16):
    N, T, idim = x.shape
    C1 = params["w1"].shape[-1]
    C2 = params["w2"].shape[-1]
    C3 = params["w3"].shape[-1]
    odim = params["wo"].shape[-1]

    T3 = ((T - 1) // 2 - 1) // 2
    F3 = ((idim - 1) // 2 - 1) // 2
    assert T3 >= 1 and F3 >= 1, "need T >= 7 and idim >= 7"
    assert params["wo"].shape[0] == C3 * F3
    Tb, Tb1, Tbx = T3 + 1, T3 + 2, T3 + 3

    Jb = _pick_cone_block(F3)                  # cones per grid step
    F3p = Jb * (-(-F3 // Jb))                  # cone count padded to multiple of Jb
    grid_j = F3p // Jb

    # ---- input layout prep: time residue split + per-cone 9-wide freq window
    #      lane layout of xw: s*9 + u  (s = time residue of padded index, u = win pos)
    idimp = idim + 2
    Tpad = 4 * Tbx                              # >= T + 2 always (T <= 4*T3 + 6)
    xp = jnp.pad(x, ((0, 0), (1, Tpad - T - 1), (1, 1)))           # (N, Tpad, idimp)
    x_res = xp.reshape(N, Tbx, 4, idimp).transpose(0, 2, 1, 3)     # (N, 4, Tbx, idimp)
    fi = (4 * jnp.arange(F3)[:, None] + jnp.arange(9)[None, :]).reshape(-1)
    xw = jnp.take(x_res, fi, axis=-1)                              # (N, 4, Tbx, F3*9)
    xw = (xw.reshape(N, 4, Tbx, F3, 9)
            .transpose(0, 3, 2, 1, 4)                              # (N, F3, Tbx, 4, 9)
            .reshape(N, F3, Tbx, 36)
            .astype(compute_dtype))
    if F3p > F3:                                                   # padded cones: zeros
        xw = jnp.pad(xw, ((0, 0), (0, F3p - F3), (0, 0), (0, 0)))

    # ---- fused / pre-stacked weights (row order kh-major matches kernel concat)
    w1f = _expand_conv1_freq(params["w1"]).reshape(27, 7 * C1).astype(compute_dtype)
    w2f = _expand_conv2_freq(params["w2"]).reshape(3 * 7 * C1, 3 * C2).astype(compute_dtype)
    w3f = params["w3"].reshape(3 * 3 * C2, C3).astype(compute_dtype)
    b1e = jnp.tile(params["b1"].astype(jnp.float32), (1, 7))       # (1, 7*C1)
    b2e = jnp.tile(params["b2"].astype(jnp.float32), (1, 3))       # (1, 3*C2)
    b3f = params["b3"].astype(jnp.float32)                         # (1, C3)
    # fold the torch (b,c,t,f)->(b,t,c*f) transpose into wo's row order; pad cones
    wo_r = params["wo"].reshape(C3, F3, odim).transpose(1, 0, 2)   # (F3, C3, odim)
    if F3p > F3:
        wo_r = jnp.pad(wo_r, ((0, F3p - F3), (0, 0), (0, 0)))      # zero-weight cones
    wo_r = wo_r.astype(compute_dtype)
    bo = params["bo"].astype(jnp.float32)                          # (1, odim)

    kernel = _make_kernel(T3, Jb)

    return pl.pallas_call(
        kernel,
        out_shape=jax.ShapeDtypeStruct((N, T3, odim), jnp.float32),
        grid_spec=pltpu.PrefetchScalarGridSpec(
            num_scalar_prefetch=0,
            grid=(N, grid_j),                       # cone-block axis innermost (reduction)
            in_specs=[
                pl.BlockSpec((1, Jb, Tbx, 36), lambda n, j: (n, j, 0, 0)),
                pl.BlockSpec((27, 7 * C1), lambda n, j: (0, 0)),
                pl.BlockSpec((1, 7 * C1), lambda n, j: (0, 0)),
                pl.BlockSpec((3 * 7 * C1, 3 * C2), lambda n, j: (0, 0)),
                pl.BlockSpec((1, 3 * C2), lambda n, j: (0, 0)),
                pl.BlockSpec((3 * 3 * C2, C3), lambda n, j: (0, 0)),
                pl.BlockSpec((1, C3), lambda n, j: (0, 0)),
                pl.BlockSpec((F3p, C3, odim), lambda n, j: (0, 0, 0)),   # resident wo
                pl.BlockSpec((1, odim), lambda n, j: (0, 0)),
            ],
            out_specs=pl.BlockSpec((1, T3, odim), lambda n, j: (n, 0, 0)),
            scratch_shapes=[
                pltpu.VMEM((Tb1, 4 * 7 * C1), compute_dtype),  # conv1, lane-dense (224)
                pltpu.VMEM((Tb, 2 * 3 * C2), compute_dtype),   # conv2, lane-dense (192)
            ],
        ),
        compiler_params=pltpu.CompilerParams(
            dimension_semantics=("parallel", "arbitrary"),
            # footprint (resident wo + blocks + scratch) is a few MiB at realistic
            # shapes; 32 MiB leaves double-buffering headroom on every generation.
            vmem_limit_bytes=32 * 1024 * 1024,
        ),
    )(xw, w1f, b1e, w2f, b2e, w3f, b3f, wo_r, bo)


# ----------------------------------------------------------------------------
# Parameters (deterministic synthetic init; effective weights of Scaled* layers)
# ----------------------------------------------------------------------------
def init_params(key, in_channels, out_channels, l1=8, l2=32, l3=128):
    assert in_channels >= 7
    ks = jax.random.split(key, 8)

    def conv_w(k, cin, cout):
        return jax.random.normal(k, (3, 3, cin, cout), jnp.float32) / jnp.sqrt(9.0 * cin)

    f_out = ((in_channels - 1) // 2 - 1) // 2
    return dict(
        w1=conv_w(ks[0], 1, l1),
        b1=0.01 * jax.random.normal(ks[1], (1, l1), jnp.float32),
        w2=conv_w(ks[2], l1, l2),
        b2=0.01 * jax.random.normal(ks[3], (1, l2), jnp.float32),
        w3=conv_w(ks[4], l2, l3),
        b3=0.01 * jax.random.normal(ks[5], (1, l3), jnp.float32),
        wo=(jax.random.normal(ks[6], (l3 * f_out, out_channels), jnp.float32)
            / jnp.sqrt(float(l3 * f_out))),
        bo=0.01 * jax.random.normal(ks[7], (1, out_channels), jnp.float32),
    )


# ----------------------------------------------------------------------------
# Pure-JAX reference (full f32 precision) for checking the Pallas path
# ----------------------------------------------------------------------------
def _doubleswish(x):
    return x * jax.nn.sigmoid(x - 1.0)


def reference_forward(x, params):
    prec = jax.lax.Precision.HIGHEST

    def conv(h, w, b, stride, pad):
        y = jax.lax.conv_general_dilated(
            h, w, (stride, stride), [(pad, pad), (pad, pad)],
            dimension_numbers=("NHWC", "HWIO", "NHWC"), precision=prec)
        return y + b.reshape(1, 1, 1, -1)

    h = x[..., None]
    h = _doubleswish(conv(h, params["w1"], params["b1"], 1, 1))
    h = _doubleswish(conv(h, params["w2"], params["b2"], 2, 0))
    h = _doubleswish(conv(h, params["w3"], params["b3"], 2, 0))
    n, t, f, c = h.shape
    flat = jnp.transpose(h, (0, 1, 3, 2)).reshape(n * t, c * f)
    y = jnp.dot(flat, params["wo"], precision=prec) + params["bo"]
    y = y * jax.lax.rsqrt(jnp.mean(y * y, axis=-1, keepdims=True) + 0.25)
    return y.reshape(n, t, -1)


if __name__ == "__main__":
    key = jax.random.PRNGKey(0)
    k_x, k_p = jax.random.split(key)

    N, T, idim, odim = 2, 16, 16, 256       # T >= 7, idim >= 7 as the module requires
    x = jax.random.normal(k_x, (N, T, idim), jnp.float32)
    params = init_params(k_p, idim, odim)

    t_out = ((T - 1) // 2 - 1) // 2
    ref = reference_forward(x, params)

    # Strict check: f32 compute path (same math, MXU multi-pass f32).
    out_f32 = jax.block_until_ready(
        conv2d_subsampling_forward(x, params, compute_dtype=jnp.float32))
    assert out_f32.shape == (N, t_out, odim), out_f32.shape
    err32 = float(jnp.max(jnp.abs(out_f32 - ref)))
    assert bool(jnp.allclose(out_f32, ref, atol=5e-3, rtol=5e-3)), err32

    # Performance path: bf16 operands, f32 accumulation / f32 epilogues.
    out_bf16 = jax.block_until_ready(
        conv2d_subsampling_forward(x, params, compute_dtype=jnp.bfloat16))
    assert out_bf16.shape == (N, t_out, odim), out_bf16.shape
    errbf = float(jnp.max(jnp.abs(out_bf16 - ref)))
    assert bool(jnp.allclose(out_bf16, ref, atol=1e-1, rtol=1e-1)), errbf

    print("KERNEL_OK")
</pallas_src>

<mosaic_0001>
module attributes {stable_mosaic.version = 11 : i64} {
  func.func @kernel(%arg0: i32, %arg1: i32, %arg2: memref<1x3x6x36xf32, #tpu.memory_space<vmem>>, %arg3: memref<27x56xf32, #tpu.memory_space<vmem>>, %arg4: memref<1x56xf32, #tpu.memory_space<vmem>>, %arg5: memref<168x96xf32, #tpu.memory_space<vmem>>, %arg6: memref<1x96xf32, #tpu.memory_space<vmem>>, %arg7: memref<288x128xf32, #tpu.memory_space<vmem>>, %arg8: memref<1x128xf32, #tpu.memory_space<vmem>>, %arg9: memref<3x128x256xf32, #tpu.memory_space<vmem>>, %arg10: memref<1x256xf32, #tpu.memory_space<vmem>>, %arg11: memref<1x3x256xf32, #tpu.memory_space<vmem>>, %arg12: memref<5x224xf32, #tpu.memory_space<vmem>>, %arg13: memref<4x192xf32, #tpu.memory_space<vmem>>) attributes {dimension_semantics = [#tpu.dimension_semantics<parallel>, #tpu.dimension_semantics<arbitrary>], iteration_bounds = array<i64: 2, 1>, scalar_prefetch = 0 : i64, scratch_operands = 2 : i64, tpu.core_type = #tpu.core_type<tc>, window_params = [{transform_indices = @transform_0, window_bounds = array<i64: 1, 3, 6, 36>}, {pipeline_mode = #tpu.pipeline_mode<synchronous>, transform_indices = @transform_1, window_bounds = array<i64: 27, 56>}, {pipeline_mode = #tpu.pipeline_mode<synchronous>, transform_indices = @transform_2, window_bounds = array<i64: 1, 56>}, {pipeline_mode = #tpu.pipeline_mode<synchronous>, transform_indices = @transform_3, window_bounds = array<i64: 168, 96>}, {pipeline_mode = #tpu.pipeline_mode<synchronous>, transform_indices = @transform_4, window_bounds = array<i64: 1, 96>}, {pipeline_mode = #tpu.pipeline_mode<synchronous>, transform_indices = @transform_5, window_bounds = array<i64: 288, 128>}, {pipeline_mode = #tpu.pipeline_mode<synchronous>, transform_indices = @transform_6, window_bounds = array<i64: 1, 128>}, {pipeline_mode = #tpu.pipeline_mode<synchronous>, transform_indices = @transform_7, window_bounds = array<i64: 3, 128, 256>}, {pipeline_mode = #tpu.pipeline_mode<synchronous>, transform_indices = @transform_8, window_bounds = array<i64: 1, 256>}, {transform_indices = @transform_9, window_bounds = array<i64: 1, 3, 256>}]} {
    %c3_i32 = arith.constant 3 : i32
    %0 = arith.muli %arg1, %c3_i32 : i32
    %c0 = arith.constant 0 : index
    %c0_0 = arith.constant 0 : index
    %1 = vector.load %arg3[%c0, %c0_0] : memref<27x56xf32, #tpu.memory_space<vmem>>, vector<27x56xf32>
    %c0_1 = arith.constant 0 : index
    %c0_2 = arith.constant 0 : index
    %2 = vector.load %arg4[%c0_1, %c0_2] : memref<1x56xf32, #tpu.memory_space<vmem>>, vector<1x56xf32>
    %c0_3 = arith.constant 0 : index
    %c0_4 = arith.constant 0 : index
    %3 = vector.load %arg5[%c0_3, %c0_4] : memref<168x96xf32, #tpu.memory_space<vmem>>, vector<168x96xf32>
    %c0_5 = arith.constant 0 : index
    %c0_6 = arith.constant 0 : index
    %4 = vector.load %arg6[%c0_5, %c0_6] : memref<1x96xf32, #tpu.memory_space<vmem>>, vector<1x96xf32>
    %c0_7 = arith.constant 0 : index
    %c0_8 = arith.constant 0 : index
    %5 = vector.load %arg7[%c0_7, %c0_8] : memref<288x128xf32, #tpu.memory_space<vmem>>, vector<288x128xf32>
    %c0_9 = arith.constant 0 : index
    %c0_10 = arith.constant 0 : index
    %6 = vector.load %arg8[%c0_9, %c0_10] : memref<1x128xf32, #tpu.memory_space<vmem>>, vector<1x128xf32>
    %c0_11 = arith.constant 0 : index
    %c0_12 = arith.constant 0 : index
    %c0_13 = arith.constant 0 : index
    %c0_14 = arith.constant 0 : index
    %7 = vector.load %arg2[%c0_11, %c0_12, %c0_13, %c0_14] : memref<1x3x6x36xf32, #tpu.memory_space<vmem>>, vector<1x1x6x36xf32>
    %8 = vector.shape_cast %7 : vector<1x1x6x36xf32> to vector<6x36xf32>
    %9 = vector.extract_strided_slice %8 {offsets = [0, 0], sizes = [5, 36], strides = [1, 1]} : vector<6x36xf32> to vector<5x36xf32>
    %10 = vector.extract_strided_slice %8 {offsets = [1, 0], sizes = [5, 36], strides = [1, 1]} : vector<6x36xf32> to vector<5x36xf32>
    %11 = vector.extract_strided_slice %9 {offsets = [0, 0], sizes = [5, 27], strides = [1, 1]} : vector<5x36xf32> to vector<5x27xf32>
    %12 = vector.extract_strided_slice %9 {offsets = [0, 9], sizes = [5, 27], strides = [1, 1]} : vector<5x36xf32> to vector<5x27xf32>
    %13 = vector.extract_strided_slice %9 {offsets = [0, 18], sizes = [5, 18], strides = [1, 1]} : vector<5x36xf32> to vector<5x18xf32>
    %14 = vector.extract_strided_slice %10 {offsets = [0, 0], sizes = [5, 9], strides = [1, 1]} : vector<5x36xf32> to vector<5x9xf32>
    %15 = tpu.concatenate %13, %14 in 1 : vector<5x18xf32>, vector<5x9xf32> -> vector<5x27xf32>
    %16 = vector.extract_strided_slice %9 {offsets = [0, 27], sizes = [5, 9], strides = [1, 1]} : vector<5x36xf32> to vector<5x9xf32>
    %17 = vector.extract_strided_slice %10 {offsets = [0, 0], sizes = [5, 18], strides = [1, 1]} : vector<5x36xf32> to vector<5x18xf32>
    %18 = tpu.concatenate %16, %17 in 1 : vector<5x9xf32>, vector<5x18xf32> -> vector<5x27xf32>
    %cst = arith.constant dense<0.000000e+00> : vector<5x56xf32>
    %19 = tpu.matmul %11, %1, %cst {dimension_numbers = #tpu.dot_dimension_numbers<[1], [0], [0], [1], [0, 0, 1, 1], [], []>, precision = #tpu.contract_precision<fp32>} : vector<5x27xf32>, vector<27x56xf32>, vector<5x56xf32> -> vector<5x56xf32>
    %20 = vector.broadcast %2 : vector<1x56xf32> to vector<5x56xf32>
    %21 = arith.addf %19, %20 : vector<5x56xf32>
    %cst_15 = arith.constant 1.000000e+00 : f32
    %22 = vector.broadcast %cst_15 : f32 to vector<5x56xf32>
    %23 = arith.subf %21, %22 : vector<5x56xf32>
    %24 = arith.negf %23 : vector<5x56xf32>
    %25 = math.exp %24 : vector<5x56xf32>
    %cst_16 = arith.constant 1.000000e+00 : f32
    %26 = vector.broadcast %cst_16 : f32 to vector<5x56xf32>
    %27 = arith.addf %26, %25 : vector<5x56xf32>
    %28 = arith.divf %26, %27 : vector<5x56xf32>
    %29 = arith.mulf %21, %28 : vector<5x56xf32>
    %cst_17 = arith.constant dense<0.000000e+00> : vector<5x56xf32>
    %30 = tpu.matmul %12, %1, %cst_17 {dimension_numbers = #tpu.dot_dimension_numbers<[1], [0], [0], [1], [0, 0, 1, 1], [], []>, precision = #tpu.contract_precision<fp32>} : vector<5x27xf32>, vector<27x56xf32>, vector<5x56xf32> -> vector<5x56xf32>
    %31 = vector.broadcast %2 : vector<1x56xf32> to vector<5x56xf32>
    %32 = arith.addf %30, %31 : vector<5x56xf32>
    %cst_18 = arith.constant 1.000000e+00 : f32
    %33 = vector.broadcast %cst_18 : f32 to vector<5x56xf32>
    %34 = arith.subf %32, %33 : vector<5x56xf32>
    %35 = arith.negf %34 : vector<5x56xf32>
    %36 = math.exp %35 : vector<5x56xf32>
    %cst_19 = arith.constant 1.000000e+00 : f32
    %37 = vector.broadcast %cst_19 : f32 to vector<5x56xf32>
    %38 = arith.addf %37, %36 : vector<5x56xf32>
    %39 = arith.divf %37, %38 : vector<5x56xf32>
    %40 = arith.mulf %32, %39 : vector<5x56xf32>
    %cst_20 = arith.constant dense<0.000000e+00> : vector<5x56xf32>
    %41 = tpu.matmul %15, %1, %cst_20 {dimension_numbers = #tpu.dot_dimension_numbers<[1], [0], [0], [1], [0, 0, 1, 1], [], []>, precision = #tpu.contract_precision<fp32>} : vector<5x27xf32>, vector<27x56xf32>, vector<5x56xf32> -> vector<5x56xf32>
    %42 = vector.broadcast %2 : vector<1x56xf32> to vector<5x56xf32>
    %43 = arith.addf %41, %42 : vector<5x56xf32>
    %cst_21 = arith.constant 1.000000e+00 : f32
    %44 = vector.broadcast %cst_21 : f32 to vector<5x56xf32>
    %45 = arith.subf %43, %44 : vector<5x56xf32>
    %46 = arith.negf %45 : vector<5x56xf32>
    %47 = math.exp %46 : vector<5x56xf32>
    %cst_22 = arith.constant 1.000000e+00 : f32
    %48 = vector.broadcast %cst_22 : f32 to vector<5x56xf32>
    %49 = arith.addf %48, %47 : vector<5x56xf32>
    %50 = arith.divf %48, %49 : vector<5x56xf32>
    %51 = arith.mulf %43, %50 : vector<5x56xf32>
    %cst_23 = arith.constant dense<0.000000e+00> : vector<5x56xf32>
    %52 = tpu.matmul %18, %1, %cst_23 {dimension_numbers = #tpu.dot_dimension_numbers<[1], [0], [0], [1], [0, 0, 1, 1], [], []>, precision = #tpu.contract_precision<fp32>} : vector<5x27xf32>, vector<27x56xf32>, vector<5x56xf32> -> vector<5x56xf32>
    %53 = vector.broadcast %2 : vector<1x56xf32> to vector<5x56xf32>
    %54 = arith.addf %52, %53 : vector<5x56xf32>
    %cst_24 = arith.constant 1.000000e+00 : f32
    %55 = vector.broadcast %cst_24 : f32 to vector<5x56xf32>
    %56 = arith.subf %54, %55 : vector<5x56xf32>
    %57 = arith.negf %56 : vector<5x56xf32>
    %58 = math.exp %57 : vector<5x56xf32>
    %cst_25 = arith.constant 1.000000e+00 : f32
    %59 = vector.broadcast %cst_25 : f32 to vector<5x56xf32>
    %60 = arith.addf %59, %58 : vector<5x56xf32>
    %61 = arith.divf %59, %60 : vector<5x56xf32>
    %62 = arith.mulf %54, %61 : vector<5x56xf32>
    %63 = tpu.concatenate %29, %40, %51, %62 in 1 : vector<5x56xf32>, vector<5x56xf32>, vector<5x56xf32>, vector<5x56xf32> -> vector<5x224xf32>
    %c0_26 = arith.constant 0 : index
    %c0_27 = arith.constant 0 : index
    %64 = vector.load %arg12[%c0_26, %c0_27] : memref<5x224xf32, #tpu.memory_space<vmem>>, vector<5x224xf32>
    tpu.vector_store %arg12[%c0_26, %c0_27], %63 {strides = array<i32>} : memref<5x224xf32, #tpu.memory_space<vmem>>, vector<5x224xf32>,
    %c0_28 = arith.constant 0 : index
    %c0_29 = arith.constant 0 : index
    %65 = vector.load %arg12[%c0_28, %c0_29] : memref<5x224xf32, #tpu.memory_space<vmem>>, vector<4x168xf32>
    %c0_30 = arith.constant 0 : index
    %c112 = arith.constant 112 : index
    %66 = vector.load %arg12[%c0_30, %c112] : memref<5x224xf32, #tpu.memory_space<vmem>>, vector<4x112xf32>
    %c1 = arith.constant 1 : index
    %c0_31 = arith.constant 0 : index
    %67 = vector.load %arg12[%c1, %c0_31] : memref<5x224xf32, #tpu.memory_space<vmem>>, vector<4x56xf32>
    %68 = tpu.concatenate %66, %67 in 1 : vector<4x112xf32>, vector<4x56xf32> -> vector<4x168xf32>
    %cst_32 = arith.constant dense<0.000000e+00> : vector<4x96xf32>
    %69 = tpu.matmul %65, %3, %cst_32 {dimension_numbers = #tpu.dot_dimension_numbers<[1], [0], [0], [1], [0, 0, 1, 1], [], []>, precision = #tpu.contract_precision<fp32>} : vector<4x168xf32>, vector<168x96xf32>, vector<4x96xf32> -> vector<4x96xf32>
    %70 = vector.broadcast %4 : vector<1x96xf32> to vector<4x96xf32>
    %71 = arith.addf %69, %70 : vector<4x96xf32>
    %cst_33 = arith.constant 1.000000e+00 : f32
    %72 = vector.broadcast %cst_33 : f32 to vector<4x96xf32>
    %73 = arith.subf %71, %72 : vector<4x96xf32>
    %74 = arith.negf %73 : vector<4x96xf32>
    %75 = math.exp %74 : vector<4x96xf32>
    %cst_34 = arith.constant 1.000000e+00 : f32
    %76 = vector.broadcast %cst_34 : f32 to vector<4x96xf32>
    %77 = arith.addf %76, %75 : vector<4x96xf32>
    %78 = arith.divf %76, %77 : vector<4x96xf32>
    %79 = arith.mulf %71, %78 : vector<4x96xf32>
    %cst_35 = arith.constant dense<0.000000e+00> : vector<4x96xf32>
    %80 = tpu.matmul %68, %3, %cst_35 {dimension_numbers = #tpu.dot_dimension_numbers<[1], [0], [0], [1], [0, 0, 1, 1], [], []>, precision = #tpu.contract_precision<fp32>} : vector<4x168xf32>, vector<168x96xf32>, vector<4x96xf32> -> vector<4x96xf32>
    %81 = vector.broadcast %4 : vector<1x96xf32> to vector<4x96xf32>
    %82 = arith.addf %80, %81 : vector<4x96xf32>
    %cst_36 = arith.constant 1.000000e+00 : f32
    %83 = vector.broadcast %cst_36 : f32 to vector<4x96xf32>
    %84 = arith.subf %82, %83 : vector<4x96xf32>
    %85 = arith.negf %84 : vector<4x96xf32>
    %86 = math.exp %85 : vector<4x96xf32>
    %cst_37 = arith.constant 1.000000e+00 : f32
    %87 = vector.broadcast %cst_37 : f32 to vector<4x96xf32>
    %88 = arith.addf %87, %86 : vector<4x96xf32>
    %89 = arith.divf %87, %88 : vector<4x96xf32>
    %90 = arith.mulf %82, %89 : vector<4x96xf32>
    %91 = tpu.concatenate %79, %90 in 1 : vector<4x96xf32>, vector<4x96xf32> -> vector<4x192xf32>
    %c0_38 = arith.constant 0 : index
    %c0_39 = arith.constant 0 : index
    %92 = vector.load %arg13[%c0_38, %c0_39] : memref<4x192xf32, #tpu.memory_space<vmem>>, vector<4x192xf32>
    tpu.vector_store %arg13[%c0_38, %c0_39], %91 {strides = array<i32>} : memref<4x192xf32, #tpu.memory_space<vmem>>, vector<4x192xf32>,
    %c0_40 = arith.constant 0 : index
    %c0_41 = arith.constant 0 : index
    %93 = vector.load %arg13[%c0_40, %c0_41] : memref<4x192xf32, #tpu.memory_space<vmem>>, vector<3x192xf32>
    %c1_42 = arith.constant 1 : index
    %c0_43 = arith.constant 0 : index
    %94 = vector.load %arg13[%c1_42, %c0_43] : memref<4x192xf32, #tpu.memory_space<vmem>>, vector<3x96xf32>
    %95 = tpu.concatenate %93, %94 in 1 : vector<3x192xf32>, vector<3x96xf32> -> vector<3x288xf32>
    %cst_44 = arith.constant dense<0.000000e+00> : vector<3x128xf32>
    %96 = tpu.matmul %95, %5, %cst_44 {dimension_numbers = #tpu.dot_dimension_numbers<[1], [0], [0], [1], [0, 0, 1, 1], [], []>, precision = #tpu.contract_precision<fp32>} : vector<3x288xf32>, vector<288x128xf32>, vector<3x128xf32> -> vector<3x128xf32>
    %97 = vector.broadcast %6 : vector<1x128xf32> to vector<3x128xf32>
    %98 = arith.addf %96, %97 : vector<3x128xf32>
    %cst_45 = arith.constant 1.000000e+00 : f32
    %99 = vector.broadcast %cst_45 : f32 to vector<3x128xf32>
    %100 = arith.subf %98, %99 : vector<3x128xf32>
    %101 = arith.negf %100 : vector<3x128xf32>
    %102 = math.exp %101 : vector<3x128xf32>
    %cst_46 = arith.constant 1.000000e+00 : f32
    %103 = vector.broadcast %cst_46 : f32 to vector<3x128xf32>
    %104 = arith.addf %103, %102 : vector<3x128xf32>
    %105 = arith.divf %103, %104 : vector<3x128xf32>
    %106 = arith.mulf %98, %105 : vector<3x128xf32>
    %c0_i32 = arith.constant 0 : i32
    %107 = arith.addi %0, %c0_i32 : i32
    %108 = arith.index_cast %107 : i32 to index
    %c0_47 = arith.constant 0 : index
    %c0_48 = arith.constant 0 : index
    %109 = vector.load %arg9[%108, %c0_47, %c0_48] : memref<3x128x256xf32, #tpu.memory_space<vmem>>, vector<1x128x256xf32>
    %110 = vector.shape_cast %109 : vector<1x128x256xf32> to vector<128x256xf32>
    %cst_49 = arith.constant dense<0.000000e+00> : vector<3x256xf32>
    %111 = tpu.matmul %106, %110, %cst_49 {dimension_numbers = #tpu.dot_dimension_numbers<[1], [0], [0], [1], [0, 0, 1, 1], [], []>, precision = #tpu.contract_precision<fp32>} : vector<3x128xf32>, vector<128x256xf32>, vector<3x256xf32> -> vector<3x256xf32>
    %c0_50 = arith.constant 0 : index
    %c1_51 = arith.constant 1 : index
    %c0_52 = arith.constant 0 : index
    %c0_53 = arith.constant 0 : index
    %112 = vector.load %arg2[%c0_50, %c1_51, %c0_52, %c0_53] : memref<1x3x6x36xf32, #tpu.memory_space<vmem>>, vector<1x1x6x36xf32>
    %113 = vector.shape_cast %112 : vector<1x1x6x36xf32> to vector<6x36xf32>
    %114 = vector.extract_strided_slice %113 {offsets = [0, 0], sizes = [5, 36], strides = [1, 1]} : vector<6x36xf32> to vector<5x36xf32>
    %115 = vector.extract_strided_slice %113 {offsets = [1, 0], sizes = [5, 36], strides = [1, 1]} : vector<6x36xf32> to vector<5x36xf32>
    %116 = vector.extract_strided_slice %114 {offsets = [0, 0], sizes = [5, 27], strides = [1, 1]} : vector<5x36xf32> to vector<5x27xf32>
    %117 = vector.extract_strided_slice %114 {offsets = [0, 9], sizes = [5, 27], strides = [1, 1]} : vector<5x36xf32> to vector<5x27xf32>
    %118 = vector.extract_strided_slice %114 {offsets = [0, 18], sizes = [5, 18], strides = [1, 1]} : vector<5x36xf32> to vector<5x18xf32>
    %119 = vector.extract_strided_slice %115 {offsets = [0, 0], sizes = [5, 9], strides = [1, 1]} : vector<5x36xf32> to vector<5x9xf32>
    %120 = tpu.concatenate %118, %119 in 1 : vector<5x18xf32>, vector<5x9xf32> -> vector<5x27xf32>
    %121 = vector.extract_strided_slice %114 {offsets = [0, 27], sizes = [5, 9], strides = [1, 1]} : vector<5x36xf32> to vector<5x9xf32>
    %122 = vector.extract_strided_slice %115 {offsets = [0, 0], sizes = [5, 18], strides = [1, 1]} : vector<5x36xf32> to vector<5x18xf32>
    %123 = tpu.concatenate %121, %122 in 1 : vector<5x9xf32>, vector<5x18xf32> -> vector<5x27xf32>
    %cst_54 = arith.constant dense<0.000000e+00> : vector<5x56xf32>
    %124 = tpu.matmul %116, %1, %cst_54 {dimension_numbers = #tpu.dot_dimension_numbers<[1], [0], [0], [1], [0, 0, 1, 1], [], []>, precision = #tpu.contract_precision<fp32>} : vector<5x27xf32>, vector<27x56xf32>, vector<5x56xf32> -> vector<5x56xf32>
    %125 = vector.broadcast %2 : vector<1x56xf32> to vector<5x56xf32>
    %126 = arith.addf %124, %125 : vector<5x56xf32>
    %cst_55 = arith.constant 1.000000e+00 : f32
    %127 = vector.broadcast %cst_55 : f32 to vector<5x56xf32>
    %128 = arith.subf %126, %127 : vector<5x56xf32>
    %129 = arith.negf %128 : vector<5x56xf32>
    %130 = math.exp %129 : vector<5x56xf32>
    %cst_56 = arith.constant 1.000000e+00 : f32
    %131 = vector.broadcast %cst_56 : f32 to vector<5x56xf32>
    %132 = arith.addf %131, %130 : vector<5x56xf32>
    %133 = arith.divf %131, %132 : vector<5x56xf32>
    %134 = arith.mulf %126, %133 : vector<5x56xf32>
    %cst_57 = arith.constant dense<0.000000e+00> : vector<5x56xf32>
    %135 = tpu.matmul %117, %1, %cst_57 {dimension_numbers = #tpu.dot_dimension_numbers<[1], [0], [0], [1], [0, 0, 1, 1], [], []>, precision = #tpu.contract_precision<fp32>} : vector<5x27xf32>, vector<27x56xf32>, vector<5x56xf32> -> vector<5x56xf32>
    %136 = vector.broadcast %2 : vector<1x56xf32> to vector<5x56xf32>
    %137 = arith.addf %135, %136 : vector<5x56xf32>
    %cst_58 = arith.constant 1.000000e+00 : f32
    %138 = vector.broadcast %cst_58 : f32 to vector<5x56xf32>
    %139 = arith.subf %137, %138 : vector<5x56xf32>
    %140 = arith.negf %139 : vector<5x56xf32>
    %141 = math.exp %140 : vector<5x56xf32>
    %cst_59 = arith.constant 1.000000e+00 : f32
    %142 = vector.broadcast %cst_59 : f32 to vector<5x56xf32>
    %143 = arith.addf %142, %141 : vector<5x56xf32>
    %144 = arith.divf %142, %143 : vector<5x56xf32>
    %145 = arith.mulf %137, %144 : vector<5x56xf32>
    %cst_60 = arith.constant dense<0.000000e+00> : vector<5x56xf32>
    %146 = tpu.matmul %120, %1, %cst_60 {dimension_numbers = #tpu.dot_dimension_numbers<[1], [0], [0], [1], [0, 0, 1, 1], [], []>, precision = #tpu.contract_precision<fp32>} : vector<5x27xf32>, vector<27x56xf32>, vector<5x56xf32> -> vector<5x56xf32>
    %147 = vector.broadcast %2 : vector<1x56xf32> to vector<5x56xf32>
    %148 = arith.addf %146, %147 : vector<5x56xf32>
    %cst_61 = arith.constant 1.000000e+00 : f32
    %149 = vector.broadcast %cst_61 : f32 to vector<5x56xf32>
    %150 = arith.subf %148, %149 : vector<5x56xf32>
    %151 = arith.negf %150 : vector<5x56xf32>
    %152 = math.exp %151 : vector<5x56xf32>
    %cst_62 = arith.constant 1.000000e+00 : f32
    %153 = vector.broadcast %cst_62 : f32 to vector<5x56xf32>
    %154 = arith.addf %153, %152 : vector<5x56xf32>
    %155 = arith.divf %153, %154 : vector<5x56xf32>
    %156 = arith.mulf %148, %155 : vector<5x56xf32>
    %cst_63 = arith.constant dense<0.000000e+00> : vector<5x56xf32>
    %157 = tpu.matmul %123, %1, %cst_63 {dimension_numbers = #tpu.dot_dimension_numbers<[1], [0], [0], [1], [0, 0, 1, 1], [], []>, precision = #tpu.contract_precision<fp32>} : vector<5x27xf32>, vector<27x56xf32>, vector<5x56xf32> -> vector<5x56xf32>
    %158 = vector.broadcast %2 : vector<1x56xf32> to vector<5x56xf32>
    %159 = arith.addf %157, %158 : vector<5x56xf32>
    %cst_64 = arith.constant 1.000000e+00 : f32
    %160 = vector.broadcast %cst_64 : f32 to vector<5x56xf32>
    %161 = arith.subf %159, %160 : vector<5x56xf32>
    %162 = arith.negf %161 : vector<5x56xf32>
    %163 = math.exp %162 : vector<5x56xf32>
    %cst_65 = arith.constant 1.000000e+00 : f32
    %164 = vector.broadcast %cst_65 : f32 to vector<5x56xf32>
    %165 = arith.addf %164, %163 : vector<5x56xf32>
    %166 = arith.divf %164, %165 : vector<5x56xf32>
    %167 = arith.mulf %159, %166 : vector<5x56xf32>
    %168 = tpu.concatenate %134, %145, %156, %167 in 1 : vector<5x56xf32>, vector<5x56xf32>, vector<5x56xf32>, vector<5x56xf32> -> vector<5x224xf32>
    %c0_66 = arith.constant 0 : index
    %c0_67 = arith.constant 0 : index
    %169 = vector.load %arg12[%c0_66, %c0_67] : memref<5x224xf32, #tpu.memory_space<vmem>>, vector<5x224xf32>
    tpu.vector_store %arg12[%c0_66, %c0_67], %168 {strides = array<i32>} : memref<5x224xf32, #tpu.memory_space<vmem>>, vector<5x224xf32>,
    %c0_68 = arith.constant 0 : index
    %c0_69 = arith.constant 0 : index
    %170 = vector.load %arg12[%c0_68, %c0_69] : memref<5x224xf32, #tpu.memory_space<vmem>>, vector<4x168xf32>
    %c0_70 = arith.constant 0 : index
    %c112_71 = arith.constant 112 : index
    %171 = vector.load %arg12[%c0_70, %c112_71] : memref<5x224xf32, #tpu.memory_space<vmem>>, vector<4x112xf32>
    %c1_72 = arith.constant 1 : index
    %c0_73 = arith.constant 0 : index
    %172 = vector.load %arg12[%c1_72, %c0_73] : memref<5x224xf32, #tpu.memory_space<vmem>>, vector<4x56xf32>
    %173 = tpu.concatenate %171, %172 in 1 : vector<4x112xf32>, vector<4x56xf32> -> vector<4x168xf32>
    %cst_74 = arith.constant dense<0.000000e+00> : vector<4x96xf32>
    %174 = tpu.matmul %170, %3, %cst_74 {dimension_numbers = #tpu.dot_dimension_numbers<[1], [0], [0], [1], [0, 0, 1, 1], [], []>, precision = #tpu.contract_precision<fp32>} : vector<4x168xf32>, vector<168x96xf32>, vector<4x96xf32> -> vector<4x96xf32>
    %175 = vector.broadcast %4 : vector<1x96xf32> to vector<4x96xf32>
    %176 = arith.addf %174, %175 : vector<4x96xf32>
    %cst_75 = arith.constant 1.000000e+00 : f32
    %177 = vector.broadcast %cst_75 : f32 to vector<4x96xf32>
    %178 = arith.subf %176, %177 : vector<4x96xf32>
    %179 = arith.negf %178 : vector<4x96xf32>
    %180 = math.exp %179 : vector<4x96xf32>
    %cst_76 = arith.constant 1.000000e+00 : f32
    %181 = vector.broadcast %cst_76 : f32 to vector<4x96xf32>
    %182 = arith.addf %181, %180 : vector<4x96xf32>
    %183 = arith.divf %181, %182 : vector<4x96xf32>
    %184 = arith.mulf %176, %183 : vector<4x96xf32>
    %cst_77 = arith.constant dense<0.000000e+00> : vector<4x96xf32>
    %185 = tpu.matmul %173, %3, %cst_77 {dimension_numbers = #tpu.dot_dimension_numbers<[1], [0], [0], [1], [0, 0, 1, 1], [], []>, precision = #tpu.contract_precision<fp32>} : vector<4x168xf32>, vector<168x96xf32>, vector<4x96xf32> -> vector<4x96xf32>
    %186 = vector.broadcast %4 : vector<1x96xf32> to vector<4x96xf32>
    %187 = arith.addf %185, %186 : vector<4x96xf32>
    %cst_78 = arith.constant 1.000000e+00 : f32
    %188 = vector.broadcast %cst_78 : f32 to vector<4x96xf32>
    %189 = arith.subf %187, %188 : vector<4x96xf32>
    %190 = arith.negf %189 : vector<4x96xf32>
    %191 = math.exp %190 : vector<4x96xf32>
    %cst_79 = arith.constant 1.000000e+00 : f32
    %192 = vector.broadcast %cst_79 : f32 to vector<4x96xf32>
    %193 = arith.addf %192, %191 : vector<4x96xf32>
    %194 = arith.divf %192, %193 : vector<4x96xf32>
    %195 = arith.mulf %187, %194 : vector<4x96xf32>
    %196 = tpu.concatenate %184, %195 in 1 : vector<4x96xf32>, vector<4x96xf32> -> vector<4x192xf32>
    %c0_80 = arith.constant 0 : index
    %c0_81 = arith.constant 0 : index
    %197 = vector.load %arg13[%c0_80, %c0_81] : memref<4x192xf32, #tpu.memory_space<vmem>>, vector<4x192xf32>
    tpu.vector_store %arg13[%c0_80, %c0_81], %196 {strides = array<i32>} : memref<4x192xf32, #tpu.memory_space<vmem>>, vector<4x192xf32>,
    %c0_82 = arith.constant 0 : index
    %c0_83 = arith.constant 0 : index
    %198 = vector.load %arg13[%c0_82, %c0_83] : memref<4x192xf32, #tpu.memory_space<vmem>>, vector<3x192xf32>
    %c1_84 = arith.constant 1 : index
    %c0_85 = arith.constant 0 : index
    %199 = vector.load %arg13[%c1_84, %c0_85] : memref<4x192xf32, #tpu.memory_space<vmem>>, vector<3x96xf32>
    %200 = tpu.concatenate %198, %199 in 1 : vector<3x192xf32>, vector<3x96xf32> -> vector<3x288xf32>
    %cst_86 = arith.constant dense<0.000000e+00> : vector<3x128xf32>
    %201 = tpu.matmul %200, %5, %cst_86 {dimension_numbers = #tpu.dot_dimension_numbers<[1], [0], [0], [1], [0, 0, 1, 1], [], []>, precision = #tpu.contract_precision<fp32>} : vector<3x288xf32>, vector<288x128xf32>, vector<3x128xf32> -> vector<3x128xf32>
    %202 = vector.broadcast %6 : vector<1x128xf32> to vector<3x128xf32>
    %203 = arith.addf %201, %202 : vector<3x128xf32>
    %cst_87 = arith.constant 1.000000e+00 : f32
    %204 = vector.broadcast %cst_87 : f32 to vector<3x128xf32>
    %205 = arith.subf %203, %204 : vector<3x128xf32>
    %206 = arith.negf %205 : vector<3x128xf32>
    %207 = math.exp %206 : vector<3x128xf32>
    %cst_88 = arith.constant 1.000000e+00 : f32
    %208 = vector.broadcast %cst_88 : f32 to vector<3x128xf32>
    %209 = arith.addf %208, %207 : vector<3x128xf32>
    %210 = arith.divf %208, %209 : vector<3x128xf32>
    %211 = arith.mulf %203, %210 : vector<3x128xf32>
    %c1_i32 = arith.constant 1 : i32
    %212 = arith.addi %0, %c1_i32 : i32
    %213 = arith.index_cast %212 : i32 to index
    %c0_89 = arith.constant 0 : index
    %c0_90 = arith.constant 0 : index
    %214 = vector.load %arg9[%213, %c0_89, %c0_90] : memref<3x128x256xf32, #tpu.memory_space<vmem>>, vector<1x128x256xf32>
    %215 = vector.shape_cast %214 : vector<1x128x256xf32> to vector<128x256xf32>
    %cst_91 = arith.constant dense<0.000000e+00> : vector<3x256xf32>
    %216 = tpu.matmul %211, %215, %cst_91 {dimension_numbers = #tpu.dot_dimension_numbers<[1], [0], [0], [1], [0, 0, 1, 1], [], []>, precision = #tpu.contract_precision<fp32>} : vector<3x128xf32>, vector<128x256xf32>, vector<3x256xf32> -> vector<3x256xf32>
    %217 = arith.addf %111, %216 : vector<3x256xf32>
    %c0_92 = arith.constant 0 : index
    %c2 = arith.constant 2 : index
    %c0_93 = arith.constant 0 : index
    %c0_94 = arith.constant 0 : index
    %218 = vector.load %arg2[%c0_92, %c2, %c0_93, %c0_94] : memref<1x3x6x36xf32, #tpu.memory_space<vmem>>, vector<1x1x6x36xf32>
    %219 = vector.shape_cast %218 : vector<1x1x6x36xf32> to vector<6x36xf32>
    %220 = vector.extract_strided_slice %219 {offsets = [0, 0], sizes = [5, 36], strides = [1, 1]} : vector<6x36xf32> to vector<5x36xf32>
    %221 = vector.extract_strided_slice %219 {offsets = [1, 0], sizes = [5, 36], strides = [1, 1]} : vector<6x36xf32> to vector<5x36xf32>
    %222 = vector.extract_strided_slice %220 {offsets = [0, 0], sizes = [5, 27], strides = [1, 1]} : vector<5x36xf32> to vector<5x27xf32>
    %223 = vector.extract_strided_slice %220 {offsets = [0, 9], sizes = [5, 27], strides = [1, 1]} : vector<5x36xf32> to vector<5x27xf32>
    %224 = vector.extract_strided_slice %220 {offsets = [0, 18], sizes = [5, 18], strides = [1, 1]} : vector<5x36xf32> to vector<5x18xf32>
    %225 = vector.extract_strided_slice %221 {offsets = [0, 0], sizes = [5, 9], strides = [1, 1]} : vector<5x36xf32> to vector<5x9xf32>
    %226 = tpu.concatenate %224, %225 in 1 : vector<5x18xf32>, vector<5x9xf32> -> vector<5x27xf32>
    %227 = vector.extract_strided_slice %220 {offsets = [0, 27], sizes = [5, 9], strides = [1, 1]} : vector<5x36xf32> to vector<5x9xf32>
    %228 = vector.extract_strided_slice %221 {offsets = [0, 0], sizes = [5, 18], strides = [1, 1]} : vector<5x36xf32> to vector<5x18xf32>
    %229 = tpu.concatenate %227, %228 in 1 : vector<5x9xf32>, vector<5x18xf32> -> vector<5x27xf32>
    %cst_95 = arith.constant dense<0.000000e+00> : vector<5x56xf32>
    %230 = tpu.matmul %222, %1, %cst_95 {dimension_numbers = #tpu.dot_dimension_numbers<[1], [0], [0], [1], [0, 0, 1, 1], [], []>, precision = #tpu.contract_precision<fp32>} : vector<5x27xf32>, vector<27x56xf32>, vector<5x56xf32> -> vector<5x56xf32>
    %231 = vector.broadcast %2 : vector<1x56xf32> to vector<5x56xf32>
    %232 = arith.addf %230, %231 : vector<5x56xf32>
    %cst_96 = arith.constant 1.000000e+00 : f32
    %233 = vector.broadcast %cst_96 : f32 to vector<5x56xf32>
    %234 = arith.subf %232, %233 : vector<5x56xf32>
    %235 = arith.negf %234 : vector<5x56xf32>
    %236 = math.exp %235 : vector<5x56xf32>
    %cst_97 = arith.constant 1.000000e+00 : f32
    %237 = vector.broadcast %cst_97 : f32 to vector<5x56xf32>
    %238 = arith.addf %237, %236 : vector<5x56xf32>
    %239 = arith.divf %237, %238 : vector<5x56xf32>
    %240 = arith.mulf %232, %239 : vector<5x56xf32>
    %cst_98 = arith.constant dense<0.000000e+00> : vector<5x56xf32>
    %241 = tpu.matmul %223, %1, %cst_98 {dimension_numbers = #tpu.dot_dimension_numbers<[1], [0], [0], [1], [0, 0, 1, 1], [], []>, precision = #tpu.contract_precision<fp32>} : vector<5x27xf32>, vector<27x56xf32>, vector<5x56xf32> -> vector<5x56xf32>
    %242 = vector.broadcast %2 : vector<1x56xf32> to vector<5x56xf32>
    %243 = arith.addf %241, %242 : vector<5x56xf32>
    %cst_99 = arith.constant 1.000000e+00 : f32
    %244 = vector.broadcast %cst_99 : f32 to vector<5x56xf32>
    %245 = arith.subf %243, %244 : vector<5x56xf32>
    %246 = arith.negf %245 : vector<5x56xf32>
    %247 = math.exp %246 : vector<5x56xf32>
    %cst_100 = arith.constant 1.000000e+00 : f32
    %248 = vector.broadcast %cst_100 : f32 to vector<5x56xf32>
    %249 = arith.addf %248, %247 : vector<5x56xf32>
    %250 = arith.divf %248, %249 : vector<5x56xf32>
    %251 = arith.mulf %243, %250 : vector<5x56xf32>
    %cst_101 = arith.constant dense<0.000000e+00> : vector<5x56xf32>
    %252 = tpu.matmul %226, %1, %cst_101 {dimension_numbers = #tpu.dot_dimension_numbers<[1], [0], [0], [1], [0, 0, 1, 1], [], []>, precision = #tpu.contract_precision<fp32>} : vector<5x27xf32>, vector<27x56xf32>, vector<5x56xf32> -> vector<5x56xf32>
    %253 = vector.broadcast %2 : vector<1x56xf32> to vector<5x56xf32>
    %254 = arith.addf %252, %253 : vector<5x56xf32>
    %cst_102 = arith.constant 1.000000e+00 : f32
    %255 = vector.broadcast %cst_102 : f32 to vector<5x56xf32>
    %256 = arith.subf %254, %255 : vector<5x56xf32>
    %257 = arith.negf %256 : vector<5x56xf32>
    %258 = math.exp %257 : vector<5x56xf32>
    %cst_103 = arith.constant 1.000000e+00 : f32
    %259 = vector.broadcast %cst_103 : f32 to vector<5x56xf32>
    %260 = arith.addf %259, %258 : vector<5x56xf32>
    %261 = arith.divf %259, %260 : vector<5x56xf32>
    %262 = arith.mulf %254, %261 : vector<5x56xf32>
    %cst_104 = arith.constant dense<0.000000e+00> : vector<5x56xf32>
    %263 = tpu.matmul %229, %1, %cst_104 {dimension_numbers = #tpu.dot_dimension_numbers<[1], [0], [0], [1], [0, 0, 1, 1], [], []>, precision = #tpu.contract_precision<fp32>} : vector<5x27xf32>, vector<27x56xf32>, vector<5x56xf32> -> vector<5x56xf32>
    %264 = vector.broadcast %2 : vector<1x56xf32> to vector<5x56xf32>
    %265 = arith.addf %263, %264 : vector<5x56xf32>
    %cst_105 = arith.constant 1.000000e+00 : f32
    %266 = vector.broadcast %cst_105 : f32 to vector<5x56xf32>
    %267 = arith.subf %265, %266 : vector<5x56xf32>
    %268 = arith.negf %267 : vector<5x56xf32>
    %269 = math.exp %268 : vector<5x56xf32>
    %cst_106 = arith.constant 1.000000e+00 : f32
    %270 = vector.broadcast %cst_106 : f32 to vector<5x56xf32>
    %271 = arith.addf %270, %269 : vector<5x56xf32>
    %272 = arith.divf %270, %271 : vector<5x56xf32>
    %273 = arith.mulf %265, %272 : vector<5x56xf32>
    %274 = tpu.concatenate %240, %251, %262, %273 in 1 : vector<5x56xf32>, vector<5x56xf32>, vector<5x56xf32>, vector<5x56xf32> -> vector<5x224xf32>
    %c0_107 = arith.constant 0 : index
    %c0_108 = arith.constant 0 : index
    %275 = vector.load %arg12[%c0_107, %c0_108] : memref<5x224xf32, #tpu.memory_space<vmem>>, vector<5x224xf32>
    tpu.vector_store %arg12[%c0_107, %c0_108], %274 {strides = array<i32>} : memref<5x224xf32, #tpu.memory_space<vmem>>, vector<5x224xf32>,
    %c0_109 = arith.constant 0 : index
    %c0_110 = arith.constant 0 : index
    %276 = vector.load %arg12[%c0_109, %c0_110] : memref<5x224xf32, #tpu.memory_space<vmem>>, vector<4x168xf32>
    %c0_111 = arith.constant 0 : index
    %c112_112 = arith.constant 112 : index
    %277 = vector.load %arg12[%c0_111, %c112_112] : memref<5x224xf32, #tpu.memory_space<vmem>>, vector<4x112xf32>
    %c1_113 = arith.constant 1 : index
    %c0_114 = arith.constant 0 : index
    %278 = vector.load %arg12[%c1_113, %c0_114] : memref<5x224xf32, #tpu.memory_space<vmem>>, vector<4x56xf32>
    %279 = tpu.concatenate %277, %278 in 1 : vector<4x112xf32>, vector<4x56xf32> -> vector<4x168xf32>
    %cst_115 = arith.constant dense<0.000000e+00> : vector<4x96xf32>
    %280 = tpu.matmul %276, %3, %cst_115 {dimension_numbers = #tpu.dot_dimension_numbers<[1], [0], [0], [1], [0, 0, 1, 1], [], []>, precision = #tpu.contract_precision<fp32>} : vector<4x168xf32>, vector<168x96xf32>, vector<4x96xf32> -> vector<4x96xf32>
    %281 = vector.broadcast %4 : vector<1x96xf32> to vector<4x96xf32>
    %282 = arith.addf %280, %281 : vector<4x96xf32>
    %cst_116 = arith.constant 1.000000e+00 : f32
    %283 = vector.broadcast %cst_116 : f32 to vector<4x96xf32>
    %284 = arith.subf %282, %283 : vector<4x96xf32>
    %285 = arith.negf %284 : vector<4x96xf32>
    %286 = math.exp %285 : vector<4x96xf32>
    %cst_117 = arith.constant 1.000000e+00 : f32
    %287 = vector.broadcast %cst_117 : f32 to vector<4x96xf32>
    %288 = arith.addf %287, %286 : vector<4x96xf32>
    %289 = arith.divf %287, %288 : vector<4x96xf32>
    %290 = arith.mulf %282, %289 : vector<4x96xf32>
    %cst_118 = arith.constant dense<0.000000e+00> : vector<4x96xf32>
    %291 = tpu.matmul %279, %3, %cst_118 {dimension_numbers = #tpu.dot_dimension_numbers<[1], [0], [0], [1], [0, 0, 1, 1], [], []>, precision = #tpu.contract_precision<fp32>} : vector<4x168xf32>, vector<168x96xf32>, vector<4x96xf32> -> vector<4x96xf32>
    %292 = vector.broadcast %4 : vector<1x96xf32> to vector<4x96xf32>
    %293 = arith.addf %291, %292 : vector<4x96xf32>
    %cst_119 = arith.constant 1.000000e+00 : f32
    %294 = vector.broadcast %cst_119 : f32 to vector<4x96xf32>
    %295 = arith.subf %293, %294 : vector<4x96xf32>
    %296 = arith.negf %295 : vector<4x96xf32>
    %297 = math.exp %296 : vector<4x96xf32>
    %cst_120 = arith.constant 1.000000e+00 : f32
    %298 = vector.broadcast %cst_120 : f32 to vector<4x96xf32>
    %299 = arith.addf %298, %297 : vector<4x96xf32>
    %300 = arith.divf %298, %299 : vector<4x96xf32>
    %301 = arith.mulf %293, %300 : vector<4x96xf32>
    %302 = tpu.concatenate %290, %301 in 1 : vector<4x96xf32>, vector<4x96xf32> -> vector<4x192xf32>
    %c0_121 = arith.constant 0 : index
    %c0_122 = arith.constant 0 : index
    %303 = vector.load %arg13[%c0_121, %c0_122] : memref<4x192xf32, #tpu.memory_space<vmem>>, vector<4x192xf32>
    tpu.vector_store %arg13[%c0_121, %c0_122], %302 {strides = array<i32>} : memref<4x192xf32, #tpu.memory_space<vmem>>, vector<4x192xf32>,
    %c0_123 = arith.constant 0 : index
    %c0_124 = arith.constant 0 : index
    %304 = vector.load %arg13[%c0_123, %c0_124] : memref<4x192xf32, #tpu.memory_space<vmem>>, vector<3x192xf32>
    %c1_125 = arith.constant 1 : index
    %c0_126 = arith.constant 0 : index
    %305 = vector.load %arg13[%c1_125, %c0_126] : memref<4x192xf32, #tpu.memory_space<vmem>>, vector<3x96xf32>
    %306 = tpu.concatenate %304, %305 in 1 : vector<3x192xf32>, vector<3x96xf32> -> vector<3x288xf32>
    %cst_127 = arith.constant dense<0.000000e+00> : vector<3x128xf32>
    %307 = tpu.matmul %306, %5, %cst_127 {dimension_numbers = #tpu.dot_dimension_numbers<[1], [0], [0], [1], [0, 0, 1, 1], [], []>, precision = #tpu.contract_precision<fp32>} : vector<3x288xf32>, vector<288x128xf32>, vector<3x128xf32> -> vector<3x128xf32>
    %308 = vector.broadcast %6 : vector<1x128xf32> to vector<3x128xf32>
    %309 = arith.addf %307, %308 : vector<3x128xf32>
    %cst_128 = arith.constant 1.000000e+00 : f32
    %310 = vector.broadcast %cst_128 : f32 to vector<3x128xf32>
    %311 = arith.subf %309, %310 : vector<3x128xf32>
    %312 = arith.negf %311 : vector<3x128xf32>
    %313 = math.exp %312 : vector<3x128xf32>
    %cst_129 = arith.constant 1.000000e+00 : f32
    %314 = vector.broadcast %cst_129 : f32 to vector<3x128xf32>
    %315 = arith.addf %314, %313 : vector<3x128xf32>
    %316 = arith.divf %314, %315 : vector<3x128xf32>
    %317 = arith.mulf %309, %316 : vector<3x128xf32>
    %c2_i32 = arith.constant 2 : i32
    %318 = arith.addi %0, %c2_i32 : i32
    %319 = arith.index_cast %318 : i32 to index
    %c0_130 = arith.constant 0 : index
    %c0_131 = arith.constant 0 : index
    %320 = vector.load %arg9[%319, %c0_130, %c0_131] : memref<3x128x256xf32, #tpu.memory_space<vmem>>, vector<1x128x256xf32>
    %321 = vector.shape_cast %320 : vector<1x128x256xf32> to vector<128x256xf32>
    %cst_132 = arith.constant dense<0.000000e+00> : vector<3x256xf32>
    %322 = tpu.matmul %317, %321, %cst_132 {dimension_numbers = #tpu.dot_dimension_numbers<[1], [0], [0], [1], [0, 0, 1, 1], [], []>, precision = #tpu.contract_precision<fp32>} : vector<3x128xf32>, vector<128x256xf32>, vector<3x256xf32> -> vector<3x256xf32>
    %323 = arith.addf %217, %322 : vector<3x256xf32>
    %c0_i32_133 = arith.constant 0 : i32
    %324 = arith.cmpi eq, %arg1, %c0_i32_133 : i32
    %325 = arith.extui %324 : i1 to i32
    %c0_i32_134 = arith.constant 0 : i32
    %326 = arith.cmpi ne, %325, %c0_i32_134 : i32
    scf.if %326 {
      %cst_143 = arith.constant 0.000000e+00 : f32
      %334 = vector.broadcast %cst_143 : f32 to vector<1x3x256xf32>
      %c0_144 = arith.constant 0 : index
      %c0_145 = arith.constant 0 : index
      %c0_146 = arith.constant 0 : index
      %335 = vector.load %arg11[%c0_144, %c0_145, %c0_146] : memref<1x3x256xf32, #tpu.memory_space<vmem>>, vector<1x3x256xf32>
      tpu.vector_store %arg11[%c0_144, %c0_145, %c0_146], %334 {strides = array<i32>} : memref<1x3x256xf32, #tpu.memory_space<vmem>>, vector<1x3x256xf32>,
    } else {
    }
    %c0_135 = arith.constant 0 : index
    %c0_136 = arith.constant 0 : index
    %c0_137 = arith.constant 0 : index
    %327 = vector.load %arg11[%c0_135, %c0_136, %c0_137] : memref<1x3x256xf32, #tpu.memory_space<vmem>>, vector<1x3x256xf32>
    %328 = vector.shape_cast %323 : vector<3x256xf32> to vector<1x3x256xf32>
    %329 = arith.addf %327, %328 : vector<1x3x256xf32>
    %c0_138 = arith.constant 0 : index
    %c0_139 = arith.constant 0 : index
    %c0_140 = arith.constant 0 : index
    %330 = vector.load %arg11[%c0_138, %c0_139, %c0_140] : memref<1x3x256xf32, #tpu.memory_space<vmem>>, vector<1x3x256xf32>
    tpu.vector_store %arg11[%c0_138, %c0_139, %c0_140], %329 {strides = array<i32>} : memref<1x3x256xf32, #tpu.memory_space<vmem>>, vector<1x3x256xf32>,
    %c0_i32_141 = arith.constant 0 : i32
    %331 = arith.cmpi eq, %arg1, %c0_i32_141 : i32
    %332 = arith.extui %331 : i1 to i32
    %c0_i32_142 = arith.constant 0 : i32
    %333 = arith.cmpi ne, %332, %c0_i32_142 : i32
    scf.if %333 {
      %c0_143 = arith.constant 0 : index
      %c0_144 = arith.constant 0 : index
      %c0_145 = arith.constant 0 : index
      %334 = vector.load %arg11[%c0_143, %c0_144, %c0_145] : memref<1x3x256xf32, #tpu.memory_space<vmem>>, vector<1x3x256xf32>
      %c0_146 = arith.constant 0 : index
      %c0_147 = arith.constant 0 : index
      %335 = vector.load %arg10[%c0_146, %c0_147] : memref<1x256xf32, #tpu.memory_space<vmem>>, vector<1x256xf32>
      %336 = vector.shape_cast %335 : vector<1x256xf32> to vector<1x1x256xf32>
      %337 = vector.broadcast %336 : vector<1x1x256xf32> to vector<1x3x256xf32>
      %338 = arith.addf %334, %337 : vector<1x3x256xf32>
      %339 = arith.mulf %338, %338 : vector<1x3x256xf32>
      %cst_148 = arith.constant dense<0.000000e+00> : vector<1x3xf32>
      %340 = vector.multi_reduction <add>, %339, %cst_148 [2] : vector<1x3x256xf32> to vector<1x3xf32>
      %341 = vector.shape_cast %340 : vector<1x3xf32> to vector<1x3x1xf32>
      %cst_149 = arith.constant 2.560000e+02 : f32
      %342 = vector.broadcast %cst_149 : f32 to vector<1x3x1xf32>
      %343 = arith.divf %341, %342 : vector<1x3x1xf32>
      %cst_150 = arith.constant 2.500000e-01 : f32
      %344 = vector.broadcast %cst_150 : f32 to vector<1x3x1xf32>
      %345 = arith.addf %343, %344 : vector<1x3x1xf32>
      %346 = math.rsqrt %345 : vector<1x3x1xf32>
      %347 = vector.broadcast %346 : vector<1x3x1xf32> to vector<1x3x256xf32>
      %348 = arith.mulf %338, %347 : vector<1x3x256xf32>
      %c0_151 = arith.constant 0 : index
      %c0_152 = arith.constant 0 : index
      %c0_153 = arith.constant 0 : index
      %349 = vector.load %arg11[%c0_151, %c0_152, %c0_153] : memref<1x3x256xf32, #tpu.memory_space<vmem>>, vector<1x3x256xf32>
      tpu.vector_store %arg11[%c0_151, %c0_152, %c0_153], %348 {strides = array<i32>} : memref<1x3x256xf32, #tpu.memory_space<vmem>>, vector<1x3x256xf32>,
    } else {
    }
    return
  }
  func.func @transform_0(%arg0: i32, %arg1: i32) -> (i32, i32, i32, i32) {
    %c0_i32 = arith.constant 0 : i32
    %c0_i32_0 = arith.constant 0 : i32
    %c0_i32_1 = arith.constant 0 : i32
    return %arg0, %arg1, %c0_i32, %c0_i32_0 : i32, i32, i32, i32
  }
  func.func @transform_1(%arg0: i32, %arg1: i32) -> (i32, i32) {
    %c0_i32 = arith.constant 0 : i32
    %c0_i32_0 = arith.constant 0 : i32
    %c0_i32_1 = arith.constant 0 : i32
    return %c0_i32, %c0_i32_0 : i32, i32
  }
  func.func @transform_2(%arg0: i32, %arg1: i32) -> (i32, i32) {
    %c0_i32 = arith.constant 0 : i32
    %c0_i32_0 = arith.constant 0 : i32
    %c0_i32_1 = arith.constant 0 : i32
    return %c0_i32, %c0_i32_0 : i32, i32
  }
  func.func @transform_3(%arg0: i32, %arg1: i32) -> (i32, i32) {
    %c0_i32 = arith.constant 0 : i32
    %c0_i32_0 = arith.constant 0 : i32
    %c0_i32_1 = arith.constant 0 : i32
    return %c0_i32, %c0_i32_0 : i32, i32
  }
  func.func @transform_4(%arg0: i32, %arg1: i32) -> (i32, i32) {
    %c0_i32 = arith.constant 0 : i32
    %c0_i32_0 = arith.constant 0 : i32
    %c0_i32_1 = arith.constant 0 : i32
    return %c0_i32, %c0_i32_0 : i32, i32
  }
  func.func @transform_5(%arg0: i32, %arg1: i32) -> (i32, i32) {
    %c0_i32 = arith.constant 0 : i32
    %c0_i32_0 = arith.constant 0 : i32
    %c0_i32_1 = arith.constant 0 : i32
    return %c0_i32, %c0_i32_0 : i32, i32
  }
  func.func @transform_6(%arg0: i32, %arg1: i32) -> (i32, i32) {
    %c0_i32 = arith.constant 0 : i32
    %c0_i32_0 = arith.constant 0 : i32
    %c0_i32_1 = arith.constant 0 : i32
    return %c0_i32, %c0_i32_0 : i32, i32
  }
  func.func @transform_7(%arg0: i32, %arg1: i32) -> (i32, i32, i32) {
    %c0_i32 = arith.constant 0 : i32
    %c0_i32_0 = arith.constant 0 : i32
    %c0_i32_1 = arith.constant 0 : i32
    %c0_i32_2 = arith.constant 0 : i32
    return %c0_i32, %c0_i32_0, %c0_i32_1 : i32, i32, i32
  }
  func.func @transform_8(%arg0: i32, %arg1: i32) -> (i32, i32) {
    %c0_i32 = arith.constant 0 : i32
    %c0_i32_0 = arith.constant 0 : i32
    %c0_i32_1 = arith.constant 0 : i32
    return %c0_i32, %c0_i32_0 : i32, i32
  }
  func.func @transform_9(%arg0: i32, %arg1: i32) -> (i32, i32, i32) {
    %c0_i32 = arith.constant 0 : i32
    %c0_i32_0 = arith.constant 0 : i32
    %c0_i32_1 = arith.constant 0 : i32
    return %arg0, %c0_i32, %c0_i32_0 : i32, i32, i32
  }
}

</mosaic_0001>

<bundles_post_ra>
// kernel: conv2d_subsampling_forward.1
= control target key start
LH: loop header
LB: loop body
LE: loop exit
PB: predicated region body
PF: predicated region fallthrough
CT: control target
= control target key end

     0   :  { %s11876_s30 = smov 0   ;;  %s11878_s10 = smov 0   ;;  %s16813_s0 = inlined_call_operand.vmem [shape: f32[2,3,6,36], index: 0, kind: input, shape index: {}]   ;;  %s16814_s1 = inlined_call_operand.vmem [shape: f32[27,56], index: 1, kind: input, shape index: {}]   ;;  %s16815_s2 = inlined_call_operand.vmem [shape: f32[1,56], index: 2, kind: input, shape index: {}]   ;;  %s16816_s3 = inlined_call_operand.vmem [shape: f32[168,96], index: 3, kind: input, shape index: {}]   ;;  %s16817_s4 = inlined_call_operand.vmem [shape: f32[1,96], index: 4, kind: input, shape index: {}]   ;;  %s16818_s5 = inlined_call_operand.vmem [shape: f32[288,128], index: 5, kind: input, shape index: {}]   ;;  %s16819_s6 = inlined_call_operand.vmem [shape: f32[1,128], index: 6, kind: input, shape index: {}]   ;;  %s16820_s7 = inlined_call_operand.vmem [shape: f32[3,128,256], index: 7, kind: input, shape index: {}]   ;;  %s16821_s8 = inlined_call_operand.vmem [shape: f32[1,256], index: 8, kind: input, shape index: {}]   ;;  %s16822_s9 = inlined_call_operand.vmem [shape: f32[2,3,256], index: 9, kind: output, shape index: {}]  }
   0x1   :  { %s11880_s11 = smov 0  }
   0x2 LB: > { %s31_s12 = sadd.s32 1, %s11806_s10  ;;  %p11538_p0 = scmp.ge.s32.totalorder %s11810_s11, 1  ;;  %s11810_s11 = sphi %s11880_s11, %s19_s11   ;;  %s11806_s10 = sphi %s11878_s10, %s18470_s10   ;;  %s11802_s30 = sphi %s11876_s30, %s18469_s30  }
   0x3   : > { %p33_p1 = scmp.ge.s32.totalorder %s31_s12, 2  ;;  %p306_p2 = scmp.lt.s32.totalorder %s11810_s11, 3 }
   0x5   : > { %s18472_s12 = smov (%p33_p1, %s31_s12), 0  ;;  %p307_p3 = pnand %p11538_p0, %p306_p2 }
   0x7   : > { %310 = sbr.rel (%p307_p3) target bundleno = 3732 (0xe94), region = 56 }
   0xc   : > { %p347_p4 = scmp.lt.s32.totalorder %s11802_s30, 1  ;;  %v365_v0 = vld [vmem:[%s16814_s1 + $0x18] sm:$0x7]  ;;  %vm17063_vm0 = vcmask 1042432   ;;  %v364_v2 = vld [vmem:[%s16814_s1 + $0x10] sm:$0xff]  ;;  %v363_v3 = vld [vmem:[%s16814_s1 + $0x8] sm:$0xff] }
   0xd   : > { %v453_v1 = vsel %vm17063_vm0, %v365_v0, 0  ;;  %v362_v4 = vld [vmem:[%s16814_s1] sm:$0xff]  ;;  %v11909_v6 = vand.u32 4294901760, %v364_v2  ;;  %v11911_v7 = vand.u32 4294901760, %v363_v3  ;;  %vm17343_vm1 = vcmask 220160   ;;  %s17064_s29 = smov 119  }
   0xe   : > { %s18474_s30 = smov (!%p347_p4, %s11802_s30), 1  ;;  %v11907_v5 = vand.u32 4294901760, %v453_v1  ;;  %v11913_v8 = vand.u32 4294901760, %v362_v4  ;;  %v11812_v13 = vmov 0.0   ;;  %s11815_s13 = smov 9   ;;  %vm17342_vm2 = vcmask 146432  }
   0xf   : > { %17486 = vst [vmem:[#allocation5_spill] sm:$0xff] %v11909_v6  ;;  %s11653_s21 = smul.u32 24, %s18474_s30  ;;  %s11652_s22 = sshll.u32 %s18474_s30, 3  ;;  %v11920_v10 = vsub.f32 %v364_v2, %v11909_v6  ;;  %v11924_v11 = vsub.f32 %v363_v3, %v11911_v7  ;;  %vm17341_vm3 = vcmask 72704   ;;  %v12089_v2 = vld [vmem:[%s16815_s2] ss:$0 sm:$0xff] }
  0x10   : > { %17485 = vst [vmem:[#allocation4_spill] sm:$0xff] %v11907_v5  ;;  %v11916_v9 = vsub.f32 %v453_v1, %v11907_v5  ;;  %468 = vmatpush.msra.mxu0 %v11907_v5  ;;  %568 = vmatpush.msra.mxu3 %v11907_v5  ;;  %s11929_s25 = scalar_lea.vmem %s16822_s9, %s11652_s22  ;;  %v11932_v12 = vsub.f32 %v362_v4, %v11913_v8  ;;  %s11814_s30 = smov 18  }
  0x11   : > { %17487 = vst [vmem:[#allocation6_spill] sm:$0xff] %v11911_v7  ;;  %s11937_s28 = scalar_lea.vmem %s16813_s0, %s11653_s21  ;;  %v11946_v15 = vand.u32 4294901760, %v11920_v10  ;;  %v11949_v16 = vand.u32 4294901760, %v11924_v11  ;;  %s11816_s14 = smov 110  }
  0x12   : > { %17488 = vst [vmem:[#allocation7_spill] sm:$0xff] %v11913_v8  ;;  %539 = vmatpush.msra.mxu2 %v11916_v9  ;;  %470 = vmatpush.msra.mxu0 %v11909_v6  ;;  %v11943_v14 = vand.u32 4294901760, %v11916_v9  ;;  %v426_v17 = vld [vmem:[%s11937_s28] sm:$0x3f]  ;;  %v11954_v18 = vand.u32 4294901760, %v11932_v12  ;;  %s11817_s15 = smov 101  }
  0x13   : > { %17489 = vst [vmem:[#allocation8_spill] sm:$0xff] %v11916_v9  ;;  %570 = vmatpush.msra.mxu3 %v11909_v6  ;;  %661 = vrot.lane.b32.xlu0 %v426_v17, %s17064_s29  ;;  %v431_v19 = vrot.slane %v426_v17, 1  ;;  %v505_v21 = vsub.f32 %v11920_v10, %v11946_v15  ;;  %v449_v22 = vsel %vm17343_vm1, %v426_v17, 0  ;;  %v511_v24 = vsub.f32 %v11924_v11, %v11949_v16  ;;  %s11818_s24 = smov 56   ;;  %s11819_s26 = smov 112  }
  0x14   : > { %17490 = vst [vmem:[#allocation9_spill] sm:$0xff] %v11920_v10  ;;  %542 = vmatpush.msra.mxu2 %v11920_v10  ;;  %v499_v20 = vsub.f32 %v11916_v9, %v11943_v14  ;;  %472 = vmatpush.msra.mxu0 %v11911_v7  ;;  %v475_v23 = vand.u32 4294901760, %v449_v22  ;;  %v517_v27 = vsub.f32 %v11932_v12, %v11954_v18  ;;  %s11820_s27 = smov 40   ;;  %s16979_s20 = smov 16  }
  0x15   : > { %17491 = vst [vmem:[#allocation10_spill] sm:$0xff] %v11924_v11  ;;  %572 = vmatpush.msra.mxu3 %v11911_v7  ;;  %432 = vrot.lane.b32.xlu1 %v431_v19, %s11814_s30  ;;  %v11971_v26 = vand.u32 4294901760, %v505_v21  ;;  %v11978_v29 = vand.u32 4294901760, %v511_v24  ;;  %s11822_s23 = smov 96   ;;  %s11823_s16 = smov 64  }
  0x16   : > { %17492 = vst [vmem:[#allocation11_spill] sm:$0xff] %v11932_v12  ;;  %440 = vrot.lane.b32.xlu2 %v431_v19, %s11815_s13  ;;  %v11969_v25 = vand.u32 4294901760, %v499_v20  ;;  %545 = vmatpush.msra.mxu2 %v11924_v11  ;;  %v476_v28 = vsub.f32 %v449_v22, %v475_v23  ;;  %v11984_v31 = vand.u32 4294901760, %v517_v27  ;;  %s17879_s21 = smov 16  }
  0x17   : > { %11395 = vst [vmem:[%s11929_s25] sm:$0x77] %v11812_v13  ;;  %474 = vmatpush.msra.mxu0 %v11913_v8  ;;  %574 = vmatpush.msra.mxu3 %v11913_v8 }
  0x18   : > { %17493 = vst [vmem:[#allocation12_spill] sm:$0xff] %v11943_v14  ;;  %501 = vmatpush.msra.mxu1 %v11969_v25  ;;  %548 = vmatpush.msra.mxu2 %v11932_v12  ;;  %v477_v30 = vand.u32 4294901760, %v476_v28 }
  0x19   : > { %17494 = vst [vmem:[#allocation13_spill] sm:$0xff] %v11946_v15  ;;  %597 = vmatpush.msrb.mxu0 %v11943_v14  ;;  %551 = vmatmul.f32.vlgmr.msra.gmra.mxu2 %v476_v28 }
  0x1a   : > { %17495 = vst [vmem:[#allocation14_spill] sm:$0xff] %v11949_v16  ;;  %507 = vmatpush.msra.mxu1 %v11971_v26  ;;  %v478_v32 = vsub.f32 %v476_v28, %v477_v30  ;;  %578 = vmatmul.f32.vlgmr.msra.gmra.mxu3 %v477_v30 }
  0x1b   : > { %17496 = vst [vmem:[#allocation15_spill] sm:$0xff] %v11954_v18  ;;  %601 = vmatpush.msrb.mxu0 %v11946_v15  ;;  %428 = vrot.lane.b32.xlu0 %v426_v17, %s11816_s14 }
  0x1c   : > { %17497 = vst [vmem:[#allocation16_spill] sm:$0xff] %v11969_v25  ;;  %513 = vmatpush.msra.mxu1 %v11978_v29  ;;  %v479_v33 = vand.u32 4294901760, %v478_v32  ;;  %711 = vmatpush.msrb.mxu3 %v11969_v25 }
  0x1d   : > { %17498 = vst [vmem:[#allocation17_spill] sm:$0xff] %v11971_v26  ;;  %605 = vmatpush.msrb.mxu0 %v11949_v16  ;;  %437 = vrot.lane.b32.xlu1 %v426_v17, %s11817_s15 }
  0x1e   : > { %17499 = vst [vmem:[#allocation18_spill] sm:$0xff] %v11978_v29  ;;  %519 = vmatpush.msra.mxu1 %v11984_v31  ;;  %480 = vmatmul.f32.vlgmr.msra.gmra.mxu0 %v479_v33 }
  0x1f   : > { %17500 = vst [vmem:[#allocation19_spill] sm:$0xff] %v11984_v31  ;;  %521 = vmatmul.f32.vlgmr.msra.gmra.mxu1 %v475_v23  ;;  %609 = vmatpush.msrb.mxu0 %v11954_v18 }
  0x20   : > { %628 = vmatpush.msrb.mxu1 %v11907_v5  ;;  %717 = vmatpush.msrb.mxu3 %v11971_v26 }
  0x21   : > { %749 = vmatpush.msra.mxu0 %v11916_v9  ;;  %678 = vmatpush.msrb.mxu2 %v11907_v5 }
  0x22   : > { %630 = vmatpush.msrb.mxu1 %v11909_v6  ;;  %723 = vmatpush.msrb.mxu3 %v11978_v29 }
  0x23   : > { %752 = vmatpush.msra.mxu0 %v11920_v10  ;;  %680 = vmatpush.msrb.mxu2 %v11909_v6 }
  0x24   : > { %632 = vmatpush.msrb.mxu1 %v11911_v7  ;;  %729 = vmatpush.msrb.mxu3 %v11984_v31 }
  0x25   : > { %755 = vmatpush.msra.mxu0 %v11924_v11  ;;  %682 = vmatpush.msrb.mxu2 %v11911_v7 }
  0x26   : > { %634 = vmatpush.msrb.mxu1 %v11913_v8  ;;  %838 = vmatpush.msra.mxu3 %v11907_v5 }
  0x27   : > { %611 = vmatmul.f32.vlgmr.msrb.gmra.mxu0 %v475_v23  ;;  %636 = vmatmul.f32.vlgmr.msrb.gmra.mxu1 %v475_v23 }
  0x28   : > { %778 = vmatpush.msra.mxu1 %v11907_v5  ;;  %758 = vmatpush.msra.mxu0 %v11932_v12 }
  0x29   : > { %840 = vmatpush.msra.mxu3 %v11909_v6  ;;  %684 = vmatpush.msrb.mxu2 %v11913_v8 }
  0x2a   : > { %780 = vmatpush.msra.mxu1 %v11909_v6  ;;  %887 = vmatpush.msrb.mxu0 %v11907_v5 }
  0x2b   : > { %842 = vmatpush.msra.mxu3 %v11911_v7  ;;  %807 = vmatpush.msra.mxu2 %v11943_v14 }
  0x2c   : > { %782 = vmatpush.msra.mxu1 %v11911_v7  ;;  %889 = vmatpush.msrb.mxu0 %v11909_v6 }
  0x2d   : > { %844 = vmatpush.msra.mxu3 %v11913_v8  ;;  %811 = vmatpush.msra.mxu2 %v11946_v15 }
  0x2e   : > { %784 = vmatpush.msra.mxu1 %v11913_v8  ;;  %891 = vmatpush.msrb.mxu0 %v11911_v7 }
  0x2f   : > { %815 = vmatpush.msra.mxu2 %v11949_v16 }
  0x30   : > { %920 = vmatpush.msrb.mxu1 %v11969_v25  ;;  %893 = vmatpush.msrb.mxu0 %v11913_v8 }
  0x31   : > { %819 = vmatpush.msra.mxu2 %v11954_v18 }
  0x32   : > { %926 = vmatpush.msrb.mxu1 %v11971_v26 }
  0x34   : > { %932 = vmatpush.msrb.mxu1 %v11978_v29 }
  0x36   : > { %938 = vmatpush.msrb.mxu1 %v11984_v31 }
  0x70   : > { %v441_v43 = vpop.permute.xlu2 %440 }
  0x85   : > { %v662_v34 = vpop.permute.xlu0 %661 }
  0x86   : > { %v663_v35 = vsel %vm17343_vm1, %v662_v34, 0 }
  0x87   : > { %v685_v36 = vand.u32 4294901760, %v663_v35  ;;  %v433_v37 = vpop.permute.xlu1 %432 }
  0x89   : > { %v686_v38 = vsub.f32 %v663_v35, %v685_v36  ;;  %731 = vmatmul.f32.vlgmr.msrb.gmra.mxu3 %v685_v36 }
  0x8a   : > { %987 = vmatpush.msrb.mxu3 %v11907_v5 }
  0x8b   : > { %v687_v39 = vand.u32 4294901760, %v686_v38  ;;  %761 = vmatmul.f32.vlgmr.msra.gmra.mxu0 %v686_v38 }
  0x8c   : > { %989 = vmatpush.msrb.mxu3 %v11909_v6  ;;  %1016 = vmatpush.msra.mxu0 %v11943_v14 }
  0x8d   : > { %v429_v40 = vpop.permute.xlu0 %428  ;;  %788 = vmatmul.f32.vlgmr.msra.gmra.mxu1 %v687_v39  ;;  %v688_v41 = vsub.f32 %v686_v38, %v687_v39 }
  0x8e   : > { %v436_v42 = vsel %vm17342_vm2, %v429_v40, %v433_v37  ;;  %991 = vmatpush.msrb.mxu3 %v11911_v7  ;;  %1047 = vmatpush.msra.mxu1 %v11907_v5 }
  0x8f   : > { %v872_v44 = vsel %vm17343_vm1, %v436_v42, 0  ;;  %v689_v45 = vand.u32 4294901760, %v688_v41  ;;  %v438_v46 = vpop.permute.xlu1 %437  ;;  %1020 = vmatpush.msra.mxu0 %v11946_v15 }
  0x90   : > { %v894_v47 = vand.u32 4294901760, %v872_v44  ;;  %993 = vmatpush.msrb.mxu3 %v11913_v8  ;;  %1049 = vmatpush.msra.mxu1 %v11909_v6  ;;  %v444_v48 = vsel %vm17341_vm3, %v438_v46, %v441_v43 }
  0x91   : > { %690 = vmatmul.f32.vlgmr.msrb.gmra.mxu2 %v689_v45  ;;  %846 = vmatmul.f32.vlgmr.msra.gmra.mxu3 %v685_v36  ;;  %v1081_v50 = vsel %vm17343_vm1, %v444_v48, 0 }
  0x92   : > { %v895_v49 = vsub.f32 %v872_v44, %v894_v47  ;;  %958 = vmatpush.msrb.mxu2 %v11916_v9  ;;  %1051 = vmatpush.msra.mxu1 %v11911_v7  ;;  %v1103_v53 = vand.u32 4294901760, %v1081_v50 }
  0x93   : > { %1129 = vmatpush.msra.mxu3 %v11969_v25  ;;  %1024 = vmatpush.msra.mxu0 %v11949_v16 }
  0x94   : > { %v896_v51 = vand.u32 4294901760, %v895_v49  ;;  %961 = vmatpush.msrb.mxu2 %v11920_v10  ;;  %1053 = vmatpush.msra.mxu1 %v11913_v8  ;;  %v1104_v55 = vsub.f32 %v1081_v50, %v1103_v53 }
  0x95   : > { %940 = vmatmul.f32.vlgmr.msrb.gmra.mxu1 %v894_v47  ;;  %1135 = vmatpush.msra.mxu3 %v11971_v26 }
  0x96   : > { %v897_v52 = vsub.f32 %v895_v49, %v896_v51  ;;  %964 = vmatpush.msrb.mxu2 %v11924_v11  ;;  %1196 = vmatpush.msrb.mxu1 %v11907_v5  ;;  %v1105_v56 = vand.u32 4294901760, %v1104_v55 }
  0x97   : > { %1141 = vmatpush.msra.mxu3 %v11978_v29  ;;  %1028 = vmatpush.msra.mxu0 %v11954_v18 }
  0x98   : > { %v898_v54 = vand.u32 4294901760, %v897_v52  ;;  %967 = vmatpush.msrb.mxu2 %v11932_v12  ;;  %1198 = vmatpush.msrb.mxu1 %v11909_v6  ;;  %v1106_v57 = vsub.f32 %v1104_v55, %v1105_v56 }
  0x99   : > { %821 = vmatmul.f32.vlgmr.msra.gmra.mxu2 %v685_v36  ;;  %997 = vmatmul.f32.vlgmr.msrb.gmra.mxu3 %v896_v51 }
  0x9a   : > { %899 = vmatmul.f32.vlgmr.msrb.gmra.mxu0 %v898_v54  ;;  %1147 = vmatpush.msra.mxu3 %v11984_v31  ;;  %v1107_v58 = vand.u32 4294901760, %v1106_v57 }
  0x9b   : > { %1096 = vmatpush.msra.mxu2 %v11907_v5  ;;  %1200 = vmatpush.msrb.mxu1 %v11911_v7  ;;  %v12074_v59 = vpop.f32.mrf.mxu0 }
  0x9c   : > { %1256 = vmatpush.msrb.mxu3 %v11907_v5  ;;  %1167 = vmatpush.msrb.mxu0 %v11916_v9  ;;  %v12076_v60 = vpop.f32.mrf.mxu1  ;;  %v12082_v63 = vpop.f32.mrf.mxu2 }
  0x9d   : > { %1055 = vmatmul.f32.vlgmr.msra.gmra.mxu1 %v894_v47  ;;  %1098 = vmatpush.msra.mxu2 %v11909_v6  ;;  %v12078_v61 = vpop.f32.mrf.mxu3 }
  0x9e   : > { %1202 = vmatpush.msrb.mxu1 %v11913_v8  ;;  %1258 = vmatpush.msrb.mxu3 %v11909_v6 }
  0x9f   : > { %1170 = vmatpush.msrb.mxu0 %v11920_v10  ;;  %1100 = vmatpush.msra.mxu2 %v11911_v7 }
  0xa0   : > { %1260 = vmatpush.msrb.mxu3 %v11911_v7 }
  0xa1   : > { %970 = vmatmul.f32.vlgmr.msrb.gmra.mxu2 %v895_v49  ;;  %1149 = vmatmul.f32.vlgmr.msra.gmra.mxu3 %v1103_v53 }
  0xa2   : > { %1030 = vmatmul.f32.vlgmr.msra.gmra.mxu0 %v894_v47  ;;  %1102 = vmatpush.msra.mxu2 %v11913_v8 }
  0xa3   : > { %1173 = vmatpush.msrb.mxu0 %v11924_v11  ;;  %1262 = vmatpush.msrb.mxu3 %v11913_v8 }
  0xa4   : > { %1225 = vmatpush.msrb.mxu2 %v11943_v14  ;;  %v12080_v62 = vpop.f32.mrf.mxu0  ;;  %v12084_v0 = vpop.f32.mrf.mxu1 }
  0xa5   : > { %1206 = vmatmul.f32.vlgmr.msrb.gmra.mxu1 %v1105_v56  ;;  %1176 = vmatpush.msrb.mxu0 %v11932_v12 }
  0xa6   : > { %1229 = vmatpush.msrb.mxu2 %v11946_v15 }
  0xa8   : > { %1233 = vmatpush.msrb.mxu2 %v11949_v16 }
  0xa9   : > { %1108 = vmatmul.f32.vlgmr.msra.gmra.mxu2 %v1107_v58  ;;  %1264 = vmatmul.f32.vlgmr.msrb.gmra.mxu3 %v1103_v53 }
  0xaa   : > { %1179 = vmatmul.f32.vlgmr.msrb.gmra.mxu0 %v1104_v55  ;;  %1237 = vmatpush.msrb.mxu2 %v11954_v18 }
  0xb1   : > { %1239 = vmatmul.f32.vlgmr.msrb.gmra.mxu2 %v1103_v53 }
 0x108   : > { %v762_v3 = vpop.f32.mrf.mxu0 }
 0x10a   : > { %v789_v4 = vpop.f32.mrf.mxu1 }
 0x10c   : > { %v732_v1 = vpop.f32.mrf.mxu3 }
 0x112   : > { %v941_v28 = vpop.f32.mrf.mxu1 }
 0x114   : > { %v691_v13 = vpop.f32.mrf.mxu2  ;;  %v847_v20 = vpop.f32.mrf.mxu3 }
 0x115   : > { %v692_v17 = vadd.f32 %v12089_v2, %v691_v13 }
 0x117   : > { %v733_v19 = vadd.f32 %v732_v1, %v692_v17  ;;  %v900_v23 = vpop.f32.mrf.mxu0 }
 0x118   : > { %v901_v30 = vadd.f32 %v12089_v2, %v900_v23 }
 0x119   : > { %v763_v21 = vadd.f32 %v762_v3, %v733_v19 }
 0x11a   : > { %v942_v36 = vadd.f32 %v941_v28, %v901_v30  ;;  %v1056_v41 = vpop.f32.mrf.mxu1  ;;  %v380_v28 = vld [vmem:[%s16816_s3 + $0x68] sm:$0xff] }
 0x11b   : > { %v790_v22 = vadd.f32 %v789_v4, %v763_v21 }
 0x11c   : > { %v822_v24 = vpop.f32.mrf.mxu2  ;;  %v998_v34 = vpop.f32.mrf.mxu3 }
 0x11d   : > { %v823_v27 = vadd.f32 %v822_v24, %v790_v22  ;;  %v382_v24 = vld [vmem:[%s16816_s3 + $0x78] sm:$0xff] }
 0x11f   : > { %v848_v32 = vadd.f32 %v847_v20, %v823_v27  ;;  %v1031_v39 = vpop.f32.mrf.mxu0  ;;  %v381_v27 = vld [vmem:[%s16816_s3 + $0x70] sm:$0xff] }
 0x121   : > { %v11544_v33 = vadd.f32 -1.0, %v848_v32 }
 0x122   : > { %v1207_v54 = vpop.f32.mrf.mxu1 }
 0x123   : > { %v11545_v35 = vmul.f32 -1.442695, %v11544_v33 }
 0x124   : > { %v971_v37 = vpop.f32.mrf.mxu2  ;;  %v1150_v46 = vpop.f32.mrf.mxu3 }
 0x125   : > { %11695 = vpow2.f32 %v11545_v35  ;;  %v972_v38 = vadd.f32 %v971_v37, %v942_v36  ;;  %v12111_v35 = vand.u32 4294901760, %v381_v27  ;;  %v12113_v37 = vand.u32 4294901760, %v380_v28 }
 0x127   : > { %v999_v40 = vadd.f32 %v998_v34, %v972_v38  ;;  %v1180_v52 = vpop.f32.mrf.mxu0  ;;  %v12109_v34 = vand.u32 4294901760, %v382_v24  ;;  %17502 = vst [vmem:[#allocation21_spill] sm:$0xff] %v12111_v35 }
 0x128   : > { %17503 = vst [vmem:[#allocation22_spill] sm:$0xff] %v12113_v37 }
 0x129   : > { %v1032_v42 = vadd.f32 %v1031_v39, %v999_v40  ;;  %17501 = vst [vmem:[#allocation20_spill] sm:$0xff] %v12109_v34  ;;  %v12116_v39 = vsub.f32 %v382_v24, %v12109_v34  ;;  %v12119_v40 = vsub.f32 %v381_v27, %v12111_v35  ;;  %1334 = vmatpush.msra.mxu0 %v12109_v34 }
 0x12a   : > { %1530 = vmatpush.msra.mxu3 %v12109_v34 }
 0x12b   : > { %v11696_v43 = vpop.eup %11695  ;;  %v12093_v44 = vadd.f32 %v1056_v41, %v1032_v42  ;;  %17504 = vst [vmem:[#allocation23_spill] sm:$0xff] %v12116_v39  ;;  %v12124_v42 = vsub.f32 %v380_v28, %v12113_v37  ;;  %1336 = vmatpush.msra.mxu0 %v12111_v35  ;;  %1477 = vmatpush.msra.mxu2 %v12116_v39 }
 0x12c   : > { %v854_v45 = vadd.f32 1.0, %v11696_v43  ;;  %v1109_v47 = vpop.f32.mrf.mxu2  ;;  %v1265_v3 = vpop.f32.mrf.mxu3  ;;  %17505 = vst [vmem:[#allocation24_spill] sm:$0xff] %v12119_v40  ;;  %1532 = vmatpush.msra.mxu3 %v12111_v35 }
 0x12d   : > { %v1110_v48 = vadd.f32 %v12089_v2, %v1109_v47  ;;  %v11546_v49 = vadd.f32 -1.0, %v12093_v44  ;;  %17506 = vst [vmem:[#allocation25_spill] sm:$0xff] %v12124_v42  ;;  %1338 = vmatpush.msra.mxu0 %v12113_v37  ;;  %1480 = vmatpush.msra.mxu2 %v12119_v40 }
 0x12e   : > { %11697 = vrcp.f32 %v854_v45  ;;  %v864_v19 = vand.u32 2147483647, %v854_v45  ;;  %v866_v20 = vand.u32 2147483648, %v854_v45  ;;  %vm860_vm5 = vweird.f32 %v854_v45  ;;  %1534 = vmatpush.msra.mxu3 %v12113_v37 }
 0x12f   : > { %v1151_v50 = vadd.f32 %v1150_v46, %v1110_v48  ;;  %v11547_v51 = vmul.f32 -1.442695, %v11546_v49  ;;  %v12130_v46 = vand.u32 4294901760, %v12119_v40  ;;  %v12135_v48 = vand.u32 4294901760, %v12124_v42  ;;  %1483 = vmatpush.msra.mxu2 %v12124_v42 }
 0x130   : > { %vm865_vm7 = vcmp.eq.f32.partialorder %v864_v19, 8.507059e+37  ;;  %v867_v36 = vor.u32 1.1754944e-38, %v866_v20 }
 0x131   : > { %v1181_v53 = vadd.f32 %v1180_v52, %v1151_v50  ;;  %11699 = vpow2.f32 %v11547_v51  ;;  %17508 = vst [vmem:[#allocation27_spill] sm:$0xff] %v12130_v46  ;;  %v1383_v50 = vsub.f32 %v12119_v40, %v12130_v46  ;;  %v1389_v51 = vsub.f32 %v12124_v42, %v12135_v48 }
 0x132   : > { %17509 = vst [vmem:[#allocation28_spill] sm:$0xff] %v12135_v48 }
 0x133   : > { %v1208_v55 = vadd.f32 %v1207_v54, %v1181_v53 }
 0x134   : > { %v11698_v56 = vpop.eup %11697  ;;  %v1240_v57 = vpop.f32.mrf.mxu2 }
 0x135   : > { %v1241_v58 = vadd.f32 %v1240_v57, %v1208_v55  ;;  %v856_v1 = vmul.f32 %v11698_v56, %v854_v45  ;;  %vm861_vm4 = vweird.f32 %v11698_v56  ;;  %v12127_v45 = vand.u32 4294901760, %v12116_v39 }
 0x136   : > { %vm862_vm6 = vmor %vm860_vm5, %vm861_vm4  ;;  %v12150_v55 = vand.u32 4294901760, %v1383_v50  ;;  %v378_v50 = vld [vmem:[%s16816_s3 + $0x58] sm:$0xff] }
 0x137   : > { %v11700_v4 = vpop.eup %11699  ;;  %v12097_v13 = vadd.f32 %v1265_v3, %v1241_v58  ;;  %v857_v17 = vsub.f32 1.0, %v856_v1  ;;  %17507 = vst [vmem:[#allocation26_spill] sm:$0xff] %v12127_v45  ;;  %v1377_v49 = vsub.f32 %v12116_v39, %v12127_v45  ;;  %v12154_v3 = vand.u32 4294901760, %v1389_v51 }
 0x138   : > { %v1063_v21 = vadd.f32 1.0, %v11700_v4  ;;  %17511 = vst [vmem:[#allocation30_spill] sm:$0xff] %v12150_v55  ;;  %v12176_v51 = vand.u32 4294901760, %v378_v50 }
 0x139   : > { %v11548_v22 = vadd.f32 -1.0, %v12097_v13  ;;  %v858_v23 = vmul.f32 %v11698_v56, %v857_v17  ;;  %v12148_v54 = vand.u32 4294901760, %v1377_v49  ;;  %17512 = vst [vmem:[#allocation31_spill] sm:$0xff] %v12154_v3 }
 0x13a   : > { %11701 = vrcp.f32 %v1063_v21  ;;  %v1075_v57 = vand.u32 2147483648, %v1063_v21  ;;  %v1073_v1 = vand.u32 2147483647, %v1063_v21  ;;  %vm1069_vm9 = vweird.f32 %v1063_v21  ;;  %17515 = vst [vmem:[#allocation34_spill] sm:$0xff] %v12176_v51 }
 0x13b   : > { %v11549_v30 = vmul.f32 -1.442695, %v11548_v22  ;;  %v859_v33 = vadd.f32 %v11698_v56, %v858_v23  ;;  %17510 = vst [vmem:[#allocation29_spill] sm:$0xff] %v12148_v54  ;;  %1379 = vmatpush.msra.mxu1 %v12148_v54 }
 0x13c   : > { %v1076_v17 = vor.u32 1.1754944e-38, %v1075_v57  ;;  %vm1074_vm11 = vcmp.eq.f32.partialorder %v1073_v1, 8.507059e+37 }
 0x13d   : > { %11703 = vpow2.f32 %v11549_v30  ;;  %v863_v38 = vsel %vm862_vm6, %v11698_v56, %v859_v33  ;;  %1385 = vmatpush.msra.mxu1 %v12150_v55 }
 0x13e   : > { %v868_v41 = vsel %vm865_vm7, %v867_v36, %v863_v38 }
 0x13f   : > { %v870_v43 = vmul.f32 %v868_v41, %v848_v32  ;;  %1391 = vmatpush.msra.mxu1 %v12154_v3 }
 0x140   : > { %v11702_v47 = vpop.eup %11701 }
 0x141   : > { %1290 = vrot.lane.b32.xlu2 %v870_v43, %s11818_s24  ;;  %v1065_v32 = vmul.f32 %v11702_v47, %v1063_v21  ;;  %vm1070_vm8 = vweird.f32 %v11702_v47 }
 0x142   : > { %vm1071_vm10 = vmor %vm1069_vm9, %vm1070_vm8  ;;  %vm1301_vm8 = vcmask 457728   ;;  %vm1303_vm9 = vcmask 916480  }
 0x143   : > { %v11704_v52 = vpop.eup %11703  ;;  %v1066_v53 = vsub.f32 1.0, %v1065_v32  ;;  %v379_v32 = vld [vmem:[%s16816_s3 + $0x60] sm:$0xff] }
 0x144   : > { %v1272_v56 = vadd.f32 1.0, %v11704_v52  ;;  %v12168_v49 = vand.u32 4294901760, %v379_v32  ;;  %v12188_v52 = vsub.f32 %v378_v50, %v12176_v51  ;;  %v370_v50 = vld [vmem:[%s16816_s3 + $0x18] sm:$0xff] }
 0x145   : > { %v1067_v58 = vmul.f32 %v11702_v47, %v1066_v53 }
 0x146   : > { %11705 = vrcp.f32 %v1272_v56  ;;  %v1284_v28 = vand.u32 2147483648, %v1272_v56  ;;  %v1282_v21 = vand.u32 2147483647, %v1272_v56  ;;  %vm1278_vm13 = vweird.f32 %v1272_v56  ;;  %17513 = vst [vmem:[#allocation32_spill] sm:$0xff] %v12168_v49  ;;  %1340 = vmatpush.msra.mxu0 %v12168_v49  ;;  %1536 = vmatpush.msra.mxu3 %v12168_v49 }
 0x147   : > { %v1068_v4 = vadd.f32 %v11702_v47, %v1067_v58  ;;  %17517 = vst [vmem:[#allocation36_spill] sm:$0xff] %v12188_v52  ;;  %v12201_v57 = vand.u32 4294901760, %v12188_v52 }
 0x148   : > { %v1285_v36 = vor.u32 1.1754944e-38, %v1284_v28  ;;  %vm1283_vm15 = vcmp.eq.f32.partialorder %v1282_v21, 8.507059e+37  ;;  %1342 = vmatpush.msra.mxu0 %v12176_v51  ;;  %1538 = vmatpush.msra.mxu3 %v12176_v51 }
 0x149   : > { %v1072_v19 = vsel %vm1071_vm10, %v11702_v47, %v1068_v4  ;;  %17519 = vst [vmem:[#allocation38_spill] sm:$0xff] %v12201_v57  ;;  %vm1305_vm10 = vcmask 326656  }
 0x14a   : > { %v1077_v20 = vsel %vm1074_vm11, %v1076_v17, %v1072_v19  ;;  %v375_v17 = vld [vmem:[%s16816_s3 + $0x40] sm:$0xff]  ;;  %vm1308_vm11 = vcmask 782336  }
 0x14b   : > { %v1079_v22 = vmul.f32 %v1077_v20, %v12093_v44  ;;  %v482_v44 = vadd.f32 %v12089_v2, %v12074_v59  ;;  %v1401_v20 = vsub.f32 %v12188_v52, %v12201_v57 }
 0x14c   : > { %v11706_v23 = vpop.eup %11705 }
 0x14d   : > { %1294 = vrot.lane.b32.xlu0 %v1079_v22, %s11819_s26  ;;  %v1274_v24 = vmul.f32 %v11706_v23, %v1272_v56  ;;  %vm1279_vm12 = vweird.f32 %v11706_v23  ;;  %v523_v47 = vadd.f32 %v12076_v60, %v482_v44  ;;  %v377_v60 = vld [vmem:[%s16816_s3 + $0x50] sm:$0xff] }
 0x14e   : > { %vm1280_vm14 = vmor %vm1278_vm13, %vm1279_vm12  ;;  %v12190_v53 = vand.u32 4294901760, %v377_v60  ;;  %vm1319_vm12 = vcmask 130048  }
 0x14f   : > { %v1275_v27 = vsub.f32 1.0, %v1274_v24  ;;  %v553_v59 = vadd.f32 %v12082_v63, %v523_v47  ;;  %v376_v63 = vld [vmem:[%s16816_s3 + $0x48] sm:$0xff]  ;;  %v374_v24 = vld [vmem:[%s16816_s3 + $0x38] sm:$0xff] }
 0x150   : > { %17518 = vst [vmem:[#allocation37_spill] sm:$0xff] %v12190_v53  ;;  %v12204_v58 = vsub.f32 %v377_v60, %v12190_v53  ;;  %v12206_v1 = vand.u32 4294901760, %v376_v63  ;;  %1344 = vmatpush.msra.mxu0 %v12190_v53  ;;  %1540 = vmatpush.msra.mxu3 %v12190_v53  ;;  %v12241_v21 = vand.u32 4294901760, %v374_v24 }
 0x151   : > { %v1276_v30 = vmul.f32 %v11706_v23, %v1275_v27  ;;  %v580_v4 = vadd.f32 %v12078_v61, %v553_v59  ;;  %v12227_v61 = vand.u32 4294901760, %v375_v17  ;;  %v12234_v27 = vand.u32 4294901760, %v1401_v20  ;;  %v369_v59 = vld [vmem:[%s16816_s3 + $0x10] sm:$0xff] }
 0x152   : > { %17520 = vst [vmem:[#allocation39_spill] sm:$0xff] %v12204_v58  ;;  %v12220_v22 = vand.u32 4294901760, %v12204_v58  ;;  %1346 = vmatpush.msra.mxu0 %v12206_v1  ;;  %1542 = vmatpush.msra.mxu3 %v12206_v1  ;;  %v12265_v47 = vsub.f32 %v374_v24, %v12241_v21  ;;  %v12298_v18 = vand.u32 4294901760, %v369_v59 }
 0x153   : > { %v1277_v33 = vadd.f32 %v11706_v23, %v1276_v30  ;;  %17521 = vst [vmem:[#allocation40_spill] sm:$0xff] %v12206_v1 }
 0x154   : > { %17523 = vst [vmem:[#allocation42_spill] sm:$0xff] %v12220_v22  ;;  %v1407_v28 = vsub.f32 %v12204_v58, %v12220_v22  ;;  %1348 = vmatpush.msra.mxu0 %v12227_v61  ;;  %1544 = vmatpush.msra.mxu3 %v12227_v61  ;;  %v12293_v24 = vand.u32 4294901760, %v12265_v47  ;;  %v12320_v7 = vsub.f32 %v369_v59, %v12298_v18 }
 0x155   : > { %v1281_v38 = vsel %vm1280_vm14, %v11706_v23, %v1277_v33  ;;  %v12223_v23 = vsub.f32 %v376_v63, %v12206_v1  ;;  %17525 = vst [vmem:[#allocation44_spill] sm:$0xff] %v12227_v61  ;;  %v613_v33 = vadd.f32 %v12080_v62, %v580_v4  ;;  %v12283_v4 = vand.u32 4294901760, %v370_v50 }
 0x156   : > { %v1286_v41 = vsel %vm1283_vm15, %v1285_v36, %v1281_v38  ;;  %17526 = vst [vmem:[#allocation45_spill] sm:$0xff] %v12234_v27  ;;  %v12246_v36 = vsub.f32 %v375_v17, %v12227_v61  ;;  %v373_v38 = vld [vmem:[%s16816_s3 + $0x30] sm:$0xff]  ;;  %v12260_v62 = vand.u32 4294901760, %v1407_v28  ;;  %1350 = vmatpush.msra.mxu0 %v12241_v21  ;;  %v368_v17 = vld [vmem:[%s16816_s3 + $0x8] sm:$0xff]  ;;  %1546 = vmatpush.msra.mxu3 %v12241_v21  ;;  %v12355_v29 = vand.u32 4294901760, %v12320_v7 }
 0x157   : > { %v1288_v43 = vmul.f32 %v1286_v41, %v12097_v13  ;;  %v12174_v13 = vsub.f32 %v379_v32, %v12168_v49  ;;  %17524 = vst [vmem:[#allocation43_spill] sm:$0xff] %v12223_v23  ;;  %v12239_v30 = vand.u32 4294901760, %v12223_v23  ;;  %v372_v41 = vld [vmem:[%s16816_s3 + $0x28] sm:$0xff]  ;;  %v12267_v32 = vand.u32 4294901760, %v373_v38 }
 0x158   : > { %17528 = vst [vmem:[#allocation47_spill] sm:$0xff] %v12241_v21  ;;  %v12276_v60 = vand.u32 4294901760, %v12246_v36  ;;  %v12278_v63 = vand.u32 4294901760, %v372_v41 }
 0x159   : > { %1298 = vrot.lane.b32.xlu1 %v1288_v43, %s11820_s27  ;;  %17514 = vst [vmem:[#allocation33_spill] sm:$0xff] %v12174_v13  ;;  %v12185_v2 = vand.u32 4294901760, %v12174_v13  ;;  %1486 = vmatpush.msra.mxu2 %v12174_v13  ;;  %v371_v43 = vld [vmem:[%s16816_s3 + $0x20] sm:$0xff]  ;;  %v1413_v44 = vsub.f32 %v12223_v23, %v12239_v30  ;;  %v12296_v28 = vsub.f32 %v373_v38, %v12267_v32 }
 0x15a   : > { %17527 = vst [vmem:[#allocation46_spill] sm:$0xff] %v12239_v30  ;;  %v1419_v16 = vsub.f32 %v12246_v36, %v12276_v60  ;;  %v12304_v15 = vsub.f32 %v372_v41, %v12278_v63  ;;  %1352 = vmatpush.msra.mxu0 %v12267_v32  ;;  %v1425_v38 = vsub.f32 %v12265_v47, %v12293_v24  ;;  %v12322_v41 = vand.u32 4294901760, %v368_v17 }
 0x15b   : > { %17516 = vst [vmem:[#allocation35_spill] sm:$0xff] %v12185_v2  ;;  %v1395_v56 = vsub.f32 %v12174_v13, %v12185_v2  ;;  %1489 = vmatpush.msra.mxu2 %v12188_v52  ;;  %v12290_v20 = vand.u32 4294901760, %v1413_v44  ;;  %v12310_v44 = vsub.f32 %v370_v50, %v12283_v4  ;;  %v12317_v8 = vand.u32 4294901760, %v12296_v28  ;;  %1548 = vmatpush.msra.mxu3 %v12267_v32 }
 0x15c   : > { %17529 = vst [vmem:[#allocation48_spill] sm:$0xff] %v12246_v36  ;;  %v12328_v50 = vand.u32 4294901760, %v1419_v16  ;;  %v12331_v12 = vand.u32 4294901760, %v12304_v15  ;;  %1354 = vmatpush.msra.mxu0 %v12278_v63  ;;  %v12341_v59 = vand.u32 4294901760, %v1425_v38  ;;  %v12346_v16 = vsub.f32 %v368_v17, %v12322_v41 }
 0x15d   : > { %v12215_v19 = vand.u32 4294901760, %v1395_v56  ;;  %1492 = vmatpush.msra.mxu2 %v12204_v58  ;;  %17530 = vst [vmem:[#allocation49_spill] sm:$0xff] %v12260_v62  ;;  %v12280_v56 = vand.u32 4294901760, %v371_v43  ;;  %v12337_v11 = vand.u32 4294901760, %v12310_v44  ;;  %v1431_v31 = vsub.f32 %v12296_v28, %v12317_v8  ;;  %1550 = vmatpush.msra.mxu3 %v12278_v63 }
 0x15e   : > { %17531 = vst [vmem:[#allocation50_spill] sm:$0xff] %v12265_v47  ;;  %v1437_v10 = vsub.f32 %v12304_v15, %v12331_v12  ;;  %v12361_v17 = vadd.f32 %v12084_v0, %v613_v33 }
 0x15f   : > { %17522 = vst [vmem:[#allocation41_spill] sm:$0xff] %v12215_v19  ;;  %1397 = vmatpush.msra.mxu1 %v12215_v19  ;;  %1495 = vmatpush.msra.mxu2 %v12223_v23  ;;  %v12307_v14 = vsub.f32 %v371_v43, %v12280_v56  ;;  %v367_v43 = vld [vmem:[%s16816_s3] sm:$0xff]  ;;  %v12363_v9 = vand.u32 4294901760, %v1431_v31  ;;  %v1449_v25 = vsub.f32 %v12310_v44, %v12337_v11 }
 0x160   : > { %17532 = vst [vmem:[#allocation51_spill] sm:$0xff] %v12267_v32  ;;  %1356 = vmatpush.msra.mxu0 %v12280_v56  ;;  %v12358_v38 = vand.u32 4294901760, %v367_v43  ;;  %v12368_v26 = vand.u32 4294901760, %v1437_v10  ;;  %1552 = vmatpush.msra.mxu3 %v12280_v56  ;;  %v1455_v10 = vsub.f32 %v12320_v7, %v12355_v29  ;;  %v11542_v33 = vadd.f32 -1.0, %v12361_v17 }
 0x161   : > { %1403 = vmatpush.msra.mxu1 %v12234_v27  ;;  %17533 = vst [vmem:[#allocation52_spill] sm:$0xff] %v12276_v60  ;;  %1498 = vmatpush.msra.mxu2 %v12246_v36  ;;  %v12334_v6 = vand.u32 4294901760, %v12307_v14 }
 0x162   : > { %17534 = vst [vmem:[#allocation53_spill] sm:$0xff] %v12278_v63  ;;  %1358 = vmatpush.msra.mxu0 %v12283_v4  ;;  %1554 = vmatpush.msra.mxu3 %v12283_v4 }
 0x163   : > { %17535 = vst [vmem:[#allocation54_spill] sm:$0xff] %v12280_v56  ;;  %1409 = vmatpush.msra.mxu1 %v12260_v62  ;;  %1501 = vmatpush.msra.mxu2 %v12265_v47  ;;  %v1443_v5 = vsub.f32 %v12307_v14, %v12334_v6 }
 0x164   : > { %17536 = vst [vmem:[#allocation55_spill] sm:$0xff] %v12283_v4  ;;  %1360 = vmatpush.msra.mxu0 %v12298_v18  ;;  %1556 = vmatpush.msra.mxu3 %v12298_v18 }
 0x165   : > { %17537 = vst [vmem:[#allocation56_spill] sm:$0xff] %v12290_v20  ;;  %1415 = vmatpush.msra.mxu1 %v12290_v20  ;;  %1504 = vmatpush.msra.mxu2 %v12296_v28  ;;  %v12376_v20 = vsub.f32 %v367_v43, %v12358_v38  ;;  %v12382_v31 = vand.u32 4294901760, %v1443_v5  ;;  %v12394_v43 = vand.u32 4294901760, %v1449_v25  ;;  %v11543_v25 = vmul.f32 -1.442695, %v11542_v33 }
 0x166   : > { %17538 = vst [vmem:[#allocation57_spill] sm:$0xff] %v12293_v24  ;;  %1362 = vmatpush.msra.mxu0 %v12322_v41  ;;  %1558 = vmatpush.msra.mxu3 %v12322_v41 }
 0x167   : > { %17539 = vst [vmem:[#allocation58_spill] sm:$0xff] %v12296_v28  ;;  %1421 = vmatpush.msra.mxu1 %v12328_v50  ;;  %1507 = vmatpush.msra.mxu2 %v12304_v15  ;;  %v12387_v0 = vand.u32 4294901760, %v12376_v20  ;;  %11707 = vpow2.f32 %v11543_v25 }
 0x168   : > { %17540 = vst [vmem:[#allocation59_spill] sm:$0xff] %v12298_v18  ;;  %1364 = vmatpush.msra.mxu0 %v12358_v38  ;;  %1560 = vmatpush.msra.mxu3 %v12358_v38 }
 0x169   : > { %17541 = vst [vmem:[#allocation60_spill] sm:$0xff] %v12304_v15  ;;  %1427 = vmatpush.msra.mxu1 %v12341_v59  ;;  %1510 = vmatpush.msra.mxu2 %v12307_v14 }
 0x16a   : > { %17542 = vst [vmem:[#allocation61_spill] sm:$0xff] %v12307_v14  ;;  %1571 = vmatpush.msrb.mxu0 %v12127_v45 }
 0x16b   : > { %17543 = vst [vmem:[#allocation62_spill] sm:$0xff] %v12310_v44  ;;  %1433 = vmatpush.msra.mxu1 %v12363_v9  ;;  %1513 = vmatpush.msra.mxu2 %v12310_v44 }
 0x16c   : > { %17544 = vst [vmem:[#allocation63_spill] sm:$0xff] %v12317_v8  ;;  %1575 = vmatpush.msrb.mxu0 %v12130_v46 }
 0x16d   : > { %17545 = vst [vmem:[#allocation64_spill] sm:$0xff] %v12320_v7  ;;  %1439 = vmatpush.msra.mxu1 %v12368_v26  ;;  %1516 = vmatpush.msra.mxu2 %v12320_v7  ;;  %v11708_v33 = vpop.eup %11707 }
 0x16e   : > { %17546 = vst [vmem:[#allocation65_spill] sm:$0xff] %v12322_v41  ;;  %1579 = vmatpush.msrb.mxu0 %v12135_v48 }
 0x16f   : > { %17547 = vst [vmem:[#allocation66_spill] sm:$0xff] %v12328_v50  ;;  %v12373_v50 = vand.u32 4294901760, %v12346_v16  ;;  %1445 = vmatpush.msra.mxu1 %v12382_v31  ;;  %1519 = vmatpush.msra.mxu2 %v12346_v16 }
 0x170   : > { %17548 = vst [vmem:[#allocation67_spill] sm:$0xff] %v12331_v12  ;;  %1583 = vmatpush.msrb.mxu0 %v12185_v2 }
 0x171   : > { %17549 = vst [vmem:[#allocation68_spill] sm:$0xff] %v12334_v6  ;;  %v1461_v5 = vsub.f32 %v12346_v16, %v12373_v50  ;;  %1451 = vmatpush.msra.mxu1 %v12394_v43  ;;  %1522 = vmatpush.msra.mxu2 %v12376_v20 }
 0x172   : > { %17550 = vst [vmem:[#allocation69_spill] sm:$0xff] %v12337_v11  ;;  %1587 = vmatpush.msrb.mxu0 %v12201_v57 }
 0x173   : > { %17551 = vst [vmem:[#allocation70_spill] sm:$0xff] %v12341_v59  ;;  %v1467_v59 = vsub.f32 %v12376_v20, %v12387_v0 }
 0x174   : > { %17552 = vst [vmem:[#allocation71_spill] sm:$0xff] %v12346_v16  ;;  %1591 = vmatpush.msrb.mxu0 %v12220_v22 }
 0x175   : > { %17553 = vst [vmem:[#allocation72_spill] sm:$0xff] %v12355_v29 }
 0x176   : > { %17554 = vst [vmem:[#allocation73_spill] sm:$0xff] %v12358_v38  ;;  %1595 = vmatpush.msrb.mxu0 %v12239_v30 }
 0x177   : > { %17555 = vst [vmem:[#allocation74_spill] sm:$0xff] %v12363_v9  ;;  %v12402_v9 = vand.u32 4294901760, %v1455_v10  ;;  %v12416_v10 = vand.u32 4294901760, %v1467_v59  ;;  %v12429_v59 = vadd.f32 1.0, %v11708_v33 }
 0x178   : > { %17556 = vst [vmem:[#allocation75_spill] sm:$0xff] %v12368_v26  ;;  %v12410_v26 = vand.u32 4294901760, %v1461_v5  ;;  %1599 = vmatpush.msrb.mxu0 %v12276_v60  ;;  %v387_v5 = vld [vmem:[%s16816_s3 + $0xa0] sm:$0xff]  ;;  %v385_v60 = vld [vmem:[%s16816_s3 + $0x90] sm:$0xff] }
 0x179   : > { %17557 = vst [vmem:[#allocation76_spill] sm:$0xff] %v12373_v50  ;;  %1457 = vmatpush.msra.mxu1 %v12402_v9  ;;  %11709 = vrcp.f32 %v12429_v59  ;;  %v12444_v25 = vand.u32 4294901760, %v387_v5  ;;  %v12472_v22 = vand.u32 4294901760, %v385_v60  ;;  %vm650_vm4 = vweird.f32 %v12429_v59 }
 0x17a   : > { %17558 = vst [vmem:[#allocation77_spill] sm:$0xff] %v12376_v20  ;;  %1603 = vmatpush.msrb.mxu0 %v12293_v24 }
 0x17b   : > { %17559 = vst [vmem:[#allocation78_spill] sm:$0xff] %v12382_v31  ;;  %1463 = vmatpush.msra.mxu1 %v12410_v26  ;;  %1686 = vmatpush.msrb.mxu2 %v12444_v25 }
 0x17c   : > { %17560 = vst [vmem:[#allocation79_spill] sm:$0xff] %v12387_v0  ;;  %1607 = vmatpush.msrb.mxu0 %v12317_v8  ;;  %v386_v8 = vld [vmem:[%s16816_s3 + $0x98] sm:$0xff] }
 0x17d   : > { %17561 = vst [vmem:[#allocation80_spill] sm:$0xff] %v12394_v43  ;;  %1469 = vmatpush.msra.mxu1 %v12416_v10  ;;  %v12456_v24 = vand.u32 4294901760, %v386_v8 }
 0x17e   : > { %17562 = vst [vmem:[#allocation81_spill] sm:$0xff] %v12402_v9  ;;  %1611 = vmatpush.msrb.mxu0 %v12331_v12  ;;  %v12454_v12 = vsub.f32 %v387_v5, %v12444_v25 }
 0x17f   : > { %17563 = vst [vmem:[#allocation82_spill] sm:$0xff] %v12410_v26  ;;  %1638 = vmatpush.msrb.mxu1 %v12109_v34  ;;  %v12447_v33 = vpop.eup %11709  ;;  %v12470_v5 = vsub.f32 %v386_v8, %v12456_v24  ;;  %1688 = vmatpush.msrb.mxu2 %v12456_v24  ;;  %v12486_v8 = vsub.f32 %v385_v60, %v12472_v22 }
 0x180   : > { %17564 = vst [vmem:[#allocation83_spill] sm:$0xff] %v12416_v10  ;;  %1615 = vmatpush.msrb.mxu0 %v12334_v6  ;;  %v646_v6 = vmul.f32 %v12447_v33, %v12429_v59  ;;  %v12467_v30 = vand.u32 4294901760, %v12454_v12  ;;  %vm651_vm5 = vweird.f32 %v12447_v33 }
 0x181   : > { %1640 = vmatpush.msrb.mxu1 %v12111_v35  ;;  %17565 = vst [vmem:[#allocation84_spill] sm:$0xff] %v12444_v25  ;;  %v12483_v2 = vand.u32 4294901760, %v12470_v5  ;;  %1690 = vmatpush.msrb.mxu2 %v12472_v22  ;;  %v12502_v60 = vand.u32 4294901760, %v12486_v8  ;;  %vm652_vm6 = vmor %vm650_vm4, %vm651_vm5 }
 0x182   : > { %17566 = vst [vmem:[#allocation85_spill] sm:$0xff] %v12454_v12  ;;  %1619 = vmatpush.msrb.mxu0 %v12337_v11  ;;  %v384_v11 = vld [vmem:[%s16816_s3 + $0x88] sm:$0xff]  ;;  %v1718_v57 = vsub.f32 %v12454_v12, %v12467_v30  ;;  %v647_v46 = vsub.f32 1.0, %v646_v6 }
 0x183   : > { %1642 = vmatpush.msrb.mxu1 %v12113_v37  ;;  %17567 = vst [vmem:[#allocation86_spill] sm:$0xff] %v12456_v24  ;;  %v12488_v48 = vand.u32 4294901760, %v384_v11  ;;  %v1724_v10 = vsub.f32 %v12470_v5, %v12483_v2 }
 0x184   : > { %17568 = vst [vmem:[#allocation87_spill] sm:$0xff] %v12467_v30  ;;  %1623 = vmatpush.msrb.mxu0 %v12355_v29  ;;  %v383_v29 = vld [vmem:[%s16816_s3 + $0x80] sm:$0xff]  ;;  %v12496_v45 = vand.u32 4294901760, %v1718_v57  ;;  %v1730_v57 = vsub.f32 %v12486_v8, %v12502_v60 }
 0x185   : > { %1644 = vmatpush.msrb.mxu1 %v12168_v49  ;;  %17569 = vst [vmem:[#allocation88_spill] sm:$0xff] %v12470_v5  ;;  %v12507_v26 = vand.u32 4294901760, %v383_v29  ;;  %1692 = vmatpush.msrb.mxu2 %v12488_v48  ;;  %v12512_v6 = vand.u32 4294901760, %v1724_v10 }
 0x186   : > { %17570 = vst [vmem:[#allocation89_spill] sm:$0xff] %v12472_v22  ;;  %1627 = vmatpush.msrb.mxu0 %v12373_v50  ;;  %v12505_v50 = vsub.f32 %v384_v11, %v12488_v48  ;;  %1720 = vmatpush.msrb.mxu3 %v12496_v45  ;;  %v648_v11 = vmul.f32 %v12447_v33, %v647_v46  ;;  %v12526_v43 = vand.u32 4294901760, %v1730_v57 }
 0x187   : > { %1646 = vmatpush.msrb.mxu1 %v12176_v51  ;;  %17571 = vst [vmem:[#allocation90_spill] sm:$0xff] %v12483_v2  ;;  %v12520_v9 = vsub.f32 %v383_v29, %v12507_v26  ;;  %1694 = vmatpush.msrb.mxu2 %v12507_v26  ;;  %v656_v29 = vand.u32 2147483648, %v12429_v59 }
 0x188   : > { %17572 = vst [vmem:[#allocation91_spill] sm:$0xff] %v12486_v8  ;;  %1631 = vmatpush.msrb.mxu0 %v12387_v0  ;;  %v12517_v0 = vand.u32 4294901760, %v12505_v50  ;;  %1726 = vmatpush.msrb.mxu3 %v12512_v6 }
 0x189   : > { %1648 = vmatpush.msrb.mxu1 %v12190_v53  ;;  %17573 = vst [vmem:[#allocation92_spill] sm:$0xff] %v12488_v48  ;;  %v12531_v31 = vand.u32 4294901760, %v12520_v9  ;;  %v657_v16 = vor.u32 1.1754944e-38, %v656_v29 }
 0x18a   : > { %17574 = vst [vmem:[#allocation93_spill] sm:$0xff] %v12496_v45  ;;  %v1736_v10 = vsub.f32 %v12505_v50, %v12517_v0  ;;  %1732 = vmatpush.msrb.mxu3 %v12526_v43  ;;  %v654_v45 = vand.u32 2147483647, %v12429_v59 }
 0x18b   : > { %1650 = vmatpush.msrb.mxu1 %v12206_v1  ;;  %17575 = vst [vmem:[#allocation94_spill] sm:$0xff] %v12502_v60  ;;  %v1742_v57 = vsub.f32 %v12520_v9, %v12531_v31 }
 0x18c   : > { %17576 = vst [vmem:[#allocation95_spill] sm:$0xff] %v12505_v50  ;;  %v12538_v46 = vand.u32 4294901760, %v1736_v10  ;;  %vm655_vm7 = vcmp.eq.f32.partialorder %v654_v45, 8.507059e+37 }
 0x18d   : > { %1652 = vmatpush.msrb.mxu1 %v12227_v61  ;;  %17577 = vst [vmem:[#allocation96_spill] sm:$0xff] %v12507_v26  ;;  %v12546_v20 = vand.u32 4294901760, %v1742_v57 }
 0x18e   : > { %17578 = vst [vmem:[#allocation97_spill] sm:$0xff] %v12512_v6  ;;  %v649_v6 = vadd.f32 %v12447_v33, %v648_v11  ;;  %1738 = vmatpush.msrb.mxu3 %v12538_v46 }
 0x18f   : > { %1654 = vmatpush.msrb.mxu1 %v12241_v21  ;;  %17579 = vst [vmem:[#allocation98_spill] sm:$0xff] %v12517_v0 }
 0x190   : > { %17580 = vst [vmem:[#allocation99_spill] sm:$0xff] %v12520_v9  ;;  %1744 = vmatpush.msrb.mxu3 %v12546_v20  ;;  %v653_v10 = vsel %vm652_vm6, %v12447_v33, %v649_v6 }
 0x191   : > { %1656 = vmatpush.msrb.mxu1 %v12267_v32  ;;  %17581 = vst [vmem:[#allocation100_spill] sm:$0xff] %v12526_v43  ;;  %v658_v43 = vsel %vm655_vm7, %v657_v16, %v653_v10 }
 0x192   : > { %17582 = vst [vmem:[#allocation101_spill] sm:$0xff] %v12531_v31  ;;  %v660_v11 = vmul.f32 %v658_v43, %v12361_v17 }
 0x193   : > { %1658 = vmatpush.msrb.mxu1 %v12278_v63  ;;  %17583 = vst [vmem:[#allocation102_spill] sm:$0xff] %v12538_v46 }
 0x194   : > { %17584 = vst [vmem:[#allocation103_spill] sm:$0xff] %v12546_v20 }
 0x195   : > { %1660 = vmatpush.msrb.mxu1 %v12280_v56 }
 0x197   : > { %1662 = vmatpush.msrb.mxu1 %v12283_v4 }
 0x199   : > { %1664 = vmatpush.msrb.mxu1 %v12298_v18 }
 0x19b   : > { %1666 = vmatpush.msrb.mxu1 %v12322_v41  ;;  %v1291_v41 = vpop.permute.xlu2 %1290 }
 0x19c   : > { %v1302_v59 = vsel %vm1301_vm8, %v660_v11, %v1291_v41 }
 0x19d   : > { %1668 = vmatpush.msrb.mxu1 %v12358_v38 }
 0x1bf   : > { %v1295_v38 = vpop.permute.xlu0 %1294 }
 0x1c0   : > { %v1304_v7 = vsel %vm1303_vm9, %v1302_v59, %v1295_v38 }
 0x1c1   : > { %1307 = vst [vmem:[#allocation2] sm:$0x1f] %v1304_v7 }
 0x1c8   : > { %v1310_v57 = vld [vmem:[#allocation2] sm:$0xf] }
 0x1c9   : > { %v1312_v46 = vld [vmem:[#allocation2] sm:$0x1e]  ;;  %1315 = vrot.lane.b32.xlu2 %v1310_v57, %s16979_s20  ;;  %v1365_v29 = vand.u32 4294901760, %v1310_v57 }
 0x1ca   : > { %v1323_v33 = vrot.slane %v1312_v46, 1 }
 0x1cb   : > { %1471 = vmatmul.f32.vlgmr.msra.gmra.mxu1 %v1365_v29  ;;  %v1299_v45 = vpop.permute.xlu1 %1298  ;;  %v1366_v16 = vsub.f32 %v1310_v57, %v1365_v29 }
 0x1cc   : > { %1324 = vrot.lane.b32.xlu1 %v1323_v33, %s11819_s26  ;;  %v1306_v41 = vsel %vm1305_vm10, %v1295_v38, %v1299_v45  ;;  %2092 = vmatpush.msra.mxu1 %v12109_v34  ;;  %v17586_v33 = vld [vmem:[#allocation66_spill] sm:$0xff]  ;;  %v17587_v45 = vld [vmem:[#allocation64_spill] sm:$0xff] }
 0x1cd   : > { %1309 = vst.msk [vmem:[#allocation2 + $0x8] sm:$0x1f] %vm1308_vm11, %v1306_v41  ;;  %1525 = vmatmul.f32.vlgmr.msra.gmra.mxu2 %v1366_v16  ;;  %v1367_v7 = vand.u32 4294901760, %v1366_v16  ;;  %v17589_v41 = vld [vmem:[#allocation70_spill] sm:$0xff] }
 0x1ce   : > { %1763 = vmatpush.msra.mxu2 %v12454_v12  ;;  %2094 = vmatpush.msra.mxu1 %v12111_v35 }
 0x1cf   : > { %1564 = vmatmul.f32.vlgmr.msra.gmra.mxu3 %v1367_v7  ;;  %v1368_v17 = vsub.f32 %v1366_v16, %v1367_v7  ;;  %v17588_v16 = vld [vmem:[#allocation65_spill] sm:$0xff]  ;;  %v17590_v7 = vld [vmem:[#allocation71_spill] sm:$0xff] }
 0x1d0   : > { %1794 = vmatpush.msra.mxu3 %v12444_v25  ;;  %1766 = vmatpush.msra.mxu2 %v12470_v5 }
 0x1d1   : > { %v1369_v43 = vand.u32 4294901760, %v1368_v17  ;;  %2096 = vmatpush.msra.mxu1 %v12113_v37  ;;  %v17591_v17 = vld [vmem:[#allocation73_spill] sm:$0xff] }
 0x1d2   : > { %1796 = vmatpush.msra.mxu3 %v12456_v24  ;;  %1769 = vmatpush.msra.mxu2 %v12486_v8 }
 0x1d3   : > { %1370 = vmatmul.f32.vlgmr.msra.gmra.mxu0 %v1369_v43  ;;  %1670 = vmatmul.f32.vlgmr.msrb.gmra.mxu1 %v1365_v29  ;;  %v17592_v43 = vld [vmem:[#allocation74_spill] sm:$0xff] }
 0x1d4   : > { %v1311_v38 = vld [vmem:[#allocation2 + $0x8] sm:$0xf]  ;;  %1798 = vmatpush.msra.mxu3 %v12472_v22  ;;  %1772 = vmatpush.msra.mxu2 %v12505_v50 }
 0x1d5   : > { %1317 = vrot.lane.b32.xlu0 %v1311_v38, %s16979_s20  ;;  %v1331_v6 = vsel %vm1305_vm10, %v1311_v38, 0  ;;  %2039 = vmatpush.msra.mxu0 %v12116_v39  ;;  %v17593_v38 = vld [vmem:[#allocation77_spill] sm:$0xff] }
 0x1d6   : > { %v1695_v46 = vand.u32 4294901760, %v1331_v6  ;;  %1800 = vmatpush.msra.mxu3 %v12488_v48  ;;  %1775 = vmatpush.msra.mxu2 %v12520_v9 }
 0x1d7   : > { %2042 = vmatpush.msra.mxu0 %v12119_v40  ;;  %2098 = vmatpush.msra.mxu1 %v12168_v49 }
 0x1d8   : > { %1746 = vmatmul.f32.vlgmr.msrb.gmra.mxu3 %v1695_v46  ;;  %v1696_v10 = vsub.f32 %v1331_v6, %v1695_v46  ;;  %v17594_v6 = vld [vmem:[#allocation93_spill] sm:$0xff] }
 0x1d9   : > { %1802 = vmatpush.msra.mxu3 %v12507_v26  ;;  %2045 = vmatpush.msra.mxu0 %v12124_v42 }
 0x1da   : > { %v1697_v11 = vand.u32 4294901760, %v1696_v10  ;;  %2100 = vmatpush.msra.mxu1 %v12176_v51 }
 0x1db   : > { %1858 = vmatpush.msrb.mxu3 %v12444_v25  ;;  %1633 = vmatmul.f32.vlgmr.msrb.gmra.mxu0 %v1365_v29  ;;  %v17585_v29 = vld [vmem:[#allocation56_spill] sm:$0xff] }
 0x1dc   : > { %v1698_v59 = vsub.f32 %v1696_v10, %v1697_v11  ;;  %2048 = vmatpush.msra.mxu0 %v12174_v13  ;;  %2102 = vmatpush.msra.mxu1 %v12190_v53 }
 0x1dd   : > { %1860 = vmatpush.msrb.mxu3 %v12456_v24 }
 0x1de   : > { %v1699_v57 = vand.u32 4294901760, %v1698_v59  ;;  %2051 = vmatpush.msra.mxu0 %v12188_v52  ;;  %2104 = vmatpush.msra.mxu1 %v12206_v1  ;;  %v17598_v59 = vld [vmem:[#allocation100_spill] sm:$0xff] }
 0x1df   : > { %1862 = vmatpush.msrb.mxu3 %v12472_v22 }
 0x1e0   : > { %1700 = vmatmul.f32.vlgmr.msrb.gmra.mxu2 %v1699_v57  ;;  %1806 = vmatmul.f32.vlgmr.msra.gmra.mxu3 %v1697_v11  ;;  %v17597_v11 = vld [vmem:[#allocation78_spill] sm:$0xff]  ;;  %v17599_v57 = vld [vmem:[#allocation80_spill] sm:$0xff] }
 0x1e1   : > { %1864 = vmatpush.msrb.mxu3 %v12488_v48  ;;  %1824 = vmatpush.msrb.mxu2 %v12467_v30 }
 0x1e2   : > { %2054 = vmatpush.msra.mxu0 %v12204_v58  ;;  %2106 = vmatpush.msra.mxu1 %v12227_v61 }
 0x1e3   : > { %1866 = vmatpush.msrb.mxu3 %v12507_v26  ;;  %1828 = vmatpush.msrb.mxu2 %v12483_v2 }
 0x1e4   : > { %2057 = vmatpush.msra.mxu0 %v12223_v23  ;;  %2108 = vmatpush.msra.mxu1 %v12241_v21  ;;  %v394_v23 = vld [vmem:[%s16818_s5 + $0x28] sm:$0xff] }
 0x1e5   : > { %1941 = vmatpush.msra.mxu3 %v12148_v54  ;;  %1832 = vmatpush.msrb.mxu2 %v12502_v60 }
 0x1e6   : > { %2060 = vmatpush.msra.mxu0 %v12246_v36  ;;  %2110 = vmatpush.msra.mxu1 %v12267_v32  ;;  %v396_v36 = vld [vmem:[%s16818_s5 + $0x38] sm:$0xff] }
 0x1e7   : > { %1947 = vmatpush.msra.mxu3 %v12150_v55  ;;  %1836 = vmatpush.msrb.mxu2 %v12517_v0 }
 0x1e8   : > { %1778 = vmatmul.f32.vlgmr.msra.gmra.mxu2 %v1696_v10  ;;  %1868 = vmatmul.f32.vlgmr.msrb.gmra.mxu3 %v1695_v46  ;;  %v17596_v10 = vld [vmem:[#allocation97_spill] sm:$0xff] }
 0x1e9   : > { %1840 = vmatpush.msrb.mxu2 %v12531_v31  ;;  %1953 = vmatpush.msra.mxu3 %v12154_v3 }
 0x1ea   : > { %2063 = vmatpush.msra.mxu0 %v12265_v47  ;;  %2112 = vmatpush.msra.mxu1 %v12278_v63 }
 0x1eb   : > { %1896 = vmatpush.msra.mxu2 %v12109_v34  ;;  %1959 = vmatpush.msra.mxu3 %v12215_v19 }
 0x1ec   : > { %2066 = vmatpush.msra.mxu0 %v12296_v28  ;;  %2114 = vmatpush.msra.mxu1 %v12280_v56 }
 0x1ed   : > { %1898 = vmatpush.msra.mxu2 %v12111_v35  ;;  %1965 = vmatpush.msra.mxu3 %v12234_v27 }
 0x1ee   : > { %2069 = vmatpush.msra.mxu0 %v12304_v15  ;;  %2116 = vmatpush.msra.mxu1 %v12283_v4 }
 0x1ef   : > { %1900 = vmatpush.msra.mxu2 %v12113_v37  ;;  %1971 = vmatpush.msra.mxu3 %v12260_v62 }
 0x1f0   : > { %1842 = vmatmul.f32.vlgmr.msrb.gmra.mxu2 %v1695_v46  ;;  %2072 = vmatpush.msra.mxu0 %v12307_v14  ;;  %v17595_v46 = vld [vmem:[#allocation75_spill] sm:$0xff] }
 0x1f1   : > { %1977 = vmatpush.msra.mxu3 %v17585_v29  ;;  %1902 = vmatpush.msra.mxu2 %v12168_v49 }
 0x1f2   : > { %2075 = vmatpush.msra.mxu0 %v12310_v44  ;;  %2118 = vmatpush.msra.mxu1 %v12298_v18  ;;  %v17618_v44 = vld [vmem:[#allocation76_spill] sm:$0xff] }
 0x1f3   : > { %1983 = vmatpush.msra.mxu3 %v17586_v33  ;;  %1904 = vmatpush.msra.mxu2 %v12176_v51  ;;  %v393_v33 = vld [vmem:[%s16818_s5 + $0x20] sm:$0xff] }
 0x1f4   : > { %2078 = vmatpush.msra.mxu0 %v17587_v45  ;;  %2120 = vmatpush.msra.mxu1 %v17588_v16  ;;  %v17608_v45 = vld [vmem:[#allocation38_spill] sm:$0xff]  ;;  %v12890_v62 = vand.u32 4294901760, %v393_v33 }
 0x1f5   : > { %1989 = vmatpush.msra.mxu3 %v17589_v41  ;;  %1906 = vmatpush.msra.mxu2 %v12190_v53 }
 0x1f6   : > { %2081 = vmatpush.msra.mxu0 %v17590_v7  ;;  %2122 = vmatpush.msra.mxu1 %v17591_v17  ;;  %v17606_v7 = vld [vmem:[#allocation28_spill] sm:$0xff]  ;;  %17652 = vst [vmem:[#allocation136_spill] sm:$0xff] %v12890_v62 }
 0x1f7   : > { %1995 = vmatpush.msra.mxu3 %v17592_v43  ;;  %1908 = vmatpush.msra.mxu2 %v12206_v1 }
 0x1f8   : > { %2084 = vmatpush.msra.mxu0 %v17593_v38  ;;  %2282 = vmatpush.msrb.mxu1 %v17594_v6  ;;  %v17600_v6 = vld [vmem:[#allocation102_spill] sm:$0xff]  ;;  %v17601_v38 = vld [vmem:[#allocation81_spill] sm:$0xff] }
 0x1f9   : > { %2001 = vmatpush.msra.mxu3 %v17595_v46  ;;  %1910 = vmatpush.msra.mxu2 %v12227_v61 }
 0x1fa   : > { %2248 = vmatpush.msrb.mxu0 %v12444_v25  ;;  %2288 = vmatpush.msrb.mxu1 %v17596_v10  ;;  %v17602_v10 = vld [vmem:[#allocation82_spill] sm:$0xff] }
 0x1fb   : > { %2007 = vmatpush.msra.mxu3 %v17597_v11  ;;  %1912 = vmatpush.msra.mxu2 %v12241_v21 }
 0x1fc   : > { %2250 = vmatpush.msrb.mxu0 %v12456_v24  ;;  %2294 = vmatpush.msrb.mxu1 %v17598_v59  ;;  %v17603_v59 = vld [vmem:[#allocation83_spill] sm:$0xff] }
 0x1fd   : > { %2013 = vmatpush.msra.mxu3 %v17599_v57  ;;  %1914 = vmatpush.msra.mxu2 %v12267_v32 }
 0x1fe   : > { %2252 = vmatpush.msrb.mxu0 %v12472_v22  ;;  %2300 = vmatpush.msrb.mxu1 %v17600_v6  ;;  %v17605_v6 = vld [vmem:[#allocation27_spill] sm:$0xff] }
 0x1ff   : > { %2019 = vmatpush.msra.mxu3 %v17601_v38  ;;  %1916 = vmatpush.msra.mxu2 %v12278_v63 }
 0x200   : > { %2254 = vmatpush.msrb.mxu0 %v12488_v48  ;;  %2306 = vmatpush.msrb.mxu1 %v12546_v20  ;;  %v17604_v20 = vld [vmem:[#allocation26_spill] sm:$0xff] }
 0x201   : > { %2025 = vmatpush.msra.mxu3 %v17602_v10  ;;  %1918 = vmatpush.msra.mxu2 %v12280_v56  ;;  %v17609_v10 = vld [vmem:[#allocation42_spill] sm:$0xff] }
 0x202   : > { %2256 = vmatpush.msrb.mxu0 %v12507_v26 }
 0x203   : > { %2031 = vmatpush.msra.mxu3 %v17603_v59  ;;  %1920 = vmatpush.msra.mxu2 %v12283_v4  ;;  %v17607_v59 = vld [vmem:[#allocation35_spill] sm:$0xff] }
 0x205   : > { %2200 = vmatpush.msrb.mxu3 %v12109_v34  ;;  %1922 = vmatpush.msra.mxu2 %v12298_v18 }
 0x207   : > { %2202 = vmatpush.msrb.mxu3 %v12111_v35  ;;  %1924 = vmatpush.msra.mxu2 %v17588_v16 }
 0x209   : > { %2204 = vmatpush.msrb.mxu3 %v12113_v37  ;;  %1926 = vmatpush.msra.mxu2 %v17591_v17 }
 0x20b   : > { %2206 = vmatpush.msrb.mxu3 %v12168_v49  ;;  %2133 = vmatpush.msrb.mxu2 %v17604_v20  ;;  %v17610_v20 = vld [vmem:[#allocation46_spill] sm:$0xff] }
 0x20d   : > { %2208 = vmatpush.msrb.mxu3 %v12176_v51  ;;  %2137 = vmatpush.msrb.mxu2 %v17605_v6  ;;  %v17611_v6 = vld [vmem:[#allocation52_spill] sm:$0xff]  ;;  %v12876_v51 = vand.u32 4294901760, %v394_v23 }
 0x20f   : > { %2210 = vmatpush.msrb.mxu3 %v12190_v53  ;;  %2141 = vmatpush.msrb.mxu2 %v17606_v7  ;;  %v17612_v7 = vld [vmem:[#allocation57_spill] sm:$0xff]  ;;  %17650 = vst [vmem:[#allocation134_spill] sm:$0xff] %v12876_v51 }
 0x211   : > { %2212 = vmatpush.msrb.mxu3 %v12206_v1  ;;  %2145 = vmatpush.msrb.mxu2 %v17607_v59  ;;  %v17613_v59 = vld [vmem:[#allocation63_spill] sm:$0xff] }
 0x213   : > { %2214 = vmatpush.msrb.mxu3 %v12227_v61  ;;  %2149 = vmatpush.msrb.mxu2 %v17608_v45  ;;  %v17614_v45 = vld [vmem:[#allocation67_spill] sm:$0xff] }
 0x215   : > { %2216 = vmatpush.msrb.mxu3 %v12241_v21  ;;  %2153 = vmatpush.msrb.mxu2 %v17609_v10  ;;  %v17615_v10 = vld [vmem:[#allocation68_spill] sm:$0xff] }
 0x217   : > { %2218 = vmatpush.msrb.mxu3 %v12267_v32  ;;  %2157 = vmatpush.msrb.mxu2 %v17610_v20  ;;  %v17616_v20 = vld [vmem:[#allocation69_spill] sm:$0xff] }
 0x219   : > { %2220 = vmatpush.msrb.mxu3 %v12278_v63  ;;  %2161 = vmatpush.msrb.mxu2 %v17611_v6  ;;  %v17617_v6 = vld [vmem:[#allocation72_spill] sm:$0xff] }
 0x21b   : > { %2222 = vmatpush.msrb.mxu3 %v12280_v56  ;;  %2165 = vmatpush.msrb.mxu2 %v17612_v7  ;;  %v17619_v7 = vld [vmem:[#allocation79_spill] sm:$0xff] }
 0x21d   : > { %2224 = vmatpush.msrb.mxu3 %v12283_v4  ;;  %2169 = vmatpush.msrb.mxu2 %v17613_v59 }
 0x21f   : > { %2226 = vmatpush.msrb.mxu3 %v12298_v18  ;;  %2173 = vmatpush.msrb.mxu2 %v17614_v45 }
 0x221   : > { %2228 = vmatpush.msrb.mxu3 %v17588_v16  ;;  %2177 = vmatpush.msrb.mxu2 %v17615_v10 }
 0x223   : > { %2230 = vmatpush.msrb.mxu3 %v17591_v17  ;;  %2181 = vmatpush.msrb.mxu2 %v17616_v20  ;;  %v1316_v45 = vpop.permute.xlu2 %1315 }
 0x225   : > { %2185 = vmatpush.msrb.mxu2 %v17617_v6 }
 0x227   : > { %2189 = vmatpush.msrb.mxu2 %v17618_v44 }
 0x229   : > { %2193 = vmatpush.msrb.mxu2 %v17619_v7 }
 0x23e   : > { %v1325_v4 = vpop.permute.xlu1 %1324 }
 0x23f   : > { %v1893_v59 = vsel %vm1305_vm10, %v1325_v4, 0 }
 0x240   : > { %v2257_v18 = vand.u32 4294901760, %v1893_v59 }
 0x242   : > { %v2258_v16 = vsub.f32 %v1893_v59, %v2257_v18 }
 0x244   : > { %v2259_v20 = vand.u32 4294901760, %v2258_v16 }
 0x246   : > { %v2260_v7 = vsub.f32 %v2258_v16, %v2259_v20 }
 0x247   : > { %v1318_v38 = vpop.permute.xlu0 %1317 }
 0x248   : > { %v1320_v10 = vsel %vm1319_vm12, %v1316_v45, %v1318_v38 }
 0x249   : > { %v1327_v17 = vsel %vm1303_vm9, %v1320_v10, %v1325_v4  ;;  %v2261_v4 = vand.u32 4294901760, %v2260_v7  ;;  %v12718_v7 = vpop.f32.mrf.mxu1 }
 0x24a   : > { %v1927_v14 = vand.u32 4294901760, %v1327_v17 }
 0x24c   : > { %v1928_v56 = vsub.f32 %v1327_v17, %v1927_v14  ;;  %2033 = vmatmul.f32.vlgmr.msra.gmra.mxu3 %v1927_v14 }
 0x24e   : > { %2087 = vmatmul.f32.vlgmr.msra.gmra.mxu0 %v1928_v56  ;;  %v1929_v44 = vand.u32 4294901760, %v1928_v56 }
 0x24f   : > { %2325 = vmatpush.msra.mxu0 %v12454_v12 }
 0x250   : > { %2126 = vmatmul.f32.vlgmr.msra.gmra.mxu1 %v1929_v44  ;;  %v1930_v6 = vsub.f32 %v1928_v56, %v1929_v44  ;;  %v12714_v45 = vpop.f32.mrf.mxu0 }
 0x251   : > { %2328 = vmatpush.msra.mxu0 %v12470_v5  ;;  %2356 = vmatpush.msra.mxu1 %v12444_v25 }
 0x252   : > { %v1931_v59 = vand.u32 4294901760, %v1930_v6  ;;  %v12708_v56 = vpop.f32.mrf.mxu3  ;;  %v12726_v6 = vpop.f32.mrf.mxu1 }
 0x253   : > { %2331 = vmatpush.msra.mxu0 %v12486_v8  ;;  %2358 = vmatpush.msra.mxu1 %v12456_v24 }
 0x254   : > { %1932 = vmatmul.f32.vlgmr.msra.gmra.mxu2 %v1931_v59  ;;  %2232 = vmatmul.f32.vlgmr.msrb.gmra.mxu3 %v1927_v14 }
 0x255   : > { %2334 = vmatpush.msra.mxu0 %v12505_v50  ;;  %2360 = vmatpush.msra.mxu1 %v12472_v22 }
 0x256   : > { %2262 = vmatmul.f32.vlgmr.msrb.gmra.mxu0 %v2261_v4 }
 0x257   : > { %2337 = vmatpush.msra.mxu0 %v12520_v9  ;;  %2362 = vmatpush.msra.mxu1 %v12488_v48 }
 0x258   : > { %2308 = vmatmul.f32.vlgmr.msrb.gmra.mxu1 %v2257_v18  ;;  %v12722_v17 = vpop.f32.mrf.mxu0 }
 0x259   : > { %2386 = vmatpush.msrb.mxu0 %v12467_v30  ;;  %2364 = vmatpush.msra.mxu1 %v12507_v26 }
 0x25b   : > { %2390 = vmatpush.msrb.mxu0 %v12483_v2  ;;  %2420 = vmatpush.msrb.mxu1 %v12444_v25  ;;  %v12712_v44 = vpop.f32.mrf.mxu3 }
 0x25c   : > { %2195 = vmatmul.f32.vlgmr.msrb.gmra.mxu2 %v1927_v14  ;;  %v12710_v14 = vpop.f32.mrf.mxu2 }
 0x25d   : > { %2394 = vmatpush.msrb.mxu0 %v12502_v60  ;;  %2422 = vmatpush.msrb.mxu1 %v12456_v24 }
 0x25e   : > { %2340 = vmatmul.f32.vlgmr.msra.gmra.mxu0 %v2258_v16 }
 0x25f   : > { %2398 = vmatpush.msrb.mxu0 %v12517_v0  ;;  %2424 = vmatpush.msrb.mxu1 %v12472_v22 }
 0x260   : > { %2368 = vmatmul.f32.vlgmr.msra.gmra.mxu1 %v2259_v20 }
 0x261   : > { %2402 = vmatpush.msrb.mxu0 %v12531_v31  ;;  %2426 = vmatpush.msrb.mxu1 %v12488_v48  ;;  %v12735_v31 = vld [vmem:[%s16817_s4] ss:$0 sm:$0xff] }
 0x263   : > { %2428 = vmatpush.msrb.mxu1 %v12507_v26  ;;  %v12720_v20 = vpop.f32.mrf.mxu3 }
 0x264   : > { %v12716_v16 = vpop.f32.mrf.mxu2 }
 0x266   : > { %2404 = vmatmul.f32.vlgmr.msrb.gmra.mxu0 %v2257_v18 }
 0x268   : > { %2430 = vmatmul.f32.vlgmr.msrb.gmra.mxu1 %v2257_v18 }
 0x26b   : > { %v12728_v10 = vpop.f32.mrf.mxu3 }
 0x26c   : > { %v12724_v38 = vpop.f32.mrf.mxu2  ;;  %17620 = vst [vmem:[#allocation104_spill] sm:$0xff] %v12728_v10 }
 0x274   : > { %v12730_v59 = vpop.f32.mrf.mxu2 }
 0x2cb   : > { %v2088_v18 = vpop.f32.mrf.mxu0 }
 0x2cd   : > { %v2127_v4 = vpop.f32.mrf.mxu1 }
 0x2cf   : > { %v2034_v0 = vpop.f32.mrf.mxu3 }
 0x2d3   : > { %v2263_v60 = vpop.f32.mrf.mxu0 }
 0x2d5   : > { %v2309_v9 = vpop.f32.mrf.mxu1 }
 0x2d7   : > { %v1933_v2 = vpop.f32.mrf.mxu2  ;;  %v2233_v48 = vpop.f32.mrf.mxu3 }
 0x2d8   : > { %v1934_v30 = vadd.f32 %v12735_v31, %v1933_v2 }
 0x2da   : > { %v2035_v50 = vadd.f32 %v2034_v0, %v1934_v30  ;;  %v404_v30 = vld [vmem:[%s16818_s5 + $0x78] sm:$0xff] }
 0x2db   : > { %v2341_v22 = vpop.f32.mrf.mxu0 }
 0x2dc   : > { %v2089_v8 = vadd.f32 %v2088_v18, %v2035_v50 }
 0x2dd   : > { %v2369_v25 = vpop.f32.mrf.mxu1 }
 0x2de   : > { %v2128_v5 = vadd.f32 %v2127_v4, %v2089_v8 }
 0x2df   : > { %v2196_v12 = vpop.f32.mrf.mxu2 }
 0x2e0   : > { %v2197_v26 = vadd.f32 %v2196_v12, %v2128_v5  ;;  %v403_v12 = vld [vmem:[%s16818_s5 + $0x70] sm:$0xff] }
 0x2e2   : > { %v2234_v24 = vadd.f32 %v2233_v48, %v2197_v26  ;;  %v12752_v26 = vand.u32 4294901760, %v403_v12 }
 0x2e3   : > { %v2405_v28 = vpop.f32.mrf.mxu0 }
 0x2e4   : > { %v2264_v57 = vadd.f32 %v2263_v60, %v2234_v24  ;;  %17622 = vst [vmem:[#allocation106_spill] sm:$0xff] %v12752_v26  ;;  %v12778_v8 = vsub.f32 %v403_v12, %v12752_v26 }
 0x2e5   : > { %v2431_v46 = vpop.f32.mrf.mxu1 }
 0x2e6   : > { %v2310_v15 = vadd.f32 %v2309_v9, %v2264_v57  ;;  %v402_v9 = vld [vmem:[%s16818_s5 + $0x68] sm:$0xff]  ;;  %17628 = vst [vmem:[#allocation112_spill] sm:$0xff] %v12778_v8 }
 0x2e7   : > { %v12754_v48 = vand.u32 4294901760, %v402_v9 }
 0x2e8   : > { %v2342_v63 = vadd.f32 %v2341_v22, %v2310_v15  ;;  %v12750_v15 = vand.u32 4294901760, %v404_v30  ;;  %v401_v22 = vld [vmem:[%s16818_s5 + $0x60] sm:$0xff] }
 0x2e9   : > { %17623 = vst [vmem:[#allocation107_spill] sm:$0xff] %v12754_v48  ;;  %v12781_v60 = vsub.f32 %v402_v9, %v12754_v48 }
 0x2ea   : > { %v2370_v11 = vadd.f32 %v2369_v25, %v2342_v63  ;;  %17621 = vst [vmem:[#allocation105_spill] sm:$0xff] %v12750_v15  ;;  %v399_v63 = vld [vmem:[%s16818_s5 + $0x50] sm:$0xff]  ;;  %v398_v25 = vld [vmem:[%s16818_s5 + $0x48] sm:$0xff]  ;;  %v12775_v5 = vsub.f32 %v404_v30, %v12750_v15  ;;  %2493 = vmatpush.msra.mxu0 %v12750_v15  ;;  %2689 = vmatpush.msra.mxu3 %v12750_v15 }
 0x2eb   : > { %v12769_v0 = vand.u32 4294901760, %v399_v63  ;;  %17629 = vst [vmem:[#allocation113_spill] sm:$0xff] %v12781_v60  ;;  %v12803_v30 = vand.u32 4294901760, %v12781_v60 }
 0x2ec   : > { %v2406_v32 = vadd.f32 %v2405_v28, %v2370_v11  ;;  %v12765_v28 = vand.u32 4294901760, %v401_v22  ;;  %17627 = vst [vmem:[#allocation111_spill] sm:$0xff] %v12775_v5  ;;  %v397_v11 = vld [vmem:[%s16818_s5 + $0x40] sm:$0xff]  ;;  %v12797_v4 = vand.u32 4294901760, %v12775_v5  ;;  %2495 = vmatpush.msra.mxu0 %v12752_v26  ;;  %2636 = vmatpush.msra.mxu2 %v12775_v5 }
 0x2ed   : > { %17626 = vst [vmem:[#allocation110_spill] sm:$0xff] %v12769_v0  ;;  %v12807_v12 = vsub.f32 %v399_v63, %v12769_v0  ;;  %2691 = vmatpush.msra.mxu3 %v12752_v26  ;;  %v2548_v43 = vsub.f32 %v12781_v60, %v12803_v30 }
 0x2ee   : > { %v12738_v47 = vadd.f32 %v2431_v46, %v2406_v32  ;;  %v400_v32 = vld [vmem:[%s16818_s5 + $0x58] sm:$0xff]  ;;  %17624 = vst [vmem:[#allocation108_spill] sm:$0xff] %v12765_v28  ;;  %v12784_v46 = vand.u32 4294901760, %v398_v25  ;;  %v12791_v57 = vsub.f32 %v401_v22, %v12765_v28  ;;  %v2536_v21 = vsub.f32 %v12775_v5, %v12797_v4  ;;  %2497 = vmatpush.msra.mxu0 %v12754_v48  ;;  %v395_v5 = vld [vmem:[%s16818_s5 + $0x30] sm:$0xff] }
 0x2ef   : > { %v12767_v50 = vand.u32 4294901760, %v400_v32  ;;  %17633 = vst [vmem:[#allocation117_spill] sm:$0xff] %v12797_v4  ;;  %2639 = vmatpush.msra.mxu2 %v12778_v8  ;;  %2693 = vmatpush.msra.mxu3 %v12754_v48  ;;  %v12866_v53 = vand.u32 4294901760, %v2548_v43  ;;  %v12871_v29 = vand.u32 4294901760, %v395_v5 }
 0x2f0   : > { %v11552_v2 = vadd.f32 -1.0, %v12738_v47  ;;  %17630 = vst [vmem:[#allocation114_spill] sm:$0xff] %v12784_v46  ;;  %v12811_v9 = vand.u32 4294901760, %v12791_v57  ;;  %v12840_v61 = vand.u32 4294901760, %v2536_v21  ;;  %2499 = vmatpush.msra.mxu0 %v12765_v28 }
 0x2f1   : > { %17625 = vst [vmem:[#allocation109_spill] sm:$0xff] %v12767_v50  ;;  %v12794_v18 = vsub.f32 %v400_v32, %v12767_v50  ;;  %v12817_v32 = vsub.f32 %v398_v25, %v12784_v46  ;;  %2642 = vmatpush.msra.mxu2 %v12781_v60  ;;  %2695 = vmatpush.msra.mxu3 %v12765_v28  ;;  %v12869_v60 = vand.u32 4294901760, %v396_v36 }
 0x2f2   : > { %v11553_v24 = vmul.f32 -1.442695, %v11552_v2  ;;  %17631 = vst [vmem:[#allocation115_spill] sm:$0xff] %v12791_v57  ;;  %v12800_v2 = vand.u32 4294901760, %v12778_v8  ;;  %2538 = vmatpush.msra.mxu1 %v12840_v61  ;;  %2501 = vmatpush.msra.mxu0 %v12767_v50  ;;  %v12898_v49 = vsub.f32 %v395_v5, %v12871_v29 }
 0x2f3   : > { %17632 = vst [vmem:[#allocation116_spill] sm:$0xff] %v12794_v18  ;;  %v12814_v22 = vand.u32 4294901760, %v12794_v18  ;;  %2645 = vmatpush.msra.mxu2 %v12791_v57  ;;  %2697 = vmatpush.msra.mxu3 %v12767_v50 }
 0x2f4   : > { %11711 = vpow2.f32 %v11553_v24  ;;  %17634 = vst [vmem:[#allocation118_spill] sm:$0xff] %v12800_v2  ;;  %v12819_v24 = vand.u32 4294901760, %v397_v11  ;;  %v2542_v63 = vsub.f32 %v12778_v8, %v12800_v2  ;;  %v2554_v8 = vsub.f32 %v12791_v57, %v12811_v9  ;;  %2503 = vmatpush.msra.mxu0 %v12769_v0 }
 0x2f5   : > { %17635 = vst [vmem:[#allocation119_spill] sm:$0xff] %v12803_v30  ;;  %v2560_v21 = vsub.f32 %v12794_v18, %v12814_v22  ;;  %v12895_v57 = vsub.f32 %v396_v36, %v12869_v60  ;;  %2648 = vmatpush.msra.mxu2 %v12794_v18  ;;  %2699 = vmatpush.msra.mxu3 %v12769_v0  ;;  %v390_v18 = vld [vmem:[%s16818_s5 + $0x8] sm:$0xff] }
 0x2f6   : > { %17636 = vst [vmem:[#allocation120_spill] sm:$0xff] %v12807_v12  ;;  %v12831_v25 = vsub.f32 %v397_v11, %v12819_v24  ;;  %v12842_v41 = vand.u32 4294901760, %v2542_v63  ;;  %v12847_v11 = vand.u32 4294901760, %v12807_v12  ;;  %v12857_v63 = vand.u32 4294901760, %v12817_v32  ;;  %2505 = vmatpush.msra.mxu0 %v12784_v46 }
 0x2f7   : > { %17637 = vst [vmem:[#allocation121_spill] sm:$0xff] %v12811_v9  ;;  %v12885_v43 = vand.u32 4294901760, %v2554_v8  ;;  %v391_v8 = vld [vmem:[%s16818_s5 + $0x10] sm:$0xff]  ;;  %v12910_v36 = vsub.f32 %v394_v23, %v12876_v51  ;;  %v12917_v42 = vand.u32 4294901760, %v12895_v57  ;;  %2651 = vmatpush.msra.mxu2 %v12807_v12  ;;  %2701 = vmatpush.msra.mxu3 %v12784_v46 }
 0x2f8   : > { %17638 = vst [vmem:[#allocation122_spill] sm:$0xff] %v12814_v22  ;;  %v12874_v52 = vand.u32 4294901760, %v12831_v25  ;;  %2544 = vmatpush.msra.mxu1 %v12842_v41  ;;  %v2572_v13 = vsub.f32 %v12817_v32, %v12857_v63  ;;  %2507 = vmatpush.msra.mxu0 %v12819_v24  ;;  %v12934_v37 = vand.u32 4294901760, %v391_v8 }
 0x2f9   : > { %17639 = vst [vmem:[#allocation123_spill] sm:$0xff] %v12817_v32  ;;  %2654 = vmatpush.msra.mxu2 %v12817_v32  ;;  %v12946_v40 = vand.u32 4294901760, %v12910_v36  ;;  %2703 = vmatpush.msra.mxu3 %v12819_v24 }
 0x2fa   : > { %17640 = vst [vmem:[#allocation124_spill] sm:$0xff] %v12819_v24  ;;  %v11712_v1 = vpop.eup %11711  ;;  %2550 = vmatpush.msra.mxu1 %v12866_v53  ;;  %v2578_v5 = vsub.f32 %v12831_v25, %v12874_v52  ;;  %v12936_v19 = vand.u32 4294901760, %v2572_v13  ;;  %2509 = vmatpush.msra.mxu0 %v12869_v60 }
 0x2fb   : > { %17641 = vst [vmem:[#allocation125_spill] sm:$0xff] %v12831_v25  ;;  %v12863_v58 = vadd.f32 1.0, %v11712_v1  ;;  %v392_v1 = vld [vmem:[%s16818_s5 + $0x18] sm:$0xff]  ;;  %2657 = vmatpush.msra.mxu2 %v12831_v25  ;;  %2705 = vmatpush.msra.mxu3 %v12869_v60  ;;  %v2596_v34 = vsub.f32 %v12910_v36, %v12946_v40 }
 0x2fc   : > { %17642 = vst [vmem:[#allocation126_spill] sm:$0xff] %v12840_v61  ;;  %v2566_v61 = vsub.f32 %v12807_v12, %v12847_v11  ;;  %v12912_v27 = vand.u32 4294901760, %v392_v1  ;;  %2556 = vmatpush.msra.mxu1 %v12885_v43  ;;  %v389_v12 = vld [vmem:[%s16818_s5] sm:$0xff]  ;;  %v12955_v3 = vand.u32 4294901760, %v2578_v5  ;;  %2511 = vmatpush.msra.mxu0 %v12871_v29 }
 0x2fd   : > { %17643 = vst [vmem:[#allocation127_spill] sm:$0xff] %v12842_v41  ;;  %11713 = vrcp.f32 %v12863_v58  ;;  %v12906_v41 = vand.u32 4294901760, %v2560_v21  ;;  %v12928_v21 = vand.u32 4294901760, %v12898_v49  ;;  %v12969_v39 = vand.u32 4294901760, %v389_v12  ;;  %2660 = vmatpush.msra.mxu2 %v12895_v57  ;;  %2707 = vmatpush.msra.mxu3 %v12871_v29 }
 0x2fe   : > { %17644 = vst [vmem:[#allocation128_spill] sm:$0xff] %v12847_v11  ;;  %v12925_v23 = vand.u32 4294901760, %v2566_v61  ;;  %v12950_v13 = vsub.f32 %v392_v1, %v12912_v27  ;;  %v12967_v1 = vsub.f32 %v391_v8, %v12934_v37  ;;  %v2450_v25 = vand.u32 2147483648, %v12863_v58  ;;  %2513 = vmatpush.msra.mxu0 %v12876_v51 }
 0x2ff   : > { %17645 = vst [vmem:[#allocation129_spill] sm:$0xff] %v12857_v63  ;;  %2562 = vmatpush.msra.mxu1 %v12906_v41  ;;  %v2590_v32 = vsub.f32 %v12898_v49, %v12928_v21  ;;  %2663 = vmatpush.msra.mxu2 %v12898_v49  ;;  %vm2444_vm14 = vweird.f32 %v12863_v58 }
 0x300   : > { %17646 = vst [vmem:[#allocation130_spill] sm:$0xff] %v12866_v53  ;;  %v12932_v53 = vsub.f32 %v393_v33, %v12890_v62  ;;  %v12952_v33 = vand.u32 4294901760, %v390_v18  ;;  %v12980_v55 = vand.u32 4294901760, %v12950_v13  ;;  %v12995_v54 = vand.u32 4294901760, %v12967_v1  ;;  %2515 = vmatpush.msra.mxu0 %v12890_v62  ;;  %2709 = vmatpush.msra.mxu3 %v12876_v51 }
 0x301   : > { %17647 = vst [vmem:[#allocation131_spill] sm:$0xff] %v12869_v60  ;;  %2568 = vmatpush.msra.mxu1 %v12925_v23  ;;  %2666 = vmatpush.msra.mxu2 %v12910_v36 }
 0x302   : > { %17648 = vst [vmem:[#allocation132_spill] sm:$0xff] %v12871_v29  ;;  %2517 = vmatpush.msra.mxu0 %v12912_v27  ;;  %2711 = vmatpush.msra.mxu3 %v12890_v62 }
 0x303   : > { %17649 = vst [vmem:[#allocation133_spill] sm:$0xff] %v12874_v52  ;;  %v11714_v61 = vpop.eup %11713  ;;  %2574 = vmatpush.msra.mxu1 %v12936_v19  ;;  %2669 = vmatpush.msra.mxu2 %v12932_v53 }
 0x304   : > { %17651 = vst [vmem:[#allocation135_spill] sm:$0xff] %v12885_v43  ;;  %v2584_v43 = vsub.f32 %v12895_v57, %v12917_v42  ;;  %v2440_v35 = vmul.f32 %v11714_v61, %v12863_v58  ;;  %vm2445_vm13 = vweird.f32 %v11714_v61  ;;  %2519 = vmatpush.msra.mxu0 %v12934_v37  ;;  %2713 = vmatpush.msra.mxu3 %v12912_v27 }
 0x305   : > { %17653 = vst [vmem:[#allocation137_spill] sm:$0xff] %v12895_v57  ;;  %v2448_v57 = vand.u32 2147483647, %v12863_v58  ;;  %2580 = vmatpush.msra.mxu1 %v12955_v3  ;;  %vm2446_vm15 = vmor %vm2444_vm14, %vm2445_vm13  ;;  %2672 = vmatpush.msra.mxu2 %v12950_v13  ;;  %vm2459_vm14 = vcmask 785408  }
 0x306   : > { %17654 = vst [vmem:[#allocation138_spill] sm:$0xff] %v12898_v49  ;;  %v2441_v5 = vsub.f32 1.0, %v2440_v35  ;;  %v12984_v35 = vsub.f32 %v390_v18, %v12952_v33  ;;  %v12999_v18 = vsub.f32 %v389_v12, %v12969_v39  ;;  %v2608_v12 = vsub.f32 %v12950_v13, %v12980_v55  ;;  %2521 = vmatpush.msra.mxu0 %v12952_v33 }
 0x307   : > { %17655 = vst [vmem:[#allocation139_spill] sm:$0xff] %v12906_v41  ;;  %v12963_v41 = vand.u32 4294901760, %v12932_v53  ;;  %vm2449_vm4 = vcmp.eq.f32.partialorder %v2448_v57, 8.507059e+37  ;;  %2675 = vmatpush.msra.mxu2 %v12967_v1  ;;  %2715 = vmatpush.msra.mxu3 %v12934_v37 }
 0x308   : > { %17656 = vst [vmem:[#allocation140_spill] sm:$0xff] %v12910_v36  ;;  %v2442_v8 = vmul.f32 %v11714_v61, %v2441_v5  ;;  %v1372_v5 = vadd.f32 %v12735_v31, %v12714_v45  ;;  %v13013_v10 = vand.u32 4294901760, %v12984_v35  ;;  %2523 = vmatpush.msra.mxu0 %v12969_v39 }
 0x309   : > { %17657 = vst [vmem:[#allocation141_spill] sm:$0xff] %v12912_v27  ;;  %2678 = vmatpush.msra.mxu2 %v12984_v35  ;;  %2717 = vmatpush.msra.mxu3 %v12952_v33 }
 0x30a   : > { %17658 = vst [vmem:[#allocation142_spill] sm:$0xff] %v12917_v42  ;;  %v2443_v49 = vadd.f32 %v11714_v61, %v2442_v8  ;;  %v1473_v57 = vadd.f32 %v12718_v7, %v1372_v5  ;;  %2730 = vmatpush.msrb.mxu0 %v12797_v4 }
 0x30b   : > { %17659 = vst [vmem:[#allocation143_spill] sm:$0xff] %v12925_v23  ;;  %v12975_v23 = vand.u32 4294901760, %v2584_v43  ;;  %v12990_v43 = vand.u32 4294901760, %v2590_v32  ;;  %v2451_v32 = vor.u32 1.1754944e-38, %v2450_v25  ;;  %v13024_v25 = vand.u32 4294901760, %v12999_v18  ;;  %2681 = vmatpush.msra.mxu2 %v12999_v18  ;;  %2719 = vmatpush.msra.mxu3 %v12969_v39 }
 0x30c   : > { %17660 = vst [vmem:[#allocation144_spill] sm:$0xff] %v12928_v21  ;;  %v2447_v58 = vsel %vm2446_vm15, %v11714_v61, %v2443_v49  ;;  %v2620_v61 = vsub.f32 %v12984_v35, %v13013_v10  ;;  %v1527_v8 = vadd.f32 %v12710_v14, %v1473_v57  ;;  %2734 = vmatpush.msrb.mxu0 %v12800_v2  ;;  %vm2463_vm15 = vcmask 1043456  }
 0x30d   : > { %17661 = vst [vmem:[#allocation145_spill] sm:$0xff] %v12932_v53  ;;  %2586 = vmatpush.msra.mxu1 %v12975_v23  ;;  %v2452_v31 = vsel %vm2449_vm4, %v2451_v32, %v2447_v58  ;;  %v2626_v7 = vsub.f32 %v12999_v18, %v13024_v25  ;;  %vm2466_vm4 = vcmask 523268  }
 0x30e   : > { %17662 = vst [vmem:[#allocation146_spill] sm:$0xff] %v12934_v37  ;;  %v2454_v49 = vmul.f32 %v2452_v31, %v12738_v47  ;;  %v13049_v5 = vand.u32 4294901760, %v2620_v61  ;;  %2738 = vmatpush.msrb.mxu0 %v12803_v30  ;;  %v1566_v14 = vadd.f32 %v12708_v56, %v1527_v8  ;;  %vm13101_vm0 = vmor %vm2466_vm4, %vm2463_vm15 }
 0x30f   : > { %17663 = vst [vmem:[#allocation147_spill] sm:$0xff] %v12936_v19  ;;  %v2602_v19 = vsub.f32 %v12932_v53, %v12963_v41  ;;  %2592 = vmatpush.msra.mxu1 %v12990_v43  ;;  %v13055_v32 = vand.u32 4294901760, %v2626_v7 }
 0x310   : > { %17664 = vst [vmem:[#allocation148_spill] sm:$0xff] %v12946_v40  ;;  %2456 = vrot.lane.b32.xlu2 %v2454_v49, %s11822_s23  ;;  %2742 = vmatpush.msrb.mxu0 %v12811_v9 }
 0x311   : > { %17665 = vst [vmem:[#allocation149_spill] sm:$0xff] %v12950_v13  ;;  %v13019_v45 = vand.u32 4294901760, %v2602_v19  ;;  %v13032_v19 = vand.u32 4294901760, %v2608_v12  ;;  %v1635_v12 = vadd.f32 %v12722_v17, %v1566_v14  ;;  %v409_v13 = vld [vmem:[%s16818_s5 + $0xa0] sm:$0xff] }
 0x312   : > { %17666 = vst [vmem:[#allocation150_spill] sm:$0xff] %v12952_v33  ;;  %2746 = vmatpush.msrb.mxu0 %v12814_v22 }
 0x313   : > { %17667 = vst [vmem:[#allocation151_spill] sm:$0xff] %v12955_v3  ;;  %v13008_v3 = vand.u32 4294901760, %v2596_v34  ;;  %v2614_v34 = vsub.f32 %v12967_v1, %v12995_v54  ;;  %v1672_v56 = vadd.f32 %v12726_v6, %v1635_v12 }
 0x314   : > { %17668 = vst [vmem:[#allocation152_spill] sm:$0xff] %v12963_v41  ;;  %2750 = vmatpush.msrb.mxu0 %v12847_v11 }
 0x315   : > { %17669 = vst [vmem:[#allocation153_spill] sm:$0xff] %v12967_v1  ;;  %2598 = vmatpush.msra.mxu1 %v13008_v3  ;;  %v13040_v47 = vand.u32 4294901760, %v2614_v34  ;;  %v1702_v58 = vadd.f32 %v12716_v16, %v1672_v56 }
 0x316   : > { %17670 = vst [vmem:[#allocation154_spill] sm:$0xff] %v12969_v39  ;;  %2754 = vmatpush.msrb.mxu0 %v12857_v63  ;;  %v411_v63 = vld [vmem:[%s16818_s5 + $0xb0] sm:$0xff] }
 0x317   : > { %17671 = vst [vmem:[#allocation155_spill] sm:$0xff] %v12975_v23  ;;  %2604 = vmatpush.msra.mxu1 %v13019_v45  ;;  %v1748_v17 = vadd.f32 %v12712_v44, %v1702_v58 }
 0x318   : > { %17672 = vst [vmem:[#allocation156_spill] sm:$0xff] %v12980_v55  ;;  %2758 = vmatpush.msrb.mxu0 %v12874_v52  ;;  %v412_v52 = vld [vmem:[%s16818_s5 + $0xb8] sm:$0xff] }
 0x319   : > { %17673 = vst [vmem:[#allocation157_spill] sm:$0xff] %v12984_v35  ;;  %2610 = vmatpush.msra.mxu1 %v13032_v19  ;;  %v1780_v6 = vadd.f32 %v12724_v38, %v1748_v17  ;;  %v17685_v38 = vld [vmem:[#allocation104_spill] sm:$0xff] }
 0x31a   : > { %17674 = vst [vmem:[#allocation158_spill] sm:$0xff] %v12990_v43  ;;  %2762 = vmatpush.msrb.mxu0 %v12917_v42 }
 0x31b   : > { %17675 = vst [vmem:[#allocation159_spill] sm:$0xff] %v12995_v54  ;;  %2616 = vmatpush.msra.mxu1 %v13040_v47  ;;  %v1808_v16 = vadd.f32 %v12720_v20, %v1780_v6 }
 0x31c   : > { %17676 = vst [vmem:[#allocation160_spill] sm:$0xff] %v12999_v18  ;;  %2766 = vmatpush.msrb.mxu0 %v12928_v21 }
 0x31d   : > { %17677 = vst [vmem:[#allocation161_spill] sm:$0xff] %v13008_v3  ;;  %2622 = vmatpush.msra.mxu1 %v13049_v5  ;;  %v1844_v44 = vadd.f32 %v12730_v59, %v1808_v16 }
 0x31e   : > { %17678 = vst [vmem:[#allocation162_spill] sm:$0xff] %v13013_v10  ;;  %2770 = vmatpush.msrb.mxu0 %v12946_v40 }
 0x31f   : > { %17679 = vst [vmem:[#allocation163_spill] sm:$0xff] %v13019_v45  ;;  %2628 = vmatpush.msra.mxu1 %v13055_v32  ;;  %v1870_v31 = vadd.f32 %v17685_v38, %v1844_v44  ;;  %v17686_v38 = vmov 0 }
 0x320   : > { %17680 = vst [vmem:[#allocation164_spill] sm:$0xff] %v13024_v25  ;;  %2774 = vmatpush.msrb.mxu0 %v12963_v41  ;;  %v17687_v38 = vsel %vm13101_vm0, 4294967295, %v17686_v38 }
 0x321   : > { %17681 = vst [vmem:[#allocation165_spill] sm:$0xff] %v13032_v19  ;;  %2797 = vmatpush.msrb.mxu1 %v12750_v15  ;;  %v11550_v20 = vadd.f32 -1.0, %v1870_v31  ;;  %v17851_v15 = vld [vmem:[#allocation96_spill] sm:$0xff] }
 0x322   : > { %17682 = vst [vmem:[#allocation166_spill] sm:$0xff] %v13040_v47  ;;  %2778 = vmatpush.msrb.mxu0 %v12980_v55 }
 0x323   : > { %17683 = vst [vmem:[#allocation167_spill] sm:$0xff] %v13049_v5  ;;  %2799 = vmatpush.msrb.mxu1 %v12752_v26  ;;  %v11551_v59 = vmul.f32 -1.442695, %v11550_v20  ;;  %v17850_v26 = vld [vmem:[#allocation42_spill] sm:$0xff] }
 0x324   : > { %17684 = vst [vmem:[#allocation168_spill] sm:$0xff] %v13055_v32  ;;  %2782 = vmatpush.msrb.mxu0 %v12995_v54  ;;  %v407_v32 = vld [vmem:[%s16818_s5 + $0x90] sm:$0xff] }
 0x325   : > { %2801 = vmatpush.msrb.mxu1 %v12754_v48  ;;  %11715 = vpow2.f32 %v11551_v59  ;;  %17688 = vst [vmem:[#allocation104_spill] sm:$0xff] %v17687_v38  ;;  %v13305_v19 = vand.u32 4294901760, %v407_v32  ;;  %v17849_v48 = vld [vmem:[#allocation102_spill] sm:$0xff] }
 0x326   : > { %2786 = vmatpush.msrb.mxu0 %v13013_v10 }
 0x327   : > { %2803 = vmatpush.msrb.mxu1 %v12765_v28  ;;  %17731 = vst [vmem:[#allocation210_spill] sm:$0xff] %v13305_v19  ;;  %v17848_v28 = vld [vmem:[#allocation92_spill] sm:$0xff] }
 0x328   : > { %2790 = vmatpush.msrb.mxu0 %v13024_v25 }
 0x329   : > { %2805 = vmatpush.msrb.mxu1 %v12767_v50  ;;  %v17847_v50 = vld [vmem:[#allocation38_spill] sm:$0xff] }
 0x32b   : > { %2807 = vmatpush.msrb.mxu1 %v12769_v0  ;;  %v11716_v34 = vpop.eup %11715 }
 0x32c   : > { %v1876_v49 = vadd.f32 1.0, %v11716_v34 }
 0x32d   : > { %2809 = vmatpush.msrb.mxu1 %v12784_v46 }
 0x32e   : > { %11717 = vrcp.f32 %v1876_v49  ;;  %v1888_v12 = vand.u32 2147483648, %v1876_v49  ;;  %vm1882_vm6 = vweird.f32 %v1876_v49  ;;  %v1886_v56 = vand.u32 2147483647, %v1876_v49 }
 0x32f   : > { %2811 = vmatpush.msrb.mxu1 %v12819_v24 }
 0x330   : > { %v1889_v17 = vor.u32 1.1754944e-38, %v1888_v12  ;;  %vm1887_vm13 = vcmp.eq.f32.partialorder %v1886_v56, 8.507059e+37  ;;  %v416_v12 = vld [vmem:[%s16818_s5 + $0xd8] sm:$0xff] }
 0x331   : > { %2813 = vmatpush.msrb.mxu1 %v12869_v60 }
 0x333   : > { %2815 = vmatpush.msrb.mxu1 %v12871_v29 }
 0x334   : > { %v11718_v57 = vpop.eup %11717 }
 0x335   : > { %2817 = vmatpush.msrb.mxu1 %v12876_v51  ;;  %v1878_v61 = vmul.f32 %v11718_v57, %v1876_v49  ;;  %vm1883_vm5 = vweird.f32 %v11718_v57  ;;  %v13110_v49 = vld [vmem:[%s11937_s28 + $0x8] sm:$0x3f] }
 0x336   : > { %vm1884_vm7 = vmor %vm1882_vm6, %vm1883_vm5  ;;  %3641 = vrot.lane.b32.xlu1 %v13110_v49, %s17064_s29  ;;  %3418 = vrot.lane.b32.xlu2 %v13110_v49, %s11816_s14  ;;  %vm2484_vm5 = vcmask 523264   ;;  %vm17344_vm6 = vcmask 261120  }
 0x337   : > { %2819 = vmatpush.msrb.mxu1 %v12890_v62  ;;  %v1879_v7 = vsub.f32 1.0, %v1878_v61 }
 0x339   : > { %2821 = vmatpush.msrb.mxu1 %v12912_v27  ;;  %v1880_v8 = vmul.f32 %v11718_v57, %v1879_v7 }
 0x33b   : > { %2823 = vmatpush.msrb.mxu1 %v12934_v37  ;;  %v1881_v14 = vadd.f32 %v11718_v57, %v1880_v8  ;;  %v418_v8 = vld [vmem:[%s16818_s5 + $0xe8] sm:$0xff] }
 0x33c   : > { %v13135_v56 = vand.u32 4294901760, %v418_v8 }
 0x33d   : > { %2825 = vmatpush.msrb.mxu1 %v12952_v33  ;;  %v1885_v58 = vsel %vm1884_vm7, %v11718_v57, %v1881_v14  ;;  %v419_v57 = vld [vmem:[%s16818_s5 + $0xf0] sm:$0xff]  ;;  %v417_v14 = vld [vmem:[%s16818_s5 + $0xe0] sm:$0xff]  ;;  %v408_v33 = vld [vmem:[%s16818_s5 + $0x98] sm:$0xff] }
 0x33e   : > { %v1890_v6 = vsel %vm1887_vm13, %v1889_v17, %v1885_v58  ;;  %v13124_v7 = vand.u32 4294901760, %v419_v57  ;;  %17691 = vst [vmem:[#allocation171_spill] sm:$0xff] %v13135_v56  ;;  %v13137_v58 = vand.u32 4294901760, %v417_v14  ;;  %v13139_v17 = vand.u32 4294901760, %v416_v12  ;;  %3426 = vrot.lane.b32.xlu1 %v13110_v49, %s11817_s15 }
 0x33f   : > { %2827 = vmatpush.msrb.mxu1 %v12969_v39  ;;  %v1892_v16 = vmul.f32 %v1890_v6, %v1870_v31  ;;  %v420_v31 = vld [vmem:[%s16818_s5 + $0xf8] sm:$0xff]  ;;  %v415_v6 = vld [vmem:[%s16818_s5 + $0xd0] sm:$0xff]  ;;  %v13162_v10 = vsub.f32 %v418_v8, %v13135_v56 }
 0x340   : > { %v13122_v61 = vand.u32 4294901760, %v420_v31  ;;  %17690 = vst [vmem:[#allocation170_spill] sm:$0xff] %v13124_v7  ;;  %v13165_v54 = vsub.f32 %v417_v14, %v13137_v58  ;;  %v13168_v55 = vsub.f32 %v416_v12, %v13139_v17 }
 0x341   : > { %17692 = vst [vmem:[#allocation172_spill] sm:$0xff] %v13137_v58  ;;  %v13181_v40 = vand.u32 4294901760, %v13162_v10 }
 0x342   : > { %17689 = vst [vmem:[#allocation169_spill] sm:$0xff] %v13122_v61  ;;  %2834 = vmatpush.msrb.mxu2 %v13122_v61  ;;  %v13184_v14 = vand.u32 4294901760, %v13165_v54 }
 0x343   : > { %17693 = vst [vmem:[#allocation173_spill] sm:$0xff] %v13139_v17  ;;  %v2889_v8 = vsub.f32 %v13162_v10, %v13181_v40 }
 0x344   : > { %17698 = vst [vmem:[#allocation178_spill] sm:$0xff] %v13162_v10  ;;  %2836 = vmatpush.msrb.mxu2 %v13124_v7  ;;  %v2895_v22 = vsub.f32 %v13165_v54, %v13184_v14 }
 0x345   : > { %17699 = vst [vmem:[#allocation179_spill] sm:$0xff] %v13165_v54  ;;  %v13227_v30 = vand.u32 4294901760, %v2889_v8 }
 0x346   : > { %17700 = vst [vmem:[#allocation180_spill] sm:$0xff] %v13168_v55  ;;  %2838 = vmatpush.msrb.mxu2 %v13135_v56  ;;  %v13250_v4 = vand.u32 4294901760, %v2895_v22 }
 0x347   : > { %17704 = vst [vmem:[#allocation184_spill] sm:$0xff] %v13181_v40 }
 0x348   : > { %17705 = vst [vmem:[#allocation185_spill] sm:$0xff] %v13184_v14  ;;  %2840 = vmatpush.msrb.mxu2 %v13137_v58 }
 0x349   : > { %17714 = vst [vmem:[#allocation193_spill] sm:$0xff] %v13227_v30 }
 0x34a   : > { %2842 = vmatpush.msrb.mxu2 %v13139_v17  ;;  %17718 = vst [vmem:[#allocation197_spill] sm:$0xff] %v13250_v4 }
 0x36a   : > { %v2457_v44 = vpop.permute.xlu2 %2456 }
 0x36b   : > { %v2460_v20 = vsel %vm2459_vm14, %v1892_v16, %v2457_v44  ;;  %v2462_v59 = vrot.slane %v2457_v44, 4  ;;  %v414_v16 = vld [vmem:[%s16818_s5 + $0xc8] sm:$0xff]  ;;  %v413_v44 = vld [vmem:[%s16818_s5 + $0xc0] sm:$0xff] }
 0x36c   : > { %v13159_v38 = vand.u32 4294901760, %v414_v16  ;;  %v13177_v41 = vand.u32 4294901760, %v413_v44 }
 0x36d   : > { %v2464_v34 = vsel %vm2463_vm15, %v2460_v20, %v2462_v59  ;;  %v13151_v20 = vsub.f32 %v420_v31, %v13122_v61  ;;  %v13154_v59 = vsub.f32 %v419_v57, %v13124_v7 }
 0x36e   : > { %2468 = vst.msk [vmem:[#allocation3] sm:$0xff] %vm13101_vm0, %v2464_v34  ;;  %v13157_v34 = vand.u32 4294901760, %v415_v6  ;;  %v13195_v42 = vsub.f32 %v414_v16, %v13159_v38  ;;  %v17709_v16 = vrot.slane %v13110_v49, 1  ;;  %v13221_v35 = vsub.f32 %v413_v44, %v13177_v41  ;;  %v410_v44 = vld [vmem:[%s16818_s5 + $0xa8] sm:$0xff] }
 0x36f   : > { %17694 = vst [vmem:[#allocation174_spill] sm:$0xff] %v13151_v20  ;;  %v13171_v31 = vand.u32 4294901760, %v13151_v20  ;;  %v13174_v57 = vand.u32 4294901760, %v13154_v59  ;;  %v13267_v22 = vand.u32 4294901760, %v410_v44 }
 0x370   : > { %17695 = vst [vmem:[#allocation175_spill] sm:$0xff] %v13154_v59  ;;  %3429 = vrot.lane.b32.xlu2 %v17709_v16, %s11815_s13  ;;  %v13235_v16 = vand.u32 4294901760, %v411_v63  ;;  %v13253_v39 = vand.u32 4294901760, %v13221_v35  ;;  %2844 = vmatpush.msrb.mxu2 %v13157_v34 }
 0x371   : > { %17696 = vst [vmem:[#allocation176_spill] sm:$0xff] %v13157_v34  ;;  %v2877_v12 = vsub.f32 %v13151_v20, %v13171_v31  ;;  %v2883_v21 = vsub.f32 %v13154_v59, %v13174_v57  ;;  %v13286_v5 = vsub.f32 %v410_v44, %v13267_v22 }
 0x372   : > { %17697 = vst [vmem:[#allocation177_spill] sm:$0xff] %v13159_v38  ;;  %v13265_v37 = vsub.f32 %v411_v63, %v13235_v16  ;;  %2846 = vmatpush.msrb.mxu2 %v13159_v38  ;;  %v2919_v51 = vsub.f32 %v13221_v35, %v13253_v39 }
 0x373   : > { %17701 = vst [vmem:[#allocation181_spill] sm:$0xff] %v13171_v31  ;;  %v13213_v11 = vand.u32 4294901760, %v2877_v12  ;;  %v13215_v18 = vand.u32 4294901760, %v2883_v21  ;;  %v13230_v12 = vand.u32 4294901760, %v13195_v42  ;;  %v13233_v21 = vand.u32 4294901760, %v412_v52 }
 0x374   : > { %17702 = vst [vmem:[#allocation182_spill] sm:$0xff] %v13174_v57  ;;  %v13299_v29 = vand.u32 4294901760, %v13265_v37  ;;  %2848 = vmatpush.msrb.mxu2 %v13177_v41  ;;  %v13325_v46 = vand.u32 4294901760, %v2919_v51 }
 0x375   : > { %v2469_v25 = vld [vmem:[#allocation3] sm:$0x77]  ;;  %17703 = vst [vmem:[#allocation183_spill] sm:$0xff] %v13177_v41  ;;  %2879 = vmatpush.msrb.mxu3 %v13213_v11  ;;  %v13256_v36 = vsub.f32 %v412_v52, %v13233_v21  ;;  %v2913_v27 = vsub.f32 %v13195_v42, %v13230_v12 }
 0x376   : > { %2472 = vst [vmem:[#allocation1] ss:$2 sm:$0xff] %v2469_v25  ;;  %v13187_v25 = vsub.f32 %v415_v6, %v13157_v34  ;;  %v13202_v6 = vand.u32 4294901760, %v13168_v55  ;;  %v2470_v9 = vld [vmem:[#allocation3] sm:$0xe]  ;;  %2850 = vmatpush.msrb.mxu2 %v13233_v21 }
 0x377   : > { %17707 = vst [vmem:[#allocation187_spill] sm:$0xff] %v13195_v42  ;;  %2885 = vmatpush.msrb.mxu3 %v13215_v18  ;;  %v13282_v63 = vand.u32 4294901760, %v13256_v36  ;;  %v13308_v60 = vand.u32 4294901760, %v2913_v27 }
 0x378   : > { %17706 = vst [vmem:[#allocation186_spill] sm:$0xff] %v13187_v25  ;;  %v13224_v1 = vand.u32 4294901760, %v13187_v25  ;;  %v2901_v2 = vsub.f32 %v13168_v55, %v13202_v6  ;;  %2852 = vmatpush.msrb.mxu2 %v13235_v16 }
 0x379   : > { %17708 = vst [vmem:[#allocation188_spill] sm:$0xff] %v13202_v6  ;;  %2891 = vmatpush.msrb.mxu3 %v13227_v30  ;;  %v2925_v24 = vsub.f32 %v13256_v36, %v13282_v63 }
 0x37a   : > { %17710 = vst [vmem:[#allocation189_spill] sm:$0xff] %v13213_v11  ;;  %v13279_v62 = vand.u32 4294901760, %v2901_v2  ;;  %v406_v2 = vld [vmem:[%s16818_s5 + $0x88] sm:$0xff]  ;;  %2854 = vmatpush.msrb.mxu2 %v13267_v22 }
 0x37b   : > { %17711 = vst [vmem:[#allocation190_spill] sm:$0xff] %v13215_v18  ;;  %v13269_v18 = vand.u32 4294901760, %v409_v13  ;;  %2897 = vmatpush.msrb.mxu3 %v13250_v4  ;;  %v13323_v27 = vand.u32 4294901760, %v406_v2  ;;  %v13343_v51 = vand.u32 4294901760, %v2925_v24 }
 0x37c   : > { %17712 = vst [vmem:[#allocation191_spill] sm:$0xff] %v13221_v35 }
 0x37d   : > { %17713 = vst [vmem:[#allocation192_spill] sm:$0xff] %v13224_v1  ;;  %v2473_v11 = vld.sshfl [vmem:[#allocation1] sm:$0xff pattern:$0x75316420]  ;;  %v13303_v44 = vsub.f32 %v409_v13, %v13269_v18  ;;  %2903 = vmatpush.msrb.mxu3 %v13279_v62  ;;  %v13317_v13 = vand.u32 4294901760, %v13286_v5  ;;  %2856 = vmatpush.msrb.mxu2 %v13269_v18 }
 0x37e   : > { %17715 = vst [vmem:[#allocation194_spill] sm:$0xff] %v13230_v12  ;;  %v13243_v8 = vld.sshfl [vmem:[#allocation1 + $0x8] sm:$0xff pattern:$0x75316420]  ;;  %v13247_v53 = vand.u32 4294901760, %v2473_v11 }
 0x37f   : > { %17716 = vst [vmem:[#allocation195_spill] sm:$0xff] %v13233_v21  ;;  %v13332_v43 = vand.u32 4294901760, %v13303_v44 }
 0x380   : > { %17717 = vst [vmem:[#allocation196_spill] sm:$0xff] %v13235_v16  ;;  %2630 = vmatmul.f32.vlgmr.msra.gmra.mxu1 %v13247_v53  ;;  %v2525_v52 = vsub.f32 %v2473_v11, %v13247_v53  ;;  %v13288_v11 = vand.u32 4294901760, %v408_v33 }
 0x381   : > { %2478 = vst [vmem:[#allocation1] ss:$2 sm:$0xff] %v2470_v9  ;;  %v2907_v9 = vsub.f32 %v13187_v25, %v13224_v1  ;;  %3030 = vmatpush.msra.mxu1 %v13122_v61  ;;  %v2943_v24 = vsub.f32 %v13303_v44, %v13332_v43 }
 0x382   : > { %17719 = vst [vmem:[#allocation198_spill] sm:$0xff] %v13253_v39  ;;  %2684 = vmatmul.f32.vlgmr.msra.gmra.mxu2 %v2525_v52  ;;  %v2526_v30 = vand.u32 4294901760, %v2525_v52  ;;  %v13321_v3 = vsub.f32 %v408_v33, %v13288_v11  ;;  %v13336_v33 = vsub.f32 %v407_v32, %v13305_v19  ;;  %v13351_v32 = vsub.f32 %v406_v2, %v13323_v27 }
 0x383   : > { %17720 = vst [vmem:[#allocation199_spill] sm:$0xff] %v13256_v36  ;;  %v13296_v47 = vand.u32 4294901760, %v2907_v9  ;;  %v405_v9 = vld [vmem:[%s16818_s5 + $0x80] sm:$0xff]  ;;  %3032 = vmatpush.msra.mxu1 %v13124_v7  ;;  %2858 = vmatpush.msrb.mxu2 %v13288_v11 }
 0x384   : > { %17721 = vst [vmem:[#allocation200_spill] sm:$0xff] %v13265_v37  ;;  %2723 = vmatmul.f32.vlgmr.msra.gmra.mxu3 %v2526_v30  ;;  %v2527_v4 = vsub.f32 %v2525_v52, %v2526_v30  ;;  %v13338_v0 = vand.u32 4294901760, %v405_v9 }
 0x385   : > { %17722 = vst [vmem:[#allocation201_spill] sm:$0xff] %v13267_v22  ;;  %2909 = vmatpush.msrb.mxu3 %v13296_v47  ;;  %3034 = vmatpush.msra.mxu1 %v13135_v56 }
 0x386   : > { %17723 = vst [vmem:[#allocation202_spill] sm:$0xff] %v13269_v18  ;;  %v2528_v30 = vand.u32 4294901760, %v2527_v4  ;;  %v2937_v4 = vsub.f32 %v13286_v5, %v13317_v13  ;;  %2860 = vmatpush.msrb.mxu2 %v13305_v19 }
 0x387   : > { %17724 = vst [vmem:[#allocation203_spill] sm:$0xff] %v13279_v62  ;;  %v2931_v62 = vsub.f32 %v13265_v37, %v13299_v29  ;;  %2915 = vmatpush.msrb.mxu3 %v13308_v60  ;;  %3036 = vmatpush.msra.mxu1 %v13137_v58 }
 0x388   : > { %17725 = vst [vmem:[#allocation204_spill] sm:$0xff] %v13282_v63  ;;  %v2479_v45 = vld.sshfl [vmem:[#allocation1] sm:$0xff pattern:$0x75316420]  ;;  %2529 = vmatmul.f32.vlgmr.msra.gmra.mxu0 %v2528_v30  ;;  %2829 = vmatmul.f32.vlgmr.msrb.gmra.mxu1 %v13247_v53  ;;  %v13370_v2 = vand.u32 4294901760, %v2937_v4 }
 0x389   : > { %17726 = vst [vmem:[#allocation205_spill] sm:$0xff] %v13286_v5  ;;  %v2480_v52 = vrot.slane %v2479_v45, 1  ;;  %v13348_v45 = vand.u32 4294901760, %v13321_v3  ;;  %2977 = vmatpush.msra.mxu0 %v13151_v20  ;;  %2921 = vmatpush.msrb.mxu3 %v13325_v46  ;;  %v13356_v30 = vand.u32 4294901760, %v2931_v62  ;;  %v13375_v20 = vand.u32 4294901760, %v13351_v32 }
 0x38a   : > { %17727 = vst [vmem:[#allocation206_spill] sm:$0xff] %v13288_v11  ;;  %3038 = vmatpush.msra.mxu1 %v13139_v17  ;;  %2862 = vmatpush.msrb.mxu2 %v13323_v27 }
 0x38b   : > { %17728 = vst [vmem:[#allocation207_spill] sm:$0xff] %v13296_v47  ;;  %2481 = vrot.lane.b32.xlu0 %v2480_v52, %s11823_s16  ;;  %v13361_v52 = vand.u32 4294901760, %v13336_v33  ;;  %2980 = vmatpush.msra.mxu0 %v13154_v59  ;;  %v2949_v62 = vsub.f32 %v13321_v3, %v13348_v45  ;;  %v17838_v47 = vld [vmem:[#allocation84_spill] sm:$0xff] }
 0x38c   : > { %17729 = vst [vmem:[#allocation208_spill] sm:$0xff] %v13299_v29  ;;  %2927 = vmatpush.msrb.mxu3 %v13343_v51  ;;  %3040 = vmatpush.msra.mxu1 %v13157_v34 }
 0x38d   : > { %17730 = vst [vmem:[#allocation209_spill] sm:$0xff] %v13303_v44  ;;  %2983 = vmatpush.msra.mxu0 %v13162_v10  ;;  %v2955_v4 = vsub.f32 %v13336_v33, %v13361_v52  ;;  %v17750_v10 = vrot.slane %v13110_v49, 1  ;;  %2864 = vmatpush.msrb.mxu2 %v13338_v0 }
 0x38e   : > { %17732 = vst [vmem:[#allocation211_spill] sm:$0xff] %v13308_v60  ;;  %v13364_v60 = vsub.f32 %v405_v9, %v13338_v0  ;;  %2933 = vmatpush.msrb.mxu3 %v13356_v30  ;;  %v13381_v9 = vand.u32 4294901760, %v2943_v24  ;;  %v13395_v24 = vand.u32 4294901760, %v2949_v62  ;;  %3042 = vmatpush.msra.mxu1 %v13159_v38 }
 0x38f   : > { %17733 = vst [vmem:[#allocation212_spill] sm:$0xff] %v13317_v13  ;;  %2986 = vmatpush.msra.mxu0 %v13165_v54  ;;  %3071 = vmatpush.msra.mxu2 %v13171_v31  ;;  %v17816_v54 = vld [vmem:[#allocation51_spill] sm:$0xff]  ;;  %v17820_v31 = vld [vmem:[#allocation60_spill] sm:$0xff] }
 0x390   : > { %17734 = vst [vmem:[#allocation213_spill] sm:$0xff] %v13321_v3  ;;  %v13386_v59 = vand.u32 4294901760, %v13364_v60  ;;  %2792 = vmatmul.f32.vlgmr.msrb.gmra.mxu0 %v13247_v53  ;;  %2939 = vmatpush.msrb.mxu3 %v13370_v2  ;;  %v13402_v53 = vand.u32 4294901760, %v2955_v4  ;;  %v423_v4 = vld [vmem:[%s16818_s5 + $0x110] sm:$0xff] }
 0x391   : > { %17735 = vst [vmem:[#allocation214_spill] sm:$0xff] %v13323_v27  ;;  %2989 = vmatpush.msra.mxu0 %v13168_v55  ;;  %3044 = vmatpush.msra.mxu1 %v13177_v41  ;;  %v17814_v55 = vld [vmem:[#allocation50_spill] sm:$0xff] }
 0x392   : > { %17736 = vst [vmem:[#allocation215_spill] sm:$0xff] %v13325_v46  ;;  %2945 = vmatpush.msrb.mxu3 %v13381_v9  ;;  %3075 = vmatpush.msra.mxu2 %v13174_v57  ;;  %v17819_v57 = vld [vmem:[#allocation53_spill] sm:$0xff] }
 0x393   : > { %17737 = vst [vmem:[#allocation216_spill] sm:$0xff] %v13332_v43  ;;  %3422 = vrot.lane.b32.xlu0 %v17750_v10, %s11814_s30  ;;  %2992 = vmatpush.msra.mxu0 %v13187_v25  ;;  %v17835_v46 = vld [vmem:[#allocation77_spill] sm:$0xff] }
 0x394   : > { %17738 = vst [vmem:[#allocation217_spill] sm:$0xff] %v13336_v33  ;;  %2951 = vmatpush.msrb.mxu3 %v13395_v24  ;;  %3046 = vmatpush.msra.mxu1 %v13233_v21 }
 0x395   : > { %17739 = vst [vmem:[#allocation218_spill] sm:$0xff] %v13338_v0  ;;  %2995 = vmatpush.msra.mxu0 %v13195_v42  ;;  %3079 = vmatpush.msra.mxu2 %v13181_v40  ;;  %v17818_v40 = vld [vmem:[#allocation78_spill] sm:$0xff] }
 0x396   : > { %17740 = vst [vmem:[#allocation219_spill] sm:$0xff] %v13343_v51  ;;  %v2967_v51 = vsub.f32 %v13364_v60, %v13386_v59  ;;  %2957 = vmatpush.msrb.mxu3 %v13402_v53  ;;  %3048 = vmatpush.msra.mxu1 %v13235_v16 }
 0x397   : > { %17741 = vst [vmem:[#allocation220_spill] sm:$0xff] %v13348_v45  ;;  %2998 = vmatpush.msra.mxu0 %v13221_v35  ;;  %3083 = vmatpush.msra.mxu2 %v13184_v14  ;;  %v17817_v14 = vld [vmem:[#allocation58_spill] sm:$0xff] }
 0x398   : > { %17742 = vst [vmem:[#allocation221_spill] sm:$0xff] %v13351_v32  ;;  %v13416_v62 = vand.u32 4294901760, %v2967_v51  ;;  %3050 = vmatpush.msra.mxu1 %v13267_v22  ;;  %v424_v51 = vld [vmem:[%s16818_s5 + $0x118] sm:$0xff] }
 0x399   : > { %17743 = vst [vmem:[#allocation222_spill] sm:$0xff] %v13356_v30  ;;  %v2961_v30 = vsub.f32 %v13351_v32, %v13375_v20  ;;  %3001 = vmatpush.msra.mxu0 %v13256_v36  ;;  %3087 = vmatpush.msra.mxu2 %v13202_v6  ;;  %v17815_v6 = vld [vmem:[#allocation75_spill] sm:$0xff] }
 0x39a   : > { %17744 = vst [vmem:[#allocation223_spill] sm:$0xff] %v13361_v52  ;;  %3052 = vmatpush.msra.mxu1 %v13269_v18 }
 0x39b   : > { %17745 = vst [vmem:[#allocation224_spill] sm:$0xff] %v13364_v60  ;;  %v13410_v10 = vand.u32 4294901760, %v2961_v30  ;;  %3004 = vmatpush.msra.mxu0 %v13265_v37  ;;  %3091 = vmatpush.msra.mxu2 %v13224_v1  ;;  %v13473_v30 = vand.u32 4294901760, %v424_v51  ;;  %v17813_v1 = vld [vmem:[#allocation47_spill] sm:$0xff] }
 0x39c   : > { %17746 = vst [vmem:[#allocation225_spill] sm:$0xff] %v13370_v2  ;;  %3054 = vmatpush.msra.mxu1 %v13288_v11  ;;  %v17831_v2 = vld [vmem:[#allocation65_spill] sm:$0xff] }
 0x39d   : > { %17747 = vst [vmem:[#allocation226_spill] sm:$0xff] %v13375_v20  ;;  %2963 = vmatpush.msrb.mxu3 %v13410_v10  ;;  %3007 = vmatpush.msra.mxu0 %v13286_v5 }
 0x39e   : > { %17748 = vst [vmem:[#allocation227_spill] sm:$0xff] %v13381_v9  ;;  %3095 = vmatpush.msra.mxu2 %v13230_v12  ;;  %3056 = vmatpush.msra.mxu1 %v13305_v19  ;;  %v17829_v9 = vld [vmem:[#allocation64_spill] sm:$0xff] }
 0x39f   : > { %17749 = vst [vmem:[#allocation228_spill] sm:$0xff] %v13386_v59  ;;  %2969 = vmatpush.msrb.mxu3 %v13416_v62  ;;  %3010 = vmatpush.msra.mxu0 %v13303_v44 }
 0x3a0   : > { %17751 = vst [vmem:[#allocation229_spill] sm:$0xff] %v13395_v24  ;;  %3099 = vmatpush.msra.mxu2 %v13253_v39  ;;  %3058 = vmatpush.msra.mxu1 %v13323_v27  ;;  %v17827_v24 = vld [vmem:[#allocation82_spill] sm:$0xff] }
 0x3a1   : > { %17752 = vst [vmem:[#allocation230_spill] sm:$0xff] %v13402_v53  ;;  %3138 = vmatpush.msra.mxu3 %v13122_v61  ;;  %3013 = vmatpush.msra.mxu0 %v13321_v3  ;;  %v421_v3 = vld [vmem:[%s16818_s5 + $0x100] sm:$0xff]  ;;  %v17825_v53 = vld [vmem:[#allocation55_spill] sm:$0xff] }
 0x3a2   : > { %17753 = vst [vmem:[#allocation231_spill] sm:$0xff] %v13410_v10  ;;  %3103 = vmatpush.msra.mxu2 %v13282_v63  ;;  %3060 = vmatpush.msra.mxu1 %v13338_v0  ;;  %v13505_v44 = vand.u32 4294901760, %v421_v3  ;;  %v17823_v10 = vld [vmem:[#allocation61_spill] sm:$0xff]  ;;  %v17845_v61 = vld [vmem:[#allocation100_spill] sm:$0xff] }
 0x3a3   : > { %17754 = vst [vmem:[#allocation232_spill] sm:$0xff] %v13416_v62  ;;  %3140 = vmatpush.msra.mxu3 %v13124_v7  ;;  %3016 = vmatpush.msra.mxu0 %v13336_v33  ;;  %v17821_v62 = vld [vmem:[#allocation80_spill] sm:$0xff]  ;;  %v17843_v7 = vld [vmem:[#allocation35_spill] sm:$0xff] }
 0x3a4   : > { %3107 = vmatpush.msra.mxu2 %v13299_v29  ;;  %17755 = vst [vmem:[#allocation233_spill] sm:$0xff] %v13473_v30  ;;  %v13519_v37 = vsub.f32 %v421_v3, %v13505_v44 }
 0x3a5   : > { %3142 = vmatpush.msra.mxu3 %v13135_v56  ;;  %3019 = vmatpush.msra.mxu0 %v13351_v32  ;;  %v422_v32 = vld [vmem:[%s16818_s5 + $0x108] sm:$0xff]  ;;  %17762 = vst [vmem:[#allocation240_spill] sm:$0xff] %v13505_v44 }
 0x3a6   : > { %3111 = vmatpush.msra.mxu2 %v13317_v13  ;;  %v13491_v33 = vand.u32 4294901760, %v422_v32  ;;  %17766 = vst [vmem:[#allocation244_spill] sm:$0xff] %v13519_v37  ;;  %v17842_v56 = vld [vmem:[#allocation97_spill] sm:$0xff] }
 0x3a7   : > { %3144 = vmatpush.msra.mxu3 %v13137_v58  ;;  %3022 = vmatpush.msra.mxu0 %v13364_v60  ;;  %v13479_v60 = vand.u32 4294901760, %v423_v4  ;;  %v17841_v58 = vld [vmem:[#allocation86_spill] sm:$0xff] }
 0x3a8   : > { %3115 = vmatpush.msra.mxu2 %v13332_v43  ;;  %17759 = vst [vmem:[#allocation237_spill] sm:$0xff] %v13491_v33  ;;  %v13508_v43 = vsub.f32 %v422_v32, %v13491_v33 }
 0x3a9   : > { %3146 = vmatpush.msra.mxu3 %v13139_v17  ;;  %3187 = vmatpush.msrb.mxu0 %v13473_v30  ;;  %17756 = vst [vmem:[#allocation234_spill] sm:$0xff] %v13479_v60  ;;  %v17840_v17 = vld [vmem:[#allocation28_spill] sm:$0xff] }
 0x3aa   : > { %3119 = vmatpush.msra.mxu2 %v13348_v45  ;;  %17763 = vst [vmem:[#allocation241_spill] sm:$0xff] %v13508_v43  ;;  %v13516_v13 = vand.u32 4294901760, %v13508_v43 }
 0x3ab   : > { %3148 = vmatpush.msra.mxu3 %v13157_v34  ;;  %3189 = vmatpush.msrb.mxu0 %v13479_v60  ;;  %v17839_v34 = vld [vmem:[#allocation93_spill] sm:$0xff] }
 0x3ac   : > { %3123 = vmatpush.msra.mxu2 %v13361_v52  ;;  %v13494_v52 = vsub.f32 %v423_v4, %v13479_v60  ;;  %17765 = vst [vmem:[#allocation243_spill] sm:$0xff] %v13516_v13  ;;  %v3230_v32 = vsub.f32 %v13508_v43, %v13516_v13 }
 0x3ad   : > { %3150 = vmatpush.msra.mxu3 %v13159_v38  ;;  %3191 = vmatpush.msrb.mxu0 %v13491_v33  ;;  %v17837_v38 = vld [vmem:[#allocation27_spill] sm:$0xff] }
 0x3ae   : > { %3127 = vmatpush.msra.mxu2 %v13375_v20  ;;  %17760 = vst [vmem:[#allocation238_spill] sm:$0xff] %v13494_v52  ;;  %v13503_v45 = vand.u32 4294901760, %v13494_v52  ;;  %v13530_v36 = vand.u32 4294901760, %v3230_v32 }
 0x3af   : > { %3152 = vmatpush.msra.mxu3 %v13177_v41  ;;  %3193 = vmatpush.msrb.mxu0 %v13505_v44 }
 0x3b0   : > { %3131 = vmatpush.msra.mxu2 %v13386_v59  ;;  %v13482_v59 = vsub.f32 %v424_v51, %v13473_v30  ;;  %17761 = vst [vmem:[#allocation239_spill] sm:$0xff] %v13503_v45  ;;  %v3224_v4 = vsub.f32 %v13494_v52, %v13503_v45 }
 0x3b1   : > { %3154 = vmatpush.msra.mxu3 %v13233_v21  ;;  %17769 = vst [vmem:[#allocation247_spill] sm:$0xff] %v13530_v36  ;;  %v17834_v21 = vld [vmem:[#allocation26_spill] sm:$0xff] }
 0x3b2   : > { %17757 = vst [vmem:[#allocation235_spill] sm:$0xff] %v13482_v59  ;;  %v13489_v20 = vand.u32 4294901760, %v13482_v59  ;;  %v13522_v29 = vand.u32 4294901760, %v3224_v4 }
 0x3b3   : > { %3156 = vmatpush.msra.mxu3 %v13235_v16  ;;  %v17833_v16 = vld [vmem:[#allocation73_spill] sm:$0xff] }
 0x3b4   : > { %17758 = vst [vmem:[#allocation236_spill] sm:$0xff] %v13489_v20  ;;  %v3218_v51 = vsub.f32 %v13482_v59, %v13489_v20 }
 0x3b5   : > { %3158 = vmatpush.msra.mxu3 %v13267_v22  ;;  %17767 = vst [vmem:[#allocation245_spill] sm:$0xff] %v13522_v29  ;;  %v17832_v22 = vld [vmem:[#allocation71_spill] sm:$0xff] }
 0x3b6   : > { %v13510_v5 = vand.u32 4294901760, %v3218_v51  ;;  %v13527_v51 = vand.u32 4294901760, %v13519_v37 }
 0x3b7   : > { %3160 = vmatpush.msra.mxu3 %v13269_v18  ;;  %v17830_v18 = vld [vmem:[#allocation83_spill] sm:$0xff] }
 0x3b8   : > { %17764 = vst [vmem:[#allocation242_spill] sm:$0xff] %v13510_v5  ;;  %3220 = vmatpush.msrb.mxu1 %v13510_v5  ;;  %v3236_v63 = vsub.f32 %v13519_v37, %v13527_v51 }
 0x3b9   : > { %3162 = vmatpush.msra.mxu3 %v13288_v11  ;;  %17768 = vst [vmem:[#allocation246_spill] sm:$0xff] %v13527_v51  ;;  %v17828_v11 = vld [vmem:[#allocation59_spill] sm:$0xff] }
 0x3ba   : > { %3226 = vmatpush.msrb.mxu1 %v13522_v29  ;;  %v13535_v3 = vand.u32 4294901760, %v3236_v63 }
 0x3bb   : > { %3164 = vmatpush.msra.mxu3 %v13305_v19  ;;  %v17826_v19 = vld [vmem:[#allocation62_spill] sm:$0xff] }
 0x3bc   : > { %3232 = vmatpush.msrb.mxu1 %v13530_v36  ;;  %17770 = vst [vmem:[#allocation248_spill] sm:$0xff] %v13535_v3 }
 0x3bd   : > { %3166 = vmatpush.msra.mxu3 %v13323_v27  ;;  %v17824_v27 = vld [vmem:[#allocation81_spill] sm:$0xff] }
 0x3be   : > { %3238 = vmatpush.msrb.mxu1 %v13535_v3 }
 0x3bf   : > { %3168 = vmatpush.msra.mxu3 %v13338_v0  ;;  %v17822_v0 = vld [vmem:[#allocation54_spill] sm:$0xff] }
 0x3fd   : > { %v2482_v4 = vpop.permute.xlu0 %2481  ;;  %v13764_v23 = vpop.f32.mrf.mxu1 }
 0x3fe   : > { %v2485_v5 = vsel %vm2484_vm5, %v13243_v8, %v2482_v4  ;;  %v2490_v35 = vsel %vm17344_vm6, %v2482_v4, 0  ;;  %v17772_v4 = vld [vmem:[#allocation17_spill] sm:$0xff]  ;;  %17846 = vst [vmem:[#allocation250_spill] sm:$0xff] %v13764_v23  ;;  %v17854_v23 = vld [vmem:[#allocation46_spill] sm:$0xff] }
 0x3ff   : > { %v2865_v29 = vand.u32 4294901760, %v2485_v5  ;;  %v3194_v32 = vand.u32 4294901760, %v2490_v35 }
 0x401   : > { %v2866_v39 = vsub.f32 %v2485_v5, %v2865_v29  ;;  %v3195_v42 = vsub.f32 %v2490_v35, %v3194_v32  ;;  %2971 = vmatmul.f32.vlgmr.msrb.gmra.mxu3 %v2865_v29  ;;  %v3642_v5 = vpop.permute.xlu1 %3641 }
 0x402   : > { %3287 = vmatpush.msrb.mxu3 %v13473_v30 }
 0x403   : > { %v2867_v36 = vand.u32 4294901760, %v2866_v39  ;;  %v3196_v63 = vand.u32 4294901760, %v3195_v42  ;;  %3025 = vmatmul.f32.vlgmr.msra.gmra.mxu0 %v2866_v39 }
 0x404   : > { %3289 = vmatpush.msrb.mxu3 %v13479_v60  ;;  %3316 = vmatpush.msra.mxu0 %v13489_v20 }
 0x405   : > { %v2868_v3 = vsub.f32 %v2866_v39, %v2867_v36  ;;  %v3197_v12 = vsub.f32 %v3195_v42, %v3196_v63  ;;  %3064 = vmatmul.f32.vlgmr.msra.gmra.mxu1 %v2867_v36  ;;  %v3433_v39 = vsel %vm17343_vm1, %v13110_v49, 0  ;;  %v17771_v36 = vld [vmem:[#allocation16_spill] sm:$0xff]  ;;  %v13750_v41 = vpop.f32.mrf.mxu0 }
 0x406   : > { %3291 = vmatpush.msrb.mxu3 %v13491_v33  ;;  %3320 = vmatpush.msra.mxu0 %v13503_v45  ;;  %v17779_v45 = vld [vmem:[#allocation5_spill] sm:$0xff]  ;;  %17836 = vst [vmem:[#allocation249_spill] sm:$0xff] %v13750_v41 }
 0x407   : > { %v2869_v8 = vand.u32 4294901760, %v2868_v3  ;;  %3347 = vmatpush.msra.mxu1 %v13473_v30  ;;  %v3198_v35 = vand.u32 4294901760, %v3197_v12  ;;  %v3643_v3 = vsel %vm17343_vm1, %v3642_v5, 0  ;;  %v13558_v12 = vand.u32 4294901760, %v3433_v39  ;;  %v17844_v41 = vld [vmem:[#allocation89_spill] sm:$0xff] }
 0x408   : > { %3293 = vmatpush.msrb.mxu3 %v13505_v44  ;;  %3324 = vmatpush.msra.mxu0 %v13516_v13  ;;  %v13564_v49 = vand.u32 4294901760, %v3643_v3  ;;  %v17777_v13 = vld [vmem:[#allocation19_spill] sm:$0xff] }
 0x409   : > { %2870 = vmatmul.f32.vlgmr.msrb.gmra.mxu2 %v2869_v8  ;;  %3170 = vmatmul.f32.vlgmr.msra.gmra.mxu3 %v2865_v29  ;;  %v17773_v8 = vld [vmem:[#allocation8_spill] sm:$0xff]  ;;  %v3456_v5 = vsub.f32 %v3433_v39, %v13558_v12  ;;  %v17781_v39 = vld [vmem:[#allocation6_spill] sm:$0xff]  ;;  %v3427_v30 = vpop.permute.xlu1 %3426 }
 0x40a   : > { %3349 = vmatpush.msra.mxu1 %v13479_v60  ;;  %3258 = vmatpush.msrb.mxu2 %v13482_v59  ;;  %v13572_v59 = vsub.f32 %v3643_v3, %v13564_v49  ;;  %v17782_v3 = vld [vmem:[#allocation7_spill] sm:$0xff]  ;;  %v17783_v60 = vld [vmem:[#allocation12_spill] sm:$0xff] }
 0x40b   : > { %3199 = vmatmul.f32.vlgmr.msrb.gmra.mxu0 %v3198_v35  ;;  %3481 = vmatpush.msra.mxu3 %v17771_v36  ;;  %v17774_v35 = vld [vmem:[#allocation18_spill] sm:$0xff] }
 0x40c   : > { %3328 = vmatpush.msra.mxu0 %v13527_v51  ;;  %3351 = vmatpush.msra.mxu1 %v13491_v33  ;;  %v17775_v51 = vld [vmem:[#allocation4_spill] sm:$0xff] }
 0x40d   : > { %3240 = vmatmul.f32.vlgmr.msrb.gmra.mxu1 %v3194_v32  ;;  %3261 = vmatpush.msrb.mxu2 %v13494_v52  ;;  %v17776_v52 = vld [vmem:[#allocation9_spill] sm:$0xff] }
 0x40e   : > { %3353 = vmatpush.msra.mxu1 %v13505_v44  ;;  %3487 = vmatpush.msra.mxu3 %v17772_v4  ;;  %v3419_v44 = vpop.permute.xlu2 %3418 }
 0x40f   : > { %3519 = vmatpush.msrb.mxu0 %v17773_v8  ;;  %3264 = vmatpush.msrb.mxu2 %v13508_v43  ;;  %v17778_v43 = vld [vmem:[#allocation10_spill] sm:$0xff] }
 0x410   : > { %3493 = vmatpush.msra.mxu3 %v17774_v35  ;;  %3548 = vmatpush.msrb.mxu1 %v17775_v51 }
 0x411   : > { %3133 = vmatmul.f32.vlgmr.msra.gmra.mxu2 %v2865_v29  ;;  %3297 = vmatmul.f32.vlgmr.msrb.gmra.mxu3 %v3196_v63  ;;  %v3457_v29 = vand.u32 4294901760, %v3456_v5  ;;  %v17780_v63 = vld [vmem:[#allocation11_spill] sm:$0xff] }
 0x412   : > { %3522 = vmatpush.msrb.mxu0 %v17776_v52  ;;  %3267 = vmatpush.msrb.mxu2 %v13519_v37  ;;  %v3667_v37 = vand.u32 4294901760, %v13572_v59 }
 0x413   : > { %3330 = vmatmul.f32.vlgmr.msra.gmra.mxu0 %v3194_v32  ;;  %3499 = vmatpush.msra.mxu3 %v17777_v13 }
 0x414   : > { %3525 = vmatpush.msrb.mxu0 %v17778_v43  ;;  %3550 = vmatpush.msrb.mxu1 %v17779_v45  ;;  %v3668_v20 = vsub.f32 %v13572_v59, %v3667_v37 }
 0x415   : > { %3355 = vmatmul.f32.vlgmr.msra.gmra.mxu1 %v3194_v32  ;;  %3448 = vmatpush.msra.mxu2 %v17775_v51  ;;  %v3458_v32 = vsub.f32 %v3456_v5, %v3457_v29 }
 0x416   : > { %3528 = vmatpush.msrb.mxu0 %v17780_v63  ;;  %3552 = vmatpush.msrb.mxu1 %v17781_v39  ;;  %v3669_v33 = vand.u32 4294901760, %v3668_v20 }
 0x417   : > { %3608 = vmatpush.msrb.mxu3 %v17775_v51  ;;  %3450 = vmatpush.msra.mxu2 %v17779_v45 }
 0x418   : > { %3554 = vmatpush.msrb.mxu1 %v17782_v3  ;;  %3658 = vmatpush.msra.mxu0 %v17775_v51 }
 0x419   : > { %3270 = vmatmul.f32.vlgmr.msrb.gmra.mxu2 %v3195_v42  ;;  %3501 = vmatmul.f32.vlgmr.msra.gmra.mxu3 %v13558_v12  ;;  %v3459_v42 = vand.u32 4294901760, %v3458_v32  ;;  %v17785_v32 = vld [vmem:[#allocation14_spill] sm:$0xff] }
 0x41a   : > { %3610 = vmatpush.msrb.mxu3 %v17779_v45  ;;  %3452 = vmatpush.msra.mxu2 %v17781_v39 }
 0x41b   : > { %3531 = vmatmul.f32.vlgmr.msrb.gmra.mxu0 %v3456_v5  ;;  %3691 = vmatpush.msra.mxu1 %v17771_v36  ;;  %v3423_v5 = vpop.permute.xlu0 %3422 }
 0x41c   : > { %3612 = vmatpush.msrb.mxu3 %v17781_v39  ;;  %3660 = vmatpush.msra.mxu0 %v17779_v45  ;;  %v3425_v20 = vsel %vm17342_vm2, %v3419_v44, %v3423_v5 }
 0x41d   : > { %3558 = vmatmul.f32.vlgmr.msrb.gmra.mxu1 %v3457_v29  ;;  %3454 = vmatpush.msra.mxu2 %v17782_v3  ;;  %v17784_v29 = vld [vmem:[#allocation13_spill] sm:$0xff]  ;;  %v3852_v25 = vsel %vm17343_vm1, %v3425_v20, 0 }
 0x41e   : > { %3614 = vmatpush.msrb.mxu3 %v17782_v3  ;;  %3662 = vmatpush.msra.mxu0 %v17781_v39  ;;  %v3874_v5 = vand.u32 4294901760, %v3852_v25 }
 0x41f   : > { %3697 = vmatpush.msra.mxu1 %v17772_v4  ;;  %3577 = vmatpush.msrb.mxu2 %v17783_v60 }
 0x420   : > { %3664 = vmatpush.msra.mxu0 %v17782_v3  ;;  %3758 = vmatpush.msra.mxu3 %v17775_v51 }
 0x421   : > { %3460 = vmatmul.f32.vlgmr.msra.gmra.mxu2 %v3459_v42  ;;  %3616 = vmatmul.f32.vlgmr.msrb.gmra.mxu3 %v13558_v12  ;;  %v3430_v42 = vpop.permute.xlu2 %3429 }
 0x422   : > { %3703 = vmatpush.msra.mxu1 %v17774_v35  ;;  %3581 = vmatpush.msrb.mxu2 %v17784_v29  ;;  %v3432_v44 = vsel %vm17341_vm3, %v3427_v30, %v3430_v42  ;;  %v3875_v30 = vsub.f32 %v3852_v25, %v3874_v5 }
 0x423   : > { %3670 = vmatmul.f32.vlgmr.msra.gmra.mxu0 %v3669_v33  ;;  %3760 = vmatpush.msra.mxu3 %v17779_v45  ;;  %v17786_v33 = vld [vmem:[#allocation15_spill] sm:$0xff]  ;;  %v4061_v20 = vsel %vm17343_vm1, %v3432_v44, 0 }
 0x424   : > { %3709 = vmatpush.msra.mxu1 %v17777_v13  ;;  %3787 = vmatpush.msrb.mxu0 %v17783_v60  ;;  %v3876_v25 = vand.u32 4294901760, %v3875_v30 }
 0x425   : > { %3711 = vmatmul.f32.vlgmr.msra.gmra.mxu1 %v13564_v49  ;;  %3585 = vmatpush.msrb.mxu2 %v17785_v32 }
 0x426   : > { %3762 = vmatpush.msra.mxu3 %v17781_v39  ;;  %3791 = vmatpush.msrb.mxu0 %v17784_v29 }
 0x427   : > { %3818 = vmatpush.msrb.mxu1 %v17775_v51  ;;  %3589 = vmatpush.msrb.mxu2 %v17786_v33 }
 0x428   : > { %3764 = vmatpush.msra.mxu3 %v17782_v3  ;;  %3795 = vmatpush.msrb.mxu0 %v17785_v32 }
 0x429   : > { %3820 = vmatpush.msrb.mxu1 %v17779_v45  ;;  %3591 = vmatmul.f32.vlgmr.msrb.gmra.mxu2 %v13558_v12 }
 0x42a   : > { %3768 = vmatmul.f32.vlgmr.msra.gmra.mxu3 %v3667_v37  ;;  %3729 = vmatpush.msra.mxu2 %v17773_v8  ;;  %v13628_v37 = vand.u32 4294901760, %v4061_v20 }
 0x42b   : > { %3799 = vmatpush.msrb.mxu0 %v17786_v33  ;;  %3822 = vmatpush.msrb.mxu1 %v17781_v39 }
 0x42c   : > { %3900 = vmatpush.msrb.mxu3 %v17771_v36  ;;  %3801 = vmatmul.f32.vlgmr.msrb.gmra.mxu0 %v13564_v49  ;;  %v4084_v12 = vsub.f32 %v4061_v20, %v13628_v37 }
 0x42d   : > { %3732 = vmatpush.msra.mxu2 %v17776_v52  ;;  %3824 = vmatpush.msrb.mxu1 %v17782_v3 }
 0x42e   : > { %3906 = vmatpush.msrb.mxu3 %v17772_v4  ;;  %3938 = vmatpush.msra.mxu0 %v17773_v8  ;;  %v4085_v42 = vand.u32 4294901760, %v4084_v12 }
 0x42f   : > { %3826 = vmatmul.f32.vlgmr.msrb.gmra.mxu1 %v13564_v49  ;;  %3735 = vmatpush.msra.mxu2 %v17778_v43  ;;  %v3877_v49 = vsub.f32 %v3875_v30, %v3876_v25 }
 0x430   : > { %3912 = vmatpush.msrb.mxu3 %v17774_v35  ;;  %3941 = vmatpush.msra.mxu0 %v17776_v52  ;;  %v4086_v44 = vsub.f32 %v4084_v12, %v4085_v42 }
 0x431   : > { %3967 = vmatpush.msra.mxu1 %v17775_v51  ;;  %3738 = vmatpush.msra.mxu2 %v17780_v63 }
 0x432   : > { %3918 = vmatpush.msrb.mxu3 %v17777_v13  ;;  %3944 = vmatpush.msra.mxu0 %v17778_v43  ;;  %v4087_v20 = vand.u32 4294901760, %v4086_v44  ;;  %v17793_v44 = vld [vmem:[#allocation24_spill] sm:$0xff] }
 0x433   : > { %3969 = vmatpush.msra.mxu1 %v17779_v45  ;;  %3741 = vmatmul.f32.vlgmr.msra.gmra.mxu2 %v13572_v59  ;;  %v3878_v59 = vand.u32 4294901760, %v3877_v49  ;;  %v17790_v49 = vld [vmem:[#allocation23_spill] sm:$0xff] }
 0x434   : > { %3920 = vmatmul.f32.vlgmr.msrb.gmra.mxu3 %v3874_v5  ;;  %3867 = vmatpush.msrb.mxu2 %v17775_v51 }
 0x435   : > { %3947 = vmatpush.msra.mxu0 %v17780_v63  ;;  %3971 = vmatpush.msra.mxu1 %v17781_v39 }
 0x436   : > { %4027 = vmatpush.msra.mxu3 %v17775_v51  ;;  %3950 = vmatmul.f32.vlgmr.msra.gmra.mxu0 %v3875_v30  ;;  %v17788_v30 = vld [vmem:[#allocation30_spill] sm:$0xff] }
 0x437   : > { %3869 = vmatpush.msrb.mxu2 %v17779_v45  ;;  %3973 = vmatpush.msra.mxu1 %v17782_v3 }
 0x438   : > { %4029 = vmatpush.msra.mxu3 %v17779_v45  ;;  %3977 = vmatmul.f32.vlgmr.msra.gmra.mxu1 %v3876_v25  ;;  %v17789_v25 = vld [vmem:[#allocation20_spill] sm:$0xff] }
 0x439   : > { %3871 = vmatpush.msrb.mxu2 %v17781_v39  ;;  %4076 = vmatpush.msrb.mxu0 %v17775_v51 }
 0x43a   : > { %4031 = vmatpush.msra.mxu3 %v17781_v39  ;;  %4109 = vmatpush.msrb.mxu1 %v17771_v36  ;;  %v17812_v36 = vld [vmem:[#allocation74_spill] sm:$0xff] }
 0x43b   : > { %3873 = vmatpush.msrb.mxu2 %v17782_v3  ;;  %4078 = vmatpush.msrb.mxu0 %v17779_v45 }
 0x43c   : > { %4033 = vmatpush.msra.mxu3 %v17782_v3  ;;  %3879 = vmatmul.f32.vlgmr.msrb.gmra.mxu2 %v3878_v59  ;;  %v17792_v59 = vld [vmem:[#allocation21_spill] sm:$0xff] }
 0x43d   : > { %4035 = vmatmul.f32.vlgmr.msra.gmra.mxu3 %v3874_v5  ;;  %3996 = vmatpush.msra.mxu2 %v17783_v60 }
 0x43e   : > { %4115 = vmatpush.msrb.mxu1 %v17772_v4  ;;  %4080 = vmatpush.msrb.mxu0 %v17781_v39  ;;  %v17811_v4 = vld [vmem:[#allocation48_spill] sm:$0xff] }
 0x43f   : > { %4000 = vmatpush.msra.mxu2 %v17784_v29  ;;  %4176 = vmatpush.msrb.mxu3 %v17775_v51 }
 0x440   : > { %4121 = vmatpush.msrb.mxu1 %v17774_v35  ;;  %4082 = vmatpush.msrb.mxu0 %v17782_v3  ;;  %v17809_v35 = vld [vmem:[#allocation70_spill] sm:$0xff] }
 0x441   : > { %4004 = vmatpush.msra.mxu2 %v17785_v32  ;;  %4178 = vmatpush.msrb.mxu3 %v17779_v45 }
 0x442   : > { %4127 = vmatpush.msrb.mxu1 %v17777_v13  ;;  %4088 = vmatmul.f32.vlgmr.msrb.gmra.mxu0 %v4087_v20  ;;  %v17795_v20 = vld [vmem:[#allocation22_spill] sm:$0xff] }
 0x443   : > { %4008 = vmatpush.msra.mxu2 %v17786_v33  ;;  %4129 = vmatmul.f32.vlgmr.msrb.gmra.mxu1 %v13628_v37  ;;  %v17806_v13 = vld [vmem:[#allocation66_spill] sm:$0xff] }
 0x444   : > { %4010 = vmatmul.f32.vlgmr.msra.gmra.mxu2 %v3874_v5  ;;  %4180 = vmatpush.msrb.mxu3 %v17781_v39  ;;  %v17787_v5 = vld [vmem:[#allocation29_spill] sm:$0xff] }
 0x445   : > { %4147 = vmatpush.msrb.mxu2 %v17773_v8  ;;  %4205 = vmatpush.msra.mxu0 %v17783_v60  ;;  %v17800_v60 = vld [vmem:[#allocation49_spill] sm:$0xff]  ;;  %v17810_v8 = vld [vmem:[#allocation44_spill] sm:$0xff] }
 0x446   : > { %4236 = vmatpush.msra.mxu1 %v17775_v51  ;;  %4182 = vmatpush.msrb.mxu3 %v17782_v3  ;;  %v17807_v51 = vld [vmem:[#allocation40_spill] sm:$0xff] }
 0x447   : > { %4150 = vmatpush.msrb.mxu2 %v17776_v52  ;;  %4209 = vmatpush.msra.mxu0 %v17784_v29  ;;  %v17799_v29 = vld [vmem:[#allocation33_spill] sm:$0xff]  ;;  %v17808_v52 = vld [vmem:[#allocation43_spill] sm:$0xff] }
 0x448   : > { %4238 = vmatpush.msra.mxu1 %v17779_v45  ;;  %4186 = vmatmul.f32.vlgmr.msrb.gmra.mxu3 %v4085_v42  ;;  %v17791_v42 = vld [vmem:[#allocation31_spill] sm:$0xff]  ;;  %v17804_v45 = vld [vmem:[#allocation37_spill] sm:$0xff] }
 0x449   : > { %4153 = vmatpush.msrb.mxu2 %v17778_v43  ;;  %4213 = vmatpush.msra.mxu0 %v17785_v32  ;;  %v17798_v32 = vld [vmem:[#allocation32_spill] sm:$0xff]  ;;  %v17805_v43 = vld [vmem:[#allocation39_spill] sm:$0xff] }
 0x44a   : > { %4240 = vmatpush.msra.mxu1 %v17781_v39  ;;  %4351 = vmatpush.msra.mxu3 %v17787_v5  ;;  %v17802_v39 = vld [vmem:[#allocation36_spill] sm:$0xff] }
 0x44b   : > { %4156 = vmatpush.msrb.mxu2 %v17780_v63  ;;  %4217 = vmatpush.msra.mxu0 %v17786_v33  ;;  %v17797_v33 = vld [vmem:[#allocation45_spill] sm:$0xff]  ;;  %v17803_v63 = vld [vmem:[#allocation56_spill] sm:$0xff] }
 0x44c   : > { %4159 = vmatmul.f32.vlgmr.msrb.gmra.mxu2 %v4084_v12  ;;  %4242 = vmatpush.msra.mxu1 %v17782_v3  ;;  %v17794_v12 = vld [vmem:[#allocation41_spill] sm:$0xff]  ;;  %v17801_v3 = vld [vmem:[#allocation34_spill] sm:$0xff] }
 0x44d   : > { %4219 = vmatmul.f32.vlgmr.msra.gmra.mxu0 %v13628_v37  ;;  %4244 = vmatmul.f32.vlgmr.msra.gmra.mxu1 %v13628_v37  ;;  %v17796_v37 = vld [vmem:[#allocation25_spill] sm:$0xff] }
 0x44e   : > { %4357 = vmatpush.msra.mxu3 %v17788_v30  ;;  %4306 = vmatpush.msra.mxu2 %v17789_v25 }
 0x44f   : > { %4449 = vmatpush.msrb.mxu0 %v17790_v49  ;;  %4502 = vmatpush.msrb.mxu1 %v17789_v25 }
 0x450   : > { %4363 = vmatpush.msra.mxu3 %v17791_v42  ;;  %4308 = vmatpush.msra.mxu2 %v17792_v59 }
 0x451   : > { %4452 = vmatpush.msrb.mxu0 %v17793_v44  ;;  %4504 = vmatpush.msrb.mxu1 %v17792_v59 }
 0x452   : > { %4369 = vmatpush.msra.mxu3 %v17794_v12  ;;  %4310 = vmatpush.msra.mxu2 %v17795_v20 }
 0x453   : > { %4455 = vmatpush.msrb.mxu0 %v17796_v37  ;;  %4506 = vmatpush.msrb.mxu1 %v17795_v20 }
 0x454   : > { %4375 = vmatpush.msra.mxu3 %v17797_v33  ;;  %4312 = vmatpush.msra.mxu2 %v17798_v32 }
 0x455   : > { %4458 = vmatpush.msrb.mxu0 %v17799_v29  ;;  %4508 = vmatpush.msrb.mxu1 %v17798_v32 }
 0x456   : > { %4381 = vmatpush.msra.mxu3 %v17800_v60  ;;  %4314 = vmatpush.msra.mxu2 %v17801_v3 }
 0x457   : > { %4461 = vmatpush.msrb.mxu0 %v17802_v39  ;;  %4510 = vmatpush.msrb.mxu1 %v17801_v3 }
 0x458   : > { %4387 = vmatpush.msra.mxu3 %v17803_v63  ;;  %4316 = vmatpush.msra.mxu2 %v17804_v45 }
 0x459   : > { %4464 = vmatpush.msrb.mxu0 %v17805_v43  ;;  %4512 = vmatpush.msrb.mxu1 %v17804_v45 }
 0x45a   : > { %4393 = vmatpush.msra.mxu3 %v17806_v13  ;;  %4318 = vmatpush.msra.mxu2 %v17807_v51 }
 0x45b   : > { %4467 = vmatpush.msrb.mxu0 %v17808_v52  ;;  %4514 = vmatpush.msrb.mxu1 %v17807_v51 }
 0x45c   : > { %4399 = vmatpush.msra.mxu3 %v17809_v35  ;;  %4320 = vmatpush.msra.mxu2 %v17810_v8 }
 0x45d   : > { %4470 = vmatpush.msrb.mxu0 %v17811_v4  ;;  %4516 = vmatpush.msrb.mxu1 %v17810_v8 }
 0x45e   : > { %4405 = vmatpush.msra.mxu3 %v17812_v36  ;;  %4322 = vmatpush.msra.mxu2 %v17813_v1 }
 0x45f   : > { %4473 = vmatpush.msrb.mxu0 %v17814_v55  ;;  %4518 = vmatpush.msrb.mxu1 %v17813_v1 }
 0x460   : > { %4411 = vmatpush.msra.mxu3 %v17815_v6  ;;  %4324 = vmatpush.msra.mxu2 %v17816_v54 }
 0x461   : > { %4476 = vmatpush.msrb.mxu0 %v17817_v14  ;;  %4520 = vmatpush.msrb.mxu1 %v17816_v54 }
 0x462   : > { %4417 = vmatpush.msra.mxu3 %v17818_v40  ;;  %4326 = vmatpush.msra.mxu2 %v17819_v57 }
 0x463   : > { %4479 = vmatpush.msrb.mxu0 %v17820_v31  ;;  %4522 = vmatpush.msrb.mxu1 %v17819_v57 }
 0x464   : > { %4423 = vmatpush.msra.mxu3 %v17821_v62  ;;  %4328 = vmatpush.msra.mxu2 %v17822_v0 }
 0x465   : > { %4482 = vmatpush.msrb.mxu0 %v17823_v10  ;;  %4524 = vmatpush.msrb.mxu1 %v17822_v0 }
 0x466   : > { %4429 = vmatpush.msra.mxu3 %v17824_v27  ;;  %4330 = vmatpush.msra.mxu2 %v17825_v53 }
 0x467   : > { %4485 = vmatpush.msrb.mxu0 %v17826_v19  ;;  %4526 = vmatpush.msrb.mxu1 %v17825_v53 }
 0x468   : > { %4435 = vmatpush.msra.mxu3 %v17827_v24  ;;  %4332 = vmatpush.msra.mxu2 %v17828_v11 }
 0x469   : > { %4488 = vmatpush.msrb.mxu0 %v17829_v9  ;;  %4528 = vmatpush.msrb.mxu1 %v17828_v11 }
 0x46a   : > { %4441 = vmatpush.msra.mxu3 %v17830_v18  ;;  %4334 = vmatpush.msra.mxu2 %v17831_v2 }
 0x46b   : > { %4491 = vmatpush.msrb.mxu0 %v17832_v22  ;;  %4530 = vmatpush.msrb.mxu1 %v17831_v2 }
 0x46c   : > { %4610 = vmatpush.msrb.mxu3 %v17789_v25  ;;  %4336 = vmatpush.msra.mxu2 %v17833_v16 }
 0x46d   : > { %4494 = vmatpush.msrb.mxu0 %v17835_v46  ;;  %4532 = vmatpush.msrb.mxu1 %v17833_v16  ;;  %v13780_v46 = vpop.f32.mrf.mxu3 }
 0x46e   : > { %4612 = vmatpush.msrb.mxu3 %v17792_v59  ;;  %4543 = vmatpush.msrb.mxu2 %v17834_v21  ;;  %17856 = vst [vmem:[#allocation252_spill] sm:$0xff] %v13780_v46  ;;  %v13794_v46 = vpop.f32.mrf.mxu2 }
 0x46f   : > { %4658 = vmatpush.msra.mxu0 %v17838_v47  ;;  %4692 = vmatpush.msra.mxu1 %v17839_v34  ;;  %v13774_v34 = vpop.f32.mrf.mxu0  ;;  %17863 = vst [vmem:[#allocation255_spill] sm:$0xff] %v13794_v46 }
 0x470   : > { %4614 = vmatpush.msrb.mxu3 %v17795_v20  ;;  %4547 = vmatpush.msrb.mxu2 %v17837_v38  ;;  %17853 = vst [vmem:[#allocation251_spill] sm:$0xff] %v13774_v34 }
 0x471   : > { %4660 = vmatpush.msra.mxu0 %v17841_v58  ;;  %4698 = vmatpush.msra.mxu1 %v17842_v56  ;;  %v17852_v56 = vld [vmem:[#allocation103_spill] sm:$0xff] }
 0x472   : > { %4616 = vmatpush.msrb.mxu3 %v17798_v32  ;;  %4551 = vmatpush.msrb.mxu2 %v17840_v17 }
 0x473   : > { %4662 = vmatpush.msra.mxu0 %v17844_v41  ;;  %4704 = vmatpush.msra.mxu1 %v17845_v61  ;;  %v17855_v61 = vld [vmem:[#allocation52_spill] sm:$0xff] }
 0x474   : > { %4618 = vmatpush.msrb.mxu3 %v17801_v3  ;;  %4555 = vmatpush.msrb.mxu2 %v17843_v7 }
 0x475   : > { %4664 = vmatpush.msra.mxu0 %v17848_v28  ;;  %4710 = vmatpush.msra.mxu1 %v17849_v48  ;;  %v17857_v48 = vld [vmem:[#allocation57_spill] sm:$0xff] }
 0x476   : > { %4620 = vmatpush.msrb.mxu3 %v17804_v45  ;;  %4559 = vmatpush.msrb.mxu2 %v17847_v50 }
 0x477   : > { %4666 = vmatpush.msra.mxu0 %v17851_v15  ;;  %4716 = vmatpush.msra.mxu1 %v17852_v56  ;;  %v17859_v56 = vld [vmem:[#allocation63_spill] sm:$0xff] }
 0x478   : > { %4622 = vmatpush.msrb.mxu3 %v17807_v51  ;;  %4563 = vmatpush.msrb.mxu2 %v17850_v26  ;;  %v13784_v26 = vpop.f32.mrf.mxu1 }
 0x479   : > { %17858 = vst [vmem:[#allocation253_spill] sm:$0xff] %v13784_v26  ;;  %v17865_v26 = vld [vmem:[#allocation69_spill] sm:$0xff] }
 0x47a   : > { %4624 = vmatpush.msrb.mxu3 %v17810_v8  ;;  %4567 = vmatpush.msrb.mxu2 %v17854_v23  ;;  %v17861_v23 = vld [vmem:[#allocation67_spill] sm:$0xff] }
 0x47c   : > { %4626 = vmatpush.msrb.mxu3 %v17813_v1  ;;  %4571 = vmatpush.msrb.mxu2 %v17855_v61  ;;  %v17862_v61 = vld [vmem:[#allocation68_spill] sm:$0xff] }
 0x47e   : > { %4628 = vmatpush.msrb.mxu3 %v17816_v54  ;;  %4575 = vmatpush.msrb.mxu2 %v17857_v48 }
 0x480   : > { %4630 = vmatpush.msrb.mxu3 %v17819_v57  ;;  %4579 = vmatpush.msrb.mxu2 %v17859_v56  ;;  %v13788_v34 = vpop.f32.mrf.mxu0 }
 0x481   : > { %17860 = vst [vmem:[#allocation254_spill] sm:$0xff] %v13788_v34  ;;  %v17867_v34 = vld [vmem:[#allocation72_spill] sm:$0xff] }
 0x482   : > { %4632 = vmatpush.msrb.mxu3 %v17822_v0  ;;  %4583 = vmatpush.msrb.mxu2 %v17861_v23  ;;  %v13800_v48 = vpop.f32.mrf.mxu1  ;;  %v17868_v23 = vld [vmem:[#allocation76_spill] sm:$0xff] }
 0x483   : > { %17866 = vst [vmem:[#allocation257_spill] sm:$0xff] %v13800_v48 }
 0x484   : > { %4634 = vmatpush.msrb.mxu3 %v17825_v53  ;;  %4587 = vmatpush.msrb.mxu2 %v17862_v61  ;;  %v13796_v50 = vpop.f32.mrf.mxu3  ;;  %v17870_v61 = vld [vmem:[#allocation79_spill] sm:$0xff] }
 0x485   : > { %17864 = vst [vmem:[#allocation256_spill] sm:$0xff] %v13796_v50 }
 0x486   : > { %4636 = vmatpush.msrb.mxu3 %v17828_v11  ;;  %4591 = vmatpush.msrb.mxu2 %v17865_v26 }
 0x488   : > { %4638 = vmatpush.msrb.mxu3 %v17831_v2  ;;  %4595 = vmatpush.msrb.mxu2 %v17867_v34  ;;  %v13806_v56 = vpop.f32.mrf.mxu0 }
 0x489   : > { %17869 = vst [vmem:[#allocation258_spill] sm:$0xff] %v13806_v56 }
 0x48a   : > { %4640 = vmatpush.msrb.mxu3 %v17833_v16  ;;  %4599 = vmatpush.msrb.mxu2 %v17868_v23  ;;  %v13813_v22 = vpop.f32.mrf.mxu1 }
 0x48b   : > { %17873 = vst [vmem:[#allocation261_spill] sm:$0xff] %v13813_v22 }
 0x48c   : > { %4603 = vmatpush.msrb.mxu2 %v17870_v61  ;;  %v13809_v46 = vpop.f32.mrf.mxu2  ;;  %v13811_v50 = vpop.f32.mrf.mxu3 }
 0x48d   : > { %17871 = vst [vmem:[#allocation259_spill] sm:$0xff] %v13809_v46 }
 0x48e   : > { %17872 = vst [vmem:[#allocation260_spill] sm:$0xff] %v13811_v50 }
 0x490   : > { %v13819_v7 = vpop.f32.mrf.mxu0 }
 0x491   : > { %17876 = vst [vmem:[#allocation264_spill] sm:$0xff] %v13819_v7 }
 0x492   : > { %v13821_v34 = vpop.f32.mrf.mxu1 }
 0x493   : > { %17877 = vst [vmem:[#allocation265_spill] sm:$0xff] %v13821_v34  ;;  %v13840_v34 = vld [vmem:[%s16815_s2] ss:$0 sm:$0xff] }
 0x494   : > { %v13815_v26 = vpop.f32.mrf.mxu2  ;;  %v13817_v48 = vpop.f32.mrf.mxu3 }
 0x495   : > { %17874 = vst [vmem:[#allocation262_spill] sm:$0xff] %v13815_v26 }
 0x496   : > { %17875 = vst [vmem:[#allocation263_spill] sm:$0xff] %v13817_v48 }
 0x498   : > { %v13827_v56 = vpop.f32.mrf.mxu0 }
 0x49a   : > { %v13831_v46 = vpop.f32.mrf.mxu1 }
 0x49c   : > { %v13823_v9 = vpop.f32.mrf.mxu2  ;;  %v13825_v23 = vpop.f32.mrf.mxu3 }
 0x49d   : > { %17878 = vst [vmem:[#allocation266_spill] sm:$0xff] %v13823_v9 }
 0x4a0   : > { %v3671_v22 = vpop.f32.mrf.mxu0 }
 0x4a1   : > { %v3672_v7 = vadd.f32 %v13840_v34, %v3671_v22 }
 0x4a2   : > { %v3712_v48 = vpop.f32.mrf.mxu1 }
 0x4a3   : > { %v3713_v19 = vadd.f32 %v3712_v48, %v3672_v7 }
 0x4a4   : > { %v13829_v61 = vpop.f32.mrf.mxu2  ;;  %v13833_v50 = vpop.f32.mrf.mxu3 }
 0x4a9   : > { %v3802_v17 = vpop.f32.mrf.mxu0 }
 0x4ac   : > { %v13835_v26 = vpop.f32.mrf.mxu2  ;;  %v3827_v21 = vpop.f32.mrf.mxu1 }
 0x4ad   : > { %v3769_v9 = vpop.f32.mrf.mxu3 }
 0x4b3   : > { %v3951_v11 = vpop.f32.mrf.mxu0 }
 0x4b5   : > { %v3978_v24 = vpop.f32.mrf.mxu1 }
 0x4b6   : > { %v3742_v38 = vpop.f32.mrf.mxu2 }
 0x4b7   : > { %v3743_v10 = vadd.f32 %v3742_v38, %v3713_v19  ;;  %v3921_v2 = vpop.f32.mrf.mxu3 }
 0x4b9   : > { %v3770_v16 = vadd.f32 %v3769_v9, %v3743_v10 }
 0x4bb   : > { %v3803_v31 = vadd.f32 %v3802_v17, %v3770_v16 }
 0x4bd   : > { %v3828_v14 = vadd.f32 %v3827_v21, %v3803_v31 }
 0x4bf   : > { %v3880_v55 = vpop.f32.mrf.mxu2  ;;  %v11559_v53 = vadd.f32 -1.0, %v3828_v14  ;;  %v4089_v57 = vpop.f32.mrf.mxu0 }
 0x4c0   : > { %v3881_v18 = vadd.f32 %v13840_v34, %v3880_v55  ;;  %v4036_v48 = vpop.f32.mrf.mxu3  ;;  %v4090_v38 = vadd.f32 %v13840_v34, %v4089_v57  ;;  %v4130_v21 = vpop.f32.mrf.mxu1 }
 0x4c1   : > { %v11560_v4 = vmul.f32 -1.442695, %v11559_v53 }
 0x4c2   : > { %v3922_v0 = vadd.f32 %v3921_v2, %v3881_v18  ;;  %v4131_v10 = vadd.f32 %v4130_v21, %v4090_v38 }
 0x4c3   : > { %11719 = vpow2.f32 %v11560_v4 }
 0x4c4   : > { %v3952_v22 = vadd.f32 %v3951_v11, %v3922_v0 }
 0x4c6   : > { %v3979_v52 = vadd.f32 %v3978_v24, %v3952_v22 }
 0x4c7   : > { %v4011_v7 = vpop.f32.mrf.mxu2 }
 0x4c8   : > { %v4012_v19 = vadd.f32 %v4011_v7, %v3979_v52 }
 0x4c9   : > { %v11720_v17 = vpop.eup %11719 }
 0x4ca   : > { %v4037_v16 = vadd.f32 %v4036_v48, %v4012_v19  ;;  %v3834_v31 = vadd.f32 1.0, %v11720_v17  ;;  %v4220_v24 = vpop.f32.mrf.mxu0  ;;  %v4245_v52 = vpop.f32.mrf.mxu1 }
 0x4cb   : > { %v4187_v18 = vpop.f32.mrf.mxu3 }
 0x4cc   : > { %v11561_v9 = vadd.f32 -1.0, %v4037_v16  ;;  %11721 = vrcp.f32 %v3834_v31  ;;  %v3846_v48 = vand.u32 2147483648, %v3834_v31  ;;  %v3844_v38 = vand.u32 2147483647, %v3834_v31 }
 0x4cd   : > { %vm3840_vm13 = vweird.f32 %v3834_v31 }
 0x4ce   : > { %v11562_v55 = vmul.f32 -1.442695, %v11561_v9  ;;  %vm3845_vm3 = vcmp.eq.f32.partialorder %v3844_v38, 8.507059e+37 }
 0x4cf   : > { %v4160_v53 = vpop.f32.mrf.mxu2 }
 0x4d0   : > { %11723 = vpow2.f32 %v11562_v55  ;;  %v4161_v2 = vadd.f32 %v4160_v53, %v4131_v10  ;;  %v3847_v10 = vor.u32 1.1754944e-38, %v3846_v48 }
 0x4d2   : > { %v11722_v0 = vpop.eup %11721  ;;  %v4188_v11 = vadd.f32 %v4187_v18, %v4161_v2 }
 0x4d3   : > { %v3836_v4 = vmul.f32 %v11722_v0, %v3834_v31  ;;  %vm3841_vm7 = vweird.f32 %v11722_v0 }
 0x4d4   : > { %v4221_v22 = vadd.f32 %v4220_v24, %v4188_v11  ;;  %vm3842_vm4 = vmor %vm3840_vm13, %vm3841_vm7 }
 0x4d5   : > { %v3837_v7 = vsub.f32 1.0, %v3836_v4 }
 0x4d6   : > { %v11724_v57 = vpop.eup %11723  ;;  %v4246_v27 = vadd.f32 %v4245_v52, %v4221_v22 }
 0x4d7   : > { %v4043_v19 = vadd.f32 1.0, %v11724_v57  ;;  %v3838_v17 = vmul.f32 %v11722_v0, %v3837_v7 }
 0x4d8   : > { %v11563_v21 = vadd.f32 -1.0, %v4246_v27 }
 0x4d9   : > { %11725 = vrcp.f32 %v4043_v19  ;;  %v3839_v9 = vadd.f32 %v11722_v0, %v3838_v17  ;;  %v4055_v7 = vand.u32 2147483648, %v4043_v19  ;;  %v4053_v17 = vand.u32 2147483647, %v4043_v19 }
 0x4da   : > { %v11564_v55 = vmul.f32 -1.442695, %v11563_v21  ;;  %vm4049_vm7 = vweird.f32 %v4043_v19 }
 0x4db   : > { %v3843_v53 = vsel %vm3842_vm4, %v11722_v0, %v3839_v9  ;;  %v4056_v0 = vor.u32 1.1754944e-38, %v4055_v7  ;;  %vm4054_vm4 = vcmp.eq.f32.partialorder %v4053_v17, 8.507059e+37 }
 0x4dc   : > { %11727 = vpow2.f32 %v11564_v55  ;;  %v3848_v18 = vsel %vm3845_vm3, %v3847_v10, %v3843_v53 }
 0x4dd   : > { %v3850_v2 = vmul.f32 %v3848_v18, %v3828_v14 }
 0x4df   : > { %v11726_v11 = vpop.eup %11725  ;;  %4270 = vrot.lane.b32.xlu0 %v3850_v2, %s11818_s24 }
 0x4e0   : > { %v4045_v24 = vmul.f32 %v11726_v11, %v4043_v19  ;;  %vm4050_vm2 = vweird.f32 %v11726_v11 }
 0x4e1   : > { %vm4051_vm13 = vmor %vm4049_vm7, %vm4050_vm2 }
 0x4e2   : > { %v11728_v4 = vpop.eup %11727  ;;  %v4046_v22 = vsub.f32 1.0, %v4045_v24 }
 0x4e3   : > { %v4252_v52 = vadd.f32 1.0, %v11728_v4 }
 0x4e4   : > { %v4047_v57 = vmul.f32 %v11726_v11, %v4046_v22 }
 0x4e5   : > { %11729 = vrcp.f32 %v4252_v52  ;;  %v4264_v10 = vand.u32 2147483648, %v4252_v52  ;;  %v4262_v18 = vand.u32 2147483647, %v4252_v52  ;;  %vm4258_vm1 = vweird.f32 %v4252_v52 }
 0x4e6   : > { %v4048_v31 = vadd.f32 %v11726_v11, %v4047_v57 }
 0x4e7   : > { %v4265_v24 = vor.u32 1.1754944e-38, %v4264_v10  ;;  %vm4263_vm2 = vcmp.eq.f32.partialorder %v4262_v18, 8.507059e+37 }
 0x4e8   : > { %v4052_v48 = vsel %vm4051_vm13, %v11726_v11, %v4048_v31 }
 0x4e9   : > { %v4057_v38 = vsel %vm4054_vm4, %v4056_v0, %v4052_v48 }
 0x4ea   : > { %v4059_v14 = vmul.f32 %v4057_v38, %v4037_v16  ;;  %v3462_v16 = vadd.f32 %v13840_v34, %v13829_v61 }
 0x4eb   : > { %v11730_v21 = vpop.eup %11729 }
 0x4ec   : > { %4274 = vrot.lane.b32.xlu1 %v4059_v14, %s11819_s26  ;;  %v4254_v9 = vmul.f32 %v11730_v21, %v4252_v52  ;;  %vm4259_vm3 = vweird.f32 %v11730_v21  ;;  %v3503_v22 = vadd.f32 %v13825_v23, %v3462_v16 }
 0x4ed   : > { %vm4260_vm6 = vmor %vm4258_vm1, %vm4259_vm3 }
 0x4ee   : > { %v4255_v55 = vsub.f32 1.0, %v4254_v9  ;;  %v3533_v7 = vadd.f32 %v13827_v56, %v3503_v22 }
 0x4f0   : > { %v4256_v53 = vmul.f32 %v11730_v21, %v4255_v55  ;;  %v3560_v57 = vadd.f32 %v13831_v46, %v3533_v7 }
 0x4f2   : > { %v4257_v2 = vadd.f32 %v11730_v21, %v4256_v53  ;;  %v3593_v17 = vadd.f32 %v13835_v26, %v3560_v57 }
 0x4f4   : > { %v4261_v19 = vsel %vm4260_vm6, %v11730_v21, %v4257_v2  ;;  %v3618_v52 = vadd.f32 %v13833_v50, %v3593_v17 }
 0x4f5   : > { %v4266_v4 = vsel %vm4263_vm2, %v4265_v24, %v4261_v19 }
 0x4f6   : > { %v4268_v11 = vmul.f32 %v4266_v4, %v4246_v27  ;;  %v11557_v31 = vadd.f32 -1.0, %v3618_v52 }
 0x4f8   : > { %4278 = vrot.lane.b32.xlu2 %v4268_v11, %s11820_s27  ;;  %v11558_v0 = vmul.f32 -1.442695, %v11557_v31 }
 0x4fa   : > { %11731 = vpow2.f32 %v11558_v0  ;;  %v17880_v0 = vld [vmem:[#allocation85_spill] sm:$0xff] }
 0x500   : > { %v11732_v48 = vpop.eup %11731 }
 0x501   : > { %v3624_v27 = vadd.f32 1.0, %v11732_v48 }
 0x503   : > { %11733 = vrcp.f32 %v3624_v27  ;;  %v3636_v23 = vand.u32 2147483648, %v3624_v27  ;;  %vm3630_vm6 = vweird.f32 %v3624_v27  ;;  %v3634_v56 = vand.u32 2147483647, %v3624_v27 }
 0x505   : > { %v3637_v26 = vor.u32 1.1754944e-38, %v3636_v23  ;;  %vm3635_vm13 = vcmp.eq.f32.partialorder %v3634_v56, 8.507059e+37  ;;  %v17883_v23 = vld [vmem:[#allocation95_spill] sm:$0xff] }
 0x506   : > { %v17884_v56 = vld [vmem:[#allocation99_spill] sm:$0xff] }
 0x509   : > { %v11734_v38 = vpop.eup %11733 }
 0x50a   : > { %v3626_v14 = vmul.f32 %v11734_v38, %v3624_v27  ;;  %vm3631_vm1 = vweird.f32 %v11734_v38 }
 0x50b   : > { %vm3632_vm7 = vmor %vm3630_vm6, %vm3631_vm1 }
 0x50c   : > { %v3627_v21 = vsub.f32 1.0, %v3626_v14 }
 0x50e   : > { %v3628_v61 = vmul.f32 %v11734_v38, %v3627_v21 }
 0x510   : > { %v3629_v34 = vadd.f32 %v11734_v38, %v3628_v61  ;;  %v17882_v61 = vld [vmem:[#allocation91_spill] sm:$0xff] }
 0x512   : > { %v3633_v46 = vsel %vm3632_vm7, %v11734_v38, %v3629_v34  ;;  %v17881_v38 = vld [vmem:[#allocation88_spill] sm:$0xff] }
 0x513   : > { %v3638_v50 = vsel %vm3635_vm13, %v3637_v26, %v3633_v46  ;;  %v17885_v46 = vld [vmem:[#allocation87_spill] sm:$0xff]  ;;  %v17886_v26 = vld [vmem:[#allocation90_spill] sm:$0xff] }
 0x514   : > { %v3640_v55 = vmul.f32 %v3638_v50, %v3618_v52  ;;  %v17887_v50 = vld [vmem:[#allocation94_spill] sm:$0xff] }
 0x551   : > { %v4271_v9 = vpop.permute.xlu0 %4270 }
 0x552   : > { %v4281_v10 = vsel %vm1301_vm8, %v3640_v55, %v4271_v9  ;;  %v4279_v53 = vpop.permute.xlu2 %4278  ;;  %v17888_v9 = vld [vmem:[#allocation98_spill] sm:$0xff]  ;;  %v17889_v55 = vld [vmem:[#allocation101_spill] sm:$0xff] }
 0x55e   : > { %v4275_v18 = vpop.permute.xlu1 %4274 }
 0x55f   : > { %v4282_v2 = vsel %vm1303_vm9, %v4281_v10, %v4275_v18  ;;  %v4283_v24 = vsel %vm1305_vm10, %v4275_v18, %v4279_v53  ;;  %v17890_v10 = vld [vmem:[#allocation81_spill] sm:$0xff]  ;;  %v17892_v18 = vld [vmem:[#allocation43_spill] sm:$0xff] }
 0x560   : > { %4284 = vst [vmem:[#allocation2] sm:$0x1f] %v4282_v2  ;;  %v17891_v53 = vld [vmem:[#allocation53_spill] sm:$0xff]  ;;  %v17893_v2 = vld [vmem:[#allocation82_spill] sm:$0xff] }
 0x561   : > { %4285 = vst.msk [vmem:[#allocation2 + $0x8] sm:$0x1f] %vm1308_vm11, %v4283_v24  ;;  %v17894_v24 = vld [vmem:[#allocation54_spill] sm:$0xff] }
 0x567   : > { %v4286_v19 = vld [vmem:[#allocation2] sm:$0xf] }
 0x568   : > { %v4288_v4 = vld [vmem:[#allocation2] sm:$0x1e]  ;;  %v4287_v11 = vld [vmem:[#allocation2 + $0x8] sm:$0xf]  ;;  %4291 = vrot.lane.b32.xlu0 %v4286_v19, %s17879_s21  ;;  %v4337_v22 = vand.u32 4294901760, %v4286_v19 }
 0x569   : > { %v4298_v16 = vrot.slane %v4288_v4, 1  ;;  %4293 = vrot.lane.b32.xlu1 %v4287_v11, %s17879_s21  ;;  %v4303_v7 = vsel %vm1305_vm10, %v4287_v11, 0  ;;  %v17896_v4 = vld [vmem:[#allocation83_spill] sm:$0xff] }
 0x56a   : > { %v4667_v57 = vand.u32 4294901760, %v4303_v7  ;;  %4443 = vmatmul.f32.vlgmr.msra.gmra.mxu3 %v4337_v22  ;;  %v4338_v17 = vsub.f32 %v4286_v19, %v4337_v22  ;;  %v17895_v19 = vld [vmem:[#allocation48_spill] sm:$0xff]  ;;  %v17897_v11 = vld [vmem:[#allocation55_spill] sm:$0xff] }
 0x56b   : > { %4299 = vrot.lane.b32.xlu2 %v4298_v16, %s11819_s26  ;;  %4913 = vmatpush.msra.mxu3 %v17787_v5  ;;  %v17898_v16 = vld [vmem:[#allocation50_spill] sm:$0xff] }
 0x56c   : > { %v4668_v52 = vsub.f32 %v4303_v7, %v4667_v57  ;;  %4497 = vmatmul.f32.vlgmr.msrb.gmra.mxu0 %v4338_v17  ;;  %v4339_v31 = vand.u32 4294901760, %v4338_v17  ;;  %v17900_v7 = vld [vmem:[#allocation58_spill] sm:$0xff] }
 0x56d   : > { %4735 = vmatpush.msrb.mxu0 %v17880_v0  ;;  %4919 = vmatpush.msra.mxu3 %v17788_v30  ;;  %v3394_v30 = vld [vmem:[%s16820_s7 + $0x58] sm:$0xff] }
 0x56e   : > { %v4669_v48 = vand.u32 4294901760, %v4668_v52  ;;  %4536 = vmatmul.f32.vlgmr.msrb.gmra.mxu1 %v4339_v31  ;;  %v4340_v27 = vsub.f32 %v4338_v17, %v4339_v31  ;;  %v17902_v17 = vld [vmem:[#allocation60_spill] sm:$0xff]  ;;  %v17904_v31 = vld [vmem:[#allocation26_spill] sm:$0xff] }
 0x56f   : > { %4738 = vmatpush.msrb.mxu0 %v17881_v38  ;;  %4766 = vmatpush.msrb.mxu1 %v17838_v47 }
 0x570   : > { %v4670_v14 = vsub.f32 %v4668_v52, %v4669_v48  ;;  %v4341_v21 = vand.u32 4294901760, %v4340_v27  ;;  %4925 = vmatpush.msra.mxu3 %v17791_v42  ;;  %v17906_v27 = vld [vmem:[#allocation27_spill] sm:$0xff]  ;;  %v3396_v42 = vld [vmem:[%s16820_s7 + $0x68] sm:$0xff] }
 0x571   : > { %4741 = vmatpush.msrb.mxu0 %v17882_v61  ;;  %4768 = vmatpush.msrb.mxu1 %v17841_v58  ;;  %v15272_v5 = vand.u32 4294901760, %v3396_v42 }
 0x572   : > { %v4671_v34 = vand.u32 4294901760, %v4670_v14  ;;  %4342 = vmatmul.f32.vlgmr.msra.gmra.mxu2 %v4341_v21  ;;  %4642 = vmatmul.f32.vlgmr.msrb.gmra.mxu3 %v4337_v22  ;;  %v17907_v14 = vld [vmem:[#allocation62_spill] sm:$0xff]  ;;  %v17908_v21 = vld [vmem:[#allocation28_spill] sm:$0xff] }
 0x573   : > { %4744 = vmatpush.msrb.mxu0 %v17883_v23  ;;  %4770 = vmatpush.msrb.mxu1 %v17844_v41 }
 0x574   : > { %4672 = vmatmul.f32.vlgmr.msra.gmra.mxu0 %v4671_v34  ;;  %4931 = vmatpush.msra.mxu3 %v17794_v12  ;;  %v17909_v34 = vld [vmem:[#allocation64_spill] sm:$0xff] }
 0x575   : > { %4747 = vmatpush.msrb.mxu0 %v17884_v56  ;;  %4772 = vmatpush.msrb.mxu1 %v17848_v28 }
 0x576   : > { %4718 = vmatmul.f32.vlgmr.msra.gmra.mxu1 %v4667_v57  ;;  %4868 = vmatpush.msra.mxu2 %v17789_v25 }
 0x577   : > { %4796 = vmatpush.msra.mxu0 %v17885_v46  ;;  %4774 = vmatpush.msrb.mxu1 %v17851_v15 }
 0x578   : > { %4937 = vmatpush.msra.mxu3 %v17797_v33  ;;  %4870 = vmatpush.msra.mxu2 %v17792_v59 }
 0x579   : > { %4800 = vmatpush.msra.mxu0 %v17886_v26  ;;  %4830 = vmatpush.msra.mxu1 %v17838_v47 }
 0x57a   : > { %4605 = vmatmul.f32.vlgmr.msrb.gmra.mxu2 %v4337_v22  ;;  %4943 = vmatpush.msra.mxu3 %v17800_v60  ;;  %v17899_v22 = vld [vmem:[#allocation59_spill] sm:$0xff] }
 0x57b   : > { %4804 = vmatpush.msra.mxu0 %v17887_v50  ;;  %4832 = vmatpush.msra.mxu1 %v17841_v58 }
 0x57c   : > { %4750 = vmatmul.f32.vlgmr.msrb.gmra.mxu0 %v4668_v52  ;;  %4872 = vmatpush.msra.mxu2 %v17795_v20  ;;  %v17903_v52 = vld [vmem:[#allocation73_spill] sm:$0xff] }
 0x57d   : > { %4808 = vmatpush.msra.mxu0 %v17888_v9  ;;  %4834 = vmatpush.msra.mxu1 %v17844_v41 }
 0x57e   : > { %4778 = vmatmul.f32.vlgmr.msrb.gmra.mxu1 %v4669_v48  ;;  %4949 = vmatpush.msra.mxu3 %v17803_v63  ;;  %v17905_v48 = vld [vmem:[#allocation61_spill] sm:$0xff] }
 0x57f   : > { %4812 = vmatpush.msra.mxu0 %v17889_v55  ;;  %4836 = vmatpush.msra.mxu1 %v17848_v28 }
 0x580   : > { %4874 = vmatpush.msra.mxu2 %v17798_v32  ;;  %4955 = vmatpush.msra.mxu3 %v17806_v13 }
 0x581   : > { %4838 = vmatpush.msra.mxu1 %v17851_v15  ;;  %5011 = vmatpush.msrb.mxu0 %v17790_v49 }
 0x582   : > { %4876 = vmatpush.msra.mxu2 %v17801_v3  ;;  %4961 = vmatpush.msra.mxu3 %v17809_v35 }
 0x583   : > { %5014 = vmatpush.msrb.mxu0 %v17793_v44  ;;  %5064 = vmatpush.msrb.mxu1 %v17789_v25  ;;  %v3392_v44 = vld [vmem:[%s16820_s7 + $0x48] sm:$0xff] }
 0x584   : > { %4814 = vmatmul.f32.vlgmr.msra.gmra.mxu0 %v4667_v57  ;;  %4878 = vmatpush.msra.mxu2 %v17804_v45 }
 0x585   : > { %4967 = vmatpush.msra.mxu3 %v17812_v36  ;;  %5017 = vmatpush.msrb.mxu0 %v17796_v37  ;;  %v3398_v37 = vld [vmem:[%s16820_s7 + $0x78] sm:$0xff] }
 0x586   : > { %4840 = vmatmul.f32.vlgmr.msra.gmra.mxu1 %v4667_v57  ;;  %4880 = vmatpush.msra.mxu2 %v17807_v51  ;;  %v17901_v57 = vld [vmem:[#allocation65_spill] sm:$0xff] }
 0x587   : > { %4973 = vmatpush.msra.mxu3 %v17815_v6  ;;  %5066 = vmatpush.msrb.mxu1 %v17792_v59 }
 0x588   : > { %4882 = vmatpush.msra.mxu2 %v17810_v8  ;;  %5020 = vmatpush.msrb.mxu0 %v17799_v29 }
 0x589   : > { %4979 = vmatpush.msra.mxu3 %v17818_v40  ;;  %5068 = vmatpush.msrb.mxu1 %v17795_v20 }
 0x58a   : > { %4884 = vmatpush.msra.mxu2 %v17813_v1  ;;  %5023 = vmatpush.msrb.mxu0 %v17802_v39 }
 0x58b   : > { %4985 = vmatpush.msra.mxu3 %v17821_v62  ;;  %5070 = vmatpush.msrb.mxu1 %v17798_v32 }
 0x58c   : > { %4886 = vmatpush.msra.mxu2 %v17816_v54  ;;  %5026 = vmatpush.msrb.mxu0 %v17805_v43 }
 0x58d   : > { %4991 = vmatpush.msra.mxu3 %v17890_v10  ;;  %5072 = vmatpush.msrb.mxu1 %v17801_v3 }
 0x58e   : > { %4888 = vmatpush.msra.mxu2 %v17891_v53  ;;  %5029 = vmatpush.msrb.mxu0 %v17892_v18 }
 0x58f   : > { %4997 = vmatpush.msra.mxu3 %v17893_v2  ;;  %5074 = vmatpush.msrb.mxu1 %v17804_v45  ;;  %v17913_v2 = vld [vmem:[#allocation77_spill] sm:$0xff] }
 0x590   : > { %4890 = vmatpush.msra.mxu2 %v17894_v24  ;;  %5032 = vmatpush.msrb.mxu0 %v17895_v19 }
 0x591   : > { %5003 = vmatpush.msra.mxu3 %v17896_v4  ;;  %5076 = vmatpush.msrb.mxu1 %v17807_v51  ;;  %v17911_v4 = vld [vmem:[#allocation71_spill] sm:$0xff] }
 0x592   : > { %4892 = vmatpush.msra.mxu2 %v17897_v11  ;;  %5035 = vmatpush.msrb.mxu0 %v17898_v16 }
 0x593   : > { %5172 = vmatpush.msrb.mxu3 %v17789_v25  ;;  %5078 = vmatpush.msrb.mxu1 %v17810_v8 }
 0x594   : > { %4894 = vmatpush.msra.mxu2 %v17899_v22  ;;  %5038 = vmatpush.msrb.mxu0 %v17900_v7 }
 0x595   : > { %5174 = vmatpush.msrb.mxu3 %v17792_v59  ;;  %5080 = vmatpush.msrb.mxu1 %v17813_v1 }
 0x596   : > { %4896 = vmatpush.msra.mxu2 %v17901_v57  ;;  %5041 = vmatpush.msrb.mxu0 %v17902_v17  ;;  %v11784_v17 = vld [vmem:[%s16817_s4] ss:$0 sm:$0xff] }
 0x597   : > { %5176 = vmatpush.msrb.mxu3 %v17795_v20  ;;  %5082 = vmatpush.msrb.mxu1 %v17816_v54 }
 0x598   : > { %4898 = vmatpush.msra.mxu2 %v17903_v52  ;;  %5044 = vmatpush.msrb.mxu0 %v17905_v48 }
 0x599   : > { %5178 = vmatpush.msrb.mxu3 %v17798_v32  ;;  %5084 = vmatpush.msrb.mxu1 %v17891_v53 }
 0x59a   : > { %5105 = vmatpush.msrb.mxu2 %v17904_v31  ;;  %5047 = vmatpush.msrb.mxu0 %v17907_v14  ;;  %v17910_v31 = vld [vmem:[#allocation35_spill] sm:$0xff] }
 0x59b   : > { %5180 = vmatpush.msrb.mxu3 %v17801_v3  ;;  %5086 = vmatpush.msrb.mxu1 %v17894_v24 }
 0x59c   : > { %5109 = vmatpush.msrb.mxu2 %v17906_v27  ;;  %5050 = vmatpush.msrb.mxu0 %v17909_v34  ;;  %v17912_v27 = vld [vmem:[#allocation38_spill] sm:$0xff]  ;;  %v17921_v34 = vld [vmem:[#allocation63_spill] sm:$0xff] }
 0x59d   : > { %5182 = vmatpush.msrb.mxu3 %v17804_v45  ;;  %5088 = vmatpush.msrb.mxu1 %v17897_v11 }
 0x59e   : > { %5113 = vmatpush.msrb.mxu2 %v17908_v21  ;;  %5053 = vmatpush.msrb.mxu0 %v17911_v4  ;;  %v17914_v21 = vld [vmem:[#allocation42_spill] sm:$0xff]  ;;  %v17919_v4 = vld [vmem:[#allocation57_spill] sm:$0xff] }
 0x59f   : > { %5184 = vmatpush.msrb.mxu3 %v17807_v51  ;;  %5090 = vmatpush.msrb.mxu1 %v17899_v22 }
 0x5a0   : > { %5117 = vmatpush.msrb.mxu2 %v17910_v31  ;;  %5056 = vmatpush.msrb.mxu0 %v17913_v2  ;;  %v17915_v31 = vld [vmem:[#allocation46_spill] sm:$0xff]  ;;  %v17917_v2 = vld [vmem:[#allocation52_spill] sm:$0xff] }
 0x5a1   : > { %5186 = vmatpush.msrb.mxu3 %v17810_v8  ;;  %5092 = vmatpush.msrb.mxu1 %v17901_v57 }
 0x5a2   : > { %5121 = vmatpush.msrb.mxu2 %v17912_v27  ;;  %5220 = vmatpush.msra.mxu0 %v17838_v47  ;;  %v17916_v27 = vld [vmem:[#allocation93_spill] sm:$0xff] }
 0x5a3   : > { %5188 = vmatpush.msrb.mxu3 %v17813_v1  ;;  %5094 = vmatpush.msrb.mxu1 %v17903_v52 }
 0x5a4   : > { %5125 = vmatpush.msrb.mxu2 %v17914_v21  ;;  %5222 = vmatpush.msra.mxu0 %v17841_v58  ;;  %v17918_v21 = vld [vmem:[#allocation97_spill] sm:$0xff] }
 0x5a5   : > { %5190 = vmatpush.msrb.mxu3 %v17816_v54  ;;  %5254 = vmatpush.msra.mxu1 %v17916_v27  ;;  %v17923_v27 = vld [vmem:[#allocation67_spill] sm:$0xff] }
 0x5a6   : > { %5129 = vmatpush.msrb.mxu2 %v17915_v31  ;;  %5224 = vmatpush.msra.mxu0 %v17844_v41  ;;  %v17920_v31 = vld [vmem:[#allocation100_spill] sm:$0xff] }
 0x5a7   : > { %5192 = vmatpush.msrb.mxu3 %v17891_v53  ;;  %5260 = vmatpush.msra.mxu1 %v17918_v21  ;;  %v17924_v21 = vld [vmem:[#allocation103_spill] sm:$0xff] }
 0x5a8   : > { %5133 = vmatpush.msrb.mxu2 %v17917_v2  ;;  %5226 = vmatpush.msra.mxu0 %v17848_v28  ;;  %v17922_v2 = vld [vmem:[#allocation102_spill] sm:$0xff]  ;;  %v17931_v53 = vld [vmem:[#allocation127_spill] sm:$0xff] }
 0x5a9   : > { %5194 = vmatpush.msrb.mxu3 %v17894_v24  ;;  %5266 = vmatpush.msra.mxu1 %v17920_v31  ;;  %v17927_v31 = vld [vmem:[#allocation72_spill] sm:$0xff]  ;;  %v17929_v24 = vld [vmem:[#allocation79_spill] sm:$0xff] }
 0x5aa   : > { %5137 = vmatpush.msrb.mxu2 %v17919_v4  ;;  %5228 = vmatpush.msra.mxu0 %v17851_v15  ;;  %v17925_v4 = vld [vmem:[#allocation68_spill] sm:$0xff] }
 0x5ab   : > { %5196 = vmatpush.msrb.mxu3 %v17897_v11  ;;  %5272 = vmatpush.msra.mxu1 %v17922_v2  ;;  %v17926_v11 = vld [vmem:[#allocation69_spill] sm:$0xff] }
 0x5ac   : > { %5141 = vmatpush.msrb.mxu2 %v17921_v34  ;;  %v17928_v34 = vld [vmem:[#allocation76_spill] sm:$0xff] }
 0x5ad   : > { %5198 = vmatpush.msrb.mxu3 %v17899_v22  ;;  %5278 = vmatpush.msra.mxu1 %v17924_v21 }
 0x5ae   : > { %5145 = vmatpush.msrb.mxu2 %v17923_v27 }
 0x5af   : > { %5200 = vmatpush.msrb.mxu3 %v17901_v57 }
 0x5b0   : > { %5149 = vmatpush.msrb.mxu2 %v17925_v4 }
 0x5b1   : > { %5202 = vmatpush.msrb.mxu3 %v17903_v52 }
 0x5b2   : > { %5153 = vmatpush.msrb.mxu2 %v17926_v11 }
 0x5b4   : > { %5157 = vmatpush.msrb.mxu2 %v17927_v31 }
 0x5b6   : > { %5161 = vmatpush.msrb.mxu2 %v17928_v34  ;;  %v17930_v34 = vld [vmem:[#allocation126_spill] sm:$0xff] }
 0x5b8   : > { %5165 = vmatpush.msrb.mxu2 %v17929_v24 }
 0x5c5   : > { %v4300_v22 = vpop.permute.xlu2 %4299 }
 0x5c6   : > { %v4865_v2 = vsel %vm1305_vm10, %v4300_v22, 0 }
 0x5c7   : > { %v13990_v27 = vand.u32 4294901760, %v4865_v2 }
 0x5c9   : > { %v5230_v21 = vsub.f32 %v4865_v2, %v13990_v27  ;;  %v17932_v2 = vld [vmem:[#allocation130_spill] sm:$0xff] }
 0x5cb   : > { %v5231_v14 = vand.u32 4294901760, %v5230_v21 }
 0x5cd   : > { %v5232_v62 = vsub.f32 %v5230_v21, %v5231_v14 }
 0x5da   : > { %v4292_v57 = vpop.permute.xlu0 %4291 }
 0x5db   : > { %v4294_v10 = vpop.permute.xlu1 %4293 }
 0x5dc   : > { %v4295_v4 = vsel %vm1319_vm12, %v4292_v57, %v4294_v10  ;;  %v17936_v57 = vld [vmem:[#allocation106_spill] sm:$0xff] }
 0x5dd   : > { %v4302_v52 = vsel %vm1303_vm9, %v4295_v4, %v4300_v22  ;;  %v5233_v4 = vand.u32 4294901760, %v5232_v62  ;;  %v17934_v62 = vld [vmem:[#allocation105_spill] sm:$0xff]  ;;  %v17935_v22 = vld [vmem:[#allocation139_spill] sm:$0xff] }
 0x5de   : > { %v4899_v11 = vand.u32 4294901760, %v4302_v52 }
 0x5e0   : > { %v4900_v31 = vsub.f32 %v4302_v52, %v4899_v11  ;;  %5005 = vmatmul.f32.vlgmr.msra.gmra.mxu3 %v4899_v11  ;;  %v17937_v52 = vld [vmem:[#allocation143_spill] sm:$0xff] }
 0x5e1   : > { %5501 = vmatpush.msra.mxu3 %v17930_v34  ;;  %v17959_v34 = vld [vmem:[#allocation166_spill] sm:$0xff] }
 0x5e2   : > { %v4901_v24 = vand.u32 4294901760, %v4900_v31  ;;  %5059 = vmatmul.f32.vlgmr.msrb.gmra.mxu0 %v4900_v31 }
 0x5e3   : > { %5297 = vmatpush.msrb.mxu0 %v17880_v0  ;;  %5507 = vmatpush.msra.mxu3 %v17931_v53  ;;  %v17954_v53 = vld [vmem:[#allocation131_spill] sm:$0xff] }
 0x5e4   : > { %v4902_v48 = vsub.f32 %v4900_v31, %v4901_v24  ;;  %5098 = vmatmul.f32.vlgmr.msrb.gmra.mxu1 %v4901_v24  ;;  %v17933_v24 = vld [vmem:[#allocation135_spill] sm:$0xff] }
 0x5e5   : > { %5300 = vmatpush.msrb.mxu0 %v17881_v38  ;;  %5328 = vmatpush.msrb.mxu1 %v17838_v47  ;;  %v17938_v31 = vld [vmem:[#allocation107_spill] sm:$0xff] }
 0x5e6   : > { %v4903_v10 = vand.u32 4294901760, %v4902_v48  ;;  %5513 = vmatpush.msra.mxu3 %v17932_v2  ;;  %v17939_v48 = vld [vmem:[#allocation147_spill] sm:$0xff] }
 0x5e7   : > { %5303 = vmatpush.msrb.mxu0 %v17882_v61  ;;  %5330 = vmatpush.msrb.mxu1 %v17841_v58  ;;  %v17953_v2 = vld [vmem:[#allocation163_spill] sm:$0xff] }
 0x5e8   : > { %4904 = vmatmul.f32.vlgmr.msra.gmra.mxu2 %v4903_v10  ;;  %5204 = vmatmul.f32.vlgmr.msrb.gmra.mxu3 %v4899_v11  ;;  %v17941_v10 = vld [vmem:[#allocation151_spill] sm:$0xff] }
 0x5e9   : > { %5306 = vmatpush.msrb.mxu0 %v17883_v23  ;;  %5332 = vmatpush.msrb.mxu1 %v17844_v41 }
 0x5ea   : > { %5234 = vmatmul.f32.vlgmr.msra.gmra.mxu0 %v5233_v4  ;;  %5519 = vmatpush.msra.mxu3 %v17933_v24  ;;  %v17943_v4 = vld [vmem:[#allocation109_spill] sm:$0xff] }
 0x5eb   : > { %5309 = vmatpush.msrb.mxu0 %v17884_v56  ;;  %5334 = vmatpush.msrb.mxu1 %v17848_v28  ;;  %v17948_v24 = vld [vmem:[#allocation113_spill] sm:$0xff]  ;;  %v18025_v56 = vld [vmem:[#allocation232_spill] sm:$0xff]  ;;  %v4537_v23 = vpop.f32.mrf.mxu1 }
 0x5ec   : > { %5280 = vmatmul.f32.vlgmr.msra.gmra.mxu1 %v13990_v27  ;;  %5456 = vmatpush.msra.mxu2 %v17934_v62 }
 0x5ed   : > { %5358 = vmatpush.msra.mxu0 %v17885_v46  ;;  %5336 = vmatpush.msrb.mxu1 %v17851_v15  ;;  %v18022_v46 = vld [vmem:[#allocation214_spill] sm:$0xff]  ;;  %v4444_v0 = vpop.f32.mrf.mxu3 }
 0x5ee   : > { %5525 = vmatpush.msra.mxu3 %v17935_v22  ;;  %5458 = vmatpush.msra.mxu2 %v17936_v57  ;;  %v17945_v22 = vld [vmem:[#allocation112_spill] sm:$0xff] }
 0x5ef   : > { %5362 = vmatpush.msra.mxu0 %v17886_v26  ;;  %5392 = vmatpush.msra.mxu1 %v17838_v47  ;;  %v18019_v26 = vld [vmem:[#allocation229_spill] sm:$0xff] }
 0x5f0   : > { %5167 = vmatmul.f32.vlgmr.msrb.gmra.mxu2 %v4899_v11  ;;  %5531 = vmatpush.msra.mxu3 %v17937_v52  ;;  %v17940_v11 = vld [vmem:[#allocation108_spill] sm:$0xff]  ;;  %v17944_v52 = vld [vmem:[#allocation155_spill] sm:$0xff] }
 0x5f1   : > { %5366 = vmatpush.msra.mxu0 %v17887_v50  ;;  %5394 = vmatpush.msra.mxu1 %v17841_v58  ;;  %v18016_v50 = vld [vmem:[#allocation202_spill] sm:$0xff] }
 0x5f2   : > { %5312 = vmatmul.f32.vlgmr.msrb.gmra.mxu0 %v5230_v21  ;;  %5460 = vmatpush.msra.mxu2 %v17938_v31  ;;  %v17942_v21 = vld [vmem:[#allocation111_spill] sm:$0xff] }
 0x5f3   : > { %5370 = vmatpush.msra.mxu0 %v17888_v9  ;;  %5396 = vmatpush.msra.mxu1 %v17844_v41  ;;  %v17965_v9 = vld [vmem:[#allocation168_spill] sm:$0xff] }
 0x5f4   : > { %5340 = vmatmul.f32.vlgmr.msrb.gmra.mxu1 %v5231_v14  ;;  %5537 = vmatpush.msra.mxu3 %v17939_v48  ;;  %v17946_v14 = vld [vmem:[#allocation110_spill] sm:$0xff] }
 0x5f5   : > { %5374 = vmatpush.msra.mxu0 %v17889_v55  ;;  %5398 = vmatpush.msra.mxu1 %v17848_v28  ;;  %v17947_v48 = vld [vmem:[#allocation158_spill] sm:$0xff]  ;;  %v17962_v55 = vld [vmem:[#allocation167_spill] sm:$0xff] }
 0x5f6   : > { %5462 = vmatpush.msra.mxu2 %v17940_v11  ;;  %5543 = vmatpush.msra.mxu3 %v17941_v10  ;;  %v17949_v10 = vld [vmem:[#allocation114_spill] sm:$0xff] }
 0x5f7   : > { %5400 = vmatpush.msra.mxu1 %v17851_v15  ;;  %5599 = vmatpush.msrb.mxu0 %v17942_v21  ;;  %v17950_v21 = vld [vmem:[#allocation161_spill] sm:$0xff] }
 0x5f8   : > { %5464 = vmatpush.msra.mxu2 %v17943_v4  ;;  %5549 = vmatpush.msra.mxu3 %v17944_v52  ;;  %v17951_v52 = vld [vmem:[#allocation124_spill] sm:$0xff] }
 0x5f9   : > { %5602 = vmatpush.msrb.mxu0 %v17945_v22  ;;  %5652 = vmatpush.msrb.mxu1 %v17934_v62  ;;  %v17952_v22 = vld [vmem:[#allocation115_spill] sm:$0xff] }
 0x5fa   : > { %5376 = vmatmul.f32.vlgmr.msra.gmra.mxu0 %v13990_v27  ;;  %5466 = vmatpush.msra.mxu2 %v17946_v14 }
 0x5fb   : > { %5555 = vmatpush.msra.mxu3 %v17947_v48  ;;  %5605 = vmatpush.msrb.mxu0 %v17948_v24  ;;  %v17955_v48 = vld [vmem:[#allocation116_spill] sm:$0xff]  ;;  %v17956_v24 = vld [vmem:[#allocation165_spill] sm:$0xff] }
 0x5fc   : > { %5402 = vmatmul.f32.vlgmr.msra.gmra.mxu1 %v13990_v27  ;;  %5468 = vmatpush.msra.mxu2 %v17949_v10  ;;  %v17957_v27 = vld [vmem:[#allocation132_spill] sm:$0xff] }
 0x5fd   : > { %5561 = vmatpush.msra.mxu3 %v17950_v21  ;;  %5654 = vmatpush.msrb.mxu1 %v17936_v57  ;;  %v17958_v21 = vld [vmem:[#allocation120_spill] sm:$0xff] }
 0x5fe   : > { %5470 = vmatpush.msra.mxu2 %v17951_v52  ;;  %5608 = vmatpush.msrb.mxu0 %v17952_v22  ;;  %v17960_v22 = vld [vmem:[#allocation134_spill] sm:$0xff] }
 0x5ff   : > { %5567 = vmatpush.msra.mxu3 %v17953_v2  ;;  %5656 = vmatpush.msrb.mxu1 %v17938_v31  ;;  %v17961_v2 = vld [vmem:[#allocation123_spill] sm:$0xff] }
 0x600   : > { %5472 = vmatpush.msra.mxu2 %v17954_v53  ;;  %5611 = vmatpush.msrb.mxu0 %v17955_v48  ;;  %v17963_v48 = vld [vmem:[#allocation136_spill] sm:$0xff] }
 0x601   : > { %5573 = vmatpush.msra.mxu3 %v17956_v24  ;;  %5658 = vmatpush.msrb.mxu1 %v17940_v11  ;;  %v17964_v24 = vld [vmem:[#allocation125_spill] sm:$0xff] }
 0x602   : > { %5474 = vmatpush.msra.mxu2 %v17957_v27  ;;  %5614 = vmatpush.msrb.mxu0 %v17958_v21  ;;  %v17967_v21 = vld [vmem:[#allocation137_spill] sm:$0xff] }
 0x603   : > { %5579 = vmatpush.msra.mxu3 %v17959_v34  ;;  %5660 = vmatpush.msrb.mxu1 %v17943_v4  ;;  %v17966_v34 = vld [vmem:[#allocation141_spill] sm:$0xff] }
 0x604   : > { %5476 = vmatpush.msra.mxu2 %v17960_v22  ;;  %5617 = vmatpush.msrb.mxu0 %v17961_v2  ;;  %v17969_v2 = vld [vmem:[#allocation138_spill] sm:$0xff] }
 0x605   : > { %5585 = vmatpush.msra.mxu3 %v17962_v55  ;;  %5662 = vmatpush.msrb.mxu1 %v17946_v14  ;;  %v17968_v55 = vld [vmem:[#allocation146_spill] sm:$0xff] }
 0x606   : > { %5478 = vmatpush.msra.mxu2 %v17963_v48  ;;  %5620 = vmatpush.msrb.mxu0 %v17964_v24  ;;  %v17971_v24 = vld [vmem:[#allocation140_spill] sm:$0xff] }
 0x607   : > { %5591 = vmatpush.msra.mxu3 %v17965_v9  ;;  %5664 = vmatpush.msrb.mxu1 %v17949_v10  ;;  %v17970_v9 = vld [vmem:[#allocation150_spill] sm:$0xff] }
 0x608   : > { %5480 = vmatpush.msra.mxu2 %v17966_v34  ;;  %5623 = vmatpush.msrb.mxu0 %v17967_v21  ;;  %v17972_v21 = vld [vmem:[#allocation154_spill] sm:$0xff] }
 0x609   : > { %5760 = vmatpush.msrb.mxu3 %v17934_v62  ;;  %5666 = vmatpush.msrb.mxu1 %v17951_v52  ;;  %v17973_v62 = vld [vmem:[#allocation117_spill] sm:$0xff] }
 0x60a   : > { %5482 = vmatpush.msra.mxu2 %v17968_v55  ;;  %5626 = vmatpush.msrb.mxu0 %v17969_v2  ;;  %v17975_v2 = vld [vmem:[#allocation118_spill] sm:$0xff] }
 0x60b   : > { %5762 = vmatpush.msrb.mxu3 %v17936_v57  ;;  %5668 = vmatpush.msrb.mxu1 %v17954_v53  ;;  %v17974_v57 = vld [vmem:[#allocation145_spill] sm:$0xff] }
 0x60c   : > { %5484 = vmatpush.msra.mxu2 %v17970_v9  ;;  %5629 = vmatpush.msrb.mxu0 %v17971_v24  ;;  %v17977_v24 = vld [vmem:[#allocation119_spill] sm:$0xff] }
 0x60d   : > { %5764 = vmatpush.msrb.mxu3 %v17938_v31  ;;  %5670 = vmatpush.msrb.mxu1 %v17957_v27  ;;  %v17976_v31 = vld [vmem:[#allocation149_spill] sm:$0xff] }
 0x60e   : > { %5486 = vmatpush.msra.mxu2 %v17972_v21  ;;  %5632 = vmatpush.msrb.mxu0 %v17974_v57  ;;  %v17979_v57 = vld [vmem:[#allocation121_spill] sm:$0xff] }
 0x60f   : > { %5766 = vmatpush.msrb.mxu3 %v17940_v11  ;;  %5672 = vmatpush.msrb.mxu1 %v17960_v22  ;;  %v17978_v11 = vld [vmem:[#allocation153_spill] sm:$0xff] }
 0x610   : > { %5693 = vmatpush.msrb.mxu2 %v17973_v62  ;;  %5635 = vmatpush.msrb.mxu0 %v17976_v31  ;;  %v17980_v62 = vld [vmem:[#allocation157_spill] sm:$0xff]  ;;  %v17981_v31 = vld [vmem:[#allocation122_spill] sm:$0xff] }
 0x611   : > { %5768 = vmatpush.msrb.mxu3 %v17943_v4  ;;  %5674 = vmatpush.msrb.mxu1 %v17963_v48  ;;  %v18013_v4 = vld [vmem:[#allocation222_spill] sm:$0xff] }
 0x612   : > { %5697 = vmatpush.msrb.mxu2 %v17975_v2  ;;  %5638 = vmatpush.msrb.mxu0 %v17978_v11  ;;  %v17982_v2 = vld [vmem:[#allocation160_spill] sm:$0xff] }
 0x613   : > { %5770 = vmatpush.msrb.mxu3 %v17946_v14  ;;  %5676 = vmatpush.msrb.mxu1 %v17966_v34  ;;  %v17983_v11 = vld [vmem:[#allocation128_spill] sm:$0xff]  ;;  %v18009_v14 = vld [vmem:[#allocation162_spill] sm:$0xff] }
 0x614   : > { %5701 = vmatpush.msrb.mxu2 %v17977_v24  ;;  %5641 = vmatpush.msrb.mxu0 %v17980_v62  ;;  %v17984_v24 = vld [vmem:[#allocation169_spill] sm:$0xff] }
 0x615   : > { %5772 = vmatpush.msrb.mxu3 %v17949_v10  ;;  %5678 = vmatpush.msrb.mxu1 %v17968_v55  ;;  %v17985_v62 = vld [vmem:[#allocation129_spill] sm:$0xff]  ;;  %v18005_v10 = vld [vmem:[#allocation183_spill] sm:$0xff] }
 0x616   : > { %5705 = vmatpush.msrb.mxu2 %v17979_v57  ;;  %5644 = vmatpush.msrb.mxu0 %v17982_v2  ;;  %v17986_v57 = vld [vmem:[#allocation189_spill] sm:$0xff] }
 0x617   : > { %5774 = vmatpush.msrb.mxu3 %v17951_v52  ;;  %5680 = vmatpush.msrb.mxu1 %v17970_v9  ;;  %v17988_v2 = vld [vmem:[#allocation133_spill] sm:$0xff]  ;;  %v17991_v52 = vld [vmem:[#allocation142_spill] sm:$0xff] }
 0x618   : > { %5709 = vmatpush.msrb.mxu2 %v17981_v31  ;;  %5797 = vmatpush.msra.mxu0 %v17984_v24  ;;  %v17987_v31 = vld [vmem:[#allocation170_spill] sm:$0xff] }
 0x619   : > { %5776 = vmatpush.msrb.mxu3 %v17954_v53  ;;  %5682 = vmatpush.msrb.mxu1 %v17972_v21  ;;  %v17989_v53 = vld [vmem:[#allocation190_spill] sm:$0xff] }
 0x61a   : > { %5713 = vmatpush.msrb.mxu2 %v17983_v11  ;;  %5799 = vmatpush.msra.mxu0 %v17987_v31  ;;  %v17990_v11 = vld [vmem:[#allocation171_spill] sm:$0xff] }
 0x61b   : > { %5778 = vmatpush.msrb.mxu3 %v17957_v27  ;;  %5842 = vmatpush.msra.mxu1 %v17986_v57  ;;  %v17992_v27 = vld [vmem:[#allocation193_spill] sm:$0xff]  ;;  %v17994_v57 = vld [vmem:[#allocation144_spill] sm:$0xff] }
 0x61c   : > { %5717 = vmatpush.msrb.mxu2 %v17985_v62  ;;  %5801 = vmatpush.msra.mxu0 %v17990_v11  ;;  %v17993_v62 = vld [vmem:[#allocation172_spill] sm:$0xff] }
 0x61d   : > { %5780 = vmatpush.msrb.mxu3 %v17960_v22  ;;  %5848 = vmatpush.msra.mxu1 %v17989_v53  ;;  %v17995_v22 = vld [vmem:[#allocation197_spill] sm:$0xff]  ;;  %v17997_v53 = vld [vmem:[#allocation148_spill] sm:$0xff] }
 0x61e   : > { %5721 = vmatpush.msrb.mxu2 %v17988_v2  ;;  %5803 = vmatpush.msra.mxu0 %v17993_v62  ;;  %v17996_v2 = vld [vmem:[#allocation173_spill] sm:$0xff] }
 0x61f   : > { %5782 = vmatpush.msrb.mxu3 %v17963_v48  ;;  %5854 = vmatpush.msra.mxu1 %v17992_v27  ;;  %v17998_v48 = vld [vmem:[#allocation203_spill] sm:$0xff]  ;;  %v18000_v27 = vld [vmem:[#allocation152_spill] sm:$0xff] }
 0x620   : > { %5725 = vmatpush.msrb.mxu2 %v17991_v52  ;;  %5805 = vmatpush.msra.mxu0 %v17996_v2  ;;  %v17999_v52 = vld [vmem:[#allocation176_spill] sm:$0xff] }
 0x621   : > { %5784 = vmatpush.msrb.mxu3 %v17966_v34  ;;  %5860 = vmatpush.msra.mxu1 %v17995_v22  ;;  %v18001_v34 = vld [vmem:[#allocation207_spill] sm:$0xff]  ;;  %v18003_v22 = vld [vmem:[#allocation156_spill] sm:$0xff] }
 0x622   : > { %5729 = vmatpush.msrb.mxu2 %v17994_v57  ;;  %5807 = vmatpush.msra.mxu0 %v17999_v52  ;;  %v18002_v57 = vld [vmem:[#allocation177_spill] sm:$0xff] }
 0x623   : > { %5786 = vmatpush.msrb.mxu3 %v17968_v55  ;;  %5866 = vmatpush.msra.mxu1 %v17998_v48  ;;  %v18004_v55 = vld [vmem:[#allocation211_spill] sm:$0xff] }
 0x624   : > { %5733 = vmatpush.msrb.mxu2 %v17997_v53  ;;  %5809 = vmatpush.msra.mxu0 %v18002_v57  ;;  %v18006_v53 = vld [vmem:[#allocation159_spill] sm:$0xff] }
 0x625   : > { %5788 = vmatpush.msrb.mxu3 %v17970_v9  ;;  %5872 = vmatpush.msra.mxu1 %v18001_v34  ;;  %v18007_v48 = vld [vmem:[#allocation215_spill] sm:$0xff]  ;;  %v18011_v34 = vld [vmem:[#allocation196_spill] sm:$0xff] }
 0x626   : > { %5737 = vmatpush.msrb.mxu2 %v18000_v27  ;;  %5811 = vmatpush.msra.mxu0 %v18005_v10  ;;  %v18008_v9 = vld [vmem:[#allocation195_spill] sm:$0xff] }
 0x627   : > { %5790 = vmatpush.msrb.mxu3 %v17972_v21  ;;  %5878 = vmatpush.msra.mxu1 %v18004_v55  ;;  %v18010_v27 = vld [vmem:[#allocation219_spill] sm:$0xff]  ;;  %v18012_v21 = vld [vmem:[#allocation164_spill] sm:$0xff]  ;;  %v18015_v55 = vld [vmem:[#allocation225_spill] sm:$0xff] }
 0x628   : > { %5741 = vmatpush.msrb.mxu2 %v18003_v22  ;;  %5813 = vmatpush.msra.mxu0 %v18008_v9  ;;  %v18014_v22 = vld [vmem:[#allocation201_spill] sm:$0xff] }
 0x629   : > { %5884 = vmatpush.msra.mxu1 %v18007_v48  ;;  %v18018_v48 = vld [vmem:[#allocation206_spill] sm:$0xff] }
 0x62a   : > { %5745 = vmatpush.msrb.mxu2 %v18006_v53  ;;  %5815 = vmatpush.msra.mxu0 %v18011_v34  ;;  %v18017_v53 = vld [vmem:[#allocation227_spill] sm:$0xff] }
 0x62b   : > { %5890 = vmatpush.msra.mxu1 %v18010_v27  ;;  %v18021_v27 = vld [vmem:[#allocation230_spill] sm:$0xff] }
 0x62c   : > { %5749 = vmatpush.msrb.mxu2 %v18009_v14  ;;  %5817 = vmatpush.msra.mxu0 %v18014_v22  ;;  %v18020_v14 = vld [vmem:[#allocation210_spill] sm:$0xff] }
 0x62d   : > { %5896 = vmatpush.msra.mxu1 %v18013_v4  ;;  %v18024_v4 = vld [vmem:[#allocation218_spill] sm:$0xff] }
 0x62e   : > { %5753 = vmatpush.msrb.mxu2 %v18012_v21  ;;  %5819 = vmatpush.msra.mxu0 %v18016_v50  ;;  %v18023_v21 = vld [vmem:[#allocation231_spill] sm:$0xff] }
 0x62f   : > { %5902 = vmatpush.msra.mxu1 %v18015_v55  ;;  %v4498_v55 = vpop.f32.mrf.mxu0 }
 0x630   : > { %5821 = vmatpush.msra.mxu0 %v18018_v48 }
 0x631   : > { %5908 = vmatpush.msra.mxu1 %v18017_v53  ;;  %v14148_v53 = vpop.f32.mrf.mxu1 }
 0x632   : > { %5823 = vmatpush.msra.mxu0 %v18020_v14 }
 0x633   : > { %5914 = vmatpush.msra.mxu1 %v18019_v26 }
 0x634   : > { %5825 = vmatpush.msra.mxu0 %v18022_v46 }
 0x635   : > { %5920 = vmatpush.msra.mxu1 %v18021_v27  ;;  %v4343_v27 = vpop.f32.mrf.mxu2 }
 0x636   : > { %5827 = vmatpush.msra.mxu0 %v18024_v4 }
 0x637   : > { %5926 = vmatpush.msra.mxu1 %v18023_v21  ;;  %v14146_v61 = vpop.f32.mrf.mxu0  ;;  %v4643_v21 = vpop.f32.mrf.mxu3 }
 0x639   : > { %5932 = vmatpush.msra.mxu1 %v18025_v56  ;;  %v14152_v26 = vpop.f32.mrf.mxu1 }
 0x63d   : > { %v4606_v58 = vpop.f32.mrf.mxu2 }
 0x63f   : > { %v14150_v38 = vpop.f32.mrf.mxu0 }
 0x641   : > { %v4841_v28 = vpop.f32.mrf.mxu1 }
 0x647   : > { %v4815_v15 = vpop.f32.mrf.mxu0 }
 0x65f   : > { %v5060_v41 = vpop.f32.mrf.mxu0 }
 0x661   : > { %v5099_v47 = vpop.f32.mrf.mxu1 }
 0x663   : > { %v5006_v54 = vpop.f32.mrf.mxu3 }
 0x667   : > { %v5235_v56 = vpop.f32.mrf.mxu0 }
 0x669   : > { %v5281_v6 = vpop.f32.mrf.mxu1 }
 0x66b   : > { %v4905_v40 = vpop.f32.mrf.mxu2  ;;  %v5205_v35 = vpop.f32.mrf.mxu3 }
 0x66c   : > { %v4906_v1 = vadd.f32 %v11784_v17, %v4905_v40 }
 0x66e   : > { %v5007_v7 = vadd.f32 %v5006_v54, %v4906_v1 }
 0x66f   : > { %v5313_v19 = vpop.f32.mrf.mxu0 }
 0x670   : > { %v5061_v8 = vadd.f32 %v5060_v41, %v5007_v7 }
 0x671   : > { %v5341_v13 = vpop.f32.mrf.mxu1 }
 0x672   : > { %v5100_v36 = vadd.f32 %v5099_v47, %v5061_v8 }
 0x673   : > { %v5168_v16 = vpop.f32.mrf.mxu2 }
 0x674   : > { %v5169_v51 = vadd.f32 %v5168_v16, %v5100_v36 }
 0x676   : > { %v5206_v45 = vadd.f32 %v5205_v35, %v5169_v51 }
 0x677   : > { %v5377_v32 = vpop.f32.mrf.mxu0 }
 0x678   : > { %v5236_v18 = vadd.f32 %v5235_v56, %v5206_v45 }
 0x679   : > { %v5403_v39 = vpop.f32.mrf.mxu1 }
 0x67a   : > { %v5282_v3 = vadd.f32 %v5281_v6, %v5236_v18 }
 0x67c   : > { %v5314_v63 = vadd.f32 %v5313_v19, %v5282_v3 }
 0x67e   : > { %v5342_v43 = vadd.f32 %v5341_v13, %v5314_v63  ;;  %v4344_v63 = vadd.f32 %v11784_v17, %v4343_v27 }
 0x680   : > { %v5378_v60 = vadd.f32 %v5377_v32, %v5342_v43 }
 0x682   : > { %v5404_v20 = vadd.f32 %v5403_v39, %v5378_v60  ;;  %v4445_v39 = vadd.f32 %v4444_v0, %v4344_v63 }
 0x684   : > { %v11567_v33 = vadd.f32 -1.0, %v5404_v20  ;;  %v4499_v3 = vadd.f32 %v4498_v55, %v4445_v39  ;;  %v18027_v39 = vld [vmem:[#allocation181_spill] sm:$0xff] }
 0x686   : > { %v11568_v40 = vmul.f32 -1.442695, %v11567_v33  ;;  %v4538_v32 = vadd.f32 %v4537_v23, %v4499_v3 }
 0x688   : > { %11735 = vpow2.f32 %v11568_v40  ;;  %v4607_v33 = vadd.f32 %v4606_v58, %v4538_v32 }
 0x68a   : > { %v4644_v56 = vadd.f32 %v4643_v21, %v4607_v33 }
 0x68c   : > { %v4674_v18 = vadd.f32 %v14146_v61, %v4644_v56 }
 0x68e   : > { %v11736_v54 = vpop.eup %11735  ;;  %v4720_v19 = vadd.f32 %v14148_v53, %v4674_v18  ;;  %v18028_v18 = vld [vmem:[#allocation182_spill] sm:$0xff] }
 0x68f   : > { %v5410_v41 = vadd.f32 1.0, %v11736_v54 }
 0x690   : > { %v4752_v16 = vadd.f32 %v14150_v38, %v4720_v19  ;;  %v18029_v19 = vld [vmem:[#allocation174_spill] sm:$0xff] }
 0x691   : > { %11737 = vrcp.f32 %v5410_v41  ;;  %v5422_v8 = vand.u32 2147483648, %v5410_v41  ;;  %v5420_v45 = vand.u32 2147483647, %v5410_v41  ;;  %vm5416_vm3 = vweird.f32 %v5410_v41 }
 0x692   : > { %v4780_v7 = vadd.f32 %v14152_v26, %v4752_v16  ;;  %v18030_v16 = vld [vmem:[#allocation175_spill] sm:$0xff] }
 0x693   : > { %v5423_v13 = vor.u32 1.1754944e-38, %v5422_v8  ;;  %vm5421_vm1 = vcmp.eq.f32.partialorder %v5420_v45, 8.507059e+37 }
 0x694   : > { %v4816_v40 = vadd.f32 %v4815_v15, %v4780_v7  ;;  %v18031_v7 = vld [vmem:[#allocation184_spill] sm:$0xff] }
 0x696   : > { %v4842_v54 = vadd.f32 %v4841_v28, %v4816_v40  ;;  %v18032_v40 = vld [vmem:[#allocation178_spill] sm:$0xff] }
 0x697   : > { %v11738_v1 = vpop.eup %11737 }
 0x698   : > { %v5412_v47 = vmul.f32 %v11738_v1, %v5410_v41  ;;  %vm5417_vm4 = vweird.f32 %v11738_v1  ;;  %v11565_v41 = vadd.f32 -1.0, %v4842_v54 }
 0x699   : > { %vm5418_vm2 = vmor %vm5416_vm3, %vm5417_vm4  ;;  %vm18067_vm3 = vcmask 261120  }
 0x69a   : > { %v5413_v36 = vsub.f32 1.0, %v5412_v47 }
 0x69c   : > { %v5414_v51 = vmul.f32 %v11738_v1, %v5413_v36 }
 0x69e   : > { %v5415_v6 = vadd.f32 %v11738_v1, %v5414_v51 }
 0x6a0   : > { %v5419_v43 = vsel %vm5418_vm2, %v11738_v1, %v5415_v6 }
 0x6a1   : > { %v5424_v60 = vsel %vm5421_vm1, %v5423_v13, %v5419_v43 }
 0x6a2   : > { %v5426_v35 = vmul.f32 %v5424_v60, %v5404_v20  ;;  %v11566_v20 = vmul.f32 -1.442695, %v11565_v41  ;;  %v18034_v41 = vld [vmem:[#allocation179_spill] sm:$0xff] }
 0x6a4   : > { %5428 = vrot.lane.b32.xlu0 %v5426_v35, %s11822_s23  ;;  %11739 = vpow2.f32 %v11566_v20  ;;  %v18035_v20 = vld [vmem:[#allocation188_spill] sm:$0xff] }
 0x6aa   : > { %v11740_v1 = vpop.eup %11739 }
 0x6ab   : > { %v4848_v17 = vadd.f32 1.0, %v11740_v1  ;;  %v18036_v1 = vld [vmem:[#allocation180_spill] sm:$0xff] }
 0x6ad   : > { %11741 = vrcp.f32 %v4848_v17  ;;  %v4860_v61 = vand.u32 2147483648, %v4848_v17  ;;  %vm4854_vm7 = vweird.f32 %v4848_v17  ;;  %v4858_v53 = vand.u32 2147483647, %v4848_v17 }
 0x6af   : > { %v4861_v26 = vor.u32 1.1754944e-38, %v4860_v61  ;;  %vm4859_vm4 = vcmp.eq.f32.partialorder %v4858_v53, 8.507059e+37  ;;  %v18043_v61 = vld [vmem:[#allocation204_spill] sm:$0xff]  ;;  %v18044_v53 = vld [vmem:[#allocation199_spill] sm:$0xff] }
 0x6b3   : > { %v11742_v0 = vpop.eup %11741 }
 0x6b4   : > { %v4850_v23 = vmul.f32 %v11742_v0, %v4848_v17  ;;  %vm4855_vm6 = vweird.f32 %v11742_v0  ;;  %v18037_v17 = vld [vmem:[#allocation192_spill] sm:$0xff] }
 0x6b5   : > { %vm4856_vm13 = vmor %vm4854_vm7, %vm4855_vm6 }
 0x6b6   : > { %v4851_v58 = vsub.f32 1.0, %v4850_v23  ;;  %v18039_v23 = vld [vmem:[#allocation194_spill] sm:$0xff] }
 0x6b8   : > { %v4852_v55 = vmul.f32 %v11742_v0, %v4851_v58  ;;  %v18040_v58 = vld [vmem:[#allocation187_spill] sm:$0xff] }
 0x6ba   : > { %v4853_v21 = vadd.f32 %v11742_v0, %v4852_v55  ;;  %v18041_v55 = vld [vmem:[#allocation198_spill] sm:$0xff] }
 0x6bc   : > { %v4857_v38 = vsel %vm4856_vm13, %v11742_v0, %v4853_v21  ;;  %v18038_v0 = vld [vmem:[#allocation186_spill] sm:$0xff]  ;;  %v18042_v21 = vld [vmem:[#allocation191_spill] sm:$0xff] }
 0x6bd   : > { %v4862_v15 = vsel %vm4859_vm4, %v4861_v26, %v4857_v38  ;;  %v18045_v38 = vld [vmem:[#allocation208_spill] sm:$0xff] }
 0x6be   : > { %v4864_v28 = vmul.f32 %v4862_v15, %v4842_v54  ;;  %v18033_v54 = vld [vmem:[#allocation185_spill] sm:$0xff]  ;;  %v18046_v26 = vld [vmem:[#allocation200_spill] sm:$0xff] }
 0x6bf   : > { %v18047_v15 = vld [vmem:[#allocation212_spill] sm:$0xff] }
 0x716   : > { %v5429_v27 = vpop.permute.xlu0 %5428 }
 0x717   : > { %v5431_v47 = vsel %vm2459_vm14, %v4864_v28, %v5429_v27  ;;  %v5433_v36 = vrot.slane %v5429_v27, 4  ;;  %v18048_v28 = vld [vmem:[#allocation205_spill] sm:$0xff]  ;;  %v18049_v27 = vld [vmem:[#allocation216_spill] sm:$0xff] }
 0x719   : > { %v5434_v8 = vsel %vm2463_vm15, %v5431_v47, %v5433_v36  ;;  %v18050_v47 = vld [vmem:[#allocation209_spill] sm:$0xff]  ;;  %v18051_v36 = vld [vmem:[#allocation220_spill] sm:$0xff] }
 0x71a   : > { %5436 = vst.msk [vmem:[#allocation3] sm:$0xff] %vm13101_vm0, %v5434_v8  ;;  %v18052_v8 = vld [vmem:[#allocation213_spill] sm:$0xff] }
 0x721   : > { %v5437_v45 = vld [vmem:[#allocation3] sm:$0x77] }
 0x722   : > { %5440 = vst [vmem:[#allocation1] ss:$2 sm:$0xff] %v5437_v45  ;;  %v5438_v6 = vld [vmem:[#allocation3] sm:$0xe]  ;;  %v18053_v45 = vld [vmem:[#allocation242_spill] sm:$0xff] }
 0x729   : > { %v5441_v13 = vld.sshfl [vmem:[#allocation1] sm:$0xff pattern:$0x75316420]  ;;  %v14166_v43 = vld.sshfl [vmem:[#allocation1 + $0x8] sm:$0xff pattern:$0x75316420] }
 0x72a   : > { %5446 = vst [vmem:[#allocation1] ss:$2 sm:$0xff] %v5438_v6  ;;  %v5487_v60 = vand.u32 4294901760, %v5441_v13  ;;  %v18054_v6 = vld [vmem:[#allocation223_spill] sm:$0xff] }
 0x72c   : > { %5593 = vmatmul.f32.vlgmr.msra.gmra.mxu3 %v5487_v60  ;;  %v5488_v35 = vsub.f32 %v5441_v13, %v5487_v60  ;;  %v18055_v13 = vld [vmem:[#allocation217_spill] sm:$0xff] }
 0x72d   : > { %5993 = vmatpush.msra.mxu3 %v17984_v24 }
 0x72e   : > { %5647 = vmatmul.f32.vlgmr.msrb.gmra.mxu0 %v5488_v35  ;;  %v5489_v63 = vand.u32 4294901760, %v5488_v35 }
 0x72f   : > { %5995 = vmatpush.msra.mxu3 %v17987_v31  ;;  %6034 = vmatpush.msrb.mxu0 %v18027_v39 }
 0x730   : > { %5686 = vmatmul.f32.vlgmr.msrb.gmra.mxu1 %v5489_v63  ;;  %v5490_v3 = vsub.f32 %v5488_v35, %v5489_v63  ;;  %v18057_v35 = vld [vmem:[#allocation226_spill] sm:$0xff]  ;;  %v18058_v63 = vld [vmem:[#allocation221_spill] sm:$0xff] }
 0x731   : > { %v5447_v32 = vld.sshfl [vmem:[#allocation1] sm:$0xff pattern:$0x75316420]  ;;  %5997 = vmatpush.msra.mxu3 %v17990_v11  ;;  %6101 = vmatpush.msrb.mxu1 %v17984_v24 }
 0x732   : > { %v5491_v33 = vand.u32 4294901760, %v5490_v3  ;;  %v5448_v56 = vrot.slane %v5447_v32, 1  ;;  %6038 = vmatpush.msrb.mxu0 %v18028_v18  ;;  %v18059_v3 = vld [vmem:[#allocation247_spill] sm:$0xff]  ;;  %v18060_v32 = vld [vmem:[#allocation228_spill] sm:$0xff] }
 0x733   : > { %5999 = vmatpush.msra.mxu3 %v17993_v62  ;;  %6103 = vmatpush.msrb.mxu1 %v17987_v31 }
 0x734   : > { %5492 = vmatmul.f32.vlgmr.msra.gmra.mxu2 %v5491_v33  ;;  %5792 = vmatmul.f32.vlgmr.msrb.gmra.mxu3 %v5487_v60  ;;  %v18061_v33 = vld [vmem:[#allocation224_spill] sm:$0xff] }
 0x735   : > { %5449 = vrot.lane.b32.xlu1 %v5448_v56, %s11823_s16  ;;  %5940 = vmatpush.msra.mxu2 %v18029_v19  ;;  %v18062_v56 = vld [vmem:[#allocation233_spill] sm:$0xff] }
 0x736   : > { %6001 = vmatpush.msra.mxu3 %v17996_v2  ;;  %6105 = vmatpush.msrb.mxu1 %v17990_v11 }
 0x737   : > { %5943 = vmatpush.msra.mxu2 %v18030_v16  ;;  %6042 = vmatpush.msrb.mxu0 %v18031_v7 }
 0x738   : > { %6003 = vmatpush.msra.mxu3 %v17999_v52  ;;  %6107 = vmatpush.msrb.mxu1 %v17993_v62 }
 0x739   : > { %5946 = vmatpush.msra.mxu2 %v18032_v40  ;;  %6046 = vmatpush.msrb.mxu0 %v18033_v54 }
 0x73a   : > { %6005 = vmatpush.msra.mxu3 %v18002_v57  ;;  %6109 = vmatpush.msrb.mxu1 %v17996_v2  ;;  %v11598_v2 = vld [vmem:[%s16820_s7 + $0x1d8] sm:$0xff] }
 0x73b   : > { %5949 = vmatpush.msra.mxu2 %v18034_v41  ;;  %6050 = vmatpush.msrb.mxu0 %v18035_v20 }
 0x73c   : > { %5755 = vmatmul.f32.vlgmr.msrb.gmra.mxu2 %v5487_v60  ;;  %6007 = vmatpush.msra.mxu3 %v18005_v10  ;;  %v18056_v60 = vld [vmem:[#allocation245_spill] sm:$0xff] }
 0x73d   : > { %5952 = vmatpush.msra.mxu2 %v18036_v1  ;;  %6111 = vmatpush.msrb.mxu1 %v17999_v52 }
 0x73e   : > { %6009 = vmatpush.msra.mxu3 %v18008_v9  ;;  %6054 = vmatpush.msrb.mxu0 %v18037_v17 }
 0x73f   : > { %5955 = vmatpush.msra.mxu2 %v18038_v0  ;;  %6113 = vmatpush.msrb.mxu1 %v18002_v57  ;;  %v11583_v0 = vld [vmem:[%s16820_s7 + $0x160] sm:$0xff] }
 0x740   : > { %6011 = vmatpush.msra.mxu3 %v18011_v34  ;;  %6058 = vmatpush.msrb.mxu0 %v18039_v23  ;;  %v14383_v17 = vand.u32 4294901760, %v11583_v0 }
 0x741   : > { %5958 = vmatpush.msra.mxu2 %v18040_v58  ;;  %6115 = vmatpush.msrb.mxu1 %v18005_v10  ;;  %v11585_v58 = vld [vmem:[%s16820_s7 + $0x170] sm:$0xff] }
 0x742   : > { %6013 = vmatpush.msra.mxu3 %v18014_v22  ;;  %6062 = vmatpush.msrb.mxu0 %v18041_v55  ;;  %v14371_v23 = vand.u32 4294901760, %v11585_v58  ;;  %v14404_v41 = vsub.f32 %v11583_v0, %v14383_v17 }
 0x743   : > { %5961 = vmatpush.msra.mxu2 %v18042_v21  ;;  %6117 = vmatpush.msrb.mxu1 %v18008_v9 }
 0x744   : > { %6015 = vmatpush.msra.mxu3 %v18016_v50  ;;  %6066 = vmatpush.msrb.mxu0 %v18043_v61  ;;  %v11587_v61 = vld [vmem:[%s16820_s7 + $0x180] sm:$0xff]  ;;  %v17413_v7 = vand.u32 4294901760, %v14404_v41 }
 0x745   : > { %5964 = vmatpush.msra.mxu2 %v18044_v53  ;;  %6119 = vmatpush.msrb.mxu1 %v18011_v34  ;;  %v14355_v21 = vand.u32 4294901760, %v11587_v61 }
 0x746   : > { %6017 = vmatpush.msra.mxu3 %v18018_v48  ;;  %6070 = vmatpush.msrb.mxu0 %v18045_v38 }
 0x747   : > { %5967 = vmatpush.msra.mxu2 %v18046_v26  ;;  %6121 = vmatpush.msrb.mxu1 %v18014_v22 }
 0x748   : > { %6019 = vmatpush.msra.mxu3 %v18020_v14  ;;  %6074 = vmatpush.msrb.mxu0 %v18047_v15 }
 0x749   : > { %5970 = vmatpush.msra.mxu2 %v18048_v28  ;;  %6123 = vmatpush.msrb.mxu1 %v18016_v50 }
 0x74a   : > { %6021 = vmatpush.msra.mxu3 %v18022_v46  ;;  %6078 = vmatpush.msrb.mxu0 %v18049_v27  ;;  %v18068_v27 = vld [vmem:[#allocation236_spill] sm:$0xff] }
 0x74b   : > { %5973 = vmatpush.msra.mxu2 %v18050_v47  ;;  %6125 = vmatpush.msrb.mxu1 %v18018_v48 }
 0x74c   : > { %6023 = vmatpush.msra.mxu3 %v18024_v4  ;;  %6082 = vmatpush.msrb.mxu0 %v18051_v36 }
 0x74d   : > { %5976 = vmatpush.msra.mxu2 %v18052_v8  ;;  %6127 = vmatpush.msrb.mxu1 %v18020_v14 }
 0x74e   : > { %6183 = vmatpush.msrb.mxu3 %v18053_v45  ;;  %6086 = vmatpush.msrb.mxu0 %v18054_v6  ;;  %v18063_v6 = vld [vmem:[#allocation248_spill] sm:$0xff]  ;;  %v18065_v45 = vld [vmem:[#allocation237_spill] sm:$0xff] }
 0x74f   : > { %5979 = vmatpush.msra.mxu2 %v18055_v13  ;;  %6129 = vmatpush.msrb.mxu1 %v18022_v46  ;;  %v18064_v13 = vld [vmem:[#allocation234_spill] sm:$0xff] }
 0x750   : > { %6189 = vmatpush.msrb.mxu3 %v18056_v60  ;;  %6090 = vmatpush.msrb.mxu0 %v18057_v35  ;;  %v18066_v60 = vld [vmem:[#allocation240_spill] sm:$0xff] }
 0x751   : > { %5982 = vmatpush.msra.mxu2 %v18058_v63  ;;  %6131 = vmatpush.msrb.mxu1 %v18024_v4 }
 0x752   : > { %6195 = vmatpush.msrb.mxu3 %v18059_v3  ;;  %6094 = vmatpush.msrb.mxu0 %v18060_v32 }
 0x753   : > { %5985 = vmatpush.msra.mxu2 %v18061_v33 }
 0x754   : > { %6201 = vmatpush.msrb.mxu3 %v18063_v6 }
 0x755   : > { %6150 = vmatpush.msrb.mxu2 %v18062_v56 }
 0x757   : > { %6152 = vmatpush.msrb.mxu2 %v18064_v13 }
 0x759   : > { %6154 = vmatpush.msrb.mxu2 %v18065_v45 }
 0x75b   : > { %6156 = vmatpush.msrb.mxu2 %v18066_v60 }
 0x7a7   : > { %v5450_v35 = vpop.permute.xlu1 %5449 }
 0x7a8   : > { %v5452_v63 = vsel %vm2484_vm5, %v14166_v43, %v5450_v35  ;;  %v5453_v3 = vsel %vm18067_vm3, %v5450_v35, 0  ;;  %v18069_v43 = vld [vmem:[#allocation239_spill] sm:$0xff] }
 0x7a9   : > { %v5828_v8 = vand.u32 4294901760, %v5452_v63  ;;  %v6157_v32 = vand.u32 4294901760, %v5453_v3 }
 0x7ab   : > { %v5829_v36 = vsub.f32 %v5452_v63, %v5828_v8  ;;  %v6158_v33 = vsub.f32 %v5453_v3, %v6157_v32  ;;  %5934 = vmatmul.f32.vlgmr.msra.gmra.mxu1 %v5828_v8  ;;  %v18070_v63 = vld [vmem:[#allocation243_spill] sm:$0xff] }
 0x7ac   : > { %6250 = vmatpush.msra.mxu1 %v18062_v56 }
 0x7ad   : > { %v5830_v6 = vand.u32 4294901760, %v5829_v36  ;;  %v6159_v47 = vand.u32 4294901760, %v6158_v33  ;;  %5988 = vmatmul.f32.vlgmr.msra.gmra.mxu2 %v5829_v36  ;;  %v5687_v22 = vpop.f32.mrf.mxu1 }
 0x7ae   : > { %6252 = vmatpush.msra.mxu1 %v18064_v13  ;;  %6279 = vmatpush.msra.mxu2 %v18068_v27  ;;  %v18071_v27 = vld [vmem:[#allocation235_spill] sm:$0xff] }
 0x7af   : > { %v5831_v28 = vsub.f32 %v5829_v36, %v5830_v6  ;;  %v6160_v15 = vsub.f32 %v6158_v33, %v6159_v47  ;;  %6027 = vmatmul.f32.vlgmr.msra.gmra.mxu3 %v5830_v6  ;;  %v18072_v36 = vld [vmem:[#allocation246_spill] sm:$0xff]  ;;  %v18074_v6 = vld [vmem:[#allocation241_spill] sm:$0xff] }
 0x7b0   : > { %6254 = vmatpush.msra.mxu1 %v18065_v45  ;;  %6283 = vmatpush.msra.mxu2 %v18069_v43 }
 0x7b1   : > { %v5832_v35 = vand.u32 4294901760, %v5831_v28  ;;  %6310 = vmatpush.msra.mxu3 %v18062_v56  ;;  %v6161_v3 = vand.u32 4294901760, %v6160_v15  ;;  %v18073_v28 = vld [vmem:[#allocation238_spill] sm:$0xff]  ;;  %v18075_v15 = vld [vmem:[#allocation244_spill] sm:$0xff] }
 0x7b2   : > { %6256 = vmatpush.msra.mxu1 %v18066_v60  ;;  %6287 = vmatpush.msra.mxu2 %v18070_v63 }
 0x7b3   : > { %5833 = vmatmul.f32.vlgmr.msra.gmra.mxu0 %v5832_v35  ;;  %6133 = vmatmul.f32.vlgmr.msrb.gmra.mxu1 %v5828_v8  ;;  %v11601_v35 = vld [vmem:[%s16820_s7 + $0x1f0] sm:$0xff] }
 0x7b4   : > { %6312 = vmatpush.msra.mxu3 %v18064_v13  ;;  %6221 = vmatpush.msra.mxu0 %v18071_v27 }
 0x7b5   : > { %6162 = vmatmul.f32.vlgmr.msrb.gmra.mxu2 %v6161_v3  ;;  %v14263_v3 = vand.u32 4294901760, %v11601_v35 }
 0x7b6   : > { %6291 = vmatpush.msra.mxu2 %v18072_v36  ;;  %6314 = vmatpush.msra.mxu3 %v18065_v45 }
 0x7b7   : > { %6203 = vmatmul.f32.vlgmr.msrb.gmra.mxu3 %v6157_v32  ;;  %6224 = vmatpush.msra.mxu0 %v18073_v28  ;;  %v11599_v28 = vld [vmem:[%s16820_s7 + $0x1e0] sm:$0xff]  ;;  %v14269_v36 = vsub.f32 %v11601_v35, %v14263_v3 }
 0x7b8   : > { %6316 = vmatpush.msra.mxu3 %v18066_v60  ;;  %v11593_v60 = vld [vmem:[%s16820_s7 + $0x1b0] sm:$0xff] }
 0x7b9   : > { %6227 = vmatpush.msra.mxu0 %v18074_v6  ;;  %6523 = vmatpush.msrb.mxu2 %v14269_v36  ;;  %v14313_v13 = vand.u32 4294901760, %v11593_v60 }
 0x7ba   : > { %6576 = vmatpush.msrb.mxu3 %v14263_v3 }
 0x7bb   : > { %6096 = vmatmul.f32.vlgmr.msrb.gmra.mxu0 %v5828_v8  ;;  %6260 = vmatmul.f32.vlgmr.msra.gmra.mxu1 %v6159_v47  ;;  %v14271_v8 = vand.u32 4294901760, %v11599_v28  ;;  %v17401_v47 = vand.u32 4294901760, %v14269_v36  ;;  %v14325_v26 = vsub.f32 %v11593_v60, %v14313_v13 }
 0x7bc   : > { %6230 = vmatpush.msra.mxu0 %v18075_v15 }
 0x7bd   : > { %6293 = vmatmul.f32.vlgmr.msra.gmra.mxu2 %v6157_v32  ;;  %6578 = vmatpush.msrb.mxu3 %v14271_v8  ;;  %v6423_v15 = vsub.f32 %v14269_v36, %v17401_v47  ;;  %v17409_v60 = vand.u32 4294901760, %v14325_v26 }
 0x7be   : > { %6380 = vmatpush.msrb.mxu0 %v14263_v3 }
 0x7bf   : > { %6318 = vmatmul.f32.vlgmr.msra.gmra.mxu3 %v6157_v32  ;;  %v14277_v32 = vsub.f32 %v11599_v28, %v14271_v8  ;;  %v11595_v28 = vld [vmem:[%s16820_s7 + $0x1c0] sm:$0xff]  ;;  %v6424_v43 = vand.u32 4294901760, %v6423_v15 }
 0x7c0   : > { %6382 = vmatpush.msrb.mxu0 %v14271_v8  ;;  %v14298_v63 = vand.u32 4294901760, %v11595_v28 }
 0x7c1   : > { %v17405_v6 = vand.u32 4294901760, %v14277_v32  ;;  %6526 = vmatpush.msrb.mxu2 %v14277_v32  ;;  %6425 = vmatpush.msrb.mxu1 %v6424_v43  ;;  %v11589_v43 = vld [vmem:[%s16820_s7 + $0x190] sm:$0xff] }
 0x7c3   : > { %6233 = vmatmul.f32.vlgmr.msra.gmra.mxu0 %v6158_v33  ;;  %v11597_v33 = vld [vmem:[%s16820_s7 + $0x1d0] sm:$0xff]  ;;  %v6429_v47 = vsub.f32 %v14277_v32, %v17405_v6  ;;  %v11591_v6 = vld [vmem:[%s16820_s7 + $0x1a0] sm:$0xff] }
 0x7c4   : > { %v14284_v35 = vand.u32 4294901760, %v11597_v33  ;;  %v14328_v38 = vand.u32 4294901760, %v11591_v6 }
 0x7c5   : > { %v6430_v15 = vand.u32 4294901760, %v6429_v47 }
 0x7c6   : > { %v14296_v27 = vsub.f32 %v11597_v33, %v14284_v35  ;;  %6580 = vmatpush.msrb.mxu3 %v14284_v35  ;;  %6384 = vmatpush.msrb.mxu0 %v14284_v35  ;;  %v14310_v33 = vsub.f32 %v11595_v28, %v14298_v63  ;;  %v14340_v53 = vsub.f32 %v11591_v6, %v14328_v38 }
 0x7c7   : > { %6431 = vmatpush.msrb.mxu1 %v6430_v15  ;;  %v14344_v15 = vand.u32 4294901760, %v11589_v43 }
 0x7c8   : > { %v17407_v45 = vand.u32 4294901760, %v14296_v27  ;;  %6529 = vmatpush.msrb.mxu2 %v14296_v27  ;;  %6582 = vmatpush.msrb.mxu3 %v14298_v63  ;;  %v17408_v28 = vand.u32 4294901760, %v14310_v33  ;;  %v17410_v6 = vand.u32 4294901760, %v14340_v53 }
 0x7c9   : > { %6386 = vmatpush.msrb.mxu0 %v14298_v63  ;;  %v14358_v55 = vsub.f32 %v11589_v43, %v14344_v15  ;;  %v14389_v43 = vld [vmem:[%s16819_s6] ss:$0 sm:$0xff] }
 0x7ca   : > { %v6435_v56 = vsub.f32 %v14296_v27, %v17407_v45  ;;  %6532 = vmatpush.msrb.mxu2 %v14310_v33  ;;  %6584 = vmatpush.msrb.mxu3 %v14313_v13  ;;  %v6441_v45 = vsub.f32 %v14310_v33, %v17408_v28  ;;  %v6447_v28 = vsub.f32 %v14325_v26, %v17409_v60 }
 0x7cb   : > { %6388 = vmatpush.msrb.mxu0 %v14313_v13  ;;  %v14369_v60 = vsub.f32 %v11587_v61, %v14355_v21  ;;  %v14381_v61 = vsub.f32 %v11585_v58, %v14371_v23  ;;  %v18076_v1 = vand.u32 4294901760, %v14358_v55  ;;  %v11581_v58 = vld [vmem:[%s16820_s7 + $0x150] sm:$0xff] }
 0x7cc   : > { %v6436_v47 = vand.u32 4294901760, %v6435_v56  ;;  %6535 = vmatpush.msrb.mxu2 %v14325_v26  ;;  %6586 = vmatpush.msrb.mxu3 %v14328_v38  ;;  %v6442_v56 = vand.u32 4294901760, %v6441_v45  ;;  %v6448_v45 = vand.u32 4294901760, %v6447_v28  ;;  %v5493_v28 = vpop.f32.mrf.mxu2  ;;  %v14406_v54 = vand.u32 4294901760, %v11581_v58 }
 0x7cd   : > { %6390 = vmatpush.msrb.mxu0 %v14328_v38  ;;  %v6459_v20 = vsub.f32 %v14358_v55, %v18076_v1  ;;  %v5494_v1 = vadd.f32 %v14389_v43, %v5493_v28  ;;  %v11577_v28 = vld [vmem:[%s16820_s7 + $0x130] sm:$0xff] }
 0x7ce   : > { %6437 = vmatpush.msrb.mxu1 %v6436_v47  ;;  %6538 = vmatpush.msrb.mxu2 %v14340_v53  ;;  %v6453_v47 = vsub.f32 %v14340_v53, %v17410_v6  ;;  %v17411_v6 = vand.u32 4294901760, %v14369_v60  ;;  %v14420_v16 = vsub.f32 %v11581_v58, %v14406_v54  ;;  %v14433_v18 = vand.u32 4294901760, %v11577_v28 }
 0x7cf   : > { %6588 = vmatpush.msrb.mxu3 %v14344_v15  ;;  %6392 = vmatpush.msrb.mxu0 %v14344_v15  ;;  %v6460_v40 = vand.u32 4294901760, %v6459_v20 }
 0x7d0   : > { %6443 = vmatpush.msrb.mxu1 %v6442_v56  ;;  %6541 = vmatpush.msrb.mxu2 %v14358_v55  ;;  %v6454_v56 = vand.u32 4294901760, %v6453_v47  ;;  %v17412_v47 = vand.u32 4294901760, %v14381_v61  ;;  %v17416_v58 = vand.u32 4294901760, %v14420_v16  ;;  %v14448_v4 = vsub.f32 %v11577_v28, %v14433_v18 }
 0x7d1   : > { %6590 = vmatpush.msrb.mxu3 %v14355_v21  ;;  %6394 = vmatpush.msrb.mxu0 %v14355_v21 }
 0x7d2   : > { %6449 = vmatpush.msrb.mxu1 %v6448_v45  ;;  %6544 = vmatpush.msrb.mxu2 %v14369_v60  ;;  %v6465_v45 = vsub.f32 %v14369_v60, %v17411_v6  ;;  %v6471_v0 = vsub.f32 %v14381_v61, %v17412_v47  ;;  %v6477_v47 = vsub.f32 %v14404_v41, %v17413_v7  ;;  %v17420_v28 = vand.u32 4294901760, %v14448_v4 }
 0x7d3   : > { %6592 = vmatpush.msrb.mxu3 %v14371_v23  ;;  %6396 = vmatpush.msrb.mxu0 %v14371_v23  ;;  %v6483_v51 = vsub.f32 %v14420_v16, %v17416_v58 }
 0x7d4   : > { %6455 = vmatpush.msrb.mxu1 %v6454_v56  ;;  %6547 = vmatpush.msrb.mxu2 %v14381_v61  ;;  %v11579_v56 = vld [vmem:[%s16820_s7 + $0x140] sm:$0xff]  ;;  %v6466_v6 = vand.u32 4294901760, %v6465_v45  ;;  %v5594_v45 = vpop.f32.mrf.mxu3  ;;  %v6472_v19 = vand.u32 4294901760, %v6471_v0  ;;  %v6478_v7 = vand.u32 4294901760, %v6477_v47  ;;  %v11573_v47 = vld [vmem:[%s16820_s7 + $0x110] sm:$0xff]  ;;  %v5756_v34 = vpop.f32.mrf.mxu2 }
 0x7d5   : > { %6594 = vmatpush.msrb.mxu3 %v14383_v17  ;;  %6398 = vmatpush.msrb.mxu0 %v14383_v17  ;;  %v14424_v20 = vand.u32 4294901760, %v11579_v56  ;;  %v11575_v0 = vld [vmem:[%s16820_s7 + $0x120] sm:$0xff]  ;;  %v14463_v58 = vand.u32 4294901760, %v11573_v47 }
 0x7d6   : > { %6461 = vmatpush.msrb.mxu1 %v6460_v40  ;;  %6550 = vmatpush.msrb.mxu2 %v14404_v41  ;;  %v5595_v40 = vadd.f32 %v5594_v45, %v5494_v1  ;;  %v14450_v46 = vand.u32 4294901760, %v11575_v0  ;;  %v5648_v1 = vpop.f32.mrf.mxu0 }
 0x7d7   : > { %6596 = vmatpush.msrb.mxu3 %v14406_v54  ;;  %6400 = vmatpush.msrb.mxu0 %v14406_v54  ;;  %v14438_v39 = vsub.f32 %v11579_v56, %v14424_v20  ;;  %v6484_v56 = vand.u32 4294901760, %v6483_v51  ;;  %v11571_v51 = vld [vmem:[%s16820_s7 + $0x100] sm:$0xff]  ;;  %v14479_v50 = vsub.f32 %v11573_v47, %v14463_v58 }
 0x7d8   : > { %6467 = vmatpush.msrb.mxu1 %v6466_v6  ;;  %6553 = vmatpush.msrb.mxu2 %v14420_v16  ;;  %v14461_v45 = vsub.f32 %v11575_v0, %v14450_v46  ;;  %v6495_v0 = vsub.f32 %v14448_v4, %v17420_v28 }
 0x7d9   : > { %6598 = vmatpush.msrb.mxu3 %v14424_v20  ;;  %6402 = vmatpush.msrb.mxu0 %v14424_v20  ;;  %v17421_v6 = vand.u32 4294901760, %v14438_v39 }
 0x7da   : > { %6473 = vmatpush.msrb.mxu1 %v6472_v19  ;;  %6556 = vmatpush.msrb.mxu2 %v14438_v39  ;;  %v5649_v19 = vadd.f32 %v5648_v1, %v5595_v40  ;;  %v17423_v48 = vand.u32 4294901760, %v14461_v45  ;;  %v6496_v1 = vand.u32 4294901760, %v6495_v0 }
 0x7db   : > { %6600 = vmatpush.msrb.mxu3 %v14433_v18  ;;  %6404 = vmatpush.msrb.mxu0 %v14433_v18  ;;  %v6489_v14 = vsub.f32 %v14438_v39, %v17421_v6  ;;  %v17425_v6 = vand.u32 4294901760, %v14479_v50 }
 0x7dc   : > { %6479 = vmatpush.msrb.mxu1 %v6478_v7  ;;  %6559 = vmatpush.msrb.mxu2 %v14448_v4  ;;  %v14481_v7 = vand.u32 4294901760, %v11571_v51  ;;  %v6501_v28 = vsub.f32 %v14461_v45, %v17423_v48  ;;  %v5793_v57 = vpop.f32.mrf.mxu3 }
 0x7dd   : > { %6602 = vmatpush.msrb.mxu3 %v14450_v46  ;;  %6406 = vmatpush.msrb.mxu0 %v14450_v46  ;;  %v6490_v40 = vand.u32 4294901760, %v6489_v14  ;;  %v5688_v14 = vadd.f32 %v5687_v22, %v5649_v19  ;;  %v6507_v0 = vsub.f32 %v14479_v50, %v17425_v6  ;;  %v18077_v6 = vand.u32 4294901760, %v14269_v36 }
 0x7de   : > { %6485 = vmatpush.msrb.mxu1 %v6484_v56  ;;  %6562 = vmatpush.msrb.mxu2 %v14461_v45  ;;  %v14491_v47 = vsub.f32 %v11571_v51, %v14481_v7  ;;  %v6502_v56 = vand.u32 4294901760, %v6501_v28  ;;  %v11602_v51 = vld [vmem:[%s16820_s7 + $0x1f8] sm:$0xff]  ;;  %v18079_v36 = vand.u32 4294901760, %v14277_v32 }
 0x7df   : > { %6604 = vmatpush.msrb.mxu3 %v14463_v58  ;;  %6408 = vmatpush.msrb.mxu0 %v14463_v58  ;;  %v14506_v22 = vand.u32 4294901760, %v11602_v51  ;;  %v6508_v28 = vand.u32 4294901760, %v6507_v0  ;;  %v18078_v0 = vld [vmem:[#allocation249_spill] sm:$0xff] }
 0x7e0   : > { %6491 = vmatpush.msrb.mxu1 %v6490_v40  ;;  %6565 = vmatpush.msrb.mxu2 %v14479_v50  ;;  %v17429_v48 = vand.u32 4294901760, %v14491_v47  ;;  %v11600_v40 = vld [vmem:[%s16820_s7 + $0x1e8] sm:$0xff]  ;;  %v2531_v10 = vadd.f32 %v14389_v43, %v18078_v0  ;;  %v18080_v43 = vand.u32 4294901760, %v14296_v27  ;;  %v18082_v27 = vand.u32 4294901760, %v14310_v33 }
 0x7e1   : > { %6606 = vmatpush.msrb.mxu3 %v14481_v7  ;;  %6410 = vmatpush.msrb.mxu0 %v14481_v7  ;;  %v14520_v9 = vand.u32 4294901760, %v11600_v40  ;;  %v11592_v33 = vld [vmem:[%s16820_s7 + $0x1a8] sm:$0xff] }
 0x7e2   : > { %6497 = vmatpush.msrb.mxu1 %v6496_v1  ;;  %6568 = vmatpush.msrb.mxu2 %v14491_v47  ;;  %v6513_v19 = vsub.f32 %v14491_v47, %v17429_v48  ;;  %v14518_v1 = vsub.f32 %v11602_v51, %v14506_v22  ;;  %v5757_v48 = vadd.f32 %v5756_v34, %v5688_v14  ;;  %v11596_v34 = vld [vmem:[%s16820_s7 + $0x1c8] sm:$0xff] }
 0x7e3   : > { %6617 = vmatpush.msra.mxu0 %v18077_v6  ;;  %v14534_v51 = vsub.f32 %v11600_v40, %v14520_v9  ;;  %v18081_v40 = vld [vmem:[#allocation250_spill] sm:$0xff] }
 0x7e4   : > { %6503 = vmatpush.msrb.mxu1 %v6502_v56  ;;  %6721 = vmatpush.msra.mxu2 %v14506_v22  ;;  %v6514_v52 = vand.u32 4294901760, %v6513_v19  ;;  %v17433_v6 = vand.u32 4294901760, %v14518_v1  ;;  %v14531_v56 = vand.u32 4294901760, %v11598_v2  ;;  %v2632_v0 = vadd.f32 %v18081_v40, %v2531_v10 }
 0x7e5   : > { %6621 = vmatpush.msra.mxu0 %v18079_v36  ;;  %v17434_v14 = vand.u32 4294901760, %v14534_v51  ;;  %v5794_v62 = vadd.f32 %v5793_v57, %v5757_v48 }
 0x7e6   : > { %6509 = vmatpush.msrb.mxu1 %v6508_v28  ;;  %6723 = vmatpush.msra.mxu2 %v14520_v9  ;;  %v6764_v32 = vsub.f32 %v14518_v1, %v17433_v6  ;;  %v14546_v28 = vand.u32 4294901760, %v11596_v34  ;;  %v14549_v19 = vsub.f32 %v11598_v2, %v14531_v56 }
 0x7e7   : > { %6625 = vmatpush.msra.mxu0 %v18080_v43  ;;  %v6770_v6 = vsub.f32 %v14534_v51, %v17434_v14 }
 0x7e8   : > { %6515 = vmatpush.msrb.mxu1 %v6514_v52  ;;  %6725 = vmatpush.msra.mxu2 %v14531_v56  ;;  %v11594_v52 = vld [vmem:[%s16820_s7 + $0x1b8] sm:$0xff]  ;;  %v6765_v43 = vand.u32 4294901760, %v6764_v32  ;;  %v6775_v2 = vand.u32 4294901760, %v14549_v19  ;;  %v18083_v32 = vand.u32 4294901760, %v14325_v26 }
 0x7e9   : > { %6629 = vmatpush.msra.mxu0 %v18082_v27  ;;  %v14563_v10 = vand.u32 4294901760, %v11594_v52  ;;  %v6771_v27 = vand.u32 4294901760, %v6770_v6  ;;  %v18085_v6 = vand.u32 4294901760, %v14340_v53  ;;  %v11588_v53 = vld [vmem:[%s16820_s7 + $0x188] sm:$0xff] }
 0x7ea   : > { %6684 = vmatpush.msra.mxu1 %v14263_v3  ;;  %6727 = vmatpush.msra.mxu2 %v14546_v28  ;;  %v14567_v3 = vsub.f32 %v11596_v34, %v14546_v28  ;;  %v6776_v14 = vsub.f32 %v14549_v19, %v6775_v2  ;;  %v18084_v34 = vld [vmem:[#allocation255_spill] sm:$0xff] }
 0x7eb   : > { %6633 = vmatpush.msra.mxu0 %v18083_v32  ;;  %6766 = vmatpush.msra.mxu3 %v6765_v43  ;;  %v2686_v11 = vadd.f32 %v18084_v34, %v2632_v0  ;;  %v14584_v26 = vsub.f32 %v11594_v52, %v14563_v10 }
 0x7ec   : > { %6686 = vmatpush.msra.mxu1 %v14271_v8  ;;  %6729 = vmatpush.msra.mxu2 %v14563_v10  ;;  %v14578_v8 = vand.u32 4294901760, %v11592_v33  ;;  %v17441_v24 = vand.u32 4294901760, %v14567_v3 }
 0x7ed   : > { %6637 = vmatpush.msra.mxu0 %v18085_v6  ;;  %6772 = vmatpush.msra.mxu3 %v6771_v27  ;;  %v17439_v32 = vand.u32 4294901760, %v14584_v26  ;;  %v18087_v27 = vld [vmem:[#allocation252_spill] sm:$0xff] }
 0x7ee   : > { %6688 = vmatpush.msra.mxu1 %v14284_v35  ;;  %6731 = vmatpush.msra.mxu2 %v14578_v8  ;;  %v14595_v35 = vsub.f32 %v11592_v33, %v14578_v8  ;;  %v6782_v52 = vsub.f32 %v14567_v3, %v17441_v24  ;;  %v2725_v34 = vadd.f32 %v18087_v27, %v2686_v11 }
 0x7f0   : > { %6690 = vmatpush.msra.mxu1 %v14298_v63  ;;  %v17438_v33 = vand.u32 4294901760, %v14595_v35  ;;  %v14609_v63 = vand.u32 4294901760, %v11588_v53  ;;  %v6783_v6 = vand.u32 4294901760, %v6782_v52 }
 0x7f2   : > { %6692 = vmatpush.msra.mxu1 %v14313_v13 }
 0x7f4   : > { %6694 = vmatpush.msra.mxu1 %v14328_v38  ;;  %v18089_v38 = vand.u32 4294901760, %v14381_v61 }
 0x7f6   : > { %6696 = vmatpush.msra.mxu1 %v14344_v15  ;;  %v18091_v15 = vand.u32 4294901760, %v14404_v41 }
 0x7f8   : > { %6698 = vmatpush.msra.mxu1 %v14355_v21 }
 0x7fa   : > { %6700 = vmatpush.msra.mxu1 %v14371_v23 }
 0x7fc   : > { %6702 = vmatpush.msra.mxu1 %v14383_v17  ;;  %v18096_v17 = vand.u32 4294901760, %v14448_v4 }
 0x7fe   : > { %6704 = vmatpush.msra.mxu1 %v14406_v54  ;;  %v18097_v54 = vand.u32 4294901760, %v14461_v45 }
 0x800   : > { %6706 = vmatpush.msra.mxu1 %v14424_v20 }
 0x802   : > { %6708 = vmatpush.msra.mxu1 %v14433_v18  ;;  %v18100_v18 = vand.u32 4294901760, %v14491_v47 }
 0x804   : > { %6710 = vmatpush.msra.mxu1 %v14450_v46  ;;  %v18102_v46 = vld [vmem:[#allocation257_spill] sm:$0xff] }
 0x806   : > { %6712 = vmatpush.msra.mxu1 %v14463_v58  ;;  %v18104_v58 = vld [vmem:[#allocation260_spill] sm:$0xff] }
 0x808   : > { %6714 = vmatpush.msra.mxu1 %v14481_v7  ;;  %v18107_v7 = vld [vmem:[#allocation266_spill] sm:$0xff] }
 0x828   : > { %v5935_v36 = vpop.f32.mrf.mxu1 }
 0x830   : > { %v5834_v57 = vpop.f32.mrf.mxu0  ;;  %v5989_v48 = vpop.f32.mrf.mxu2 }
 0x831   : > { %v5835_v40 = vadd.f32 %v5834_v57, %v5794_v62  ;;  %v11590_v62 = vld [vmem:[%s16820_s7 + $0x198] sm:$0xff]  ;;  %v6777_v57 = vand.u32 4294901760, %v6776_v14  ;;  %v18086_v14 = vand.u32 4294901760, %v14358_v55  ;;  %v6788_v55 = vsub.f32 %v14584_v26, %v17439_v32  ;;  %v6134_v52 = vpop.f32.mrf.mxu1 }
 0x832   : > { %v6028_v31 = vpop.f32.mrf.mxu3  ;;  %v14592_v0 = vand.u32 4294901760, %v11590_v62 }
 0x833   : > { %v5936_v43 = vadd.f32 %v5935_v36, %v5835_v40  ;;  %6641 = vmatpush.msra.mxu0 %v18086_v14  ;;  %6778 = vmatpush.msra.mxu3 %v6777_v57  ;;  %v6789_v27 = vand.u32 4294901760, %v6788_v55 }
 0x834   : > { %6733 = vmatpush.msra.mxu2 %v14592_v0  ;;  %v14612_v40 = vsub.f32 %v11590_v62, %v14592_v0  ;;  %v6794_v62 = vsub.f32 %v14595_v35, %v17438_v33 }
 0x835   : > { %v5990_v36 = vadd.f32 %v5989_v48, %v5936_v43  ;;  %v11586_v48 = vld [vmem:[%s16820_s7 + $0x178] sm:$0xff]  ;;  %v18088_v43 = vand.u32 4294901760, %v14369_v60  ;;  %6784 = vmatpush.msra.mxu3 %v6783_v6  ;;  %v14633_v60 = vsub.f32 %v11588_v53, %v14609_v63 }
 0x836   : > { %6735 = vmatpush.msra.mxu2 %v14609_v63  ;;  %v17440_v11 = vand.u32 4294901760, %v14612_v40  ;;  %v14629_v13 = vand.u32 4294901760, %v11586_v48  ;;  %v18090_v6 = vld [vmem:[#allocation251_spill] sm:$0xff] }
 0x837   : > { %6645 = vmatpush.msra.mxu0 %v18088_v43  ;;  %v6029_v57 = vadd.f32 %v6028_v31, %v5990_v36  ;;  %v11584_v31 = vld [vmem:[%s16820_s7 + $0x168] sm:$0xff]  ;;  %v6795_v43 = vand.u32 4294901760, %v6794_v62  ;;  %v2794_v53 = vadd.f32 %v18090_v6, %v2725_v34  ;;  %6790 = vmatpush.msra.mxu3 %v6789_v27 }
 0x838   : > { %v6097_v14 = vpop.f32.mrf.mxu0  ;;  %v6800_v33 = vsub.f32 %v14612_v40, %v17440_v11  ;;  %6737 = vmatpush.msra.mxu2 %v14629_v13  ;;  %v14642_v32 = vand.u32 4294901760, %v11584_v31  ;;  %v6163_v55 = vpop.f32.mrf.mxu2  ;;  %v14650_v62 = vsub.f32 %v11586_v48, %v14629_v13 }
 0x839   : > { %v6098_v36 = vadd.f32 %v6097_v14, %v6029_v57  ;;  %6649 = vmatpush.msra.mxu0 %v18089_v38  ;;  %v17442_v57 = vand.u32 4294901760, %v14633_v60  ;;  %v11582_v14 = vld [vmem:[%s16820_s7 + $0x158] sm:$0xff]  ;;  %6796 = vmatpush.msra.mxu3 %v6795_v43  ;;  %v18092_v43 = vand.u32 4294901760, %v14420_v16  ;;  %v18093_v38 = vld [vmem:[#allocation253_spill] sm:$0xff] }
 0x83a   : > { %v6801_v24 = vand.u32 4294901760, %v6800_v33  ;;  %6739 = vmatpush.msra.mxu2 %v14642_v32  ;;  %v14656_v61 = vand.u32 4294901760, %v11582_v14  ;;  %v14659_v34 = vsub.f32 %v11584_v31, %v14642_v32  ;;  %v6204_v27 = vpop.f32.mrf.mxu3  ;;  %v17444_v33 = vand.u32 4294901760, %v14650_v62 }
 0x83b   : > { %v6135_v11 = vadd.f32 %v6134_v52, %v6098_v36  ;;  %6653 = vmatpush.msra.mxu0 %v18091_v15  ;;  %v6806_v48 = vsub.f32 %v14633_v60, %v17442_v57  ;;  %v11580_v52 = vld [vmem:[%s16820_s7 + $0x148] sm:$0xff]  ;;  %v2831_v6 = vadd.f32 %v18093_v38, %v2794_v53 }
 0x83c   : > { %6741 = vmatpush.msra.mxu2 %v14656_v61  ;;  %v17443_v41 = vand.u32 4294901760, %v14659_v34  ;;  %v14673_v31 = vand.u32 4294901760, %v11580_v52  ;;  %v14676_v21 = vsub.f32 %v11582_v14, %v14656_v61  ;;  %6802 = vmatpush.msra.mxu3 %v6801_v24  ;;  %v18094_v24 = vand.u32 4294901760, %v14438_v39  ;;  %v18095_v14 = vld [vmem:[#allocation259_spill] sm:$0xff]  ;;  %v11576_v38 = vld [vmem:[%s16820_s7 + $0x128] sm:$0xff] }
 0x83d   : > { %v6164_v36 = vadd.f32 %v6163_v55, %v6135_v11  ;;  %6657 = vmatpush.msra.mxu0 %v18092_v43  ;;  %v6807_v15 = vand.u32 4294901760, %v6806_v48  ;;  %v6812_v11 = vsub.f32 %v14650_v62, %v17444_v33  ;;  %v11578_v55 = vld [vmem:[%s16820_s7 + $0x138] sm:$0xff]  ;;  %v2872_v48 = vadd.f32 %v18095_v14, %v2831_v6 }
 0x83e   : > { %v6818_v16 = vsub.f32 %v14659_v34, %v17443_v41  ;;  %6743 = vmatpush.msra.mxu2 %v14673_v31  ;;  %v17450_v53 = vand.u32 4294901760, %v14676_v21  ;;  %v14693_v23 = vand.u32 4294901760, %v11578_v55  ;;  %v14709_v6 = vand.u32 4294901760, %v11576_v38 }
 0x83f   : > { %v6205_v57 = vadd.f32 %v6204_v27, %v6164_v36  ;;  %6661 = vmatpush.msra.mxu0 %v18094_v24  ;;  %6808 = vmatpush.msra.mxu3 %v6807_v15  ;;  %v6813_v27 = vand.u32 4294901760, %v6812_v11  ;;  %v14700_v36 = vsub.f32 %v11580_v52, %v14673_v31  ;;  %v6261_v15 = vpop.f32.mrf.mxu1  ;;  %v11574_v11 = vld [vmem:[%s16820_s7 + $0x118] sm:$0xff] }
 0x840   : > { %v6234_v43 = vpop.f32.mrf.mxu0  ;;  %v6819_v33 = vand.u32 4294901760, %v6818_v16  ;;  %v6824_v39 = vsub.f32 %v14676_v21, %v17450_v53  ;;  %6745 = vmatpush.msra.mxu2 %v14693_v23  ;;  %v14722_v14 = vand.u32 4294901760, %v11574_v11  ;;  %v14725_v4 = vsub.f32 %v11576_v38, %v14709_v6  ;;  %v11572_v38 = vld [vmem:[%s16820_s7 + $0x108] sm:$0xff] }
 0x841   : > { %v6235_v41 = vadd.f32 %v6234_v43, %v6205_v57  ;;  %6665 = vmatpush.msra.mxu0 %v18096_v17  ;;  %6814 = vmatpush.msra.mxu3 %v6813_v27  ;;  %v17448_v52 = vand.u32 4294901760, %v14700_v36  ;;  %v14716_v57 = vsub.f32 %v11578_v55, %v14693_v23  ;;  %v18098_v43 = vld [vmem:[#allocation256_spill] sm:$0xff]  ;;  %v6294_v55 = vpop.f32.mrf.mxu2 }
 0x842   : > { %v6825_v24 = vand.u32 4294901760, %v6824_v39  ;;  %6747 = vmatpush.msra.mxu2 %v14709_v6  ;;  %v2973_v27 = vadd.f32 %v18098_v43, %v2872_v48  ;;  %v17445_v45 = vand.u32 4294901760, %v14725_v4  ;;  %v14740_v48 = vand.u32 4294901760, %v11572_v38 }
 0x843   : > { %v6262_v16 = vadd.f32 %v6261_v15, %v6235_v41  ;;  %6669 = vmatpush.msra.mxu0 %v18097_v54  ;;  %6820 = vmatpush.msra.mxu3 %v6819_v33  ;;  %v6830_v41 = vsub.f32 %v14700_v36, %v17448_v52  ;;  %v17446_v39 = vand.u32 4294901760, %v14716_v57  ;;  %v14743_v20 = vsub.f32 %v11574_v11, %v14722_v14  ;;  %v6319_v15 = vpop.f32.mrf.mxu3 }
 0x844   : > { %6749 = vmatpush.msra.mxu2 %v14722_v14  ;;  %v18099_v33 = vand.u32 4294901760, %v14479_v50  ;;  %v14757_v50 = vsub.f32 %v11572_v38, %v14740_v48 }
 0x845   : > { %v6295_v17 = vadd.f32 %v6294_v55, %v6262_v16  ;;  %6826 = vmatpush.msra.mxu3 %v6825_v24  ;;  %v6831_v54 = vand.u32 4294901760, %v6830_v41  ;;  %v6836_v16 = vsub.f32 %v14716_v57, %v17446_v39  ;;  %v6842_v55 = vsub.f32 %v14725_v4, %v17445_v45  ;;  %v18101_v24 = vld [vmem:[#allocation254_spill] sm:$0xff] }
 0x846   : > { %6673 = vmatpush.msra.mxu0 %v18099_v33  ;;  %6751 = vmatpush.msra.mxu2 %v14740_v48  ;;  %v17447_v11 = vand.u32 4294901760, %v14743_v20  ;;  %v3027_v41 = vadd.f32 %v18101_v24, %v2973_v27  ;;  %v17449_v39 = vand.u32 4294901760, %v14757_v50 }
 0x847   : > { %v6320_v43 = vadd.f32 %v6319_v15, %v6295_v17  ;;  %6832 = vmatpush.msra.mxu3 %v6831_v54  ;;  %v6837_v17 = vand.u32 4294901760, %v6836_v16  ;;  %v6843_v15 = vand.u32 4294901760, %v6842_v55  ;;  %v18103_v55 = vld [vmem:[#allocation262_spill] sm:$0xff] }
 0x848   : > { %6677 = vmatpush.msra.mxu0 %v18100_v18  ;;  %v6848_v45 = vsub.f32 %v14743_v20, %v17447_v11  ;;  %v6854_v27 = vsub.f32 %v14757_v50, %v17449_v39  ;;  %v3066_v54 = vadd.f32 %v18102_v46, %v3027_v41  ;;  %v18106_v39 = vld [vmem:[#allocation261_spill] sm:$0xff] }
 0x849   : > { %v11569_v33 = vadd.f32 -1.0, %v6320_v43  ;;  %6838 = vmatpush.msra.mxu3 %v6837_v17 }
 0x84a   : > { %v6849_v47 = vand.u32 4294901760, %v6848_v45  ;;  %v6855_v16 = vand.u32 4294901760, %v6854_v27  ;;  %v3135_v18 = vadd.f32 %v18103_v55, %v3066_v54  ;;  %v18105_v45 = vld [vmem:[#allocation258_spill] sm:$0xff] }
 0x84b   : > { %v11570_v38 = vmul.f32 -1.442695, %v11569_v33  ;;  %6844 = vmatpush.msra.mxu3 %v6843_v15 }
 0x84c   : > { %v3172_v17 = vadd.f32 %v18104_v58, %v3135_v18 }
 0x84d   : > { %11743 = vpow2.f32 %v11570_v38  ;;  %6850 = vmatpush.msra.mxu3 %v6849_v47 }
 0x84e   : > { %v3201_v11 = vadd.f32 %v18105_v45, %v3172_v17 }
 0x84f   : > { %6856 = vmatpush.msra.mxu3 %v6855_v16  ;;  %v18108_v16 = vld [vmem:[#allocation263_spill] sm:$0xff] }
 0x850   : > { %v3242_v53 = vadd.f32 %v18106_v39, %v3201_v11  ;;  %v18109_v39 = vld [vmem:[#allocation264_spill] sm:$0xff] }
 0x852   : > { %v3272_v15 = vadd.f32 %v18107_v7, %v3242_v53 }
 0x853   : > { %v11744_v24 = vpop.eup %11743 }
 0x854   : > { %v6326_v33 = vadd.f32 1.0, %v11744_v24  ;;  %v3299_v55 = vadd.f32 %v18108_v16, %v3272_v15 }
 0x856   : > { %11745 = vrcp.f32 %v6326_v33  ;;  %v6338_v38 = vand.u32 2147483648, %v6326_v33  ;;  %v6336_v47 = vand.u32 2147483647, %v6326_v33  ;;  %vm6332_vm1 = vweird.f32 %v6326_v33 }
 0x857   : > { %v3332_v11 = vadd.f32 %v18109_v39, %v3299_v55  ;;  %v18118_v55 = vand.u32 4294901760, %v14633_v60 }
 0x858   : > { %v6339_v18 = vor.u32 1.1754944e-38, %v6338_v38  ;;  %vm6337_vm7 = vcmp.eq.f32.partialorder %v6336_v47, 8.507059e+37 }
 0x85c   : > { %v11746_v52 = vpop.eup %11745 }
 0x85d   : > { %v6328_v41 = vmul.f32 %v11746_v52, %v6326_v33  ;;  %vm6333_vm2 = vweird.f32 %v11746_v52 }
 0x85e   : > { %vm6334_vm6 = vmor %vm6332_vm1, %vm6333_vm2  ;;  %vm18172_vm1 = vcmask 220160  }
 0x85f   : > { %v6329_v46 = vsub.f32 1.0, %v6328_v41  ;;  %v18110_v41 = vld [vmem:[#allocation265_spill] sm:$0xff] }
 0x860   : > { %v14787_v33 = vadd.f32 %v18110_v41, %v3332_v11  ;;  %v18121_v41 = vand.u32 4294901760, %v14676_v21 }
 0x861   : > { %v6330_v27 = vmul.f32 %v11746_v52, %v6329_v46  ;;  %v18112_v46 = vand.u32 4294901760, %v14518_v1 }
 0x862   : > { %v11554_v38 = vadd.f32 -1.0, %v14787_v33 }
 0x863   : > { %v6331_v54 = vadd.f32 %v11746_v52, %v6330_v27  ;;  %v18113_v27 = vand.u32 4294901760, %v14534_v51 }
 0x865   : > { %v6335_v24 = vsel %vm6334_vm6, %v11746_v52, %v6331_v54  ;;  %v11555_v54 = vmul.f32 -1.442695, %v11554_v38  ;;  %vm18174_vm6 = vmmov %vm18172_vm1 }
 0x866   : > { %v6340_v58 = vsel %vm6337_vm7, %v6339_v18, %v6335_v24  ;;  %v18119_v24 = vand.u32 4294901760, %v14650_v62  ;;  %vm18191_vm7 = vcmask 146432  }
 0x867   : > { %v6342_v17 = vmul.f32 %v6340_v58, %v6320_v43  ;;  %v14795_v43 = vld [vmem:[%s11937_s28 + $0x10] sm:$0x3f]  ;;  %11747 = vpow2.f32 %v11555_v54  ;;  %v18123_v54 = vand.u32 4294901760, %v14716_v57 }
 0x868   : > { %18111 = vst [vmem:[#allocation249_spill] sm:$0xff] %v14795_v43  ;;  %7746 = vrot.lane.b32.xlu0 %v14795_v43, %s11816_s14  ;;  %v7749_v15 = vrot.slane %v14795_v43, 1 }
 0x869   : > { %v14780_v45 = vand.u32 4294901760, %v6342_v17 }
 0x86a   : > { %7750 = vrot.lane.b32.xlu1 %v7749_v15, %s11814_s30 }
 0x86b   : > { %v14783_v53 = vsub.f32 %v6342_v17, %v14780_v45  ;;  %6517 = vmatmul.f32.vlgmr.msrb.gmra.mxu1 %v14780_v45  ;;  %v3405_v17 = vld [vmem:[%s16820_s7 + $0xb0] sm:$0xff] }
 0x86c   : > { %6917 = vmatpush.msrb.mxu1 %v14506_v22  ;;  %v14893_v11 = vand.u32 4294901760, %v3405_v17 }
 0x86d   : > { %6571 = vmatmul.f32.vlgmr.msrb.gmra.mxu2 %v14783_v53  ;;  %v14792_v52 = vand.u32 4294901760, %v14783_v53 }
 0x86e   : > { %6919 = vmatpush.msrb.mxu1 %v14520_v9  ;;  %6958 = vmatpush.msrb.mxu2 %v18112_v46 }
 0x86f   : > { %6610 = vmatmul.f32.vlgmr.msrb.gmra.mxu3 %v14792_v52  ;;  %v6414_v7 = vsub.f32 %v14783_v53, %v14792_v52 }
 0x870   : > { %6921 = vmatpush.msrb.mxu1 %v14531_v56  ;;  %6962 = vmatpush.msrb.mxu2 %v18113_v27 }
 0x871   : > { %7025 = vmatpush.msrb.mxu3 %v14506_v22  ;;  %v6415_v47 = vand.u32 4294901760, %v6414_v7  ;;  %v18114_v22 = vand.u32 4294901760, %v14567_v3  ;;  %v18122_v7 = vand.u32 4294901760, %v14700_v36  ;;  %7757 = vrot.lane.b32.xlu0 %v7749_v15, %s11815_s13  ;;  %s18127_s13 = smov 119  }
 0x872   : > { %6923 = vmatpush.msrb.mxu1 %v14546_v28  ;;  %6966 = vmatpush.msrb.mxu2 %v6775_v2  ;;  %v18117_v2 = vand.u32 4294901760, %v14612_v40 }
 0x873   : > { %7027 = vmatpush.msrb.mxu3 %v14520_v9  ;;  %6416 = vmatmul.f32.vlgmr.msrb.gmra.mxu0 %v6415_v47  ;;  %v18115_v9 = vand.u32 4294901760, %v14584_v26 }
 0x874   : > { %6716 = vmatmul.f32.vlgmr.msra.gmra.mxu1 %v14780_v45  ;;  %6864 = vmatpush.msrb.mxu0 %v14518_v1  ;;  %v3413_v1 = vld [vmem:[%s16820_s7 + $0xf0] sm:$0xff] }
 0x875   : > { %6925 = vmatpush.msrb.mxu1 %v14563_v10  ;;  %6970 = vmatpush.msrb.mxu2 %v18114_v22 }
 0x876   : > { %7029 = vmatpush.msrb.mxu3 %v14531_v56  ;;  %6757 = vmatmul.f32.vlgmr.msra.gmra.mxu2 %v6415_v47  ;;  %v18116_v56 = vand.u32 4294901760, %v14595_v35  ;;  %v3399_v47 = vld [vmem:[%s16820_s7 + $0x80] sm:$0xff] }
 0x877   : > { %6867 = vmatpush.msrb.mxu0 %v14534_v51  ;;  %6927 = vmatpush.msrb.mxu1 %v14578_v8  ;;  %v3411_v51 = vld [vmem:[%s16820_s7 + $0xe0] sm:$0xff] }
 0x878   : > { %6974 = vmatpush.msrb.mxu2 %v18115_v9  ;;  %7031 = vmatpush.msrb.mxu3 %v14546_v28  ;;  %v14842_v28 = vand.u32 4294901760, %v3413_v1  ;;  %v14852_v16 = vand.u32 4294901760, %v3411_v51 }
 0x879   : > { %6858 = vmatmul.f32.vlgmr.msra.gmra.mxu3 %v14780_v45  ;;  %6870 = vmatpush.msrb.mxu0 %v14549_v19  ;;  %v3409_v19 = vld [vmem:[%s16820_s7 + $0xd0] sm:$0xff] }
 0x87a   : > { %6929 = vmatpush.msrb.mxu1 %v14592_v0  ;;  %6978 = vmatpush.msrb.mxu2 %v18116_v56  ;;  %v14865_v18 = vand.u32 4294901760, %v3409_v19  ;;  %v14875_v58 = vsub.f32 %v3411_v51, %v14852_v16 }
 0x87b   : > { %7033 = vmatpush.msrb.mxu3 %v14563_v10  ;;  %6873 = vmatpush.msrb.mxu0 %v14567_v3  ;;  %v11748_v10 = vpop.eup %11747  ;;  %v3407_v3 = vld [vmem:[%s16820_s7 + $0xc0] sm:$0xff] }
 0x87c   : > { %6931 = vmatpush.msrb.mxu1 %v14609_v63  ;;  %6982 = vmatpush.msrb.mxu2 %v18117_v2  ;;  %v14889_v39 = vsub.f32 %v3409_v19, %v14865_v18 }
 0x87d   : > { %7035 = vmatpush.msrb.mxu3 %v14578_v8  ;;  %6679 = vmatmul.f32.vlgmr.msra.gmra.mxu0 %v14780_v45  ;;  %v14863_v8 = vsub.f32 %v3413_v1, %v14842_v28  ;;  %v3397_v1 = vld [vmem:[%s16820_s7 + $0x70] sm:$0xff] }
 0x87e   : > { %6876 = vmatpush.msrb.mxu0 %v14584_v26  ;;  %6933 = vmatpush.msrb.mxu1 %v14629_v13  ;;  %v14869_v26 = vadd.f32 1.0, %v11748_v10  ;;  %v17464_v38 = vand.u32 4294901760, %v14889_v39 }
 0x87f   : > { %6986 = vmatpush.msrb.mxu2 %v18118_v55  ;;  %7037 = vmatpush.msrb.mxu3 %v14592_v0  ;;  %v14877_v0 = vand.u32 4294901760, %v3407_v3 }
 0x880   : > { %6879 = vmatpush.msrb.mxu0 %v14595_v35  ;;  %6935 = vmatpush.msrb.mxu1 %v14642_v32  ;;  %v18120_v35 = vand.u32 4294901760, %v14659_v34  ;;  %11749 = vrcp.f32 %v14869_v26  ;;  %vm3369_vm4 = vweird.f32 %v14869_v26 }
 0x881   : > { %6990 = vmatpush.msrb.mxu2 %v18119_v24  ;;  %7039 = vmatpush.msrb.mxu3 %v14609_v63  ;;  %v17466_v63 = vand.u32 4294901760, %v14863_v8  ;;  %v14904_v46 = vsub.f32 %v3407_v3, %v14877_v0  ;;  %v18125_v3 = vand.u32 4294901760, %v14743_v20  ;;  %v14970_v24 = vand.u32 4294901760, %v3397_v1 }
 0x882   : > { %6882 = vmatpush.msrb.mxu0 %v14612_v40  ;;  %6937 = vmatpush.msrb.mxu1 %v14656_v61  ;;  %v3403_v40 = vld [vmem:[%s16820_s7 + $0xa0] sm:$0xff] }
 0x883   : > { %6994 = vmatpush.msrb.mxu2 %v18120_v35  ;;  %7041 = vmatpush.msrb.mxu3 %v14629_v13  ;;  %v17465_v13 = vand.u32 4294901760, %v14875_v58  ;;  %v14918_v27 = vand.u32 4294901760, %v3403_v40  ;;  %v17457_v9 = vand.u32 4294901760, %v14904_v46 }
 0x884   : > { %6885 = vmatpush.msrb.mxu0 %v14633_v60  ;;  %6939 = vmatpush.msrb.mxu1 %v14673_v31  ;;  %v3401_v60 = vld [vmem:[%s16820_s7 + $0x90] sm:$0xff] }
 0x885   : > { %6998 = vmatpush.msrb.mxu2 %v18121_v41  ;;  %7043 = vmatpush.msrb.mxu3 %v14642_v32  ;;  %v7105_v32 = vsub.f32 %v14863_v8, %v17466_v63  ;;  %v7111_v22 = vsub.f32 %v14875_v58, %v17465_v13  ;;  %v14953_v2 = vsub.f32 %v3403_v40, %v14918_v27  ;;  %v18126_v40 = vand.u32 4294901760, %v14757_v50 }
 0x886   : > { %6888 = vmatpush.msrb.mxu0 %v14650_v62  ;;  %6941 = vmatpush.msrb.mxu1 %v14693_v23  ;;  %v14926_v62 = vsub.f32 %v3405_v17, %v14893_v11  ;;  %v14944_v56 = vpop.eup %11749 }
 0x887   : > { %7002 = vmatpush.msrb.mxu2 %v18122_v7  ;;  %7045 = vmatpush.msrb.mxu3 %v14656_v61  ;;  %v14928_v61 = vand.u32 4294901760, %v3401_v60  ;;  %v7106_v51 = vand.u32 4294901760, %v7105_v32  ;;  %v7112_v55 = vand.u32 4294901760, %v7111_v22  ;;  %v3365_v17 = vmul.f32 %v14944_v56, %v14869_v26  ;;  %v3391_v32 = vld [vmem:[%s16820_s7 + $0x40] sm:$0xff] }
 0x888   : > { %6891 = vmatpush.msrb.mxu0 %v14659_v34  ;;  %6943 = vmatpush.msrb.mxu1 %v14709_v6  ;;  %v14939_v34 = vand.u32 4294901760, %v3399_v47  ;;  %v17456_v19 = vand.u32 4294901760, %v14926_v62  ;;  %vm3370_vm13 = vweird.f32 %v14944_v56 }
 0x889   : > { %7006 = vmatpush.msrb.mxu2 %v18123_v54  ;;  %7047 = vmatpush.msrb.mxu3 %v14673_v31  ;;  %v18124_v31 = vand.u32 4294901760, %v14725_v4  ;;  %v14959_v10 = vsub.f32 %v3401_v60, %v14928_v61  ;;  %v17454_v60 = vand.u32 4294901760, %v14953_v2  ;;  %v14998_v54 = vsub.f32 %v3397_v1, %v14970_v24  ;;  %vm15088_vm3 = vmor %vm3369_vm4, %vm3370_vm13 }
 0x88a   : > { %6894 = vmatpush.msrb.mxu0 %v14676_v21  ;;  %6945 = vmatpush.msrb.mxu1 %v14722_v14  ;;  %v7117_v21 = vsub.f32 %v14889_v39, %v17464_v38  ;;  %v14977_v35 = vsub.f32 %v3399_v47, %v14939_v34  ;;  %v3366_v22 = vsub.f32 1.0, %v3365_v17  ;;  %v3402_v38 = vld [vmem:[%s16820_s7 + $0x98] sm:$0xff]  ;;  %vm18192_vm13 = vcmask 72704   ;;  %vm18194_vm4 = vmmov %vm18172_vm1 }
 0x88b   : > { %7010 = vmatpush.msrb.mxu2 %v18124_v31  ;;  %7049 = vmatpush.msrb.mxu3 %v14693_v23  ;;  %v3395_v23 = vld [vmem:[%s16820_s7 + $0x60] sm:$0xff]  ;;  %v7135_v1 = vsub.f32 %v14953_v2, %v17454_v60  ;;  %v3373_v60 = vand.u32 2147483647, %v14869_v26 }
 0x88c   : > { %6897 = vmatpush.msrb.mxu0 %v14700_v36  ;;  %6947 = vmatpush.msrb.mxu1 %v14740_v48  ;;  %v7123_v36 = vsub.f32 %v14904_v46, %v17457_v9  ;;  %v7118_v41 = vand.u32 4294901760, %v7117_v21  ;;  %v14985_v7 = vand.u32 4294901760, %v3395_v23  ;;  %v17451_v31 = vand.u32 4294901760, %v14977_v35 }
 0x88d   : > { %7014 = vmatpush.msrb.mxu2 %v18125_v3  ;;  %7051 = vmatpush.msrb.mxu3 %v14709_v6  ;;  %v3393_v6 = vld [vmem:[%s16820_s7 + $0x50] sm:$0xff]  ;;  %v15015_v3 = vand.u32 4294901760, %v3391_v32  ;;  %v3367_v17 = vmul.f32 %v14944_v56, %v3366_v22  ;;  %vm3374_vm2 = vcmp.eq.f32.partialorder %v3373_v60, 8.507059e+37 }
 0x88e   : > { %6951 = vmatmul.f32.vlgmr.msrb.gmra.mxu1 %v14792_v52  ;;  %6900 = vmatpush.msrb.mxu0 %v14716_v57  ;;  %v7129_v57 = vsub.f32 %v14926_v62, %v17456_v19  ;;  %v17453_v52 = vand.u32 4294901760, %v14959_v10  ;;  %v7124_v47 = vand.u32 4294901760, %v7123_v36  ;;  %v15013_v21 = vsub.f32 %v3395_v23, %v14985_v7 }
 0x88f   : > { %7107 = vmatpush.msra.mxu1 %v7106_v51  ;;  %7018 = vmatpush.msrb.mxu2 %v18126_v40  ;;  %v3389_v51 = vld [vmem:[%s16820_s7 + $0x30] sm:$0xff]  ;;  %v17452_v23 = vand.u32 4294901760, %v14998_v54  ;;  %v7147_v40 = vsub.f32 %v14977_v35, %v17451_v31 }
 0x890   : > { %7053 = vmatpush.msrb.mxu3 %v14722_v14  ;;  %7020 = vmatmul.f32.vlgmr.msrb.gmra.mxu2 %v14780_v45  ;;  %v15000_v14 = vand.u32 4294901760, %v3393_v6  ;;  %v15030_v36 = vand.u32 4294901760, %v3389_v51 }
 0x891   : > { %7113 = vmatpush.msra.mxu1 %v7112_v55  ;;  %7205 = vmatpush.msra.mxu2 %v14863_v8  ;;  %v7153_v15 = vsub.f32 %v14998_v54, %v17452_v23  ;;  %v7148_v31 = vand.u32 4294901760, %v7147_v40 }
 0x892   : > { %6903 = vmatpush.msrb.mxu0 %v14725_v4  ;;  %7055 = vmatpush.msrb.mxu3 %v14740_v48  ;;  %v7130_v4 = vand.u32 4294901760, %v7129_v57  ;;  %v7141_v48 = vsub.f32 %v14959_v10, %v17453_v52  ;;  %v15028_v55 = vsub.f32 %v3393_v6, %v15000_v14  ;;  %v7136_v6 = vand.u32 4294901760, %v7135_v1 }
 0x893   : > { %7057 = vmatmul.f32.vlgmr.msrb.gmra.mxu3 %v14780_v45  ;;  %7119 = vmatpush.msra.mxu1 %v7118_v41  ;;  %v3387_v45 = vld [vmem:[%s16820_s7 + $0x20] sm:$0xff]  ;;  %v17455_v41 = vand.u32 4294901760, %v15013_v21  ;;  %v15047_v57 = vsub.f32 %v3391_v32, %v15015_v3  ;;  %v15062_v1 = vsub.f32 %v3389_v51, %v15030_v36 }
 0x894   : > { %7208 = vmatpush.msra.mxu2 %v14875_v58  ;;  %7258 = vmatpush.msra.mxu3 %v14842_v28  ;;  %v7142_v22 = vand.u32 4294901760, %v7141_v48  ;;  %v17458_v32 = vand.u32 4294901760, %v15028_v55  ;;  %v3375_v48 = vand.u32 2147483648, %v14869_v26 }
 0x895   : > { %6906 = vmatpush.msrb.mxu0 %v14743_v20  ;;  %7125 = vmatpush.msra.mxu1 %v7124_v47  ;;  %v3385_v20 = vld [vmem:[%s16820_s7 + $0x10] sm:$0xff]  ;;  %v15049_v47 = vand.u32 4294901760, %v3387_v45  ;;  %v7159_v51 = vsub.f32 %v15013_v21, %v17455_v41  ;;  %v17463_v23 = vand.u32 4294901760, %v15047_v57  ;;  %v17462_v26 = vand.u32 4294901760, %v15062_v1 }
 0x896   : > { %7211 = vmatpush.msra.mxu2 %v14889_v39  ;;  %7260 = vmatpush.msra.mxu3 %v14852_v16  ;;  %v3376_v9 = vor.u32 1.1754944e-38, %v3375_v48 }
 0x897   : > { %6909 = vmatpush.msrb.mxu0 %v14757_v50  ;;  %7131 = vmatpush.msra.mxu1 %v7130_v4  ;;  %v3383_v50 = vld [vmem:[%s16820_s7] sm:$0xff]  ;;  %v3368_v4 = vadd.f32 %v14944_v56, %v3367_v17  ;;  %v15078_v17 = vsub.f32 %v3387_v45, %v15049_v47  ;;  %v7154_v45 = vand.u32 4294901760, %v7153_v15  ;;  %v7171_v15 = vsub.f32 %v15047_v57, %v17463_v23 }
 0x898   : > { %6912 = vmatmul.f32.vlgmr.msrb.gmra.mxu0 %v14783_v53  ;;  %7214 = vmatpush.msra.mxu2 %v14904_v46  ;;  %v15064_v53 = vand.u32 4294901760, %v3385_v20  ;;  %v15080_v52 = vand.u32 4294901760, %v3383_v50 }
 0x899   : > { %7062 = vmatpush.msra.mxu0 %v14842_v28  ;;  %7262 = vmatpush.msra.mxu3 %v14865_v18  ;;  %v3372_v19 = vsel %vm15088_vm3, %v14944_v56, %v3368_v4  ;;  %v7177_v4 = vsub.f32 %v15062_v1, %v17462_v26  ;;  %vm18195_vm3 = vmmov %vm18172_vm1 }
 0x89a   : > { %7969 = vrot.lane.b32.xlu2 %v14795_v43, %s18127_s13  ;;  %7137 = vmatpush.msra.mxu1 %v7136_v6  ;;  %v7165_v6 = vsub.f32 %v15028_v55, %v17458_v32  ;;  %v15098_v41 = vsub.f32 %v3385_v20, %v15064_v53  ;;  %v17460_v20 = vand.u32 4294901760, %v15078_v17  ;;  %v15111_v32 = vsub.f32 %v3383_v50, %v15080_v52  ;;  %v3414_v50 = vld [vmem:[%s16820_s7 + $0xf8] sm:$0xff] }
 0x89b   : > { %7064 = vmatpush.msra.mxu0 %v14852_v16  ;;  %7217 = vmatpush.msra.mxu2 %v14926_v62  ;;  %v3377_v56 = vsel %vm3374_vm2, %v3376_v9, %v3372_v19  ;;  %v7172_v9 = vand.u32 4294901760, %v7171_v15 }
 0x89c   : > { %7264 = vmatpush.msra.mxu3 %v14877_v0  ;;  %7143 = vmatpush.msra.mxu1 %v7142_v22  ;;  %v7160_v22 = vand.u32 4294901760, %v7159_v51  ;;  %v17459_v48 = vand.u32 4294901760, %v15098_v41  ;;  %v7183_v19 = vsub.f32 %v15078_v17, %v17460_v20  ;;  %v17461_v60 = vand.u32 4294901760, %v15111_v32  ;;  %v3412_v51 = vld [vmem:[%s16820_s7 + $0xe8] sm:$0xff] }
 0x89d   : > { %7066 = vmatpush.msra.mxu0 %v14865_v18  ;;  %7220 = vmatpush.msra.mxu2 %v14953_v2  ;;  %v3379_v40 = vmul.f32 %v3377_v56, %v14787_v33  ;;  %v15144_v15 = vand.u32 4294901760, %v3412_v51  ;;  %v3410_v33 = vld [vmem:[%s16820_s7 + $0xd8] sm:$0xff]  ;;  %v3408_v20 = vld [vmem:[%s16820_s7 + $0xc8] sm:$0xff] }
 0x89e   : > { %7266 = vmatpush.msra.mxu3 %v14893_v11  ;;  %7149 = vmatpush.msra.mxu1 %v7148_v31  ;;  %v7166_v31 = vand.u32 4294901760, %v7165_v6  ;;  %v7178_v6 = vand.u32 4294901760, %v7177_v4  ;;  %v7184_v56 = vand.u32 4294901760, %v7183_v19  ;;  %v15164_v19 = vand.u32 4294901760, %v3410_v33 }
 0x89f   : > { %7068 = vmatpush.msra.mxu0 %v14877_v0  ;;  %7223 = vmatpush.msra.mxu2 %v14959_v10  ;;  %v15153_v4 = vand.u32 4294901760, %v3379_v40  ;;  %v15175_v23 = vand.u32 4294901760, %v3408_v20 }
 0x8a0   : > { %7268 = vmatpush.msra.mxu3 %v14918_v27  ;;  %7155 = vmatpush.msra.mxu1 %v7154_v45  ;;  %v15136_v45 = vand.u32 4294901760, %v3414_v50 }
 0x8a1   : > { %7070 = vmatpush.msra.mxu0 %v14893_v11  ;;  %7226 = vmatpush.msra.mxu2 %v14977_v35 }
 0x8a2   : > { %7270 = vmatpush.msra.mxu3 %v14928_v61  ;;  %7161 = vmatpush.msra.mxu1 %v7160_v22  ;;  %v7189_v22 = vsub.f32 %v15098_v41, %v17459_v48  ;;  %v15158_v48 = vsub.f32 %v3414_v50, %v15136_v45  ;;  %v3406_v50 = vld [vmem:[%s16820_s7 + $0xb8] sm:$0xff] }
 0x8a3   : > { %7072 = vmatpush.msra.mxu0 %v14918_v27  ;;  %7229 = vmatpush.msra.mxu2 %v14998_v54 }
 0x8a4   : > { %7272 = vmatpush.msra.mxu3 %v14939_v34  ;;  %7167 = vmatpush.msra.mxu1 %v7166_v31  ;;  %v7195_v31 = vsub.f32 %v15111_v32, %v17461_v60  ;;  %v15169_v60 = vsub.f32 %v3412_v51, %v15144_v15  ;;  %v17468_v51 = vand.u32 4294901760, %v15158_v48 }
 0x8a5   : > { %7074 = vmatpush.msra.mxu0 %v14928_v61  ;;  %7232 = vmatpush.msra.mxu2 %v15013_v21 }
 0x8a6   : > { %7274 = vmatpush.msra.mxu3 %v14970_v24  ;;  %7173 = vmatpush.msra.mxu1 %v7172_v9  ;;  %v7190_v9 = vand.u32 4294901760, %v7189_v22  ;;  %v7196_v26 = vand.u32 4294901760, %v7195_v31  ;;  %v15181_v22 = vsub.f32 %v3379_v40, %v15153_v4  ;;  %v15190_v31 = vand.u32 4294901760, %v3406_v50 }
 0x8a7   : > { %7076 = vmatpush.msra.mxu0 %v14939_v34  ;;  %7235 = vmatpush.msra.mxu2 %v15028_v55  ;;  %v7446_v63 = vsub.f32 %v15158_v48, %v17468_v51  ;;  %v15212_v40 = vand.u32 4294901760, %v3402_v38  ;;  %v18132_v51 = vand.u32 4294901760, %v15169_v60 }
 0x8a8   : > { %7276 = vmatpush.msra.mxu3 %v14985_v7  ;;  %7179 = vmatpush.msra.mxu1 %v7178_v6  ;;  %v3404_v6 = vld [vmem:[%s16820_s7 + $0xa8] sm:$0xff]  ;;  %18130 = vst [vmem:[#allocation250_spill] sm:$0xff] %v15181_v22  ;;  %v15222_v29 = vsub.f32 %v3406_v50, %v15190_v31 }
 0x8a9   : > { %7078 = vmatpush.msra.mxu0 %v14970_v24  ;;  %7238 = vmatpush.msra.mxu2 %v15047_v57  ;;  %v15198_v13 = vand.u32 4294901760, %v3404_v6  ;;  %v7452_v59 = vsub.f32 %v15169_v60, %v18132_v51  ;;  %v7447_v51 = vand.u32 4294901760, %v7446_v63  ;;  %v15256_v63 = vand.u32 4294901760, %v3398_v37 }
 0x8aa   : > { %7278 = vmatpush.msra.mxu3 %v15000_v14  ;;  %7185 = vmatpush.msra.mxu1 %v7184_v56  ;;  %v15188_v56 = vsub.f32 %v3410_v33, %v15164_v19  ;;  %v15202_v33 = vsub.f32 %v3408_v20, %v15175_v23  ;;  %v15245_v20 = vsub.f32 %v3402_v38, %v15212_v40 }
 0x8ab   : > { %7080 = vmatpush.msra.mxu0 %v14985_v7  ;;  %7241 = vmatpush.msra.mxu2 %v15062_v1  ;;  %v15230_v12 = vsub.f32 %v3404_v6, %v15198_v13  ;;  %v7453_v38 = vand.u32 4294901760, %v7452_v59 }
 0x8ac   : > { %7280 = vmatpush.msra.mxu3 %v15015_v3  ;;  %7191 = vmatpush.msra.mxu1 %v7190_v9  ;;  %v15207_v9 = vand.u32 4294901760, %v15181_v22  ;;  %v18134_v50 = vand.u32 4294901760, %v15188_v56 }
 0x8ad   : > { %7082 = vmatpush.msra.mxu0 %v15000_v14  ;;  %7244 = vmatpush.msra.mxu2 %v15078_v17  ;;  %18133 = vst [vmem:[#allocation252_spill] sm:$0xff] %v15230_v12 }
 0x8ae   : > { %7282 = vmatpush.msra.mxu3 %v15030_v36  ;;  %7197 = vmatpush.msra.mxu1 %v7196_v26  ;;  %18131 = vst [vmem:[#allocation255_spill] sm:$0xff] %v15207_v9  ;;  %v3400_v26 = vld [vmem:[%s16820_s7 + $0x88] sm:$0xff]  ;;  %v7096_v6 = vsub.f32 %v15181_v22, %v15207_v9  ;;  %v7458_v25 = vsub.f32 %v15188_v56, %v18134_v50  ;;  %v18135_v50 = vand.u32 4294901760, %v15202_v33 }
 0x8af   : > { %7084 = vmatpush.msra.mxu0 %v15015_v3  ;;  %7247 = vmatpush.msra.mxu2 %v15098_v41 }
 0x8b0   : > { %7284 = vmatpush.msra.mxu3 %v15049_v47  ;;  %7199 = vmatmul.f32.vlgmr.msra.gmra.mxu1 %v15153_v4  ;;  %v15275_v59 = vand.u32 4294901760, %v7096_v6  ;;  %v15289_v6 = vand.u32 4294901760, %v3394_v30 }
 0x8b1   : > { %7754 = vrot.lane.b32.xlu2 %v14795_v43, %s11817_s15  ;;  %7366 = vmatpush.msrb.mxu1 %v14842_v28  ;;  %v15238_v28 = vand.u32 4294901760, %v3400_v26  ;;  %v18138_v43 = vand.u32 4294901760, %v14863_v8  ;;  %v18140_v8 = vand.u32 4294901760, %v14875_v58 }
 0x8b2   : > { %7086 = vmatpush.msra.mxu0 %v15030_v36  ;;  %7250 = vmatpush.msra.mxu2 %v15111_v32 }
 0x8b3   : > { %7286 = vmatpush.msra.mxu3 %v15064_v53  ;;  %7253 = vmatmul.f32.vlgmr.msra.gmra.mxu2 %v15181_v22  ;;  %v15270_v49 = vsub.f32 %v3400_v26, %v15238_v28  ;;  %v18136_v26 = vand.u32 4294901760, %v15222_v29 }
 0x8b4   : > { %7368 = vmatpush.msrb.mxu1 %v14852_v16  ;;  %7403 = vmatpush.msrb.mxu2 %v15136_v45  ;;  %v7464_v16 = vsub.f32 %v15202_v33, %v18135_v50  ;;  %v7459_v50 = vand.u32 4294901760, %v7458_v25  ;;  %v3390_v25 = vld [vmem:[%s16820_s7 + $0x38] sm:$0xff] }
 0x8b5   : > { %7088 = vmatpush.msra.mxu0 %v15049_v47  ;;  %7288 = vmatpush.msra.mxu3 %v15080_v52  ;;  %v7470_v22 = vsub.f32 %v15222_v29, %v18136_v26  ;;  %v15302_v26 = vsub.f32 %v3396_v42, %v15272_v5 }
 0x8b6   : > { %7370 = vmatpush.msrb.mxu1 %v14865_v18  ;;  %7292 = vmatmul.f32.vlgmr.msra.gmra.mxu3 %v15207_v9  ;;  %v18137_v18 = vand.u32 4294901760, %v15230_v12 }
 0x8b7   : > { %7405 = vmatpush.msrb.mxu2 %v15144_v15  ;;  %7448 = vmatpush.msrb.mxu3 %v7447_v51  ;;  %v15287_v51 = vsub.f32 %v3398_v37, %v15256_v63  ;;  %v7471_v42 = vand.u32 4294901760, %v7470_v22  ;;  %v15318_v37 = vsub.f32 %v3394_v30, %v15289_v6 }
 0x8b8   : > { %7090 = vmatpush.msra.mxu0 %v15064_v53  ;;  %7372 = vmatpush.msrb.mxu1 %v14877_v0  ;;  %v7476_v9 = vsub.f32 %v15230_v12, %v18137_v18  ;;  %v7465_v0 = vand.u32 4294901760, %v7464_v16  ;;  %v18139_v18 = vand.u32 4294901760, %v15245_v20 }
 0x8b9   : > { %7407 = vmatpush.msrb.mxu2 %v15164_v19  ;;  %7454 = vmatpush.msrb.mxu3 %v7453_v38  ;;  %v15304_v38 = vand.u32 4294901760, %v3392_v44 }
 0x8ba   : > { %7092 = vmatpush.msra.mxu0 %v15080_v52  ;;  %7374 = vmatpush.msrb.mxu1 %v14893_v11  ;;  %v7482_v12 = vsub.f32 %v15245_v20, %v18139_v18  ;;  %v3388_v11 = vld [vmem:[%s16820_s7 + $0x28] sm:$0xff]  ;;  %v7477_v18 = vand.u32 4294901760, %v7476_v9  ;;  %v18142_v9 = vand.u32 4294901760, %v14889_v39 }
 0x8bb   : > { %7098 = vmatmul.f32.vlgmr.msra.gmra.mxu0 %v15275_v59  ;;  %7409 = vmatpush.msrb.mxu2 %v15175_v23  ;;  %v15334_v16 = vsub.f32 %v3392_v44, %v15304_v38  ;;  %v15336_v58 = vand.u32 4294901760, %v3388_v11  ;;  %v3384_v39 = vld [vmem:[%s16820_s7 + $0x8] sm:$0xff] }
 0x8bc   : > { %7299 = vmatpush.msrb.mxu0 %v18138_v43  ;;  %7460 = vmatpush.msrb.mxu3 %v7459_v50  ;;  %v15320_v43 = vand.u32 4294901760, %v3390_v25  ;;  %v3386_v50 = vld [vmem:[%s16820_s7 + $0x18] sm:$0xff] }
 0x8bd   : > { %7376 = vmatpush.msrb.mxu1 %v14918_v27  ;;  %7411 = vmatpush.msrb.mxu2 %v15190_v31  ;;  %v18141_v27 = vand.u32 4294901760, %v15270_v49  ;;  %v15349_v22 = vand.u32 4294901760, %v3386_v50 }
 0x8be   : > { %7303 = vmatpush.msrb.mxu0 %v18140_v8  ;;  %7466 = vmatpush.msrb.mxu3 %v7465_v0  ;;  %v7483_v8 = vand.u32 4294901760, %v7482_v12  ;;  %v15347_v44 = vsub.f32 %v3390_v25, %v15320_v43  ;;  %v18144_v12 = vand.u32 4294901760, %v14904_v46  ;;  %v15368_v46 = vand.u32 4294901760, %v3384_v39 }
 0x8bf   : > { %7378 = vmatpush.msrb.mxu1 %v14928_v61  ;;  %v7488_v30 = vsub.f32 %v15270_v49, %v18141_v27  ;;  %7413 = vmatpush.msrb.mxu2 %v15198_v13  ;;  %v18143_v61 = vand.u32 4294901760, %v15287_v51  ;;  %v18146_v27 = vand.u32 4294901760, %v14926_v62  ;;  %v18148_v62 = vand.u32 4294901760, %v14953_v2 }
 0x8c0   : > { %7307 = vmatpush.msrb.mxu0 %v18142_v9  ;;  %7472 = vmatpush.msrb.mxu3 %v7471_v42  ;;  %v18145_v42 = vand.u32 4294901760, %v15302_v26  ;;  %v7511_v9 = vand.u32 4294901760, %v15334_v16  ;;  %v15390_v2 = vsub.f32 %v3384_v39, %v15368_v46  ;;  %v18151_v39 = vand.u32 4294901760, %v14998_v54 }
 0x8c1   : > { %7380 = vmatpush.msrb.mxu1 %v14939_v34  ;;  %v7494_v0 = vsub.f32 %v15287_v51, %v18143_v61  ;;  %7415 = vmatpush.msrb.mxu2 %v15212_v40  ;;  %v7489_v34 = vand.u32 4294901760, %v7488_v30  ;;  %v15363_v61 = vsub.f32 %v3388_v11, %v15336_v58  ;;  %v15376_v11 = vsub.f32 %v3386_v50, %v15349_v22 }
 0x8c2   : > { %7311 = vmatpush.msrb.mxu0 %v18144_v12  ;;  %7478 = vmatpush.msrb.mxu3 %v7477_v18  ;;  %v7500_v25 = vsub.f32 %v15302_v26, %v18145_v42  ;;  %v18147_v18 = vand.u32 4294901760, %v15318_v37  ;;  %v7517_v12 = vand.u32 4294901760, %v15347_v44  ;;  %v18150_v42 = vand.u32 4294901760, %v14977_v35 }
 0x8c3   : > { %7382 = vmatpush.msrb.mxu1 %v14970_v24  ;;  %7417 = vmatpush.msrb.mxu2 %v15238_v28  ;;  %v7495_v24 = vand.u32 4294901760, %v7494_v0  ;;  %v7523_v0 = vand.u32 4294901760, %v15363_v61 }
 0x8c4   : > { %7315 = vmatpush.msrb.mxu0 %v18146_v27  ;;  %7484 = vmatpush.msrb.mxu3 %v7483_v8  ;;  %v7506_v30 = vsub.f32 %v15318_v37, %v18147_v18  ;;  %v7501_v8 = vand.u32 4294901760, %v7500_v25  ;;  %v18149_v27 = vand.u32 4294901760, %v14959_v10  ;;  %v7535_v25 = vand.u32 4294901760, %v15390_v2 }
 0x8c5   : > { %7384 = vmatpush.msrb.mxu1 %v14985_v7  ;;  %7419 = vmatpush.msrb.mxu2 %v15256_v63  ;;  %v7512_v7 = vsub.f32 %v15334_v16, %v7511_v9  ;;  %v18153_v18 = vand.u32 4294901760, %v15028_v55  ;;  %v18155_v55 = vand.u32 4294901760, %v15062_v1  ;;  %v18158_v1 = vand.u32 4294901760, %v15169_v60 }
 0x8c6   : > { %7319 = vmatpush.msrb.mxu0 %v18148_v62  ;;  %7490 = vmatpush.msrb.mxu3 %v7489_v34  ;;  %v7507_v50 = vand.u32 4294901760, %v7506_v30  ;;  %v7529_v34 = vand.u32 4294901760, %v15376_v11  ;;  %v18154_v30 = vand.u32 4294901760, %v15047_v57  ;;  %v18157_v57 = vand.u32 4294901760, %v15078_v17 }
 0x8c7   : > { %7386 = vmatpush.msrb.mxu1 %v15000_v14  ;;  %7421 = vmatpush.msrb.mxu2 %v15272_v5  ;;  %v7518_v14 = vsub.f32 %v15347_v44, %v7517_v12  ;;  %v7513_v10 = vand.u32 4294901760, %v7512_v7  ;;  %v18160_v62 = vand.u32 4294901760, %v15188_v56  ;;  %v18161_v17 = vand.u32 4294901760, %v15111_v32  ;;  %v18164_v32 = vld [vmem:[#allocation252_spill] sm:$0xff]  ;;  %v18181_v7 = vld [vmem:[#allocation19_spill] sm:$0xff] }
 0x8c8   : > { %7323 = vmatpush.msrb.mxu0 %v18149_v27  ;;  %7496 = vmatpush.msrb.mxu3 %v7495_v24  ;;  %v18152_v24 = vand.u32 4294901760, %v15013_v21  ;;  %v18182_v27 = vld [vmem:[#allocation10_spill] sm:$0xff] }
 0x8c9   : > { %7388 = vmatpush.msrb.mxu1 %v15015_v3  ;;  %7423 = vmatpush.msrb.mxu2 %v15289_v6  ;;  %v7524_v3 = vsub.f32 %v15363_v61, %v7523_v0  ;;  %v7519_v35 = vand.u32 4294901760, %v7518_v14 }
 0x8ca   : > { %7327 = vmatpush.msrb.mxu0 %v18150_v42  ;;  %7502 = vmatpush.msrb.mxu3 %v7501_v8 }
 0x8cb   : > { %7390 = vmatpush.msrb.mxu1 %v15030_v36  ;;  %7425 = vmatpush.msrb.mxu2 %v15304_v38  ;;  %v7530_v36 = vsub.f32 %v15376_v11, %v7529_v34  ;;  %v7525_v54 = vand.u32 4294901760, %v7524_v3 }
 0x8cc   : > { %7331 = vmatpush.msrb.mxu0 %v18151_v39  ;;  %7508 = vmatpush.msrb.mxu3 %v7507_v50  ;;  %v18184_v50 = vld [vmem:[#allocation250_spill] sm:$0xff] }
 0x8cd   : > { %7392 = vmatpush.msrb.mxu1 %v15049_v47  ;;  %7427 = vmatpush.msrb.mxu2 %v15320_v43  ;;  %v7536_v47 = vsub.f32 %v15390_v2, %v7535_v25  ;;  %v7531_v21 = vand.u32 4294901760, %v7530_v36  ;;  %v18188_v36 = vld [vmem:[#allocation12_spill] sm:$0xff] }
 0x8ce   : > { %7335 = vmatpush.msrb.mxu0 %v18152_v24  ;;  %7514 = vmatpush.msrb.mxu3 %v7513_v10  ;;  %v18187_v10 = vld [vmem:[#allocation7_spill] sm:$0xff]  ;;  %v18189_v24 = vld [vmem:[#allocation13_spill] sm:$0xff] }
 0x8cf   : > { %7394 = vmatpush.msrb.mxu1 %v15064_v53  ;;  %7429 = vmatpush.msrb.mxu2 %v15336_v58  ;;  %v7537_v53 = vand.u32 4294901760, %v7536_v47 }
 0x8d0   : > { %7339 = vmatpush.msrb.mxu0 %v18153_v18  ;;  %7520 = vmatpush.msrb.mxu3 %v7519_v35 }
 0x8d1   : > { %7396 = vmatpush.msrb.mxu1 %v15080_v52  ;;  %7431 = vmatpush.msrb.mxu2 %v15349_v22  ;;  %v18156_v52 = vand.u32 4294901760, %v15158_v48 }
 0x8d2   : > { %7343 = vmatpush.msrb.mxu0 %v18154_v30  ;;  %7526 = vmatpush.msrb.mxu3 %v7525_v54 }
 0x8d3   : > { %7398 = vmatmul.f32.vlgmr.msrb.gmra.mxu1 %v15153_v4  ;;  %7433 = vmatpush.msrb.mxu2 %v15368_v46 }
 0x8d4   : > { %7599 = vmatpush.msra.mxu1 %v15136_v45  ;;  %7347 = vmatpush.msrb.mxu0 %v18155_v55 }
 0x8d5   : > { %7532 = vmatpush.msrb.mxu3 %v7531_v21  ;;  %7439 = vmatmul.f32.vlgmr.msrb.gmra.mxu2 %v15275_v59  ;;  %v18159_v59 = vand.u32 4294901760, %v15098_v41  ;;  %v18163_v41 = vand.u32 4294901760, %v15222_v29  ;;  %v18190_v21 = vld [vmem:[#allocation14_spill] sm:$0xff] }
 0x8d6   : > { %7601 = vmatpush.msra.mxu1 %v15144_v15  ;;  %7640 = vmatpush.msra.mxu2 %v18156_v52  ;;  %v18193_v52 = vld [vmem:[#allocation15_spill] sm:$0xff] }
 0x8d7   : > { %7351 = vmatpush.msrb.mxu0 %v18157_v57  ;;  %7538 = vmatpush.msrb.mxu3 %v7537_v53 }
 0x8d8   : > { %7603 = vmatpush.msra.mxu1 %v15164_v19  ;;  %7540 = vmatmul.f32.vlgmr.msrb.gmra.mxu3 %v15153_v4 }
 0x8d9   : > { %7644 = vmatpush.msra.mxu2 %v18158_v1  ;;  %7707 = vmatpush.msra.mxu3 %v15136_v45  ;;  %v18162_v45 = vand.u32 4294901760, %v15202_v33 }
 0x8da   : > { %7355 = vmatpush.msrb.mxu0 %v18159_v59  ;;  %7605 = vmatpush.msra.mxu1 %v15175_v23  ;;  %v7747_v3 = vpop.permute.xlu0 %7746 }
 0x8db   : > { %7648 = vmatpush.msra.mxu2 %v18160_v62  ;;  %7709 = vmatpush.msra.mxu3 %v15144_v15  ;;  %v18168_v15 = vand.u32 4294901760, %v15287_v51 }
 0x8dc   : > { %7359 = vmatpush.msrb.mxu0 %v18161_v17  ;;  %7607 = vmatpush.msra.mxu1 %v15190_v31  ;;  %v7751_v54 = vpop.permute.xlu1 %7750 }
 0x8dd   : > { %7361 = vmatmul.f32.vlgmr.msrb.gmra.mxu0 %v15153_v4  ;;  %7652 = vmatpush.msra.mxu2 %v18162_v45  ;;  %v7753_v30 = vsel %vm18191_vm7, %v7747_v3, %v7751_v54  ;;  %v18218_v3 = vld [vmem:[#allocation70_spill] sm:$0xff]  ;;  %v18224_v54 = vld [vmem:[#allocation75_spill] sm:$0xff] }
 0x8de   : > { %7546 = vmatpush.msra.mxu0 %v15158_v48  ;;  %7711 = vmatpush.msra.mxu3 %v15164_v19  ;;  %v18165_v48 = vand.u32 4294901760, %v18164_v32  ;;  %v8180_v57 = vsel %vm18194_vm4, %v7753_v30, 0  ;;  %v18228_v30 = vld [vmem:[#allocation51_spill] sm:$0xff] }
 0x8df   : > { %7609 = vmatpush.msra.mxu1 %v15198_v13  ;;  %7656 = vmatpush.msra.mxu2 %v18163_v41  ;;  %v15589_v17 = vand.u32 4294901760, %v8180_v57 }
 0x8e0   : > { %7549 = vmatpush.msra.mxu0 %v15169_v60  ;;  %7713 = vmatpush.msra.mxu3 %v15175_v23  ;;  %v18166_v60 = vand.u32 4294901760, %v15245_v20  ;;  %v18167_v23 = vand.u32 4294901760, %v15270_v49 }
 0x8e1   : > { %7611 = vmatpush.msra.mxu1 %v15212_v40  ;;  %7660 = vmatpush.msra.mxu2 %v18165_v48 }
 0x8e2   : > { %7552 = vmatpush.msra.mxu0 %v15188_v56  ;;  %7715 = vmatpush.msra.mxu3 %v15190_v31  ;;  %v18171_v56 = vld [vmem:[#allocation249_spill] sm:$0xff] }
 0x8e3   : > { %7613 = vmatpush.msra.mxu1 %v15238_v28  ;;  %7664 = vmatpush.msra.mxu2 %v18166_v60  ;;  %v7761_v31 = vsel %vm18172_vm1, %v18171_v56, 0  ;;  %v7758_v47 = vpop.permute.xlu0 %7757 }
 0x8e4   : > { %7555 = vmatpush.msra.mxu0 %v15202_v33  ;;  %7717 = vmatpush.msra.mxu3 %v15198_v13  ;;  %v18170_v13 = vand.u32 4294901760, %v15318_v37 }
 0x8e5   : > { %7615 = vmatpush.msra.mxu1 %v15256_v63  ;;  %7668 = vmatpush.msra.mxu2 %v18167_v23  ;;  %v8203_v23 = vsub.f32 %v8180_v57, %v15589_v17  ;;  %v18232_v57 = vld [vmem:[#allocation62_spill] sm:$0xff] }
 0x8e6   : > { %7558 = vmatpush.msra.mxu0 %v15222_v29  ;;  %7719 = vmatpush.msra.mxu3 %v15212_v40  ;;  %v18169_v29 = vand.u32 4294901760, %v15302_v26 }
 0x8e7   : > { %7617 = vmatpush.msra.mxu1 %v15272_v5  ;;  %7672 = vmatpush.msra.mxu2 %v18168_v15 }
 0x8e8   : > { %7561 = vmatpush.msra.mxu0 %v18164_v32  ;;  %7721 = vmatpush.msra.mxu3 %v15238_v28 }
 0x8e9   : > { %7619 = vmatpush.msra.mxu1 %v15289_v6  ;;  %7676 = vmatpush.msra.mxu2 %v18169_v29  ;;  %v8204_v29 = vand.u32 4294901760, %v8203_v23 }
 0x8ea   : > { %7564 = vmatpush.msra.mxu0 %v15245_v20  ;;  %7723 = vmatpush.msra.mxu3 %v15256_v63  ;;  %v18173_v20 = vld [vmem:[#allocation255_spill] sm:$0xff]  ;;  %v15515_v63 = vand.u32 4294901760, %v7761_v31 }
 0x8eb   : > { %7621 = vmatpush.msra.mxu1 %v15304_v38  ;;  %7680 = vmatpush.msra.mxu2 %v18170_v13 }
 0x8ec   : > { %7567 = vmatpush.msra.mxu0 %v15270_v49  ;;  %7725 = vmatpush.msra.mxu3 %v15272_v5  ;;  %v6518_v49 = vpop.f32.mrf.mxu1 }
 0x8ed   : > { %7623 = vmatpush.msra.mxu1 %v15320_v43  ;;  %7684 = vmatpush.msra.mxu2 %v7511_v9 }
 0x8ee   : > { %7570 = vmatpush.msra.mxu0 %v15287_v51  ;;  %7727 = vmatpush.msra.mxu3 %v15289_v6  ;;  %v18175_v6 = vld [vmem:[#allocation16_spill] sm:$0xff] }
 0x8ef   : > { %7625 = vmatpush.msra.mxu1 %v15336_v58  ;;  %7688 = vmatpush.msra.mxu2 %v7517_v12  ;;  %v18180_v12 = vld [vmem:[#allocation4_spill] sm:$0xff] }
 0x8f0   : > { %7573 = vmatpush.msra.mxu0 %v15302_v26  ;;  %v6417_v19 = vpop.f32.mrf.mxu0  ;;  %7729 = vmatpush.msra.mxu3 %v15304_v38  ;;  %v6572_v33 = vpop.f32.mrf.mxu2  ;;  %v18176_v38 = vld [vmem:[#allocation17_spill] sm:$0xff] }
 0x8f1   : > { %7627 = vmatpush.msra.mxu1 %v15349_v22  ;;  %v6519_v5 = vadd.f32 %v6518_v49, %v6417_v19  ;;  %7692 = vmatpush.msra.mxu2 %v7523_v0  ;;  %v8205_v49 = vsub.f32 %v8203_v23, %v8204_v29 }
 0x8f2   : > { %7576 = vmatpush.msra.mxu0 %v15318_v37  ;;  %7731 = vmatpush.msra.mxu3 %v15320_v43  ;;  %v6611_v26 = vpop.f32.mrf.mxu3 }
 0x8f3   : > { %7629 = vmatpush.msra.mxu1 %v15368_v46  ;;  %7696 = vmatpush.msra.mxu2 %v7529_v34  ;;  %v6573_v51 = vadd.f32 %v6572_v33, %v6519_v5  ;;  %v18185_v34 = vld [vmem:[#allocation11_spill] sm:$0xff]  ;;  %v8206_v5 = vand.u32 4294901760, %v8205_v49  ;;  %v18244_v49 = vld [vmem:[#allocation84_spill] sm:$0xff] }
 0x8f4   : > { %7579 = vmatpush.msra.mxu0 %v15334_v16  ;;  %v7970_v40 = vpop.permute.xlu2 %7969  ;;  %7733 = vmatpush.msra.mxu3 %v15336_v58  ;;  %v7784_v16 = vsub.f32 %v7761_v31, %v15515_v63  ;;  %v18177_v58 = vld [vmem:[#allocation8_spill] sm:$0xff]  ;;  %v6717_v8 = vpop.f32.mrf.mxu1  ;;  %v18197_v33 = vld [vmem:[#allocation23_spill] sm:$0xff] }
 0x8f5   : > { %7633 = vmatmul.f32.vlgmr.msra.gmra.mxu1 %v18173_v20  ;;  %v7971_v28 = vsel %vm18174_vm6, %v7970_v40, 0  ;;  %7700 = vmatpush.msra.mxu2 %v7535_v25  ;;  %v6612_v43 = vadd.f32 %v6611_v26, %v6573_v51  ;;  %v18196_v40 = vld [vmem:[#allocation29_spill] sm:$0xff]  ;;  %v18201_v26 = vld [vmem:[#allocation31_spill] sm:$0xff] }
 0x8f6   : > { %7582 = vmatpush.msra.mxu0 %v15347_v44  ;;  %7735 = vmatpush.msra.mxu3 %v15349_v22  ;;  %v15524_v37 = vand.u32 4294901760, %v7971_v28  ;;  %v18178_v44 = vld [vmem:[#allocation18_spill] sm:$0xff]  ;;  %v7785_v0 = vand.u32 4294901760, %v7784_v16 }
 0x8f7   : > { %7809 = vmatpush.msrb.mxu1 %v18175_v6  ;;  %7702 = vmatmul.f32.vlgmr.msra.gmra.mxu2 %v15153_v4 }
 0x8f8   : > { %7585 = vmatpush.msra.mxu0 %v15363_v61  ;;  %7737 = vmatpush.msra.mxu3 %v15368_v46  ;;  %v18179_v61 = vld [vmem:[#allocation9_spill] sm:$0xff]  ;;  %v15536_v46 = vsub.f32 %v7971_v28, %v15524_v37  ;;  %v7786_v42 = vsub.f32 %v7784_v16, %v7785_v0  ;;  %v18198_v28 = vld [vmem:[#allocation30_spill] sm:$0xff] }
 0x8f9   : > { %7815 = vmatpush.msrb.mxu1 %v18176_v38  ;;  %7847 = vmatpush.msrb.mxu2 %v18177_v58  ;;  %v6758_v1 = vpop.f32.mrf.mxu2 }
 0x8fa   : > { %7739 = vmatmul.f32.vlgmr.msra.gmra.mxu3 %v15153_v4  ;;  %v6680_v22 = vpop.f32.mrf.mxu0  ;;  %7588 = vmatpush.msra.mxu0 %v15376_v11  ;;  %v18183_v11 = vld [vmem:[#allocation5_spill] sm:$0xff]  ;;  %v7995_v14 = vand.u32 4294901760, %v15536_v46  ;;  %v7787_v25 = vand.u32 4294901760, %v7786_v42 }
 0x8fb   : > { %7821 = vmatpush.msrb.mxu1 %v18178_v44  ;;  %v6681_v9 = vadd.f32 %v6680_v22, %v6612_v43  ;;  %7850 = vmatpush.msrb.mxu2 %v18179_v61  ;;  %v18204_v22 = vld [vmem:[#allocation21_spill] sm:$0xff] }
 0x8fc   : > { %7876 = vmatpush.msrb.mxu3 %v18180_v12  ;;  %7591 = vmatpush.msra.mxu0 %v15390_v2  ;;  %v18186_v2 = vld [vmem:[#allocation6_spill] sm:$0xff]  ;;  %v7996_v39 = vsub.f32 %v15536_v46, %v7995_v14  ;;  %v6859_v53 = vpop.f32.mrf.mxu3  ;;  %v18216_v42 = vld [vmem:[#allocation37_spill] sm:$0xff] }
 0x8fd   : > { %7827 = vmatpush.msrb.mxu1 %v18181_v7  ;;  %v15540_v4 = vadd.f32 %v6717_v8, %v6681_v9  ;;  %7853 = vmatpush.msrb.mxu2 %v18182_v27  ;;  %v6860_v62 = vadd.f32 %v6859_v53, %v6758_v1  ;;  %v18205_v9 = vld [vmem:[#allocation33_spill] sm:$0xff]  ;;  %v18230_v53 = vld [vmem:[#allocation80_spill] sm:$0xff] }
 0x8fe   : > { %7878 = vmatpush.msrb.mxu3 %v18183_v11  ;;  %7594 = vmatmul.f32.vlgmr.msra.gmra.mxu0 %v18184_v50  ;;  %v7997_v35 = vand.u32 4294901760, %v7996_v39  ;;  %v18212_v50 = vld [vmem:[#allocation56_spill] sm:$0xff]  ;;  %v18233_v1 = vld [vmem:[#allocation81_spill] sm:$0xff] }
 0x8ff   : > { %7829 = vmatmul.f32.vlgmr.msrb.gmra.mxu1 %v15515_v63  ;;  %7776 = vmatpush.msrb.mxu0 %v18180_v12  ;;  %v18219_v39 = vld [vmem:[#allocation40_spill] sm:$0xff] }
 0x900   : > { %7856 = vmatpush.msrb.mxu2 %v18185_v34  ;;  %7880 = vmatpush.msrb.mxu3 %v18186_v2 }
 0x901   : > { %7936 = vmatpush.msra.mxu1 %v18180_v12  ;;  %7778 = vmatpush.msrb.mxu0 %v18183_v11 }
 0x902   : > { %7859 = vmatmul.f32.vlgmr.msrb.gmra.mxu2 %v7784_v16  ;;  %7882 = vmatpush.msrb.mxu3 %v18187_v10  ;;  %v18202_v16 = vld [vmem:[#allocation25_spill] sm:$0xff] }
 0x903   : > { %7938 = vmatpush.msra.mxu1 %v18183_v11  ;;  %7986 = vmatpush.msra.mxu2 %v18180_v12 }
 0x904   : > { %7780 = vmatpush.msrb.mxu0 %v18186_v2  ;;  %7886 = vmatmul.f32.vlgmr.msrb.gmra.mxu3 %v7785_v0 }
 0x905   : > { %7940 = vmatpush.msra.mxu1 %v18186_v2  ;;  %7988 = vmatpush.msra.mxu2 %v18183_v11 }
 0x906   : > { %8019 = vmatpush.msra.mxu3 %v18175_v6  ;;  %7782 = vmatpush.msrb.mxu0 %v18187_v10 }
 0x907   : > { %7942 = vmatpush.msra.mxu1 %v18187_v10  ;;  %7990 = vmatpush.msra.mxu2 %v18186_v2 }
 0x908   : > { %8025 = vmatpush.msra.mxu3 %v18176_v38  ;;  %7788 = vmatmul.f32.vlgmr.msrb.gmra.mxu0 %v7787_v25  ;;  %v18220_v25 = vld [vmem:[#allocation50_spill] sm:$0xff] }
 0x909   : > { %7944 = vmatmul.f32.vlgmr.msra.gmra.mxu1 %v15515_v63  ;;  %7905 = vmatpush.msra.mxu0 %v18188_v36 }
 0x90a   : > { %7992 = vmatpush.msra.mxu2 %v18187_v10  ;;  %8031 = vmatpush.msra.mxu3 %v18178_v44 }
 0x90b   : > { %8086 = vmatpush.msrb.mxu1 %v18180_v12  ;;  %7909 = vmatpush.msra.mxu0 %v18189_v24  ;;  %v7755_v18 = vpop.permute.xlu2 %7754  ;;  %v6952_v48 = vpop.f32.mrf.mxu1 }
 0x90c   : > { %7998 = vmatmul.f32.vlgmr.msra.gmra.mxu2 %v7997_v35  ;;  %8037 = vmatpush.msra.mxu3 %v18181_v7  ;;  %v7760_v55 = vsel %vm18192_vm13, %v7755_v18, %v7758_v47  ;;  %v18221_v35 = vld [vmem:[#allocation74_spill] sm:$0xff]  ;;  %v18225_v18 = vld [vmem:[#allocation47_spill] sm:$0xff]  ;;  %v18226_v47 = vld [vmem:[#allocation60_spill] sm:$0xff] }
 0x90d   : > { %8088 = vmatpush.msrb.mxu1 %v18183_v11  ;;  %8115 = vmatpush.msrb.mxu2 %v18188_v36  ;;  %v8389_v59 = vsel %vm18195_vm3, %v7760_v55, 0  ;;  %v18229_v55 = vld [vmem:[#allocation61_spill] sm:$0xff] }
 0x90e   : > { %7913 = vmatpush.msra.mxu0 %v18190_v21  ;;  %8039 = vmatmul.f32.vlgmr.msra.gmra.mxu3 %v15524_v37  ;;  %v15595_v41 = vand.u32 4294901760, %v8389_v59 }
 0x90f   : > { %8090 = vmatpush.msrb.mxu1 %v18186_v2  ;;  %8119 = vmatpush.msrb.mxu2 %v18189_v24 }
 0x910   : > { %8146 = vmatpush.msrb.mxu3 %v18180_v12  ;;  %7917 = vmatpush.msra.mxu0 %v18193_v52  ;;  %v15607_v15 = vsub.f32 %v8389_v59, %v15595_v41  ;;  %v18234_v59 = vld [vmem:[#allocation54_spill] sm:$0xff] }
 0x911   : > { %8092 = vmatpush.msrb.mxu1 %v18187_v10  ;;  %8123 = vmatpush.msrb.mxu2 %v18190_v21 }
 0x912   : > { %8148 = vmatpush.msrb.mxu3 %v18183_v11  ;;  %7919 = vmatmul.f32.vlgmr.msra.gmra.mxu0 %v15515_v63  ;;  %v8413_v13 = vand.u32 4294901760, %v15607_v15  ;;  %v18199_v63 = vld [vmem:[#allocation24_spill] sm:$0xff] }
 0x913   : > { %8096 = vmatmul.f32.vlgmr.msrb.gmra.mxu1 %v7995_v14  ;;  %8057 = vmatpush.msrb.mxu0 %v18177_v58  ;;  %v15658_v31 = vpop.f32.mrf.mxu2  ;;  %v18213_v14 = vld [vmem:[#allocation34_spill] sm:$0xff] }
 0x914   : > { %8127 = vmatpush.msrb.mxu2 %v18193_v52  ;;  %8150 = vmatpush.msrb.mxu3 %v18186_v2  ;;  %v8414_v19 = vsub.f32 %v15607_v15, %v8413_v13 }
 0x915   : > { %8228 = vmatpush.msra.mxu1 %v18175_v6  ;;  %v6913_v45 = vpop.f32.mrf.mxu0  ;;  %8060 = vmatpush.msrb.mxu0 %v18179_v61 }
 0x916   : > { %8129 = vmatmul.f32.vlgmr.msrb.gmra.mxu2 %v15524_v37  ;;  %v6914_v32 = vadd.f32 %v6913_v45, %v6860_v62  ;;  %8152 = vmatpush.msrb.mxu3 %v18187_v10  ;;  %v8415_v56 = vand.u32 4294901760, %v8414_v19  ;;  %v15664_v20 = vpop.f32.mrf.mxu3  ;;  %v18235_v62 = vld [vmem:[#allocation64_spill] sm:$0xff]  ;;  %v18237_v45 = vld [vmem:[#allocation55_spill] sm:$0xff] }
 0x917   : > { %8234 = vmatpush.msra.mxu1 %v18176_v38  ;;  %8266 = vmatpush.msra.mxu2 %v18177_v58 }
 0x918   : > { %8063 = vmatpush.msrb.mxu0 %v18182_v27  ;;  %v15601_v60 = vadd.f32 %v6952_v48, %v6914_v32  ;;  %8154 = vmatmul.f32.vlgmr.msrb.gmra.mxu3 %v15524_v37  ;;  %v18239_v32 = vld [vmem:[#allocation83_spill] sm:$0xff] }
 0x919   : > { %8240 = vmatpush.msra.mxu1 %v18178_v44  ;;  %8269 = vmatpush.msra.mxu2 %v18179_v61  ;;  %v18240_v48 = vld [vmem:[#allocation59_spill] sm:$0xff] }
 0x91a   : > { %8295 = vmatpush.msra.mxu3 %v18180_v12  ;;  %8066 = vmatpush.msrb.mxu0 %v18185_v34 }
 0x91b   : > { %8246 = vmatpush.msra.mxu1 %v18181_v7  ;;  %8272 = vmatpush.msra.mxu2 %v18182_v27 }
 0x91c   : > { %8297 = vmatpush.msra.mxu3 %v18183_v11  ;;  %8069 = vmatmul.f32.vlgmr.msrb.gmra.mxu0 %v15536_v46  ;;  %v18207_v46 = vld [vmem:[#allocation22_spill] sm:$0xff] }
 0x91d   : > { %8248 = vmatmul.f32.vlgmr.msra.gmra.mxu1 %v15589_v17  ;;  %8195 = vmatpush.msra.mxu0 %v18180_v12 }
 0x91e   : > { %8275 = vmatpush.msra.mxu2 %v18185_v34  ;;  %8299 = vmatpush.msra.mxu3 %v18186_v2 }
 0x91f   : > { %8355 = vmatpush.msrb.mxu1 %v18180_v12  ;;  %8278 = vmatmul.f32.vlgmr.msra.gmra.mxu2 %v8203_v23  ;;  %v7022_v23 = vadd.f32 %v15658_v31, %v15601_v60 }
 0x920   : > { %8197 = vmatpush.msra.mxu0 %v18183_v11  ;;  %8301 = vmatpush.msra.mxu3 %v18187_v10 }
 0x921   : > { %8357 = vmatpush.msrb.mxu1 %v18183_v11  ;;  %8404 = vmatpush.msrb.mxu2 %v18180_v12  ;;  %v7059_v19 = vadd.f32 %v15664_v20, %v7022_v23 }
 0x922   : > { %8305 = vmatmul.f32.vlgmr.msra.gmra.mxu3 %v8204_v29  ;;  %8199 = vmatpush.msra.mxu0 %v18186_v2  ;;  %v18242_v29 = vld [vmem:[#allocation65_spill] sm:$0xff] }
 0x923   : > { %8359 = vmatpush.msrb.mxu1 %v18186_v2  ;;  %8406 = vmatpush.msrb.mxu2 %v18183_v11 }
 0x924   : > { %8437 = vmatpush.msrb.mxu3 %v18175_v6  ;;  %8201 = vmatpush.msra.mxu0 %v18187_v10  ;;  %v18200_v6 = vld [vmem:[#allocation20_spill] sm:$0xff] }
 0x925   : > { %8361 = vmatpush.msrb.mxu1 %v18187_v10  ;;  %8408 = vmatpush.msrb.mxu2 %v18186_v2 }
 0x926   : > { %8443 = vmatpush.msrb.mxu3 %v18176_v38  ;;  %8207 = vmatmul.f32.vlgmr.msra.gmra.mxu0 %v8206_v5  ;;  %v18245_v5 = vld [vmem:[#allocation26_spill] sm:$0xff] }
 0x927   : > { %8363 = vmatmul.f32.vlgmr.msrb.gmra.mxu1 %v15589_v17  ;;  %8324 = vmatpush.msrb.mxu0 %v18188_v36 }
 0x928   : > { %8410 = vmatpush.msrb.mxu2 %v18187_v10  ;;  %8449 = vmatpush.msrb.mxu3 %v18178_v44 }
 0x929   : > { %8504 = vmatpush.msra.mxu1 %v18180_v12  ;;  %8416 = vmatmul.f32.vlgmr.msrb.gmra.mxu2 %v8415_v56  ;;  %v18246_v56 = vld [vmem:[#allocation93_spill] sm:$0xff] }
 0x92a   : > { %8328 = vmatpush.msrb.mxu0 %v18189_v24  ;;  %8455 = vmatpush.msrb.mxu3 %v18181_v7  ;;  %v18208_v7 = vld [vmem:[#allocation36_spill] sm:$0xff] }
 0x92b   : > { %8506 = vmatpush.msra.mxu1 %v18183_v11  ;;  %8533 = vmatpush.msra.mxu2 %v18188_v36  ;;  %v18222_v36 = vld [vmem:[#allocation44_spill] sm:$0xff] }
 0x92c   : > { %8457 = vmatmul.f32.vlgmr.msrb.gmra.mxu3 %v15595_v41  ;;  %8332 = vmatpush.msrb.mxu0 %v18190_v21 }
 0x92d   : > { %8508 = vmatpush.msra.mxu1 %v18186_v2  ;;  %8537 = vmatpush.msra.mxu2 %v18189_v24  ;;  %v7200_v38 = vpop.f32.mrf.mxu1  ;;  %v18223_v24 = vld [vmem:[#allocation58_spill] sm:$0xff] }
 0x92e   : > { %8564 = vmatpush.msra.mxu3 %v18180_v12  ;;  %8336 = vmatpush.msrb.mxu0 %v18193_v52  ;;  %v18206_v12 = vld [vmem:[#allocation45_spill] sm:$0xff] }
 0x92f   : > { %8510 = vmatpush.msra.mxu1 %v18187_v10  ;;  %8541 = vmatpush.msra.mxu2 %v18190_v21  ;;  %v18227_v21 = vld [vmem:[#allocation78_spill] sm:$0xff] }
 0x930   : > { %8566 = vmatpush.msra.mxu3 %v18183_v11  ;;  %8338 = vmatmul.f32.vlgmr.msrb.gmra.mxu0 %v15589_v17  ;;  %v18211_v11 = vld [vmem:[#allocation39_spill] sm:$0xff]  ;;  %v18236_v17 = vld [vmem:[#allocation82_spill] sm:$0xff] }
 0x931   : > { %8514 = vmatmul.f32.vlgmr.msra.gmra.mxu1 %v8413_v13  ;;  %8475 = vmatpush.msra.mxu0 %v18177_v58  ;;  %v18203_v58 = vld [vmem:[#allocation41_spill] sm:$0xff] }
 0x932   : > { %8545 = vmatpush.msra.mxu2 %v18193_v52  ;;  %8568 = vmatpush.msra.mxu3 %v18186_v2  ;;  %v18215_v2 = vld [vmem:[#allocation66_spill] sm:$0xff]  ;;  %v18231_v52 = vld [vmem:[#allocation53_spill] sm:$0xff] }
 0x933   : > { %8547 = vmatmul.f32.vlgmr.msra.gmra.mxu2 %v15595_v41  ;;  %8478 = vmatpush.msra.mxu0 %v18179_v61  ;;  %v18243_v13 = vld [vmem:[#allocation73_spill] sm:$0xff] }
 0x934   : > { %8679 = vmatpush.msrb.mxu1 %v18196_v40  ;;  %8570 = vmatpush.msra.mxu3 %v18187_v10  ;;  %v18217_v10 = vld [vmem:[#allocation48_spill] sm:$0xff] }
 0x935   : > { %8777 = vmatpush.msrb.mxu2 %v18197_v33  ;;  %8572 = vmatmul.f32.vlgmr.msra.gmra.mxu3 %v15595_v41  ;;  %v18238_v41 = vld [vmem:[#allocation71_spill] sm:$0xff] }
 0x936   : > { %8481 = vmatpush.msra.mxu0 %v18182_v27  ;;  %8685 = vmatpush.msrb.mxu1 %v18198_v28  ;;  %v7254_v44 = vpop.f32.mrf.mxu2  ;;  %v18210_v27 = vld [vmem:[#allocation32_spill] sm:$0xff] }
 0x937   : > { %8780 = vmatpush.msrb.mxu2 %v18199_v63  ;;  %8830 = vmatpush.msrb.mxu3 %v18200_v6 }
 0x938   : > { %8484 = vmatpush.msra.mxu0 %v18185_v34  ;;  %v7099_v51 = vpop.f32.mrf.mxu0  ;;  %8691 = vmatpush.msrb.mxu1 %v18201_v26  ;;  %v18214_v34 = vld [vmem:[#allocation43_spill] sm:$0xff] }
 0x939   : > { %8487 = vmatmul.f32.vlgmr.msra.gmra.mxu0 %v15607_v15  ;;  %v7100_v37 = vadd.f32 %v7099_v51, %v15540_v4  ;;  %8783 = vmatpush.msrb.mxu2 %v18202_v16  ;;  %v7293_v8 = vpop.f32.mrf.mxu3  ;;  %v18209_v4 = vld [vmem:[#allocation49_spill] sm:$0xff] }
 0x93a   : > { %8634 = vmatpush.msrb.mxu0 %v18200_v6  ;;  %8697 = vmatpush.msrb.mxu1 %v18203_v58  ;;  %v18241_v15 = vld [vmem:[#allocation77_spill] sm:$0xff] }
 0x93b   : > { %v7201_v43 = vadd.f32 %v7200_v38, %v7100_v37  ;;  %8832 = vmatpush.msrb.mxu3 %v18204_v22  ;;  %8786 = vmatpush.msrb.mxu2 %v18205_v9  ;;  %v18247_v37 = vld [vmem:[#allocation86_spill] sm:$0xff] }
 0x93c   : > { %8636 = vmatpush.msrb.mxu0 %v18204_v22  ;;  %8703 = vmatpush.msrb.mxu1 %v18206_v12 }
 0x93d   : > { %v7255_v61 = vadd.f32 %v7254_v44, %v7201_v43  ;;  %8834 = vmatpush.msrb.mxu3 %v18207_v46  ;;  %8789 = vmatpush.msrb.mxu2 %v18208_v7  ;;  %v18248_v43 = vld [vmem:[#allocation27_spill] sm:$0xff]  ;;  %v18249_v44 = vld [vmem:[#allocation97_spill] sm:$0xff] }
 0x93e   : > { %8638 = vmatpush.msrb.mxu0 %v18207_v46  ;;  %8709 = vmatpush.msrb.mxu1 %v18209_v4 }
 0x93f   : > { %v7294_v0 = vadd.f32 %v7293_v8, %v7255_v61  ;;  %8836 = vmatpush.msrb.mxu3 %v18210_v27  ;;  %8792 = vmatpush.msrb.mxu2 %v18211_v11  ;;  %v18250_v8 = vld [vmem:[#allocation89_spill] sm:$0xff] }
 0x940   : > { %8640 = vmatpush.msrb.mxu0 %v18210_v27  ;;  %8715 = vmatpush.msrb.mxu1 %v18212_v50 }
 0x941   : > { %8838 = vmatpush.msrb.mxu3 %v18213_v14  ;;  %8795 = vmatpush.msrb.mxu2 %v18214_v34 }
 0x942   : > { %8642 = vmatpush.msrb.mxu0 %v18213_v14  ;;  %8721 = vmatpush.msrb.mxu1 %v18215_v2 }
 0x943   : > { %8840 = vmatpush.msrb.mxu3 %v18216_v42  ;;  %8798 = vmatpush.msrb.mxu2 %v18217_v10 }
 0x944   : > { %8644 = vmatpush.msrb.mxu0 %v18216_v42  ;;  %8727 = vmatpush.msrb.mxu1 %v18218_v3 }
 0x945   : > { %8842 = vmatpush.msrb.mxu3 %v18219_v39  ;;  %8801 = vmatpush.msrb.mxu2 %v18220_v25 }
 0x946   : > { %8646 = vmatpush.msrb.mxu0 %v18219_v39  ;;  %8733 = vmatpush.msrb.mxu1 %v18221_v35 }
 0x947   : > { %8844 = vmatpush.msrb.mxu3 %v18222_v36  ;;  %8804 = vmatpush.msrb.mxu2 %v18223_v24 }
 0x948   : > { %8648 = vmatpush.msrb.mxu0 %v18222_v36  ;;  %8739 = vmatpush.msrb.mxu1 %v18224_v54 }
 0x949   : > { %8846 = vmatpush.msrb.mxu3 %v18225_v18  ;;  %8807 = vmatpush.msrb.mxu2 %v18226_v47  ;;  %v18270_v47 = vld [vmem:[#allocation79_spill] sm:$0xff] }
 0x94a   : > { %8650 = vmatpush.msrb.mxu0 %v18225_v18  ;;  %8745 = vmatpush.msrb.mxu1 %v18227_v21 }
 0x94b   : > { %8848 = vmatpush.msrb.mxu3 %v18228_v30  ;;  %8810 = vmatpush.msrb.mxu2 %v18229_v55  ;;  %v18269_v55 = vld [vmem:[#allocation76_spill] sm:$0xff] }
 0x94c   : > { %8652 = vmatpush.msrb.mxu0 %v18228_v30  ;;  %8751 = vmatpush.msrb.mxu1 %v18230_v53 }
 0x94d   : > { %8850 = vmatpush.msrb.mxu3 %v18231_v52  ;;  %8813 = vmatpush.msrb.mxu2 %v18232_v57  ;;  %v18267_v57 = vld [vmem:[#allocation69_spill] sm:$0xff] }
 0x94e   : > { %8654 = vmatpush.msrb.mxu0 %v18231_v52  ;;  %8757 = vmatpush.msrb.mxu1 %v18233_v1 }
 0x94f   : > { %8852 = vmatpush.msrb.mxu3 %v18234_v59  ;;  %8816 = vmatpush.msrb.mxu2 %v18235_v62  ;;  %v18257_v62 = vld [vmem:[#allocation96_spill] sm:$0xff] }
 0x950   : > { %8656 = vmatpush.msrb.mxu0 %v18234_v59  ;;  %8763 = vmatpush.msrb.mxu1 %v18236_v17  ;;  %v7399_v20 = vpop.f32.mrf.mxu1 }
 0x951   : > { %8854 = vmatpush.msrb.mxu3 %v18237_v45  ;;  %8819 = vmatpush.msrb.mxu2 %v18238_v41  ;;  %v18252_v41 = vld [vmem:[#allocation28_spill] sm:$0xff] }
 0x952   : > { %8658 = vmatpush.msrb.mxu0 %v18237_v45  ;;  %8769 = vmatpush.msrb.mxu1 %v18239_v32 }
 0x953   : > { %8856 = vmatpush.msrb.mxu3 %v18240_v48  ;;  %8822 = vmatpush.msrb.mxu2 %v18241_v15 }
 0x954   : > { %8938 = vmatpush.msra.mxu1 %v18200_v6  ;;  %8660 = vmatpush.msrb.mxu0 %v18240_v48 }
 0x955   : > { %8858 = vmatpush.msrb.mxu3 %v18242_v29  ;;  %8986 = vmatpush.msra.mxu2 %v18244_v49 }
 0x956   : > { %8940 = vmatpush.msra.mxu1 %v18204_v22  ;;  %8662 = vmatpush.msrb.mxu0 %v18242_v29 }
 0x957   : > { %8860 = vmatpush.msrb.mxu3 %v18243_v13  ;;  %8988 = vmatpush.msra.mxu2 %v18247_v37 }
 0x958   : > { %8942 = vmatpush.msra.mxu1 %v18207_v46  ;;  %8664 = vmatpush.msrb.mxu0 %v18243_v13  ;;  %v7440_v60 = vpop.f32.mrf.mxu2 }
 0x959   : > { %9020 = vmatpush.msra.mxu3 %v18246_v56  ;;  %v7441_v51 = vadd.f32 %v7440_v60, %v7059_v19  ;;  %8990 = vmatpush.msra.mxu2 %v18250_v8  ;;  %v18253_v19 = vld [vmem:[#allocation100_spill] sm:$0xff]  ;;  %v18255_v60 = vld [vmem:[#allocation35_spill] sm:$0xff] }
 0x95a   : > { %8871 = vmatpush.msra.mxu0 %v18245_v5  ;;  %v7362_v31 = vpop.f32.mrf.mxu0  ;;  %8944 = vmatpush.msra.mxu1 %v18210_v27  ;;  %v18268_v56 = vld [vmem:[#allocation72_spill] sm:$0xff] }
 0x95b   : > { %v7363_v38 = vadd.f32 %v7362_v31, %v7294_v0  ;;  %9026 = vmatpush.msra.mxu3 %v18249_v44  ;;  %v7541_v61 = vpop.f32.mrf.mxu3  ;;  %v18254_v0 = vld [vmem:[#allocation92_spill] sm:$0xff]  ;;  %v18256_v31 = vld [vmem:[#allocation102_spill] sm:$0xff] }
 0x95c   : > { %8875 = vmatpush.msra.mxu0 %v18248_v43  ;;  %8946 = vmatpush.msra.mxu1 %v18213_v14  ;;  %v7542_v15 = vadd.f32 %v7541_v61, %v7441_v51  ;;  %v18258_v44 = vld [vmem:[#allocation38_spill] sm:$0xff]  ;;  %v18262_v61 = vld [vmem:[#allocation52_spill] sm:$0xff] }
 0x95d   : > { %v15748_v23 = vadd.f32 %v7399_v20, %v7363_v38  ;;  %9032 = vmatpush.msra.mxu3 %v18253_v19  ;;  %8992 = vmatpush.msra.mxu2 %v18254_v0  ;;  %v18259_v38 = vld [vmem:[#allocation103_spill] sm:$0xff]  ;;  %v18260_v51 = vld [vmem:[#allocation42_spill] sm:$0xff]  ;;  %v18266_v19 = vld [vmem:[#allocation68_spill] sm:$0xff] }
 0x95e   : > { %8879 = vmatpush.msra.mxu0 %v18252_v41  ;;  %8948 = vmatpush.msra.mxu1 %v18216_v42  ;;  %v18261_v20 = vld [vmem:[#allocation46_spill] sm:$0xff] }
 0x95f   : > { %18251 = vst [vmem:[#allocation251_spill] sm:$0xff] %v15748_v23  ;;  %9038 = vmatpush.msra.mxu3 %v18256_v31  ;;  %8994 = vmatpush.msra.mxu2 %v18257_v62  ;;  %v18263_v23 = vld [vmem:[#allocation57_spill] sm:$0xff]  ;;  %v18264_v31 = vld [vmem:[#allocation63_spill] sm:$0xff] }
 0x960   : > { %8883 = vmatpush.msra.mxu0 %v18255_v60  ;;  %8950 = vmatpush.msra.mxu1 %v18219_v39 }
 0x961   : > { %9044 = vmatpush.msra.mxu3 %v18259_v38  ;;  %v18265_v38 = vld [vmem:[#allocation67_spill] sm:$0xff] }
 0x962   : > { %8887 = vmatpush.msra.mxu0 %v18258_v44  ;;  %8952 = vmatpush.msra.mxu1 %v18222_v36 }
 0x964   : > { %8891 = vmatpush.msra.mxu0 %v18260_v51  ;;  %8954 = vmatpush.msra.mxu1 %v18225_v18 }
 0x966   : > { %8895 = vmatpush.msra.mxu0 %v18261_v20  ;;  %8956 = vmatpush.msra.mxu1 %v18228_v30 }
 0x968   : > { %8899 = vmatpush.msra.mxu0 %v18262_v61  ;;  %8958 = vmatpush.msra.mxu1 %v18231_v52 }
 0x96a   : > { %8903 = vmatpush.msra.mxu0 %v18263_v23  ;;  %8960 = vmatpush.msra.mxu1 %v18234_v59 }
 0x96c   : > { %8907 = vmatpush.msra.mxu0 %v18264_v31  ;;  %8962 = vmatpush.msra.mxu1 %v18237_v45 }
 0x96e   : > { %8911 = vmatpush.msra.mxu0 %v18265_v38  ;;  %8964 = vmatpush.msra.mxu1 %v18240_v48 }
 0x970   : > { %8915 = vmatpush.msra.mxu0 %v18266_v19  ;;  %8966 = vmatpush.msra.mxu1 %v18242_v29 }
 0x972   : > { %8919 = vmatpush.msra.mxu0 %v18267_v57  ;;  %8968 = vmatpush.msra.mxu1 %v18243_v13  ;;  %v7634_v31 = vpop.f32.mrf.mxu1 }
 0x974   : > { %8923 = vmatpush.msra.mxu0 %v18268_v56  ;;  %v11785_v56 = vld [vmem:[%s16815_s2] ss:$0 sm:$0xff] }
 0x976   : > { %8927 = vmatpush.msra.mxu0 %v18269_v55 }
 0x978   : > { %8931 = vmatpush.msra.mxu0 %v18270_v47 }
 0x97a   : > { %v7703_v23 = vpop.f32.mrf.mxu2 }
 0x97b   : > { %v7595_v24 = vpop.f32.mrf.mxu0 }
 0x97c   : > { %v7596_v38 = vadd.f32 %v7595_v24, %v7542_v15  ;;  %v7830_v20 = vpop.f32.mrf.mxu1 }
 0x97d   : > { %v7740_v61 = vpop.f32.mrf.mxu3 }
 0x97e   : > { %v7635_v25 = vadd.f32 %v7634_v31, %v7596_v38 }
 0x980   : > { %v7704_v10 = vadd.f32 %v7703_v23, %v7635_v25 }
 0x982   : > { %v15780_v19 = vadd.f32 %v7740_v61, %v7704_v10 }
 0x984   : > { %18271 = vst [vmem:[#allocation253_spill] sm:$0xff] %v15780_v19 }
 0x985   : > { %v7789_v34 = vpop.f32.mrf.mxu0  ;;  %v7860_v57 = vpop.f32.mrf.mxu2 }
 0x986   : > { %v7790_v51 = vadd.f32 %v11785_v56, %v7789_v34  ;;  %v7945_v7 = vpop.f32.mrf.mxu1 }
 0x987   : > { %v7887_v11 = vpop.f32.mrf.mxu3 }
 0x988   : > { %v7831_v55 = vadd.f32 %v7830_v20, %v7790_v51 }
 0x98a   : > { %v7861_v47 = vadd.f32 %v7860_v57, %v7831_v55 }
 0x98c   : > { %v7888_v44 = vadd.f32 %v7887_v11, %v7861_v47 }
 0x98f   : > { %v7920_v60 = vpop.f32.mrf.mxu0  ;;  %v7999_v24 = vpop.f32.mrf.mxu2 }
 0x990   : > { %v7921_v15 = vadd.f32 %v7920_v60, %v7888_v44  ;;  %v8000_v25 = vadd.f32 %v11785_v56, %v7999_v24  ;;  %v8097_v23 = vpop.f32.mrf.mxu1 }
 0x991   : > { %v8040_v10 = vpop.f32.mrf.mxu3 }
 0x992   : > { %v15785_v31 = vadd.f32 %v7945_v7, %v7921_v15  ;;  %v8041_v38 = vadd.f32 %v8040_v10, %v8000_v25 }
 0x999   : > { %v8070_v61 = vpop.f32.mrf.mxu0  ;;  %v8130_v19 = vpop.f32.mrf.mxu2 }
 0x99a   : > { %v8071_v9 = vadd.f32 %v8070_v61, %v8041_v38  ;;  %v8249_v20 = vpop.f32.mrf.mxu1 }
 0x99b   : > { %v8155_v16 = vpop.f32.mrf.mxu3 }
 0x99c   : > { %v8098_v41 = vadd.f32 %v8097_v23, %v8071_v9 }
 0x99e   : > { %v8131_v34 = vadd.f32 %v8130_v19, %v8098_v41 }
 0x9a0   : > { %v8156_v51 = vadd.f32 %v8155_v16, %v8131_v34 }
 0x9a2   : > { %v11606_v55 = vadd.f32 -1.0, %v8156_v51  ;;  %v8279_v47 = vpop.f32.mrf.mxu2 }
 0x9a3   : > { %v8208_v11 = vpop.f32.mrf.mxu0 }
 0x9a4   : > { %v11607_v57 = vmul.f32 -1.442695, %v11606_v55  ;;  %v8209_v43 = vadd.f32 %v11785_v56, %v8208_v11  ;;  %v8364_v10 = vpop.f32.mrf.mxu1 }
 0x9a5   : > { %v8306_v44 = vpop.f32.mrf.mxu3 }
 0x9a6   : > { %11751 = vpow2.f32 %v11607_v57  ;;  %v8250_v7 = vadd.f32 %v8249_v20, %v8209_v43 }
 0x9a8   : > { %v8280_v60 = vadd.f32 %v8279_v47, %v8250_v7 }
 0x9aa   : > { %v8307_v24 = vadd.f32 %v8306_v44, %v8280_v60 }
 0x9ac   : > { %v11752_v15 = vpop.eup %11751  ;;  %v8417_v38 = vpop.f32.mrf.mxu2 }
 0x9ad   : > { %v8162_v25 = vadd.f32 1.0, %v11752_v15  ;;  %v8339_v63 = vpop.f32.mrf.mxu0  ;;  %v8418_v16 = vadd.f32 %v11785_v56, %v8417_v38 }
 0x9ae   : > { %v8340_v9 = vadd.f32 %v8339_v63, %v8307_v24  ;;  %v8515_v20 = vpop.f32.mrf.mxu1 }
 0x9af   : > { %11753 = vrcp.f32 %v8162_v25  ;;  %v8458_v19 = vpop.f32.mrf.mxu3  ;;  %v8174_v44 = vand.u32 2147483648, %v8162_v25  ;;  %v8172_v63 = vand.u32 2147483647, %v8162_v25  ;;  %vm8168_vm1 = vweird.f32 %v8162_v25 }
 0x9b0   : > { %v8365_v41 = vadd.f32 %v8364_v10, %v8340_v9  ;;  %v8459_v34 = vadd.f32 %v8458_v19, %v8418_v16 }
 0x9b1   : > { %v8175_v16 = vor.u32 1.1754944e-38, %v8174_v44  ;;  %vm8173_vm7 = vcmp.eq.f32.partialorder %v8172_v63, 8.507059e+37 }
 0x9b2   : > { %v11608_v23 = vadd.f32 -1.0, %v8365_v41 }
 0x9b4   : > { %v11609_v61 = vmul.f32 -1.442695, %v11608_v23 }
 0x9b5   : > { %v11754_v55 = vpop.eup %11753 }
 0x9b6   : > { %v8488_v11 = vpop.f32.mrf.mxu0  ;;  %v8164_v57 = vmul.f32 %v11754_v55, %v8162_v25  ;;  %11755 = vpow2.f32 %v11609_v61  ;;  %v8548_v60 = vpop.f32.mrf.mxu2  ;;  %vm8169_vm2 = vweird.f32 %v11754_v55 }
 0x9b7   : > { %v8489_v43 = vadd.f32 %v8488_v11, %v8459_v34  ;;  %vm8170_vm6 = vmor %vm8168_vm1, %vm8169_vm2 }
 0x9b8   : > { %v8165_v47 = vsub.f32 1.0, %v8164_v57  ;;  %v8573_v10 = vpop.f32.mrf.mxu3 }
 0x9b9   : > { %v8516_v7 = vadd.f32 %v8515_v20, %v8489_v43 }
 0x9ba   : > { %v8166_v15 = vmul.f32 %v11754_v55, %v8165_v47 }
 0x9bb   : > { %v8549_v24 = vadd.f32 %v8548_v60, %v8516_v7 }
 0x9bc   : > { %v11756_v56 = vpop.eup %11755  ;;  %v8167_v38 = vadd.f32 %v11754_v55, %v8166_v15 }
 0x9bd   : > { %v8574_v9 = vadd.f32 %v8573_v10, %v8549_v24  ;;  %v8371_v19 = vadd.f32 1.0, %v11756_v56 }
 0x9be   : > { %v8171_v23 = vsel %vm8170_vm6, %v11754_v55, %v8167_v38 }
 0x9bf   : > { %v11610_v61 = vadd.f32 -1.0, %v8574_v9  ;;  %v8176_v34 = vsel %vm8173_vm7, %v8175_v16, %v8171_v23  ;;  %11757 = vrcp.f32 %v8371_v19  ;;  %v8383_v25 = vand.u32 2147483648, %v8371_v19 }
 0x9c0   : > { %v8178_v11 = vmul.f32 %v8176_v34, %v8156_v51  ;;  %v8381_v44 = vand.u32 2147483647, %v8371_v19  ;;  %vm8377_vm4 = vweird.f32 %v8371_v19 }
 0x9c1   : > { %v11611_v57 = vmul.f32 -1.442695, %v11610_v61  ;;  %v8384_v63 = vor.u32 1.1754944e-38, %v8383_v25 }
 0x9c2   : > { %8598 = vrot.lane.b32.xlu1 %v8178_v11, %s11818_s24  ;;  %vm8382_vm2 = vcmp.eq.f32.partialorder %v8381_v44, 8.507059e+37 }
 0x9c3   : > { %11759 = vpow2.f32 %v11611_v57 }
 0x9c5   : > { %v11758_v43 = vpop.eup %11757 }
 0x9c6   : > { %v8373_v20 = vmul.f32 %v11758_v43, %v8371_v19  ;;  %vm8378_vm13 = vweird.f32 %v11758_v43 }
 0x9c7   : > { %vm8379_vm3 = vmor %vm8377_vm4, %vm8378_vm13 }
 0x9c8   : > { %v8374_v7 = vsub.f32 1.0, %v8373_v20 }
 0x9c9   : > { %v11760_v47 = vpop.eup %11759 }
 0x9ca   : > { %v8580_v60 = vadd.f32 1.0, %v11760_v47  ;;  %v8375_v15 = vmul.f32 %v11758_v43, %v8374_v7 }
 0x9cc   : > { %11761 = vrcp.f32 %v8580_v60  ;;  %v8376_v55 = vadd.f32 %v11758_v43, %v8375_v15  ;;  %v8592_v23 = vand.u32 2147483648, %v8580_v60  ;;  %v8590_v34 = vand.u32 2147483647, %v8580_v60 }
 0x9cd   : > { %vm8586_vm6 = vweird.f32 %v8580_v60 }
 0x9ce   : > { %v8380_v24 = vsel %vm8379_vm3, %v11758_v43, %v8376_v55  ;;  %v8593_v57 = vor.u32 1.1754944e-38, %v8592_v23  ;;  %vm8591_vm13 = vcmp.eq.f32.partialorder %v8590_v34, 8.507059e+37 }
 0x9cf   : > { %v8385_v51 = vsel %vm8382_vm2, %v8384_v63, %v8380_v24 }
 0x9d0   : > { %v8387_v10 = vmul.f32 %v8385_v51, %v8365_v41  ;;  %v11604_v41 = vadd.f32 -1.0, %v15785_v31 }
 0x9d2   : > { %v11762_v56 = vpop.eup %11761  ;;  %8602 = vrot.lane.b32.xlu2 %v8387_v10, %s11819_s26  ;;  %v11605_v47 = vmul.f32 -1.442695, %v11604_v41  ;;  %v18272_v41 = vld [vmem:[#allocation85_spill] sm:$0xff] }
 0x9d3   : > { %v8582_v38 = vmul.f32 %v11762_v56, %v8580_v60  ;;  %vm8587_vm1 = vweird.f32 %v11762_v56 }
 0x9d4   : > { %vm8588_vm7 = vmor %vm8586_vm6, %vm8587_vm1  ;;  %11763 = vpow2.f32 %v11605_v47 }
 0x9d5   : > { %v8583_v16 = vsub.f32 1.0, %v8582_v38 }
 0x9d7   : > { %v8584_v61 = vmul.f32 %v11762_v56, %v8583_v16 }
 0x9d9   : > { %v8585_v11 = vadd.f32 %v11762_v56, %v8584_v61 }
 0x9da   : > { %v11764_v7 = vpop.eup %11763 }
 0x9db   : > { %v8589_v19 = vsel %vm8588_vm7, %v11762_v56, %v8585_v11  ;;  %v7952_v25 = vadd.f32 1.0, %v11764_v7  ;;  %v18273_v7 = vld [vmem:[#allocation88_spill] sm:$0xff] }
 0x9dc   : > { %v8594_v20 = vsel %vm8591_vm13, %v8593_v57, %v8589_v19 }
 0x9dd   : > { %v8596_v43 = vmul.f32 %v8594_v20, %v8574_v9  ;;  %11765 = vrcp.f32 %v7952_v25  ;;  %v7964_v24 = vand.u32 2147483648, %v7952_v25  ;;  %vm7958_vm3 = vweird.f32 %v7952_v25 }
 0x9de   : > { %v7962_v51 = vand.u32 2147483647, %v7952_v25 }
 0x9df   : > { %8606 = vrot.lane.b32.xlu0 %v8596_v43, %s11820_s27  ;;  %v7965_v10 = vor.u32 1.1754944e-38, %v7964_v24  ;;  %v18298_v24 = vld [vmem:[#allocation58_spill] sm:$0xff] }
 0x9e0   : > { %vm7963_vm1 = vcmp.eq.f32.partialorder %v7962_v51, 8.507059e+37  ;;  %v18300_v51 = vld [vmem:[#allocation60_spill] sm:$0xff] }
 0x9e3   : > { %v11766_v15 = vpop.eup %11765 }
 0x9e4   : > { %v7954_v44 = vmul.f32 %v11766_v15, %v7952_v25  ;;  %vm7959_vm4 = vweird.f32 %v11766_v15 }
 0x9e5   : > { %vm7960_vm2 = vmor %vm7958_vm3, %vm7959_vm4 }
 0x9e6   : > { %v7955_v55 = vsub.f32 1.0, %v7954_v44 }
 0x9e8   : > { %v7956_v63 = vmul.f32 %v11766_v15, %v7955_v55  ;;  %v18292_v55 = vld [vmem:[#allocation43_spill] sm:$0xff] }
 0x9ea   : > { %v7957_v60 = vadd.f32 %v11766_v15, %v7956_v63  ;;  %v18294_v63 = vld [vmem:[#allocation48_spill] sm:$0xff] }
 0x9ec   : > { %v7961_v9 = vsel %vm7960_vm2, %v11766_v15, %v7957_v60  ;;  %v18274_v15 = vld [vmem:[#allocation91_spill] sm:$0xff]  ;;  %v18296_v60 = vld [vmem:[#allocation50_spill] sm:$0xff]  ;;  %vm18467_vm2 = vcmask 1042432  }
 0x9ed   : > { %v7966_v56 = vsel %vm7963_vm1, %v7965_v10, %v7961_v9  ;;  %v18302_v9 = vld [vmem:[#allocation61_spill] sm:$0xff]  ;;  %v18304_v10 = vld [vmem:[#allocation68_spill] sm:$0xff]  ;;  %vm18468_vm1 = vmmov %vm18467_vm2 }
 0x9ee   : > { %v7968_v38 = vmul.f32 %v7966_v56, %v15785_v31  ;;  %v18305_v56 = vld [vmem:[#allocation62_spill] sm:$0xff] }
 0xa2c   : > { %v8603_v23 = vpop.permute.xlu2 %8602 }
 0xa34   : > { %v8599_v16 = vpop.permute.xlu1 %8598 }
 0xa35   : > { %v8609_v61 = vsel %vm1301_vm8, %v7968_v38, %v8599_v16  ;;  %v18307_v38 = vld [vmem:[#allocation69_spill] sm:$0xff]  ;;  %v18308_v16 = vld [vmem:[#allocation64_spill] sm:$0xff] }
 0xa36   : > { %v8610_v34 = vsel %vm1303_vm9, %v8609_v61, %v8603_v23  ;;  %v18311_v61 = vld [vmem:[#allocation71_spill] sm:$0xff] }
 0xa37   : > { %8612 = vst [vmem:[#allocation2] sm:$0x1f] %v8610_v34  ;;  %v18312_v34 = vld [vmem:[#allocation102_spill] sm:$0xff] }
 0xa3e   : > { %v8614_v11 = vld [vmem:[#allocation2] sm:$0xf] }
 0xa3f   : > { %v8616_v57 = vld [vmem:[#allocation2] sm:$0x1e]  ;;  %8619 = vrot.lane.b32.xlu1 %v8614_v11, %s17879_s21  ;;  %v8665_v19 = vand.u32 4294901760, %v8614_v11 }
 0xa40   : > { %v8626_v20 = vrot.slane %v8616_v57, 1  ;;  %v18314_v57 = vld [vmem:[#allocation77_spill] sm:$0xff] }
 0xa41   : > { %v8666_v43 = vsub.f32 %v8614_v11, %v8665_v19  ;;  %8771 = vmatmul.f32.vlgmr.msrb.gmra.mxu1 %v8665_v19  ;;  %v18313_v11 = vld [vmem:[#allocation76_spill] sm:$0xff] }
 0xa42   : > { %8627 = vrot.lane.b32.xlu0 %v8626_v20, %s11819_s26  ;;  %9241 = vmatpush.msrb.mxu1 %v18196_v40  ;;  %v18275_v40 = vld [vmem:[#allocation95_spill] sm:$0xff] }
 0xa43   : > { %v8667_v31 = vand.u32 4294901760, %v8666_v43  ;;  %8825 = vmatmul.f32.vlgmr.msrb.gmra.mxu2 %v8666_v43 }
 0xa44   : > { %9063 = vmatpush.msrb.mxu2 %v18272_v41  ;;  %9247 = vmatpush.msrb.mxu1 %v18198_v28  ;;  %v18276_v28 = vld [vmem:[#allocation99_spill] sm:$0xff] }
 0xa45   : > { %v8668_v47 = vsub.f32 %v8666_v43, %v8667_v31  ;;  %8864 = vmatmul.f32.vlgmr.msrb.gmra.mxu3 %v8667_v31 }
 0xa46   : > { %9094 = vmatpush.msrb.mxu3 %v18244_v49  ;;  %9066 = vmatpush.msrb.mxu2 %v18273_v7 }
 0xa47   : > { %v8669_v25 = vand.u32 4294901760, %v8668_v47  ;;  %9253 = vmatpush.msrb.mxu1 %v18201_v26 }
 0xa48   : > { %9096 = vmatpush.msrb.mxu3 %v18247_v37  ;;  %9069 = vmatpush.msrb.mxu2 %v18274_v15 }
 0xa49   : > { %8670 = vmatmul.f32.vlgmr.msrb.gmra.mxu0 %v8669_v25  ;;  %8970 = vmatmul.f32.vlgmr.msra.gmra.mxu1 %v8665_v19 }
 0xa4a   : > { %9098 = vmatpush.msrb.mxu3 %v18250_v8  ;;  %9072 = vmatpush.msrb.mxu2 %v18275_v40 }
 0xa4b   : > { %9259 = vmatpush.msrb.mxu1 %v18203_v58  ;;  %9196 = vmatpush.msrb.mxu0 %v18200_v6 }
 0xa4c   : > { %9100 = vmatpush.msrb.mxu3 %v18254_v0  ;;  %9075 = vmatpush.msrb.mxu2 %v18276_v28 }
 0xa4d   : > { %9265 = vmatpush.msrb.mxu1 %v18206_v12  ;;  %9198 = vmatpush.msrb.mxu0 %v18204_v22 }
 0xa4e   : > { %9102 = vmatpush.msrb.mxu3 %v18257_v62 }
 0xa4f   : > { %9271 = vmatpush.msrb.mxu1 %v18209_v4  ;;  %9200 = vmatpush.msrb.mxu0 %v18207_v46 }
 0xa51   : > { %v8607_v26 = vpop.permute.xlu0 %8606  ;;  %8933 = vmatmul.f32.vlgmr.msra.gmra.mxu0 %v8665_v19  ;;  %9277 = vmatpush.msrb.mxu1 %v18212_v50  ;;  %v18316_v19 = vld [vmem:[#allocation79_spill] sm:$0xff] }
 0xa52   : > { %v8611_v44 = vsel %vm1305_vm10, %v8603_v23, %v8607_v26  ;;  %9202 = vmatpush.msrb.mxu0 %v18210_v27  ;;  %v18309_v23 = vld [vmem:[#allocation100_spill] sm:$0xff] }
 0xa53   : > { %8613 = vst.msk [vmem:[#allocation2 + $0x8] sm:$0x1f] %vm1308_vm11, %v8611_v44  ;;  %9283 = vmatpush.msrb.mxu1 %v18215_v2 }
 0xa54   : > { %9204 = vmatpush.msrb.mxu0 %v18213_v14 }
 0xa55   : > { %9289 = vmatpush.msrb.mxu1 %v18218_v3 }
 0xa56   : > { %9206 = vmatpush.msrb.mxu0 %v18216_v42 }
 0xa57   : > { %9295 = vmatpush.msrb.mxu1 %v18221_v35 }
 0xa58   : > { %9208 = vmatpush.msrb.mxu0 %v18219_v39 }
 0xa59   : > { %9301 = vmatpush.msrb.mxu1 %v18224_v54  ;;  %v18277_v54 = vld [vmem:[#allocation87_spill] sm:$0xff] }
 0xa5a   : > { %v8615_v58 = vld [vmem:[#allocation2 + $0x8] sm:$0xf]  ;;  %9210 = vmatpush.msrb.mxu0 %v18222_v36 }
 0xa5b   : > { %8621 = vrot.lane.b32.xlu2 %v8615_v58, %s17879_s21  ;;  %v8631_v12 = vsel %vm1305_vm10, %v8615_v58, 0  ;;  %9307 = vmatpush.msrb.mxu1 %v18227_v21  ;;  %v18278_v21 = vld [vmem:[#allocation90_spill] sm:$0xff] }
 0xa5c   : > { %v8995_v4 = vand.u32 4294901760, %v8631_v12  ;;  %9212 = vmatpush.msrb.mxu0 %v18225_v18 }
 0xa5d   : > { %9313 = vmatpush.msrb.mxu1 %v18230_v53  ;;  %v18279_v53 = vld [vmem:[#allocation94_spill] sm:$0xff] }
 0xa5e   : > { %v8996_v50 = vsub.f32 %v8631_v12, %v8995_v4  ;;  %9046 = vmatmul.f32.vlgmr.msra.gmra.mxu3 %v8995_v4  ;;  %9214 = vmatpush.msrb.mxu0 %v18228_v30 }
 0xa5f   : > { %9158 = vmatpush.msra.mxu3 %v18244_v49  ;;  %9319 = vmatpush.msrb.mxu1 %v18233_v1  ;;  %v18280_v1 = vld [vmem:[#allocation98_spill] sm:$0xff] }
 0xa60   : > { %v8997_v2 = vand.u32 4294901760, %v8996_v50  ;;  %9216 = vmatpush.msrb.mxu0 %v18231_v52 }
 0xa61   : > { %9160 = vmatpush.msra.mxu3 %v18247_v37  ;;  %9325 = vmatpush.msrb.mxu1 %v18236_v17  ;;  %v18284_v17 = vld [vmem:[#allocation25_spill] sm:$0xff] }
 0xa62   : > { %v8998_v3 = vsub.f32 %v8996_v50, %v8997_v2  ;;  %9218 = vmatpush.msrb.mxu0 %v18234_v59 }
 0xa63   : > { %9162 = vmatpush.msra.mxu3 %v18250_v8  ;;  %9331 = vmatpush.msrb.mxu1 %v18239_v32  ;;  %v18288_v32 = vld [vmem:[#allocation36_spill] sm:$0xff] }
 0xa64   : > { %v8999_v35 = vand.u32 4294901760, %v8998_v3  ;;  %9220 = vmatpush.msrb.mxu0 %v18237_v45 }
 0xa65   : > { %9164 = vmatpush.msra.mxu3 %v18254_v0  ;;  %9500 = vmatpush.msra.mxu1 %v18200_v6 }
 0xa66   : > { %9000 = vmatmul.f32.vlgmr.msra.gmra.mxu2 %v8999_v35  ;;  %9106 = vmatmul.f32.vlgmr.msrb.gmra.mxu3 %v8997_v2  ;;  %v18317_v2 = vld [vmem:[#allocation126_spill] sm:$0xff]  ;;  %v18318_v35 = vld [vmem:[#allocation127_spill] sm:$0xff] }
 0xa67   : > { %9124 = vmatpush.msra.mxu2 %v18277_v54  ;;  %9166 = vmatpush.msra.mxu3 %v18257_v62 }
 0xa68   : > { %9502 = vmatpush.msra.mxu1 %v18204_v22  ;;  %9222 = vmatpush.msrb.mxu0 %v18240_v48 }
 0xa69   : > { %9392 = vmatpush.msrb.mxu3 %v18200_v6  ;;  %9128 = vmatpush.msra.mxu2 %v18278_v21  ;;  %v18281_v6 = vld [vmem:[#allocation101_spill] sm:$0xff] }
 0xa6a   : > { %9504 = vmatpush.msra.mxu1 %v18207_v46  ;;  %9224 = vmatpush.msrb.mxu0 %v18242_v29 }
 0xa6b   : > { %9394 = vmatpush.msrb.mxu3 %v18204_v22  ;;  %9132 = vmatpush.msra.mxu2 %v18279_v53  ;;  %v18282_v22 = vld [vmem:[#allocation24_spill] sm:$0xff] }
 0xa6c   : > { %9506 = vmatpush.msra.mxu1 %v18210_v27  ;;  %9226 = vmatpush.msrb.mxu0 %v18243_v13 }
 0xa6d   : > { %9396 = vmatpush.msrb.mxu3 %v18207_v46  ;;  %9136 = vmatpush.msra.mxu2 %v18280_v1  ;;  %v18283_v46 = vld [vmem:[#allocation27_spill] sm:$0xff] }
 0xa6e   : > { %9078 = vmatmul.f32.vlgmr.msrb.gmra.mxu2 %v8996_v50  ;;  %9168 = vmatmul.f32.vlgmr.msra.gmra.mxu3 %v8995_v4 }
 0xa6f   : > { %9140 = vmatpush.msra.mxu2 %v18281_v6  ;;  %9398 = vmatpush.msrb.mxu3 %v18210_v27  ;;  %v18286_v27 = vld [vmem:[#allocation33_spill] sm:$0xff] }
 0xa70   : > { %9433 = vmatpush.msra.mxu0 %v18245_v5  ;;  %9508 = vmatpush.msra.mxu1 %v18213_v14  ;;  %v18290_v5 = vld [vmem:[#allocation39_spill] sm:$0xff] }
 0xa71   : > { %9339 = vmatpush.msrb.mxu2 %v18197_v33  ;;  %9400 = vmatpush.msrb.mxu3 %v18213_v14  ;;  %v18285_v33 = vld [vmem:[#allocation28_spill] sm:$0xff]  ;;  %v18287_v14 = vld [vmem:[#allocation35_spill] sm:$0xff] }
 0xa72   : > { %9437 = vmatpush.msra.mxu0 %v18283_v46  ;;  %9510 = vmatpush.msra.mxu1 %v18216_v42 }
 0xa73   : > { %9342 = vmatpush.msrb.mxu2 %v18282_v22  ;;  %9402 = vmatpush.msrb.mxu3 %v18216_v42  ;;  %v18289_v42 = vld [vmem:[#allocation38_spill] sm:$0xff] }
 0xa74   : > { %9441 = vmatpush.msra.mxu0 %v18285_v33  ;;  %9512 = vmatpush.msra.mxu1 %v18219_v39  ;;  %v18319_v33 = vld [vmem:[#allocation130_spill] sm:$0xff] }
 0xa75   : > { %9345 = vmatpush.msrb.mxu2 %v18284_v17  ;;  %9404 = vmatpush.msrb.mxu3 %v18219_v39  ;;  %v18291_v39 = vld [vmem:[#allocation42_spill] sm:$0xff] }
 0xa76   : > { %9142 = vmatmul.f32.vlgmr.msra.gmra.mxu2 %v8995_v4  ;;  %9445 = vmatpush.msra.mxu0 %v18287_v14 }
 0xa77   : > { %9348 = vmatpush.msrb.mxu2 %v18286_v27  ;;  %9406 = vmatpush.msrb.mxu3 %v18222_v36 }
 0xa78   : > { %9514 = vmatpush.msra.mxu1 %v18222_v36  ;;  %9449 = vmatpush.msra.mxu0 %v18289_v42  ;;  %v18293_v36 = vld [vmem:[#allocation46_spill] sm:$0xff] }
 0xa79   : > { %9351 = vmatpush.msrb.mxu2 %v18288_v32  ;;  %9408 = vmatpush.msrb.mxu3 %v18225_v18  ;;  %v18322_v32 = vld [vmem:[#allocation139_spill] sm:$0xff] }
 0xa7a   : > { %9516 = vmatpush.msra.mxu1 %v18225_v18  ;;  %9453 = vmatpush.msra.mxu0 %v18291_v39  ;;  %v18295_v18 = vld [vmem:[#allocation52_spill] sm:$0xff]  ;;  %v18324_v39 = vld [vmem:[#allocation143_spill] sm:$0xff] }
 0xa7b   : > { %9354 = vmatpush.msrb.mxu2 %v18290_v5  ;;  %9410 = vmatpush.msrb.mxu3 %v18228_v30 }
 0xa7c   : > { %9518 = vmatpush.msra.mxu1 %v18228_v30  ;;  %9457 = vmatpush.msra.mxu0 %v18293_v36  ;;  %v18297_v30 = vld [vmem:[#allocation57_spill] sm:$0xff]  ;;  %v18325_v36 = vld [vmem:[#allocation107_spill] sm:$0xff] }
 0xa7d   : > { %9357 = vmatpush.msrb.mxu2 %v18292_v55  ;;  %9412 = vmatpush.msrb.mxu3 %v18231_v52 }
 0xa7e   : > { %9520 = vmatpush.msra.mxu1 %v18231_v52  ;;  %9461 = vmatpush.msra.mxu0 %v18295_v18  ;;  %v18299_v52 = vld [vmem:[#allocation63_spill] sm:$0xff] }
 0xa7f   : > { %9360 = vmatpush.msrb.mxu2 %v18294_v63  ;;  %9414 = vmatpush.msrb.mxu3 %v18234_v59  ;;  %v18326_v63 = vld [vmem:[#allocation147_spill] sm:$0xff] }
 0xa80   : > { %9522 = vmatpush.msra.mxu1 %v18234_v59  ;;  %9465 = vmatpush.msra.mxu0 %v18297_v30  ;;  %v18301_v59 = vld [vmem:[#allocation67_spill] sm:$0xff]  ;;  %v18335_v30 = vld [vmem:[#allocation113_spill] sm:$0xff] }
 0xa81   : > { %9363 = vmatpush.msrb.mxu2 %v18296_v60  ;;  %9416 = vmatpush.msrb.mxu3 %v18237_v45  ;;  %v18329_v18 = vld [vmem:[#allocation111_spill] sm:$0xff]  ;;  %v18330_v60 = vld [vmem:[#allocation109_spill] sm:$0xff] }
 0xa82   : > { %9524 = vmatpush.msra.mxu1 %v18237_v45  ;;  %9469 = vmatpush.msra.mxu0 %v18299_v52  ;;  %v18303_v45 = vld [vmem:[#allocation93_spill] sm:$0xff]  ;;  %v18338_v52 = vld [vmem:[#allocation124_spill] sm:$0xff] }
 0xa83   : > { %9366 = vmatpush.msrb.mxu2 %v18298_v24  ;;  %9418 = vmatpush.msrb.mxu3 %v18240_v48  ;;  %v18337_v24 = vld [vmem:[#allocation161_spill] sm:$0xff] }
 0xa84   : > { %9526 = vmatpush.msra.mxu1 %v18240_v48  ;;  %9473 = vmatpush.msra.mxu0 %v18301_v59  ;;  %v18306_v48 = vld [vmem:[#allocation97_spill] sm:$0xff]  ;;  %v18340_v59 = vld [vmem:[#allocation163_spill] sm:$0xff] }
 0xa85   : > { %9369 = vmatpush.msrb.mxu2 %v18300_v51  ;;  %9420 = vmatpush.msrb.mxu3 %v18242_v29  ;;  %v18339_v51 = vld [vmem:[#allocation115_spill] sm:$0xff] }
 0xa86   : > { %9528 = vmatpush.msra.mxu1 %v18242_v29  ;;  %9477 = vmatpush.msra.mxu0 %v18304_v10  ;;  %v18310_v29 = vld [vmem:[#allocation72_spill] sm:$0xff]  ;;  %v18343_v10 = vld [vmem:[#allocation165_spill] sm:$0xff] }
 0xa87   : > { %9372 = vmatpush.msrb.mxu2 %v18302_v9  ;;  %9422 = vmatpush.msrb.mxu3 %v18243_v13  ;;  %v18341_v9 = vld [vmem:[#allocation131_spill] sm:$0xff] }
 0xa88   : > { %9530 = vmatpush.msra.mxu1 %v18243_v13  ;;  %9481 = vmatpush.msra.mxu0 %v18307_v38  ;;  %v18315_v13 = vld [vmem:[#allocation103_spill] sm:$0xff]  ;;  %v18346_v38 = vld [vmem:[#allocation166_spill] sm:$0xff] }
 0xa89   : > { %9582 = vmatpush.msra.mxu3 %v18303_v45  ;;  %9375 = vmatpush.msrb.mxu2 %v18305_v56  ;;  %v18342_v45 = vld [vmem:[#allocation116_spill] sm:$0xff] }
 0xa8a   : > { %9485 = vmatpush.msra.mxu0 %v18310_v29  ;;  %v18344_v56 = vld [vmem:[#allocation132_spill] sm:$0xff]  ;;  %v18349_v29 = vld [vmem:[#allocation167_spill] sm:$0xff] }
 0xa8b   : > { %9588 = vmatpush.msra.mxu3 %v18306_v48  ;;  %9378 = vmatpush.msrb.mxu2 %v18308_v16  ;;  %v18345_v48 = vld [vmem:[#allocation120_spill] sm:$0xff]  ;;  %v18347_v16 = vld [vmem:[#allocation134_spill] sm:$0xff] }
 0xa8c   : > { %9489 = vmatpush.msra.mxu0 %v18313_v11 }
 0xa8d   : > { %9594 = vmatpush.msra.mxu3 %v18309_v23  ;;  %9381 = vmatpush.msrb.mxu2 %v18311_v61  ;;  %v18348_v23 = vld [vmem:[#allocation123_spill] sm:$0xff]  ;;  %v18350_v61 = vld [vmem:[#allocation136_spill] sm:$0xff] }
 0xa8e   : > { %9493 = vmatpush.msra.mxu0 %v18316_v19  ;;  %v18354_v19 = vld [vmem:[#allocation137_spill] sm:$0xff] }
 0xa8f   : > { %9600 = vmatpush.msra.mxu3 %v18312_v34  ;;  %9384 = vmatpush.msrb.mxu2 %v18314_v57  ;;  %v18351_v34 = vld [vmem:[#allocation125_spill] sm:$0xff]  ;;  %v18352_v57 = vld [vmem:[#allocation168_spill] sm:$0xff] }
 0xa91   : > { %9548 = vmatpush.msra.mxu2 %v18244_v49  ;;  %9606 = vmatpush.msra.mxu3 %v18315_v13  ;;  %v18353_v13 = vld [vmem:[#allocation141_spill] sm:$0xff] }
 0xa93   : > { %9550 = vmatpush.msra.mxu2 %v18247_v37 }
 0xa95   : > { %9552 = vmatpush.msra.mxu2 %v18250_v8 }
 0xa97   : > { %9554 = vmatpush.msra.mxu2 %v18254_v0 }
 0xa99   : > { %9556 = vmatpush.msra.mxu2 %v18257_v62 }
 0xab1   : > { %v8620_v20 = vpop.permute.xlu1 %8619 }
 0xab4   : > { %v8628_v43 = vpop.permute.xlu0 %8627 }
 0xab5   : > { %v8622_v31 = vpop.permute.xlu2 %8621  ;;  %v9193_v47 = vsel %vm1305_vm10, %v8628_v43, 0 }
 0xab6   : > { %v8623_v25 = vsel %vm1319_vm12, %v8620_v20, %v8622_v31  ;;  %v15928_v26 = vand.u32 4294901760, %v9193_v47  ;;  %v18356_v31 = vld [vmem:[#allocation138_spill] sm:$0xff] }
 0xab7   : > { %v8630_v44 = vsel %vm1303_vm9, %v8623_v25, %v8628_v43  ;;  %v18355_v43 = vld [vmem:[#allocation146_spill] sm:$0xff] }
 0xab8   : > { %v9227_v58 = vand.u32 4294901760, %v8630_v44  ;;  %v9558_v12 = vsub.f32 %v9193_v47, %v15928_v26  ;;  %v18357_v47 = vld [vmem:[#allocation150_spill] sm:$0xff] }
 0xaba   : > { %v9228_v4 = vsub.f32 %v8630_v44, %v9227_v58  ;;  %v9559_v50 = vand.u32 4294901760, %v9558_v12  ;;  %9333 = vmatmul.f32.vlgmr.msrb.gmra.mxu1 %v9227_v58 }
 0xabb   : > { %9829 = vmatpush.msrb.mxu1 %v18317_v2  ;;  %v18361_v2 = vld [vmem:[#allocation145_spill] sm:$0xff] }
 0xabc   : > { %v9229_v3 = vand.u32 4294901760, %v9228_v4  ;;  %9387 = vmatmul.f32.vlgmr.msrb.gmra.mxu2 %v9228_v4  ;;  %v9560_v46 = vsub.f32 %v9558_v12, %v9559_v50 }
 0xabd   : > { %9625 = vmatpush.msrb.mxu2 %v18272_v41  ;;  %9835 = vmatpush.msrb.mxu1 %v18318_v35  ;;  %v18320_v41 = vld [vmem:[#allocation135_spill] sm:$0xff]  ;;  %v18362_v35 = vld [vmem:[#allocation118_spill] sm:$0xff] }
 0xabe   : > { %v9230_v22 = vsub.f32 %v9228_v4, %v9229_v3  ;;  %9426 = vmatmul.f32.vlgmr.msrb.gmra.mxu3 %v9229_v3  ;;  %v9561_v27 = vand.u32 4294901760, %v9560_v46 }
 0xabf   : > { %9628 = vmatpush.msrb.mxu2 %v18273_v7  ;;  %9656 = vmatpush.msrb.mxu3 %v18244_v49 }
 0xac0   : > { %v9231_v17 = vand.u32 4294901760, %v9230_v22  ;;  %9841 = vmatpush.msrb.mxu1 %v18319_v33  ;;  %v18363_v22 = vld [vmem:[#allocation149_spill] sm:$0xff] }
 0xac1   : > { %9631 = vmatpush.msrb.mxu2 %v18274_v15  ;;  %9658 = vmatpush.msrb.mxu3 %v18247_v37  ;;  %v18321_v15 = vld [vmem:[#allocation105_spill] sm:$0xff] }
 0xac2   : > { %9232 = vmatmul.f32.vlgmr.msrb.gmra.mxu0 %v9231_v17  ;;  %9532 = vmatmul.f32.vlgmr.msra.gmra.mxu1 %v9227_v58  ;;  %v18364_v17 = vld [vmem:[#allocation119_spill] sm:$0xff]  ;;  %v18365_v33 = vld [vmem:[#allocation153_spill] sm:$0xff] }
 0xac3   : > { %9634 = vmatpush.msrb.mxu2 %v18275_v40  ;;  %9660 = vmatpush.msrb.mxu3 %v18250_v8  ;;  %v15952_v40 = vld [vmem:[%s16817_s4] ss:$0 sm:$0xff] }
 0xac4   : > { %9562 = vmatmul.f32.vlgmr.msra.gmra.mxu2 %v9561_v27  ;;  %9847 = vmatpush.msrb.mxu1 %v18320_v41  ;;  %v18366_v27 = vld [vmem:[#allocation121_spill] sm:$0xff] }
 0xac5   : > { %9637 = vmatpush.msrb.mxu2 %v18276_v28  ;;  %9662 = vmatpush.msrb.mxu3 %v18254_v0  ;;  %v8772_v28 = vpop.f32.mrf.mxu1  ;;  %v18367_v41 = vld [vmem:[#allocation157_spill] sm:$0xff] }
 0xac6   : > { %9608 = vmatmul.f32.vlgmr.msra.gmra.mxu3 %v15928_v26  ;;  %v8671_v7 = vpop.f32.mrf.mxu0  ;;  %9784 = vmatpush.msrb.mxu0 %v18321_v15  ;;  %v8826_v5 = vpop.f32.mrf.mxu2 }
 0xac7   : > { %9686 = vmatpush.msra.mxu2 %v18277_v54  ;;  %9664 = vmatpush.msrb.mxu3 %v18257_v62  ;;  %v8672_v14 = vadd.f32 %v15952_v40, %v8671_v7  ;;  %v18323_v54 = vld [vmem:[#allocation106_spill] sm:$0xff] }
 0xac8   : > { %9853 = vmatpush.msrb.mxu1 %v18322_v32  ;;  %9786 = vmatpush.msrb.mxu0 %v18323_v54 }
 0xac9   : > { %9690 = vmatpush.msra.mxu2 %v18278_v21  ;;  %9720 = vmatpush.msra.mxu3 %v18244_v49  ;;  %v8773_v42 = vadd.f32 %v8772_v28, %v8672_v14  ;;  %v8865_v21 = vpop.f32.mrf.mxu3  ;;  %v18369_v14 = vld [vmem:[#allocation160_spill] sm:$0xff] }
 0xaca   : > { %9495 = vmatmul.f32.vlgmr.msra.gmra.mxu0 %v9227_v58  ;;  %9859 = vmatpush.msrb.mxu1 %v18324_v39  ;;  %v18359_v58 = vld [vmem:[#allocation154_spill] sm:$0xff]  ;;  %v18372_v39 = vld [vmem:[#allocation129_spill] sm:$0xff] }
 0xacb   : > { %9694 = vmatpush.msra.mxu2 %v18279_v53  ;;  %9722 = vmatpush.msra.mxu3 %v18247_v37  ;;  %v8827_v55 = vadd.f32 %v8826_v5, %v8773_v42  ;;  %v18327_v37 = vld [vmem:[#allocation108_spill] sm:$0xff]  ;;  %v18328_v53 = vld [vmem:[#allocation151_spill] sm:$0xff]  ;;  %v18371_v42 = vld [vmem:[#allocation169_spill] sm:$0xff] }
 0xacc   : > { %9640 = vmatmul.f32.vlgmr.msrb.gmra.mxu2 %v9558_v12  ;;  %9788 = vmatpush.msrb.mxu0 %v18325_v36 }
 0xacd   : > { %9698 = vmatpush.msra.mxu2 %v18280_v1  ;;  %9724 = vmatpush.msra.mxu3 %v18250_v8  ;;  %v8866_v49 = vadd.f32 %v8865_v21, %v8827_v55  ;;  %v18331_v1 = vld [vmem:[#allocation155_spill] sm:$0xff]  ;;  %v18332_v8 = vld [vmem:[#allocation112_spill] sm:$0xff]  ;;  %v8971_v25 = vpop.f32.mrf.mxu1  ;;  %v18373_v55 = vld [vmem:[#allocation189_spill] sm:$0xff] }
 0xace   : > { %9668 = vmatmul.f32.vlgmr.msrb.gmra.mxu3 %v9559_v50  ;;  %9865 = vmatpush.msrb.mxu1 %v18326_v63  ;;  %v8934_v11 = vpop.f32.mrf.mxu0  ;;  %v18360_v50 = vld [vmem:[#allocation117_spill] sm:$0xff]  ;;  %v18377_v63 = vld [vmem:[#allocation171_spill] sm:$0xff] }
 0xacf   : > { %9702 = vmatpush.msra.mxu2 %v18281_v6  ;;  %9726 = vmatpush.msra.mxu3 %v18254_v0  ;;  %v18333_v6 = vld [vmem:[#allocation110_spill] sm:$0xff]  ;;  %v8935_v20 = vadd.f32 %v8934_v11, %v8866_v49  ;;  %v18375_v21 = vld [vmem:[#allocation133_spill] sm:$0xff] }
 0xad0   : > { %9790 = vmatpush.msrb.mxu0 %v18327_v37  ;;  %9871 = vmatpush.msrb.mxu1 %v18328_v53  ;;  %v18334_v0 = vld [vmem:[#allocation158_spill] sm:$0xff]  ;;  %v18379_v53 = vld [vmem:[#allocation193_spill] sm:$0xff] }
 0xad1   : > { %9728 = vmatpush.msra.mxu3 %v18257_v62  ;;  %9927 = vmatpush.msrb.mxu2 %v18329_v18  ;;  %v18336_v62 = vld [vmem:[#allocation114_spill] sm:$0xff]  ;;  %v8972_v44 = vadd.f32 %v8971_v25, %v8935_v20  ;;  %v18380_v18 = vld [vmem:[#allocation172_spill] sm:$0xff] }
 0xad2   : > { %9792 = vmatpush.msrb.mxu0 %v18330_v60  ;;  %9877 = vmatpush.msrb.mxu1 %v18331_v1  ;;  %v18376_v49 = vld [vmem:[#allocation190_spill] sm:$0xff]  ;;  %v18382_v1 = vld [vmem:[#allocation197_spill] sm:$0xff] }
 0xad3   : > { %9930 = vmatpush.msrb.mxu2 %v18332_v8  ;;  %9980 = vmatpush.msrb.mxu3 %v18321_v15  ;;  %v18383_v8 = vld [vmem:[#allocation173_spill] sm:$0xff]  ;;  %v18403_v11 = vld [vmem:[#allocation202_spill] sm:$0xff] }
 0xad4   : > { %9704 = vmatmul.f32.vlgmr.msra.gmra.mxu2 %v15928_v26  ;;  %9794 = vmatpush.msrb.mxu0 %v18333_v6  ;;  %v18407_v20 = vld [vmem:[#allocation210_spill] sm:$0xff] }
 0xad5   : > { %9883 = vmatpush.msrb.mxu1 %v18334_v0  ;;  %9933 = vmatpush.msrb.mxu2 %v18335_v30  ;;  %v18385_v0 = vld [vmem:[#allocation203_spill] sm:$0xff]  ;;  %v18386_v30 = vld [vmem:[#allocation176_spill] sm:$0xff]  ;;  %v18411_v25 = vld [vmem:[#allocation218_spill] sm:$0xff] }
 0xad6   : > { %9730 = vmatmul.f32.vlgmr.msra.gmra.mxu3 %v15928_v26  ;;  %9796 = vmatpush.msrb.mxu0 %v18336_v62  ;;  %v18358_v26 = vld [vmem:[#allocation140_spill] sm:$0xff] }
 0xad7   : > { %9889 = vmatpush.msrb.mxu1 %v18337_v24  ;;  %9982 = vmatpush.msrb.mxu3 %v18323_v54  ;;  %v18388_v24 = vld [vmem:[#allocation207_spill] sm:$0xff] }
 0xad8   : > { %9798 = vmatpush.msrb.mxu0 %v18338_v52  ;;  %9936 = vmatpush.msrb.mxu2 %v18339_v51  ;;  %v18390_v51 = vld [vmem:[#allocation156_spill] sm:$0xff] }
 0xad9   : > { %9895 = vmatpush.msrb.mxu1 %v18340_v59  ;;  %9984 = vmatpush.msrb.mxu3 %v18325_v36  ;;  %v18391_v59 = vld [vmem:[#allocation211_spill] sm:$0xff] }
 0xada   : > { %9800 = vmatpush.msrb.mxu0 %v18341_v9  ;;  %9939 = vmatpush.msrb.mxu2 %v18342_v45  ;;  %v18393_v45 = vld [vmem:[#allocation159_spill] sm:$0xff] }
 0xadb   : > { %9901 = vmatpush.msrb.mxu1 %v18343_v10  ;;  %9986 = vmatpush.msrb.mxu3 %v18327_v37  ;;  %v18394_v10 = vld [vmem:[#allocation215_spill] sm:$0xff] }
 0xadc   : > { %9802 = vmatpush.msrb.mxu0 %v18344_v56  ;;  %9942 = vmatpush.msrb.mxu2 %v18345_v48  ;;  %v18396_v48 = vld [vmem:[#allocation162_spill] sm:$0xff] }
 0xadd   : > { %9907 = vmatpush.msrb.mxu1 %v18346_v38  ;;  %9988 = vmatpush.msrb.mxu3 %v18330_v60  ;;  %v18397_v38 = vld [vmem:[#allocation219_spill] sm:$0xff] }
 0xade   : > { %9804 = vmatpush.msrb.mxu0 %v18347_v16  ;;  %9945 = vmatpush.msrb.mxu2 %v18348_v23  ;;  %v18399_v23 = vld [vmem:[#allocation164_spill] sm:$0xff] }
 0xadf   : > { %9913 = vmatpush.msrb.mxu1 %v18349_v29  ;;  %9990 = vmatpush.msrb.mxu3 %v18333_v6  ;;  %v18400_v29 = vld [vmem:[#allocation222_spill] sm:$0xff] }
 0xae0   : > { %9806 = vmatpush.msrb.mxu0 %v18350_v61  ;;  %9948 = vmatpush.msrb.mxu2 %v18351_v34  ;;  %v18402_v34 = vld [vmem:[#allocation225_spill] sm:$0xff] }
 0xae1   : > { %9919 = vmatpush.msrb.mxu1 %v18352_v57  ;;  %9992 = vmatpush.msrb.mxu3 %v18336_v62  ;;  %v9047_v12 = vpop.f32.mrf.mxu3  ;;  %v18404_v57 = vld [vmem:[#allocation227_spill] sm:$0xff] }
 0xae2   : > { %9808 = vmatpush.msrb.mxu0 %v18353_v13  ;;  %9951 = vmatpush.msrb.mxu2 %v18354_v19  ;;  %v18406_v19 = vld [vmem:[#allocation229_spill] sm:$0xff] }
 0xae3   : > { %10088 = vmatpush.msra.mxu1 %v18321_v15  ;;  %9994 = vmatpush.msrb.mxu3 %v18338_v52  ;;  %v18368_v15 = vld [vmem:[#allocation122_spill] sm:$0xff] }
 0xae4   : > { %9810 = vmatpush.msrb.mxu0 %v18355_v43  ;;  %9954 = vmatpush.msrb.mxu2 %v18356_v31  ;;  %v18409_v31 = vld [vmem:[#allocation214_spill] sm:$0xff] }
 0xae5   : > { %10090 = vmatpush.msra.mxu1 %v18323_v54  ;;  %9996 = vmatpush.msrb.mxu3 %v18341_v9  ;;  %v18370_v54 = vld [vmem:[#allocation128_spill] sm:$0xff] }
 0xae6   : > { %9812 = vmatpush.msrb.mxu0 %v18357_v47  ;;  %9957 = vmatpush.msrb.mxu2 %v18358_v26  ;;  %v18412_v26 = vld [vmem:[#allocation232_spill] sm:$0xff] }
 0xae7   : > { %10092 = vmatpush.msra.mxu1 %v18325_v36  ;;  %9998 = vmatpush.msrb.mxu3 %v18344_v56  ;;  %v18374_v36 = vld [vmem:[#allocation170_spill] sm:$0xff] }
 0xae8   : > { %9814 = vmatpush.msrb.mxu0 %v18359_v58  ;;  %9960 = vmatpush.msrb.mxu2 %v18361_v2 }
 0xae9   : > { %10094 = vmatpush.msra.mxu1 %v18327_v37  ;;  %v9001_v4 = vpop.f32.mrf.mxu2  ;;  %10000 = vmatpush.msrb.mxu3 %v18347_v16  ;;  %v9107_v32 = vpop.f32.mrf.mxu3  ;;  %v18378_v37 = vld [vmem:[#allocation142_spill] sm:$0xff] }
 0xaea   : > { %10021 = vmatpush.msra.mxu0 %v18360_v50  ;;  %v9002_v3 = vadd.f32 %v9001_v4, %v8972_v44  ;;  %9963 = vmatpush.msrb.mxu2 %v18363_v22 }
 0xaeb   : > { %10096 = vmatpush.msra.mxu1 %v18330_v60  ;;  %10002 = vmatpush.msrb.mxu3 %v18350_v61  ;;  %v18381_v60 = vld [vmem:[#allocation144_spill] sm:$0xff] }
 0xaec   : > { %10025 = vmatpush.msra.mxu0 %v18362_v35  ;;  %v9048_v46 = vadd.f32 %v9047_v12, %v9002_v3  ;;  %9966 = vmatpush.msrb.mxu2 %v18365_v33 }
 0xaed   : > { %10098 = vmatpush.msra.mxu1 %v18333_v6  ;;  %10004 = vmatpush.msrb.mxu3 %v18353_v13  ;;  %v18384_v6 = vld [vmem:[#allocation148_spill] sm:$0xff] }
 0xaee   : > { %10029 = vmatpush.msra.mxu0 %v18364_v17  ;;  %9969 = vmatpush.msrb.mxu2 %v18367_v41 }
 0xaef   : > { %10100 = vmatpush.msra.mxu1 %v18336_v62  ;;  %10006 = vmatpush.msrb.mxu3 %v18355_v43  ;;  %v18387_v62 = vld [vmem:[#allocation152_spill] sm:$0xff] }
 0xaf0   : > { %10033 = vmatpush.msra.mxu0 %v18366_v27  ;;  %9972 = vmatpush.msrb.mxu2 %v18369_v14 }
 0xaf1   : > { %10102 = vmatpush.msra.mxu1 %v18338_v52  ;;  %v9079_v7 = vpop.f32.mrf.mxu2  ;;  %10008 = vmatpush.msrb.mxu3 %v18357_v47  ;;  %v18389_v52 = vld [vmem:[#allocation177_spill] sm:$0xff] }
 0xaf2   : > { %10037 = vmatpush.msra.mxu0 %v18368_v15  ;;  %v9080_v28 = vadd.f32 %v9079_v7, %v9048_v46  ;;  %10125 = vmatpush.msra.mxu2 %v18371_v42 }
 0xaf3   : > { %10104 = vmatpush.msra.mxu1 %v18341_v9  ;;  %10010 = vmatpush.msrb.mxu3 %v18359_v58  ;;  %v18392_v9 = vld [vmem:[#allocation183_spill] sm:$0xff] }
 0xaf4   : > { %10041 = vmatpush.msra.mxu0 %v18370_v54  ;;  %v16040_v5 = vadd.f32 %v9107_v32, %v9080_v28  ;;  %10127 = vmatpush.msra.mxu2 %v18374_v36 }
 0xaf5   : > { %10106 = vmatpush.msra.mxu1 %v18344_v56  ;;  %10170 = vmatpush.msra.mxu3 %v18373_v55  ;;  %v18395_v56 = vld [vmem:[#allocation195_spill] sm:$0xff] }
 0xaf6   : > { %10045 = vmatpush.msra.mxu0 %v18372_v39  ;;  %10129 = vmatpush.msra.mxu2 %v18377_v63 }
 0xaf7   : > { %10108 = vmatpush.msra.mxu1 %v18347_v16  ;;  %10176 = vmatpush.msra.mxu3 %v18376_v49  ;;  %v18398_v16 = vld [vmem:[#allocation196_spill] sm:$0xff] }
 0xaf8   : > { %10049 = vmatpush.msra.mxu0 %v18375_v21  ;;  %10131 = vmatpush.msra.mxu2 %v18380_v18 }
 0xaf9   : > { %10110 = vmatpush.msra.mxu1 %v18350_v61  ;;  %10182 = vmatpush.msra.mxu3 %v18379_v53  ;;  %v18401_v61 = vld [vmem:[#allocation201_spill] sm:$0xff]  ;;  %v9143_v44 = vpop.f32.mrf.mxu2 }
 0xafa   : > { %10053 = vmatpush.msra.mxu0 %v18378_v37  ;;  %10133 = vmatpush.msra.mxu2 %v18383_v8 }
 0xafb   : > { %10112 = vmatpush.msra.mxu1 %v18353_v13  ;;  %10188 = vmatpush.msra.mxu3 %v18382_v1  ;;  %v18405_v13 = vld [vmem:[#allocation206_spill] sm:$0xff] }
 0xafc   : > { %10057 = vmatpush.msra.mxu0 %v18381_v60  ;;  %10135 = vmatpush.msra.mxu2 %v18386_v30 }
 0xafd   : > { %10114 = vmatpush.msra.mxu1 %v18355_v43  ;;  %10194 = vmatpush.msra.mxu3 %v18385_v0  ;;  %v18408_v43 = vld [vmem:[#allocation230_spill] sm:$0xff] }
 0xafe   : > { %10061 = vmatpush.msra.mxu0 %v18384_v6  ;;  %10137 = vmatpush.msra.mxu2 %v18389_v52 }
 0xaff   : > { %10116 = vmatpush.msra.mxu1 %v18357_v47  ;;  %10200 = vmatpush.msra.mxu3 %v18388_v24  ;;  %v18410_v47 = vld [vmem:[#allocation231_spill] sm:$0xff] }
 0xb00   : > { %10065 = vmatpush.msra.mxu0 %v18387_v62  ;;  %10139 = vmatpush.msra.mxu2 %v18392_v9 }
 0xb01   : > { %10118 = vmatpush.msra.mxu1 %v18359_v58  ;;  %10206 = vmatpush.msra.mxu3 %v18391_v59  ;;  %v9169_v58 = vpop.f32.mrf.mxu3 }
 0xb02   : > { %10069 = vmatpush.msra.mxu0 %v18390_v51  ;;  %10141 = vmatpush.msra.mxu2 %v18395_v56 }
 0xb03   : > { %10212 = vmatpush.msra.mxu3 %v18394_v10 }
 0xb04   : > { %10073 = vmatpush.msra.mxu0 %v18393_v45  ;;  %10143 = vmatpush.msra.mxu2 %v18398_v16 }
 0xb05   : > { %10218 = vmatpush.msra.mxu3 %v18397_v38 }
 0xb06   : > { %10077 = vmatpush.msra.mxu0 %v18396_v48  ;;  %10145 = vmatpush.msra.mxu2 %v18401_v61 }
 0xb07   : > { %10224 = vmatpush.msra.mxu3 %v18400_v29 }
 0xb08   : > { %10081 = vmatpush.msra.mxu0 %v18399_v23  ;;  %10147 = vmatpush.msra.mxu2 %v18403_v11 }
 0xb09   : > { %10230 = vmatpush.msra.mxu3 %v18402_v34  ;;  %v9144_v34 = vadd.f32 %v9143_v44, %v16040_v5 }
 0xb0a   : > { %10149 = vmatpush.msra.mxu2 %v18405_v13 }
 0xb0b   : > { %10236 = vmatpush.msra.mxu3 %v18404_v57  ;;  %v9170_v57 = vadd.f32 %v9169_v58, %v9144_v34  ;;  %v18440_v34 = vld [vmem:[#allocation242_spill] sm:$0xff] }
 0xb0c   : > { %10151 = vmatpush.msra.mxu2 %v18407_v20 }
 0xb0d   : > { %10242 = vmatpush.msra.mxu3 %v18406_v19  ;;  %v11612_v19 = vadd.f32 -1.0, %v9170_v57 }
 0xb0e   : > { %10153 = vmatpush.msra.mxu2 %v18409_v31 }
 0xb0f   : > { %10248 = vmatpush.msra.mxu3 %v18408_v43  ;;  %v11613_v43 = vmul.f32 -1.442695, %v11612_v19  ;;  %v18443_v19 = vld [vmem:[#allocation245_spill] sm:$0xff] }
 0xb10   : > { %10155 = vmatpush.msra.mxu2 %v18411_v25 }
 0xb11   : > { %10254 = vmatpush.msra.mxu3 %v18410_v47 }
 0xb13   : > { %10260 = vmatpush.msra.mxu3 %v18412_v26 }
 0xb37   : > { %v9334_v12 = vpop.f32.mrf.mxu1 }
 0xb3f   : > { %v9233_v4 = vpop.f32.mrf.mxu0  ;;  %v9388_v50 = vpop.f32.mrf.mxu2 }
 0xb40   : > { %v9234_v2 = vadd.f32 %v15952_v40, %v9233_v4  ;;  %v9533_v41 = vpop.f32.mrf.mxu1 }
 0xb41   : > { %v9427_v3 = vpop.f32.mrf.mxu3 }
 0xb42   : > { %v9335_v35 = vadd.f32 %v9334_v12, %v9234_v2 }
 0xb44   : > { %v9389_v22 = vadd.f32 %v9388_v50, %v9335_v35 }
 0xb46   : > { %v9428_v46 = vadd.f32 %v9427_v3, %v9389_v22 }
 0xb47   : > { %v9496_v17 = vpop.f32.mrf.mxu0  ;;  %v9563_v33 = vpop.f32.mrf.mxu2 }
 0xb48   : > { %v9497_v27 = vadd.f32 %v9496_v17, %v9428_v46 }
 0xb49   : > { %v9609_v7 = vpop.f32.mrf.mxu3 }
 0xb4a   : > { %v9534_v15 = vadd.f32 %v9533_v41, %v9497_v27 }
 0xb4c   : > { %v9564_v14 = vadd.f32 %v9563_v33, %v9534_v15 }
 0xb4e   : > { %v9610_v28 = vadd.f32 %v9609_v7, %v9564_v14  ;;  %v18456_v7 = vld [vmem:[#allocation239_spill] sm:$0xff] }
 0xb4f   : > { %v9641_v32 = vpop.f32.mrf.mxu2 }
 0xb50   : > { %v9642_v39 = vadd.f32 %v9641_v32, %v9610_v28 }
 0xb51   : > { %v9669_v54 = vpop.f32.mrf.mxu3 }
 0xb52   : > { %v9670_v55 = vadd.f32 %v9669_v54, %v9642_v39 }
 0xb57   : > { %v9705_v21 = vpop.f32.mrf.mxu2 }
 0xb58   : > { %v9706_v49 = vadd.f32 %v9705_v21, %v9670_v55  ;;  %v18414_v21 = vld [vmem:[#allocation181_spill] sm:$0xff] }
 0xb59   : > { %v9731_v37 = vpop.f32.mrf.mxu3 }
 0xb5a   : > { %v9732_v40 = vadd.f32 %v9731_v37, %v9706_v49 }
 0xb5c   : > { %v11614_v53 = vadd.f32 -1.0, %v9732_v40 }
 0xb5e   : > { %v11615_v60 = vmul.f32 -1.442695, %v11614_v53 }
 0xb60   : > { %11767 = vpow2.f32 %v11615_v60  ;;  %v18415_v60 = vld [vmem:[#allocation182_spill] sm:$0xff] }
 0xb66   : > { %v11768_v1 = vpop.eup %11767 }
 0xb67   : > { %v9738_v6 = vadd.f32 1.0, %v11768_v1  ;;  %v18416_v1 = vld [vmem:[#allocation174_spill] sm:$0xff] }
 0xb69   : > { %11769 = vrcp.f32 %v9738_v6  ;;  %v9750_v51 = vand.u32 2147483648, %v9738_v6  ;;  %v9748_v45 = vand.u32 2147483647, %v9738_v6  ;;  %vm9744_vm9 = vweird.f32 %v9738_v6 }
 0xb6a   : > { %11771 = vpow2.f32 %v11613_v43  ;;  %v18444_v43 = vld [vmem:[#allocation226_spill] sm:$0xff] }
 0xb6b   : > { %v9751_v48 = vor.u32 1.1754944e-38, %v9750_v51  ;;  %vm9749_vm11 = vcmp.eq.f32.partialorder %v9748_v45, 8.507059e+37  ;;  %v18425_v51 = vld [vmem:[#allocation186_spill] sm:$0xff] }
 0xb6c   : > { %v18428_v45 = vld [vmem:[#allocation198_spill] sm:$0xff] }
 0xb6f   : > { %v11770_v0 = vpop.eup %11769 }
 0xb70   : > { %v9740_v62 = vmul.f32 %v11770_v0, %v9738_v6  ;;  %vm9745_vm8 = vweird.f32 %v11770_v0  ;;  %v11772_v47 = vpop.eup %11771  ;;  %v18417_v6 = vld [vmem:[#allocation175_spill] sm:$0xff] }
 0xb71   : > { %vm9746_vm10 = vmor %vm9744_vm9, %vm9745_vm8  ;;  %v9176_v26 = vadd.f32 1.0, %v11772_v47  ;;  %v18446_v47 = vld [vmem:[#allocation247_spill] sm:$0xff] }
 0xb72   : > { %v9741_v24 = vsub.f32 1.0, %v9740_v62  ;;  %v18421_v62 = vld [vmem:[#allocation179_spill] sm:$0xff] }
 0xb73   : > { %11773 = vrcp.f32 %v9176_v26  ;;  %v9188_v35 = vand.u32 2147483648, %v9176_v26  ;;  %vm9182_vm6 = vweird.f32 %v9176_v26  ;;  %v9186_v22 = vand.u32 2147483647, %v9176_v26 }
 0xb74   : > { %v9742_v59 = vmul.f32 %v11770_v0, %v9741_v24  ;;  %v18422_v24 = vld [vmem:[#allocation188_spill] sm:$0xff] }
 0xb75   : > { %v9189_v17 = vor.u32 1.1754944e-38, %v9188_v35  ;;  %vm9187_vm13 = vcmp.eq.f32.partialorder %v9186_v22, 8.507059e+37 }
 0xb76   : > { %v9743_v10 = vadd.f32 %v11770_v0, %v9742_v59  ;;  %v18427_v59 = vld [vmem:[#allocation187_spill] sm:$0xff] }
 0xb78   : > { %v9747_v38 = vsel %vm9746_vm10, %v11770_v0, %v9743_v10  ;;  %v18419_v0 = vld [vmem:[#allocation178_spill] sm:$0xff]  ;;  %v18430_v10 = vld [vmem:[#allocation204_spill] sm:$0xff] }
 0xb79   : > { %v9752_v23 = vsel %vm9749_vm11, %v9751_v48, %v9747_v38  ;;  %v11774_v12 = vpop.eup %11773  ;;  %v18432_v48 = vld [vmem:[#allocation208_spill] sm:$0xff] }
 0xb7a   : > { %v9754_v29 = vmul.f32 %v9752_v23, %v9732_v40  ;;  %v9178_v4 = vmul.f32 %v11774_v12, %v9176_v26  ;;  %vm9183_vm12 = vweird.f32 %v11774_v12  ;;  %v18434_v38 = vld [vmem:[#allocation212_spill] sm:$0xff] }
 0xb7b   : > { %vm9184_vm7 = vmor %vm9182_vm6, %vm9183_vm12  ;;  %v18436_v23 = vld [vmem:[#allocation216_spill] sm:$0xff] }
 0xb7c   : > { %9756 = vrot.lane.b32.xlu1 %v9754_v29, %s11822_s23  ;;  %v9179_v50 = vsub.f32 1.0, %v9178_v4  ;;  %v18438_v29 = vld [vmem:[#allocation220_spill] sm:$0xff] }
 0xb7d   : > { %v18447_v26 = vld [vmem:[#allocation228_spill] sm:$0xff] }
 0xb7e   : > { %v9180_v2 = vmul.f32 %v11774_v12, %v9179_v50  ;;  %v18450_v4 = vld [vmem:[#allocation248_spill] sm:$0xff]  ;;  %v18451_v50 = vld [vmem:[#allocation234_spill] sm:$0xff] }
 0xb80   : > { %v9181_v3 = vadd.f32 %v11774_v12, %v9180_v2  ;;  %v18453_v2 = vld [vmem:[#allocation240_spill] sm:$0xff] }
 0xb82   : > { %v9185_v46 = vsel %vm9184_vm7, %v11774_v12, %v9181_v3  ;;  %v18449_v12 = vld [vmem:[#allocation233_spill] sm:$0xff] }
 0xb83   : > { %v9190_v5 = vsel %vm9187_vm13, %v9189_v17, %v9185_v46 }
 0xb84   : > { %v9192_v44 = vmul.f32 %v9190_v5, %v9170_v57  ;;  %v18441_v57 = vld [vmem:[#allocation223_spill] sm:$0xff] }
 0xbee   : > { %v9757_v58 = vpop.permute.xlu1 %9756 }
 0xbef   : > { %v9759_v33 = vsel %vm2459_vm14, %v9192_v44, %v9757_v58  ;;  %v9761_v27 = vrot.slane %v9757_v58, 4 }
 0xbf1   : > { %v9762_v41 = vsel %vm2463_vm15, %v9759_v33, %v9761_v27  ;;  %v18455_v33 = vld [vmem:[#allocation236_spill] sm:$0xff] }
 0xbf2   : > { %9764 = vst.msk [vmem:[#allocation3] sm:$0xff] %vm13101_vm0, %v9762_v41  ;;  %vm18454_vm0 = vcmask 261120  }
 0xbf9   : > { %v9765_v15 = vld [vmem:[#allocation3] sm:$0x77] }
 0xbfa   : > { %9768 = vst [vmem:[#allocation1] ss:$2 sm:$0xff] %v9765_v15  ;;  %v9766_v14 = vld [vmem:[#allocation3] sm:$0xe] }
 0xc01   : > { %v9769_v28 = vld.sshfl [vmem:[#allocation1] sm:$0xff pattern:$0x75316420]  ;;  %v16098_v32 = vld.sshfl [vmem:[#allocation1 + $0x8] sm:$0xff pattern:$0x75316420] }
 0xc02   : > { %v9815_v54 = vand.u32 4294901760, %v9769_v28  ;;  %9774 = vst [vmem:[#allocation1] ss:$2 sm:$0xff] %v9766_v14  ;;  %v18457_v14 = vld [vmem:[#allocation243_spill] sm:$0xff] }
 0xc04   : > { %9921 = vmatmul.f32.vlgmr.msrb.gmra.mxu1 %v9815_v54  ;;  %v9816_v39 = vsub.f32 %v9769_v28, %v9815_v54 }
 0xc05   : > { %10321 = vmatpush.msrb.mxu1 %v18371_v42 }
 0xc06   : > { %9975 = vmatmul.f32.vlgmr.msrb.gmra.mxu2 %v9816_v39  ;;  %v9817_v55 = vand.u32 4294901760, %v9816_v39 }
 0xc07   : > { %10323 = vmatpush.msrb.mxu1 %v18374_v36  ;;  %10362 = vmatpush.msrb.mxu2 %v18414_v21  ;;  %v18462_v21 = vld [vmem:[#allocation244_spill] sm:$0xff] }
 0xc08   : > { %10014 = vmatmul.f32.vlgmr.msrb.gmra.mxu3 %v9817_v55  ;;  %v9818_v49 = vsub.f32 %v9816_v39, %v9817_v55  ;;  %v18460_v39 = vld [vmem:[#allocation238_spill] sm:$0xff]  ;;  %v18461_v55 = vld [vmem:[#allocation241_spill] sm:$0xff] }
 0xc09   : > { %v9775_v37 = vld.sshfl [vmem:[#allocation1] sm:$0xff pattern:$0x75316420]  ;;  %10325 = vmatpush.msrb.mxu1 %v18377_v63  ;;  %10429 = vmatpush.msrb.mxu3 %v18371_v42 }
 0xc0a   : > { %v9819_v40 = vand.u32 4294901760, %v9818_v49  ;;  %v9776_v53 = vrot.slane %v9775_v37, 1  ;;  %10366 = vmatpush.msrb.mxu2 %v18415_v60  ;;  %v18418_v42 = vld [vmem:[#allocation184_spill] sm:$0xff]  ;;  %v11648_v49 = vld [vmem:[%s16820_s7 + $0x2f0] sm:$0xff] }
 0xc0b   : > { %10327 = vmatpush.msrb.mxu1 %v18380_v18  ;;  %10431 = vmatpush.msrb.mxu3 %v18374_v36  ;;  %v18420_v36 = vld [vmem:[#allocation185_spill] sm:$0xff]  ;;  %v16195_v37 = vand.u32 4294901760, %v11648_v49 }
 0xc0c   : > { %9820 = vmatmul.f32.vlgmr.msrb.gmra.mxu0 %v9819_v40  ;;  %10120 = vmatmul.f32.vlgmr.msra.gmra.mxu1 %v9815_v54  ;;  %v11646_v40 = vld [vmem:[%s16820_s7 + $0x2e0] sm:$0xff] }
 0xc0d   : > { %9777 = vrot.lane.b32.xlu2 %v9776_v53, %s11823_s16  ;;  %10268 = vmatpush.msrb.mxu0 %v18416_v1  ;;  %v16201_v53 = vsub.f32 %v11648_v49, %v16195_v37  ;;  %v16203_v60 = vand.u32 4294901760, %v11646_v40  ;;  %v11644_v1 = vld [vmem:[%s16820_s7 + $0x2d0] sm:$0xff] }
 0xc0e   : > { %10329 = vmatpush.msrb.mxu1 %v18383_v8  ;;  %10433 = vmatpush.msrb.mxu3 %v18377_v63  ;;  %v18423_v63 = vld [vmem:[#allocation180_spill] sm:$0xff] }
 0xc0f   : > { %10271 = vmatpush.msrb.mxu0 %v18417_v6  ;;  %10370 = vmatpush.msrb.mxu2 %v18418_v42  ;;  %v10750_v6 = vand.u32 4294901760, %v16201_v53  ;;  %v16212_v42 = vsub.f32 %v11646_v40, %v16203_v60  ;;  %v11624_v40 = vld [vmem:[%s16820_s7 + $0x230] sm:$0xff] }
 0xc10   : > { %10331 = vmatpush.msrb.mxu1 %v18386_v30  ;;  %10435 = vmatpush.msrb.mxu3 %v18380_v18  ;;  %v18424_v18 = vld [vmem:[#allocation192_spill] sm:$0xff] }
 0xc11   : > { %10274 = vmatpush.msrb.mxu0 %v18419_v0  ;;  %10374 = vmatpush.msrb.mxu2 %v18420_v36  ;;  %v16215_v0 = vand.u32 4294901760, %v11644_v1  ;;  %v11642_v36 = vld [vmem:[%s16820_s7 + $0x2c0] sm:$0xff] }
 0xc12   : > { %10333 = vmatpush.msrb.mxu1 %v18389_v52  ;;  %10437 = vmatpush.msrb.mxu3 %v18383_v8  ;;  %v18426_v8 = vld [vmem:[#allocation194_spill] sm:$0xff] }
 0xc13   : > { %10277 = vmatpush.msrb.mxu0 %v18421_v62  ;;  %10378 = vmatpush.msrb.mxu2 %v18422_v24  ;;  %v10751_v62 = vsub.f32 %v16201_v53, %v10750_v6  ;;  %v10756_v24 = vand.u32 4294901760, %v16212_v42 }
 0xc14   : > { %10083 = vmatmul.f32.vlgmr.msra.gmra.mxu0 %v9815_v54  ;;  %10335 = vmatpush.msrb.mxu1 %v18392_v9  ;;  %v18459_v54 = vld [vmem:[#allocation246_spill] sm:$0xff] }
 0xc15   : > { %10280 = vmatpush.msrb.mxu0 %v18423_v63  ;;  %10439 = vmatpush.msrb.mxu3 %v18386_v30  ;;  %v18429_v30 = vld [vmem:[#allocation191_spill] sm:$0xff]  ;;  %v16227_v63 = vsub.f32 %v11644_v1, %v16215_v0 }
 0xc16   : > { %10337 = vmatpush.msrb.mxu1 %v18395_v56  ;;  %10382 = vmatpush.msrb.mxu2 %v18424_v18  ;;  %v16230_v18 = vand.u32 4294901760, %v11642_v36 }
 0xc17   : > { %10283 = vmatpush.msrb.mxu0 %v18425_v51  ;;  %10441 = vmatpush.msrb.mxu3 %v18389_v52  ;;  %v18431_v52 = vld [vmem:[#allocation199_spill] sm:$0xff]  ;;  %v11640_v51 = vld [vmem:[%s16820_s7 + $0x2b0] sm:$0xff] }
 0xc18   : > { %10339 = vmatpush.msrb.mxu1 %v18398_v16  ;;  %10386 = vmatpush.msrb.mxu2 %v18426_v8  ;;  %v10752_v8 = vand.u32 4294901760, %v10751_v62 }
 0xc19   : > { %10286 = vmatpush.msrb.mxu0 %v18427_v59  ;;  %10443 = vmatpush.msrb.mxu3 %v18392_v9  ;;  %v18433_v9 = vld [vmem:[#allocation200_spill] sm:$0xff]  ;;  %v10757_v59 = vsub.f32 %v16212_v42, %v10756_v24 }
 0xc1a   : > { %10341 = vmatpush.msrb.mxu1 %v18401_v61  ;;  %10390 = vmatpush.msrb.mxu2 %v18428_v45  ;;  %v10762_v45 = vand.u32 4294901760, %v16227_v63 }
 0xc1b   : > { %10289 = vmatpush.msrb.mxu0 %v18429_v30  ;;  %10445 = vmatpush.msrb.mxu3 %v18395_v56  ;;  %v18435_v56 = vld [vmem:[#allocation205_spill] sm:$0xff]  ;;  %v16242_v30 = vsub.f32 %v11642_v36, %v16230_v18 }
 0xc1c   : > { %10343 = vmatpush.msrb.mxu1 %v18403_v11  ;;  %10394 = vmatpush.msrb.mxu2 %v18430_v10  ;;  %v16246_v10 = vand.u32 4294901760, %v11640_v51 }
 0xc1d   : > { %10292 = vmatpush.msrb.mxu0 %v18431_v52  ;;  %10447 = vmatpush.msrb.mxu3 %v18398_v16  ;;  %v18437_v16 = vld [vmem:[#allocation209_spill] sm:$0xff]  ;;  %v11638_v52 = vld [vmem:[%s16820_s7 + $0x2a0] sm:$0xff] }
 0xc1e   : > { %10345 = vmatpush.msrb.mxu1 %v18405_v13  ;;  %10398 = vmatpush.msrb.mxu2 %v18432_v48  ;;  %v10758_v48 = vand.u32 4294901760, %v10757_v59 }
 0xc1f   : > { %10295 = vmatpush.msrb.mxu0 %v18433_v9  ;;  %10449 = vmatpush.msrb.mxu3 %v18401_v61  ;;  %v18439_v61 = vld [vmem:[#allocation213_spill] sm:$0xff]  ;;  %v10763_v9 = vsub.f32 %v16227_v63, %v10762_v45 }
 0xc20   : > { %10347 = vmatpush.msrb.mxu1 %v18407_v20  ;;  %10402 = vmatpush.msrb.mxu2 %v18434_v38  ;;  %v10768_v38 = vand.u32 4294901760, %v16242_v30 }
 0xc21   : > { %10298 = vmatpush.msrb.mxu0 %v18435_v56  ;;  %10451 = vmatpush.msrb.mxu3 %v18403_v11  ;;  %v18442_v11 = vld [vmem:[#allocation217_spill] sm:$0xff]  ;;  %v16257_v56 = vand.u32 4294901760, %v11638_v52 }
 0xc22   : > { %10349 = vmatpush.msrb.mxu1 %v18409_v31  ;;  %10406 = vmatpush.msrb.mxu2 %v18436_v23  ;;  %v16260_v23 = vsub.f32 %v11640_v51, %v16246_v10 }
 0xc23   : > { %10301 = vmatpush.msrb.mxu0 %v18437_v16  ;;  %10453 = vmatpush.msrb.mxu3 %v18405_v13  ;;  %v18445_v13 = vld [vmem:[#allocation221_spill] sm:$0xff]  ;;  %v11636_v16 = vld [vmem:[%s16820_s7 + $0x290] sm:$0xff] }
 0xc24   : > { %10351 = vmatpush.msrb.mxu1 %v18411_v25  ;;  %10410 = vmatpush.msrb.mxu2 %v18438_v29  ;;  %v10764_v29 = vand.u32 4294901760, %v10763_v9 }
 0xc25   : > { %10304 = vmatpush.msrb.mxu0 %v18439_v61  ;;  %10455 = vmatpush.msrb.mxu3 %v18407_v20  ;;  %v18448_v20 = vld [vmem:[#allocation224_spill] sm:$0xff]  ;;  %v10769_v61 = vsub.f32 %v16242_v30, %v10768_v38 }
 0xc26   : > { %10511 = vmatpush.msra.mxu1 %v18440_v34  ;;  %10414 = vmatpush.msrb.mxu2 %v18441_v57  ;;  %v16271_v34 = vsub.f32 %v11638_v52, %v16257_v56  ;;  %v16273_v57 = vand.u32 4294901760, %v11636_v16 }
 0xc27   : > { %10307 = vmatpush.msrb.mxu0 %v18442_v11  ;;  %10457 = vmatpush.msrb.mxu3 %v18409_v31  ;;  %v18452_v31 = vld [vmem:[#allocation237_spill] sm:$0xff]  ;;  %v10774_v11 = vand.u32 4294901760, %v16260_v23 }
 0xc28   : > { %10517 = vmatpush.msra.mxu1 %v18443_v19  ;;  %10418 = vmatpush.msrb.mxu2 %v18444_v43  ;;  %v11634_v19 = vld [vmem:[%s16820_s7 + $0x280] sm:$0xff]  ;;  %v10770_v43 = vand.u32 4294901760, %v10769_v61 }
 0xc29   : > { %10310 = vmatpush.msrb.mxu0 %v18445_v13  ;;  %10459 = vmatpush.msrb.mxu3 %v18411_v25  ;;  %v10780_v13 = vand.u32 4294901760, %v16271_v34 }
 0xc2a   : > { %10523 = vmatpush.msra.mxu1 %v18446_v47  ;;  %10422 = vmatpush.msrb.mxu2 %v18447_v26  ;;  %v16283_v47 = vsub.f32 %v11636_v16, %v16273_v57  ;;  %v16285_v26 = vand.u32 4294901760, %v11634_v19 }
 0xc2b   : > { %10313 = vmatpush.msrb.mxu0 %v18448_v20  ;;  %v10775_v20 = vsub.f32 %v16260_v23, %v10774_v11 }
 0xc2c   : > { %10529 = vmatpush.msra.mxu1 %v18450_v4  ;;  %v10781_v4 = vsub.f32 %v16271_v34, %v10780_v13 }
 0xc2d   : > { %10478 = vmatpush.msra.mxu0 %v18449_v12 }
 0xc2f   : > { %10480 = vmatpush.msra.mxu0 %v18451_v50 }
 0xc31   : > { %10482 = vmatpush.msra.mxu0 %v18452_v31 }
 0xc33   : > { %10484 = vmatpush.msra.mxu0 %v18453_v2 }
 0xc67   : > { %v9778_v3 = vpop.permute.xlu2 %9777 }
 0xc68   : > { %v9780_v25 = vsel %vm2484_vm5, %v16098_v32, %v9778_v3  ;;  %v9781_v35 = vsel %vm18454_vm0, %v9778_v3, 0  ;;  %v18458_v32 = vld [vmem:[#allocation235_spill] sm:$0xff]  ;;  %v10776_v3 = vand.u32 4294901760, %v10775_v20 }
 0xc69   : > { %v10156_v22 = vand.u32 4294901760, %v9780_v25  ;;  %v10485_v46 = vand.u32 4294901760, %v9781_v35 }
 0xc6b   : > { %v10157_v17 = vsub.f32 %v9780_v25, %v10156_v22  ;;  %v10486_v5 = vsub.f32 %v9781_v35, %v10485_v46  ;;  %10262 = vmatmul.f32.vlgmr.msra.gmra.mxu3 %v10156_v22  ;;  %v11630_v25 = vld [vmem:[%s16820_s7 + $0x260] sm:$0xff] }
 0xc6c   : > { %10578 = vmatpush.msra.mxu3 %v18449_v12 }
 0xc6d   : > { %v10158_v44 = vand.u32 4294901760, %v10157_v17  ;;  %v10487_v58 = vand.u32 4294901760, %v10486_v5  ;;  %10316 = vmatmul.f32.vlgmr.msrb.gmra.mxu0 %v10157_v17 }
 0xc6e   : > { %10580 = vmatpush.msra.mxu3 %v18451_v50  ;;  %10607 = vmatpush.msrb.mxu0 %v18455_v33 }
 0xc6f   : > { %v10159_v27 = vsub.f32 %v10157_v17, %v10158_v44  ;;  %v10488_v41 = vsub.f32 %v10486_v5, %v10487_v58  ;;  %10355 = vmatmul.f32.vlgmr.msrb.gmra.mxu1 %v10158_v44  ;;  %v16320_v44 = vand.u32 4294901760, %v11630_v25 }
 0xc70   : > { %10582 = vmatpush.msra.mxu3 %v18452_v31  ;;  %10611 = vmatpush.msrb.mxu0 %v18456_v7 }
 0xc71   : > { %v10160_v15 = vand.u32 4294901760, %v10159_v27  ;;  %10638 = vmatpush.msrb.mxu1 %v18449_v12  ;;  %v10489_v28 = vand.u32 4294901760, %v10488_v41  ;;  %v11632_v12 = vld [vmem:[%s16820_s7 + $0x270] sm:$0xff] }
 0xc72   : > { %10584 = vmatpush.msra.mxu3 %v18453_v2  ;;  %10615 = vmatpush.msrb.mxu0 %v18457_v14 }
 0xc73   : > { %10161 = vmatmul.f32.vlgmr.msra.gmra.mxu2 %v10160_v15  ;;  %10461 = vmatmul.f32.vlgmr.msrb.gmra.mxu3 %v10156_v22  ;;  %v11787_v15 = vld [vmem:[%s16819_s6] ss:$0 sm:$0xff] }
 0xc74   : > { %10640 = vmatpush.msrb.mxu1 %v18451_v50  ;;  %10549 = vmatpush.msra.mxu2 %v18458_v32  ;;  %v10786_v50 = vand.u32 4294901760, %v16283_v47  ;;  %v11626_v32 = vld [vmem:[%s16820_s7 + $0x240] sm:$0xff] }
 0xc75   : > { %10490 = vmatmul.f32.vlgmr.msra.gmra.mxu0 %v10489_v28  ;;  %10753 = vmatpush.msrb.mxu3 %v10752_v8  ;;  %v16337_v28 = vsub.f32 %v11630_v25, %v16320_v44  ;;  %v16362_v8 = vand.u32 4294901760, %v11624_v40 }
 0xc76   : > { %10619 = vmatpush.msrb.mxu0 %v18459_v54  ;;  %10642 = vmatpush.msrb.mxu1 %v18452_v31  ;;  %v16301_v31 = vsub.f32 %v11634_v19, %v16285_v26 }
 0xc77   : > { %10531 = vmatmul.f32.vlgmr.msra.gmra.mxu1 %v10485_v46  ;;  %10552 = vmatpush.msra.mxu2 %v18460_v39  ;;  %v10804_v49 = vand.u32 4294901760, %v16337_v28 }
 0xc78   : > { %10644 = vmatpush.msrb.mxu1 %v18453_v2  ;;  %10851 = vmatpush.msra.mxu0 %v16201_v53  ;;  %v16303_v2 = vand.u32 4294901760, %v11632_v12  ;;  %v10792_v17 = vand.u32 4294901760, %v16301_v31 }
 0xc79   : > { %10555 = vmatpush.msra.mxu2 %v18461_v55  ;;  %10759 = vmatpush.msrb.mxu3 %v10758_v48  ;;  %v10805_v52 = vsub.f32 %v16337_v28, %v10804_v49  ;;  %v11622_v48 = vld [vmem:[%s16820_s7 + $0x220] sm:$0xff] }
 0xc7a   : > { %10904 = vmatpush.msra.mxu1 %v16195_v37  ;;  %10854 = vmatpush.msra.mxu0 %v16212_v42  ;;  %v10793_v27 = vsub.f32 %v16301_v31, %v10792_v17  ;;  %v16380_v61 = vand.u32 4294901760, %v11622_v48 }
 0xc7b   : > { %10424 = vmatmul.f32.vlgmr.msrb.gmra.mxu2 %v10156_v22  ;;  %10588 = vmatmul.f32.vlgmr.msra.gmra.mxu3 %v10487_v58  ;;  %v10782_v22 = vand.u32 4294901760, %v10781_v4  ;;  %v11628_v58 = vld [vmem:[%s16820_s7 + $0x250] sm:$0xff]  ;;  %v10806_v19 = vand.u32 4294901760, %v10805_v52 }
 0xc7c   : > { %10558 = vmatpush.msra.mxu2 %v18462_v21  ;;  %10906 = vmatpush.msra.mxu1 %v16203_v60  ;;  %v16329_v7 = vand.u32 4294901760, %v11628_v58  ;;  %v10794_v54 = vand.u32 4294901760, %v10793_v27  ;;  %v16349_v21 = vand.u32 4294901760, %v11626_v32  ;;  %v16393_v25 = vsub.f32 %v11622_v48, %v16380_v61  ;;  %v11649_v48 = vld [vmem:[%s16820_s7 + $0x2f8] sm:$0xff] }
 0xc7d   : > { %10621 = vmatmul.f32.vlgmr.msrb.gmra.mxu0 %v10485_v46  ;;  %10765 = vmatpush.msrb.mxu3 %v10764_v29  ;;  %v16378_v29 = vsub.f32 %v11624_v40, %v16362_v8 }
 0xc7e   : > { %10708 = vmatpush.msrb.mxu2 %v16195_v37  ;;  %10908 = vmatpush.msra.mxu1 %v16215_v0  ;;  %v16347_v55 = vsub.f32 %v11628_v58, %v16329_v7  ;;  %v16360_v51 = vsub.f32 %v11626_v32, %v16349_v21  ;;  %v10828_v27 = vand.u32 4294901760, %v16393_v25 }
 0xc7f   : > { %10646 = vmatmul.f32.vlgmr.msrb.gmra.mxu1 %v10485_v46  ;;  %10857 = vmatpush.msra.mxu0 %v16227_v63  ;;  %v10787_v46 = vsub.f32 %v16283_v47, %v10786_v50  ;;  %v11641_v63 = vld [vmem:[%s16820_s7 + $0x2b8] sm:$0xff] }
 0xc80   : > { %10710 = vmatpush.msrb.mxu2 %v16203_v60  ;;  %10910 = vmatpush.msra.mxu1 %v16230_v18  ;;  %v10810_v62 = vand.u32 4294901760, %v16347_v55  ;;  %v10816_v16 = vand.u32 4294901760, %v16360_v51 }
 0xc81   : > { %10860 = vmatpush.msra.mxu0 %v16242_v30  ;;  %10771 = vmatpush.msrb.mxu3 %v10770_v43  ;;  %v10788_v33 = vand.u32 4294901760, %v10787_v46  ;;  %v9922_v1 = vpop.f32.mrf.mxu1  ;;  %v11620_v43 = vld [vmem:[%s16820_s7 + $0x210] sm:$0xff]  ;;  %v11618_v46 = vld [vmem:[%s16820_s7 + $0x200] sm:$0xff]  ;;  %v11639_v30 = vld [vmem:[%s16820_s7 + $0x2a8] sm:$0xff] }
 0xc82   : > { %10712 = vmatpush.msrb.mxu2 %v16215_v0  ;;  %10912 = vmatpush.msra.mxu1 %v16246_v10  ;;  %v10811_v9 = vsub.f32 %v16347_v55, %v10810_v62  ;;  %v10817_v4 = vsub.f32 %v16360_v51, %v10816_v16 }
 0xc83   : > { %10561 = vmatmul.f32.vlgmr.msra.gmra.mxu2 %v10486_v5  ;;  %10863 = vmatpush.msra.mxu0 %v16260_v23  ;;  %v16316_v5 = vsub.f32 %v11632_v12, %v16303_v2 }
 0xc84   : > { %10714 = vmatpush.msrb.mxu2 %v16230_v18  ;;  %10914 = vmatpush.msra.mxu1 %v16257_v56  ;;  %v10812_v12 = vand.u32 4294901760, %v10811_v9  ;;  %v10818_v58 = vand.u32 4294901760, %v10817_v4 }
 0xc85   : > { %10866 = vmatpush.msra.mxu0 %v16271_v34  ;;  %10777 = vmatpush.msrb.mxu3 %v10776_v3  ;;  %v10798_v41 = vand.u32 4294901760, %v16316_v5  ;;  %v10822_v3 = vand.u32 4294901760, %v16378_v29  ;;  %v11635_v34 = vld [vmem:[%s16820_s7 + $0x288] sm:$0xff] }
 0xc86   : > { %10716 = vmatpush.msrb.mxu2 %v16246_v10  ;;  %10916 = vmatpush.msra.mxu1 %v16273_v57 }
 0xc87   : > { %10869 = vmatpush.msra.mxu0 %v16283_v47  ;;  %10783 = vmatpush.msrb.mxu3 %v10782_v22  ;;  %v10799_v39 = vsub.f32 %v16316_v5, %v10798_v41  ;;  %v16398_v22 = vand.u32 4294901760, %v11620_v43  ;;  %v11633_v47 = vld [vmem:[%s16820_s7 + $0x278] sm:$0xff] }
 0xc88   : > { %10718 = vmatpush.msrb.mxu2 %v16257_v56  ;;  %10918 = vmatpush.msra.mxu1 %v16285_v26 }
 0xc89   : > { %v9821_v35 = vpop.f32.mrf.mxu0  ;;  %10872 = vmatpush.msra.mxu0 %v16301_v31  ;;  %10789 = vmatpush.msrb.mxu3 %v10788_v33  ;;  %v10800_v36 = vand.u32 4294901760, %v10799_v39  ;;  %v9976_v20 = vpop.f32.mrf.mxu2  ;;  %v10823_v33 = vsub.f32 %v16378_v29, %v10822_v3 }
 0xc8a   : > { %10720 = vmatpush.msrb.mxu2 %v16273_v57  ;;  %10920 = vmatpush.msra.mxu1 %v16303_v2  ;;  %v9822_v14 = vadd.f32 %v11787_v15, %v9821_v35  ;;  %v16407_v15 = vand.u32 4294901760, %v11618_v46  ;;  %v10121_v4 = vpop.f32.mrf.mxu1 }
 0xc8b   : > { %10875 = vmatpush.msra.mxu0 %v16316_v5  ;;  %10795 = vmatpush.msrb.mxu3 %v10794_v54  ;;  %v10824_v32 = vand.u32 4294901760, %v10823_v33  ;;  %v10829_v54 = vsub.f32 %v16393_v25, %v10828_v27  ;;  %v10015_v40 = vpop.f32.mrf.mxu3 }
 0xc8c   : > { %10722 = vmatpush.msrb.mxu2 %v16285_v26  ;;  %10922 = vmatpush.msra.mxu1 %v16320_v44  ;;  %v9923_v59 = vadd.f32 %v9922_v1, %v9822_v14  ;;  %v16412_v14 = vsub.f32 %v11620_v43, %v16398_v22  ;;  %v16419_v39 = vsub.f32 %v11618_v46, %v16407_v15  ;;  %v16435_v43 = vand.u32 4294901760, %v11649_v48 }
 0xc8d   : > { %10878 = vmatpush.msra.mxu0 %v16337_v28  ;;  %10801 = vmatpush.msrb.mxu3 %v10800_v36 }
 0xc8e   : > { %10724 = vmatpush.msrb.mxu2 %v16303_v2  ;;  %10924 = vmatpush.msra.mxu1 %v16329_v7  ;;  %v9977_v35 = vadd.f32 %v9976_v20, %v9923_v59  ;;  %v10834_v1 = vand.u32 4294901760, %v16412_v14  ;;  %v10830_v59 = vand.u32 4294901760, %v10829_v54  ;;  %v10840_v52 = vand.u32 4294901760, %v16419_v39  ;;  %v11645_v54 = vld [vmem:[%s16820_s7 + $0x2d8] sm:$0xff] }
 0xc8f   : > { %10881 = vmatpush.msra.mxu0 %v16347_v55  ;;  %10807 = vmatpush.msrb.mxu3 %v10806_v19  ;;  %v16447_v46 = vsub.f32 %v11649_v48, %v16435_v43 }
 0xc90   : > { %10726 = vmatpush.msrb.mxu2 %v16320_v44  ;;  %10926 = vmatpush.msra.mxu1 %v16349_v21  ;;  %v10016_v36 = vadd.f32 %v10015_v40, %v9977_v35  ;;  %v10835_v19 = vsub.f32 %v16412_v14, %v10834_v1  ;;  %v10841_v20 = vsub.f32 %v16419_v39, %v10840_v52 }
 0xc91   : > { %10884 = vmatpush.msra.mxu0 %v16360_v51  ;;  %10813 = vmatpush.msrb.mxu3 %v10812_v12  ;;  %v10084_v9 = vpop.f32.mrf.mxu0  ;;  %v11647_v12 = vld [vmem:[%s16820_s7 + $0x2e8] sm:$0xff]  ;;  %v11091_v53 = vand.u32 4294901760, %v16447_v46 }
 0xc92   : > { %10728 = vmatpush.msrb.mxu2 %v16329_v7  ;;  %10928 = vmatpush.msra.mxu1 %v16362_v8  ;;  %v10836_v35 = vand.u32 4294901760, %v10835_v19  ;;  %v10085_v33 = vadd.f32 %v10084_v9, %v10016_v36  ;;  %v11643_v36 = vld [vmem:[%s16820_s7 + $0x2c8] sm:$0xff] }
 0xc93   : > { %10887 = vmatpush.msra.mxu0 %v16378_v29  ;;  %10819 = vmatpush.msrb.mxu3 %v10818_v58  ;;  %v16449_v58 = vand.u32 4294901760, %v11647_v12  ;;  %v11092_v42 = vsub.f32 %v16447_v46, %v11091_v53  ;;  %v16473_v48 = vand.u32 4294901760, %v11643_v36 }
 0xc94   : > { %10730 = vmatpush.msrb.mxu2 %v16349_v21  ;;  %10930 = vmatpush.msra.mxu1 %v16380_v61  ;;  %v10122_v19 = vadd.f32 %v10121_v4, %v10085_v33  ;;  %v16489_v33 = vand.u32 4294901760, %v11641_v63 }
 0xc95   : > { %10890 = vmatpush.msra.mxu0 %v16393_v25  ;;  %10825 = vmatpush.msrb.mxu3 %v10824_v32  ;;  %v10842_v32 = vand.u32 4294901760, %v10841_v20  ;;  %v16461_v40 = vsub.f32 %v11647_v12, %v16449_v58  ;;  %v11093_v12 = vand.u32 4294901760, %v11092_v42 }
 0xc96   : > { %10732 = vmatpush.msrb.mxu2 %v16362_v8  ;;  %10932 = vmatpush.msra.mxu1 %v16398_v22 }
 0xc97   : > { %10893 = vmatpush.msra.mxu0 %v16412_v14  ;;  %10831 = vmatpush.msrb.mxu3 %v10830_v59 }
 0xc98   : > { %10734 = vmatpush.msrb.mxu2 %v16380_v61  ;;  %10934 = vmatpush.msra.mxu1 %v16407_v15 }
 0xc99   : > { %10896 = vmatpush.msra.mxu0 %v16419_v39  ;;  %10837 = vmatpush.msrb.mxu3 %v10836_v35 }
 0xc9a   : > { %10736 = vmatpush.msrb.mxu2 %v16398_v22  ;;  %11094 = vmatpush.msrb.mxu1 %v11093_v12 }
 0xc9b   : > { %11049 = vmatpush.msrb.mxu0 %v16435_v43  ;;  %10843 = vmatpush.msrb.mxu3 %v10842_v32  ;;  %v16493_v32 = vsub.f32 %v11643_v36, %v16473_v48  ;;  %v16507_v36 = vsub.f32 %v11641_v63, %v16489_v33 }
 0xc9c   : > { %10738 = vmatpush.msrb.mxu2 %v16407_v15 }
 0xc9d   : > { %11051 = vmatpush.msrb.mxu0 %v16449_v58  ;;  %11012 = vmatpush.msra.mxu3 %v16195_v37  ;;  %v11109_v23 = vand.u32 4294901760, %v16493_v32  ;;  %v11115_v12 = vand.u32 4294901760, %v16507_v36 }
 0xc9e   : > { %10945 = vmatpush.msra.mxu2 %v10750_v6  ;;  %v16458_v6 = vand.u32 4294901760, %v11645_v54 }
 0xc9f   : > { %11014 = vmatpush.msra.mxu3 %v16203_v60  ;;  %v16504_v60 = vand.u32 4294901760, %v11639_v30 }
 0xca0   : > { %10949 = vmatpush.msra.mxu2 %v10756_v24  ;;  %11053 = vmatpush.msrb.mxu0 %v16458_v6  ;;  %v11097_v24 = vand.u32 4294901760, %v16461_v40  ;;  %v16476_v9 = vsub.f32 %v11645_v54, %v16458_v6 }
 0xca1   : > { %11016 = vmatpush.msra.mxu3 %v16215_v0 }
 0xca2   : > { %10953 = vmatpush.msra.mxu2 %v10762_v45  ;;  %v11098_v35 = vsub.f32 %v16461_v40, %v11097_v24  ;;  %11055 = vmatpush.msrb.mxu0 %v16473_v48  ;;  %v11103_v4 = vand.u32 4294901760, %v16476_v9 }
 0xca3   : > { %11018 = vmatpush.msra.mxu3 %v16230_v18 }
 0xca4   : > { %10957 = vmatpush.msra.mxu2 %v10768_v38  ;;  %v11099_v54 = vand.u32 4294901760, %v11098_v35  ;;  %v11104_v42 = vsub.f32 %v16476_v9, %v11103_v4  ;;  %11057 = vmatpush.msrb.mxu0 %v16489_v33  ;;  %v11110_v35 = vsub.f32 %v16493_v32, %v11109_v23 }
 0xca5   : > { %11020 = vmatpush.msra.mxu3 %v16246_v10  ;;  %v16553_v10 = vand.u32 4294901760, %v11633_v47 }
 0xca6   : > { %10961 = vmatpush.msra.mxu2 %v10774_v11  ;;  %v11637_v11 = vld [vmem:[%s16820_s7 + $0x298] sm:$0xff]  ;;  %11100 = vmatpush.msrb.mxu1 %v11099_v54  ;;  %v11111_v54 = vand.u32 4294901760, %v11110_v35 }
 0xca7   : > { %11059 = vmatpush.msrb.mxu0 %v16504_v60  ;;  %v16518_v63 = vand.u32 4294901760, %v11637_v11  ;;  %11022 = vmatpush.msra.mxu3 %v16257_v56  ;;  %v16569_v56 = vsub.f32 %v11633_v47, %v16553_v10 }
 0xca8   : > { %10965 = vmatpush.msra.mxu2 %v10780_v13  ;;  %v11116_v13 = vsub.f32 %v16507_v36, %v11115_v12 }
 0xca9   : > { %11061 = vmatpush.msrb.mxu0 %v16518_v63  ;;  %11024 = vmatpush.msra.mxu3 %v16273_v57  ;;  %v11139_v47 = vand.u32 4294901760, %v16569_v56 }
 0xcaa   : > { %10969 = vmatpush.msra.mxu2 %v10786_v50 }
 0xcab   : > { %11026 = vmatpush.msra.mxu3 %v16285_v26 }
 0xcac   : > { %10973 = vmatpush.msra.mxu2 %v10792_v17  ;;  %v11631_v17 = vld [vmem:[%s16820_s7 + $0x268] sm:$0xff] }
 0xcad   : > { %11028 = vmatpush.msra.mxu3 %v16303_v2 }
 0xcae   : > { %10977 = vmatpush.msra.mxu2 %v10798_v41 }
 0xcaf   : > { %11030 = vmatpush.msra.mxu3 %v16320_v44 }
 0xcb0   : > { %10981 = vmatpush.msra.mxu2 %v10804_v49 }
 0xcb1   : > { %11032 = vmatpush.msra.mxu3 %v16329_v7 }
 0xcb2   : > { %10985 = vmatpush.msra.mxu2 %v10810_v62 }
 0xcb3   : > { %11034 = vmatpush.msra.mxu3 %v16349_v21 }
 0xcb4   : > { %10989 = vmatpush.msra.mxu2 %v10816_v16 }
 0xcb5   : > { %11036 = vmatpush.msra.mxu3 %v16362_v8 }
 0xcb6   : > { %10993 = vmatpush.msra.mxu2 %v10822_v3 }
 0xcb7   : > { %11038 = vmatpush.msra.mxu3 %v16380_v61 }
 0xcb8   : > { %10997 = vmatpush.msra.mxu2 %v10828_v27 }
 0xcb9   : > { %11040 = vmatpush.msra.mxu3 %v16398_v22 }
 0xcba   : > { %11001 = vmatpush.msra.mxu2 %v10834_v1 }
 0xcbb   : > { %11042 = vmatpush.msra.mxu3 %v16407_v15 }
 0xcbc   : > { %11005 = vmatpush.msra.mxu2 %v10840_v52 }
 0xcea   : > { %v10317_v45 = vpop.f32.mrf.mxu0 }
 0xcec   : > { %v10356_v38 = vpop.f32.mrf.mxu1 }
 0xcee   : > { %v10263_v59 = vpop.f32.mrf.mxu3 }
 0xcf6   : > { %v10162_v20 = vpop.f32.mrf.mxu2  ;;  %v10462_v50 = vpop.f32.mrf.mxu3 }
 0xcf7   : > { %v10163_v37 = vadd.f32 %v10162_v20, %v10122_v19  ;;  %v11105_v20 = vand.u32 4294901760, %v11104_v42 }
 0xcf9   : > { %v10264_v19 = vadd.f32 %v10263_v59, %v10163_v37  ;;  %v16521_v59 = vsub.f32 %v11639_v30, %v16504_v60  ;;  %11106 = vmatpush.msrb.mxu1 %v11105_v20  ;;  %v16540_v37 = vsub.f32 %v11637_v11, %v16518_v63 }
 0xcfb   : > { %v10318_v0 = vadd.f32 %v10317_v45, %v10264_v19  ;;  %v17483_v18 = vand.u32 4294901760, %v16521_v59  ;;  %v16537_v45 = vand.u32 4294901760, %v11635_v34  ;;  %v11117_v19 = vand.u32 4294901760, %v11116_v13  ;;  %11112 = vmatpush.msrb.mxu1 %v11111_v54  ;;  %v11629_v54 = vld [vmem:[%s16820_s7 + $0x258] sm:$0xff] }
 0xcfd   : > { %v10357_v30 = vadd.f32 %v10356_v38, %v10318_v0  ;;  %v11122_v20 = vsub.f32 %v16521_v59, %v17483_v18  ;;  %11063 = vmatpush.msrb.mxu0 %v16537_v45  ;;  %v17484_v38 = vand.u32 4294901760, %v16540_v37  ;;  %v16557_v31 = vsub.f32 %v11635_v34, %v16537_v45  ;;  %v10491_v0 = vpop.f32.mrf.mxu0  ;;  %11118 = vmatpush.msrb.mxu1 %v11117_v19 }
 0xcfe   : > { %v10425_v42 = vpop.f32.mrf.mxu2  ;;  %v16566_v18 = vand.u32 4294901760, %v11631_v17  ;;  %v11140_v19 = vsub.f32 %v16569_v56, %v11139_v47 }
 0xcff   : > { %v10426_v11 = vadd.f32 %v10425_v42, %v10357_v30  ;;  %v11123_v35 = vand.u32 4294901760, %v11122_v20  ;;  %v11128_v13 = vsub.f32 %v16540_v37, %v17484_v38  ;;  %11065 = vmatpush.msrb.mxu0 %v16553_v10  ;;  %v11133_v30 = vand.u32 4294901760, %v16557_v31  ;;  %v10532_v42 = vpop.f32.mrf.mxu1 }
 0xd00   : > { %v16580_v38 = vand.u32 4294901760, %v11629_v54  ;;  %v16583_v5 = vsub.f32 %v11631_v17, %v16566_v18 }
 0xd01   : > { %v10463_v34 = vadd.f32 %v10462_v50, %v10426_v11  ;;  %v11129_v20 = vand.u32 4294901760, %v11128_v13  ;;  %11067 = vmatpush.msrb.mxu0 %v16566_v18  ;;  %11124 = vmatpush.msrb.mxu1 %v11123_v35  ;;  %v11134_v41 = vsub.f32 %v16557_v31, %v11133_v30  ;;  %v11627_v50 = vld [vmem:[%s16820_s7 + $0x248] sm:$0xff]  ;;  %v11141_v13 = vand.u32 4294901760, %v11140_v19  ;;  %v11621_v19 = vld [vmem:[%s16820_s7 + $0x218] sm:$0xff] }
 0xd02   : > { %v11145_v28 = vand.u32 4294901760, %v16583_v5  ;;  %v16599_v49 = vand.u32 4294901760, %v11627_v50  ;;  %v16602_v26 = vsub.f32 %v11629_v54, %v16580_v38 }
 0xd03   : > { %v10492_v57 = vadd.f32 %v10491_v0, %v10463_v34  ;;  %11069 = vmatpush.msrb.mxu0 %v16580_v38  ;;  %11130 = vmatpush.msrb.mxu1 %v11129_v20  ;;  %v11135_v17 = vand.u32 4294901760, %v11134_v41  ;;  %v11625_v0 = vld [vmem:[%s16820_s7 + $0x238] sm:$0xff]  ;;  %v10589_v20 = vpop.f32.mrf.mxu3 }
 0xd04   : > { %v11146_v34 = vsub.f32 %v16583_v5, %v11145_v28  ;;  %v11151_v55 = vand.u32 4294901760, %v16602_v26  ;;  %v16615_v62 = vand.u32 4294901760, %v11625_v0  ;;  %v16621_v54 = vsub.f32 %v11627_v50, %v16599_v49 }
 0xd05   : > { %v10533_v11 = vadd.f32 %v10532_v42, %v10492_v57  ;;  %11071 = vmatpush.msrb.mxu0 %v16599_v49  ;;  %11136 = vmatpush.msrb.mxu1 %v11135_v17  ;;  %v11623_v42 = vld [vmem:[%s16820_s7 + $0x228] sm:$0xff] }
 0xd06   : > { %v10562_v35 = vpop.f32.mrf.mxu2  ;;  %v11147_v57 = vand.u32 4294901760, %v11146_v34  ;;  %v11152_v41 = vsub.f32 %v16602_v26, %v11151_v55  ;;  %v16630_v51 = vand.u32 4294901760, %v11623_v42  ;;  %v16633_v44 = vsub.f32 %v11625_v0, %v16615_v62 }
 0xd07   : > { %v10563_v2 = vadd.f32 %v10562_v35, %v10533_v11  ;;  %11073 = vmatpush.msrb.mxu0 %v16615_v62  ;;  %11142 = vmatpush.msrb.mxu1 %v11141_v13  ;;  %v11157_v50 = vand.u32 4294901760, %v16621_v54  ;;  %v10622_v11 = vpop.f32.mrf.mxu0  ;;  %v16644_v35 = vand.u32 4294901760, %v11621_v19  ;;  %v11619_v13 = vld [vmem:[%s16820_s7 + $0x208] sm:$0xff]  ;;  %v10647_v34 = vpop.f32.mrf.mxu1 }
 0xd08   : > { %v11153_v17 = vand.u32 4294901760, %v11152_v41  ;;  %v11163_v0 = vand.u32 4294901760, %v16633_v44  ;;  %v16647_v29 = vsub.f32 %v11623_v42, %v16630_v51  ;;  %v16663_v27 = vand.u32 4294901760, %v11619_v13 }
 0xd09   : > { %v10590_v16 = vadd.f32 %v10589_v20, %v10563_v2  ;;  %11075 = vmatpush.msrb.mxu0 %v16630_v51  ;;  %11148 = vmatpush.msrb.mxu1 %v11147_v57  ;;  %v11158_v3 = vsub.f32 %v16621_v54, %v11157_v50  ;;  %v16666_v21 = vsub.f32 %v11621_v19, %v16644_v35 }
 0xd0a   : > { %v11164_v2 = vsub.f32 %v16633_v44, %v11163_v0  ;;  %v11169_v25 = vand.u32 4294901760, %v16647_v29  ;;  %v16677_v19 = vsub.f32 %v11619_v13, %v16663_v27 }
 0xd0b   : > { %v10623_v7 = vadd.f32 %v10622_v11, %v10590_v16  ;;  %11077 = vmatpush.msrb.mxu0 %v16644_v35  ;;  %11154 = vmatpush.msrb.mxu1 %v11153_v17  ;;  %v11159_v20 = vand.u32 4294901760, %v11158_v3  ;;  %v11175_v16 = vand.u32 4294901760, %v16666_v21 }
 0xd0c   : > { %v11165_v57 = vand.u32 4294901760, %v11164_v2  ;;  %v11170_v41 = vsub.f32 %v16647_v29, %v11169_v25  ;;  %v11181_v11 = vand.u32 4294901760, %v16677_v19 }
 0xd0d   : > { %v10648_v42 = vadd.f32 %v10647_v34, %v10623_v7  ;;  %11079 = vmatpush.msrb.mxu0 %v16663_v27  ;;  %11160 = vmatpush.msrb.mxu1 %v11159_v20  ;;  %v11176_v1 = vsub.f32 %v16666_v21, %v11175_v16 }
 0xd0e   : > { %v11171_v8 = vand.u32 4294901760, %v11170_v41  ;;  %v11182_v39 = vsub.f32 %v16677_v19, %v11181_v11 }
 0xd0f   : > { %v11616_v14 = vadd.f32 -1.0, %v10648_v42  ;;  %11166 = vmatpush.msrb.mxu1 %v11165_v57  ;;  %v11177_v7 = vand.u32 4294901760, %v11176_v1 }
 0xd10   : > { %v11183_v61 = vand.u32 4294901760, %v11182_v39 }
 0xd11   : > { %v11617_v17 = vmul.f32 -1.442695, %v11616_v14  ;;  %11172 = vmatpush.msrb.mxu1 %v11171_v8 }
 0xd13   : > { %11775 = vpow2.f32 %v11617_v17  ;;  %11178 = vmatpush.msrb.mxu1 %v11177_v7 }
 0xd15   : > { %11184 = vmatpush.msrb.mxu1 %v11183_v61 }
 0xd19   : > { %v11776_v52 = vpop.eup %11775 }
 0xd1a   : > { %v10654_v3 = vadd.f32 1.0, %v11776_v52 }
 0xd1c   : > { %11777 = vrcp.f32 %v10654_v3  ;;  %v10666_v22 = vand.u32 2147483648, %v10654_v3  ;;  %v10664_v57 = vand.u32 2147483647, %v10654_v3  ;;  %vm10660_vm5 = vweird.f32 %v10654_v3 }
 0xd1e   : > { %v10667_v14 = vor.u32 1.1754944e-38, %v10666_v22  ;;  %vm10665_vm3 = vcmp.eq.f32.partialorder %v10664_v57, 8.507059e+37 }
 0xd22   : > { %v11778_v13 = vpop.eup %11777 }
 0xd23   : > { %v10656_v34 = vmul.f32 %v11778_v13, %v10654_v3  ;;  %vm10661_vm14 = vweird.f32 %v11778_v13 }
 0xd24   : > { %vm10662_vm4 = vmor %vm10660_vm5, %vm10661_vm14 }
 0xd25   : > { %v10657_v2 = vsub.f32 1.0, %v10656_v34 }
 0xd27   : > { %v10658_v20 = vmul.f32 %v11778_v13, %v10657_v2 }
 0xd29   : > { %v10659_v41 = vadd.f32 %v11778_v13, %v10658_v20 }
 0xd2b   : > { %v10663_v1 = vsel %vm10662_vm4, %v11778_v13, %v10659_v41 }
 0xd2c   : > { %v10668_v15 = vsel %vm10665_vm3, %v10667_v14, %v10663_v1 }
 0xd2d   : > { %v10670_v8 = vmul.f32 %v10668_v15, %v10648_v42 }
 0xd2f   : > { %v16691_v17 = vand.u32 4294901760, %v10670_v8 }
 0xd31   : > { %v16694_v7 = vsub.f32 %v10670_v8, %v16691_v17  ;;  %10845 = vmatmul.f32.vlgmr.msrb.gmra.mxu3 %v16691_v17  ;;  %v11825_v8 = vmov 839922192  }
 0xd32   : > { %11245 = vmatpush.msrb.mxu3 %v16435_v43 }
 0xd33   : > { %10899 = vmatmul.f32.vlgmr.msra.gmra.mxu0 %v16694_v7  ;;  %v16700_v39 = vand.u32 4294901760, %v16694_v7 }
 0xd34   : > { %11247 = vmatpush.msrb.mxu3 %v16449_v58  ;;  %11286 = vmatpush.msra.mxu0 %v11091_v53 }
 0xd35   : > { %10938 = vmatmul.f32.vlgmr.msra.gmra.mxu1 %v16700_v39  ;;  %v10742_v42 = vsub.f32 %v16694_v7, %v16700_v39 }
 0xd36   : > { %11249 = vmatpush.msrb.mxu3 %v16458_v6  ;;  %11290 = vmatpush.msra.mxu0 %v11097_v24 }
 0xd37   : > { %11353 = vmatpush.msra.mxu1 %v16435_v43  ;;  %v10743_v61 = vand.u32 4294901760, %v10742_v42  ;;  %v18463_v43 = vand.u32 4294901760, %v16521_v59 }
 0xd38   : > { %11251 = vmatpush.msrb.mxu3 %v16473_v48  ;;  %11294 = vmatpush.msra.mxu0 %v11103_v4 }
 0xd39   : > { %11355 = vmatpush.msra.mxu1 %v16449_v58  ;;  %10744 = vmatmul.f32.vlgmr.msrb.gmra.mxu2 %v10743_v61 }
 0xd3a   : > { %11044 = vmatmul.f32.vlgmr.msra.gmra.mxu3 %v16691_v17  ;;  %11192 = vmatpush.msrb.mxu2 %v16447_v46  ;;  %v18464_v46 = vand.u32 4294901760, %v16540_v37 }
 0xd3b   : > { %11253 = vmatpush.msrb.mxu3 %v16489_v33  ;;  %11298 = vmatpush.msra.mxu0 %v11109_v23 }
 0xd3c   : > { %11357 = vmatpush.msra.mxu1 %v16458_v6  ;;  %11085 = vmatmul.f32.vlgmr.msrb.gmra.mxu0 %v10743_v61 }
 0xd3d   : > { %11195 = vmatpush.msrb.mxu2 %v16461_v40  ;;  %11255 = vmatpush.msrb.mxu3 %v16504_v60 }
 0xd3e   : > { %11302 = vmatpush.msra.mxu0 %v11115_v12  ;;  %11359 = vmatpush.msra.mxu1 %v16473_v48 }
 0xd3f   : > { %11186 = vmatmul.f32.vlgmr.msrb.gmra.mxu1 %v16691_v17  ;;  %11198 = vmatpush.msrb.mxu2 %v16476_v9 }
 0xd40   : > { %11257 = vmatpush.msrb.mxu3 %v16518_v63  ;;  %11306 = vmatpush.msra.mxu0 %v18463_v43 }
 0xd41   : > { %11361 = vmatpush.msra.mxu1 %v16489_v33  ;;  %11201 = vmatpush.msrb.mxu2 %v16493_v32 }
 0xd42   : > { %11259 = vmatpush.msrb.mxu3 %v16537_v45  ;;  %11310 = vmatpush.msra.mxu0 %v18464_v46 }
 0xd43   : > { %11363 = vmatpush.msra.mxu1 %v16504_v60  ;;  %11007 = vmatmul.f32.vlgmr.msra.gmra.mxu2 %v16691_v17 }
 0xd44   : > { %11204 = vmatpush.msrb.mxu2 %v16507_v36  ;;  %11261 = vmatpush.msrb.mxu3 %v16553_v10 }
 0xd45   : > { %11314 = vmatpush.msra.mxu0 %v11133_v30  ;;  %11365 = vmatpush.msra.mxu1 %v16518_v63 }
 0xd46   : > { %11207 = vmatpush.msrb.mxu2 %v16521_v59  ;;  %11263 = vmatpush.msrb.mxu3 %v16566_v18 }
 0xd47   : > { %11318 = vmatpush.msra.mxu0 %v11139_v47  ;;  %11367 = vmatpush.msra.mxu1 %v16537_v45  ;;  %v11408_v47 = vld [vmem:[%s16821_s8] sm:$0x3] }
 0xd48   : > { %11210 = vmatpush.msrb.mxu2 %v16540_v37  ;;  %11265 = vmatpush.msrb.mxu3 %v16580_v38 }
 0xd49   : > { %11322 = vmatpush.msra.mxu0 %v11145_v28  ;;  %11369 = vmatpush.msra.mxu1 %v16553_v10 }
 0xd4a   : > { %11213 = vmatpush.msrb.mxu2 %v16557_v31  ;;  %11267 = vmatpush.msrb.mxu3 %v16599_v49 }
 0xd4b   : > { %11326 = vmatpush.msra.mxu0 %v11151_v55  ;;  %11371 = vmatpush.msra.mxu1 %v16566_v18  ;;  %v11411_v55 = vperm.slane %v11408_v47, 1 }
 0xd4c   : > { %11216 = vmatpush.msrb.mxu2 %v16569_v56  ;;  %11269 = vmatpush.msrb.mxu3 %v16615_v62  ;;  %v18465_v56 = vld [vmem:[#allocation253_spill] sm:$0xff] }
 0xd4d   : > { %11330 = vmatpush.msra.mxu0 %v11157_v50  ;;  %11373 = vmatpush.msra.mxu1 %v16580_v38 }
 0xd4e   : > { %11219 = vmatpush.msrb.mxu2 %v16583_v5  ;;  %11271 = vmatpush.msrb.mxu3 %v16630_v51  ;;  %v18466_v5 = vld [vmem:[#allocation251_spill] sm:$0xff] }
 0xd4f   : > { %11334 = vmatpush.msra.mxu0 %v11163_v0  ;;  %11375 = vmatpush.msra.mxu1 %v16599_v49  ;;  %v11396_v49 = vld [vmem:[%s11929_s25] sm:$0x77] }
 0xd50   : > { %11222 = vmatpush.msrb.mxu2 %v16602_v26  ;;  %11273 = vmatpush.msrb.mxu3 %v16644_v35 }
 0xd51   : > { %11338 = vmatpush.msra.mxu0 %v11169_v25  ;;  %11377 = vmatpush.msra.mxu1 %v16615_v62 }
 0xd52   : > { %11225 = vmatpush.msrb.mxu2 %v16621_v54  ;;  %11275 = vmatpush.msrb.mxu3 %v16663_v27 }
 0xd53   : > { %11342 = vmatpush.msra.mxu0 %v11175_v16  ;;  %11379 = vmatpush.msra.mxu1 %v16630_v51  ;;  %v11410_v51 = vperm.slane %v11408_v47, 0 }
 0xd54   : > { %11279 = vmatmul.f32.vlgmr.msrb.gmra.mxu3 %v16700_v39  ;;  %11228 = vmatpush.msrb.mxu2 %v16633_v44  ;;  %v11412_v44 = vrot.slane %v11411_v55, 4 }
 0xd55   : > { %11346 = vmatpush.msra.mxu0 %v11181_v11  ;;  %11381 = vmatpush.msra.mxu1 %v16644_v35  ;;  %v11824_v11 = vmov 256.0  }
 0xd56   : > { %11348 = vmatmul.f32.vlgmr.msra.gmra.mxu0 %v16691_v17  ;;  %11231 = vmatpush.msrb.mxu2 %v16647_v29  ;;  %v11413_v50 = vsel %vm2463_vm15, %v11410_v51, %v11412_v44  ;;  %11779 = vrcp.f32 %v11824_v11 }
 0xd57   : > { %11383 = vmatpush.msra.mxu1 %v16663_v27 }
 0xd58   : > { %11385 = vmatmul.f32.vlgmr.msra.gmra.mxu1 %v16691_v17  ;;  %11234 = vmatpush.msrb.mxu2 %v16666_v21  ;;  %v11449_v17 = vunpack.c.l.s4 %v11825_v8 }
 0xd5a   : > { %11237 = vmatpush.msrb.mxu2 %v16677_v19  ;;  %v11450_v42 = vunpack.c.0.s8 %v11449_v17 }
 0xd5b   : > { %11240 = vmatmul.f32.vlgmr.msrb.gmra.mxu2 %v16694_v7 }
 0xd5c   : > { %v11780_v52 = vpop.eup %11779 }
 0xd5d   : > { %v11429_v3 = vmul.f32 256.0, %v11780_v52 }
 0xd5f   : > { %v11430_v13 = vsub.f32 1.0, %v11429_v3 }
 0xd61   : > { %v11431_v34 = vmul.f32 %v11780_v52, %v11430_v13 }
 0xd63   : > { %v11432_v2 = vadd.f32 %v11780_v52, %v11431_v34 }
 0xdb0   : > { %v10900_v6 = vpop.f32.mrf.mxu0 }
 0xdb2   : > { %v10939_v40 = vpop.f32.mrf.mxu1 }
 0xdb4   : > { %v10846_v53 = vpop.f32.mrf.mxu3 }
 0xdb9   : > { %v11086_v4 = vpop.f32.mrf.mxu0 }
 0xdbc   : > { %v10745_v58 = vpop.f32.mrf.mxu2  ;;  %v11187_v33 = vpop.f32.mrf.mxu1 }
 0xdbd   : > { %v10847_v48 = vadd.f32 %v10846_v53, %v10745_v58  ;;  %v11045_v9 = vpop.f32.mrf.mxu3  ;;  %v11188_v60 = vadd.f32 %v11187_v33, %v11086_v4 }
 0xdbf   : > { %v10901_v32 = vadd.f32 %v10900_v6, %v10847_v48 }
 0xdc1   : > { %v10940_v23 = vadd.f32 %v10939_v40, %v10901_v32 }
 0xdc6   : > { %v11008_v24 = vpop.f32.mrf.mxu2 }
 0xdc7   : > { %v11009_v59 = vadd.f32 %v11008_v24, %v10940_v23 }
 0xdc9   : > { %v11046_v10 = vadd.f32 %v11045_v9, %v11009_v59 }
 0xdcb   : > { %v11389_v28 = vadd.f32 %v11046_v10, %v18466_v5 }
 0xdd3   : > { %v11349_v45 = vpop.f32.mrf.mxu0 }
 0xdd5   : > { %v11386_v38 = vpop.f32.mrf.mxu1 }
 0xdd7   : > { %v11280_v63 = vpop.f32.mrf.mxu3 }
 0xdde   : > { %v11241_v36 = vpop.f32.mrf.mxu2 }
 0xddf   : > { %v11242_v12 = vadd.f32 %v11241_v36, %v11188_v60 }
 0xde1   : > { %v11281_v18 = vadd.f32 %v11280_v63, %v11242_v12 }
 0xde3   : > { %v11350_v37 = vadd.f32 %v11349_v45, %v11281_v18 }
 0xde5   : > { %v11387_v31 = vadd.f32 %v11386_v38, %v11350_v37 }
 0xde7   : > { %v11390_v30 = vadd.f32 %v11387_v31, %v18465_v56 }
 0xde9   : > { %v11399_v26 = vrot.slane %v11390_v30, 4 }
 0xdeb   : > { %v11400_v62 = vsel %vm2463_vm15, %v11389_v28, %v11399_v26  ;;  %vm11433_vm15 = vweird.f32 %v11780_v52 }
 0xdec   : > { %v11402_v54 = vadd.f32 %v11400_v62, %v11396_v49  ;;  %v11434_v22 = vsel %vm11433_vm15, %v11780_v52, %v11432_v2 }
 0xdee   : > { %11403 = vst [vmem:[%s11929_s25] sm:$0x77] %v11402_v54 }
 0xdf5   : > { %v11407_v0 = vld [vmem:[%s11929_s25] sm:$0x77] }
 0xdf6   : > { %v11415_v35 = vadd.f32 %v11413_v50, %v11407_v0 }
 0xdf8   : > { %v11416_v29 = vmul.f32 %v11415_v35, %v11415_v35 }
 0xdfa   : > { %11418 = vst [vmem:[#allocation1] ss:$2 sm:$0xff] %v11416_v29 }
 0xe01   : > { %v11419_v25 = vld.sshfl [vmem:[#allocation1] sm:$0xff pattern:$0x75316420]  ;;  %v11420_v27 = vld.sshfl [vmem:[#allocation1 + $0x8] sm:$0xff pattern:$0x75316420] }
 0xe02   : > { %v11423_v21 = vsel %vm18467_vm2, %v11419_v25, 0.0  ;;  %v11424_v16 = vsel %vm18468_vm1, %v11420_v27, 0.0 }
 0xe03   : > { %v11425_v19 = vadd.f32 %v11424_v16, %v11423_v21 }
 0xe05   : > { %11426 = vadd.xlane.f32.xlu0 %v11425_v19 }
 0xe78   : > { %v11427_v20 = vpop.xlane.xlu0 %11426 }
 0xe79   : > { %v11435_v57 = vmul.f32 %v11434_v22, %v11427_v20 }
 0xe7b   : > { %v11436_v41 = vadd.f32 0.25, %v11435_v57 }
 0xe7d   : > { %11781 = vrsqrt.f32 %v11436_v41  ;;  %vm11443_vm9 = vweird.f32 %v11436_v41 }
 0xe83   : > { %v11782_v14 = vpop.eup %11781 }
 0xe84   : > { %v11438_v1 = vmul.f32 %v11782_v14, %v11436_v41  ;;  %vm11444_vm8 = vweird.f32 %v11782_v14 }
 0xe85   : > { %vm11445_vm10 = vmor %vm11443_vm9, %vm11444_vm8 }
 0xe86   : > { %v11439_v15 = vmul.f32 %v11782_v14, %v11438_v1 }
 0xe88   : > { %v11440_v7 = vmul.f32 0.5, %v11439_v15 }
 0xe8a   : > { %v11441_v39 = vsub.f32 1.5, %v11440_v7 }
 0xe8c   : > { %v11442_v61 = vmul.f32 %v11782_v14, %v11441_v39 }
 0xe8e   : > { %v11446_v43 = vsel %vm11445_vm10, %v11782_v14, %v11442_v61 }
 0xe8f   : > { %v11451_v46 = vperm.slane %v11446_v43, %v11450_v42 }
 0xe91   : > { %v11453_v58 = vmul.f32 %v11451_v46, %v11415_v35 }
 0xe93   : > { %11454 = vst [vmem:[%s11929_s25] sm:$0x77] %v11453_v58 }
 0xe94 PF: > { %s19_s11 = sadd.s32 1, %s11810_s11   ;;  %s18469_s30 = smov %s11806_s10 }
 0xe95   : > { %p16_p5 = scmp.ge.s32.totalorder %s19_s11, 4   ;;  %s18470_s10 = smov %s18472_s12 }
 0xe97   :  { %18 = sbr.rel (!%p16_p5) target bundleno = 2 (0x2), region = 99 }

</bundles_post_ra>
